<compile_context>
chip_gen: v7x
topology: tpu7x:2x2x1
jax: 0.10.0
libtpu: 0.0.40
codegen_flags: <defaults>
</compile_context>

<pallas_src>
import functools

import jax
import jax.numpy as jnp
from jax import lax
from jax.experimental import pallas as pl
from jax.experimental.pallas import tpu as pltpu


# ------------------------------ in-kernel helpers --------------------------- #

def _pad_hw(v, ph, pw, value):
    """Zero / -inf halo for a (B, H, W, C) VMEM value.

    The H concat is on a leading (untiled) dim and is cheap; the W concat is a
    single sublane relayout per branch (far fewer than the per-tap slices the
    previous version did)."""
    B, H, W, C = v.shape
    if ph:
        row = jnp.full((B, ph, W, C), value, v.dtype)
        v = jnp.concatenate([row, v, row], axis=1)
    if pw:
        col = jnp.full((B, H + 2 * ph, pw, C), value, v.dtype)
        v = jnp.concatenate([col, v, col], axis=2)
    return v


def _conv_im2col(t, w_flat, K, H, W):
    """KxK stride-1 'same' conv as ONE MXU matmul (im2col).

    t:      (B, H, W, Cred) bf16
    w_flat: (K*K*Cred, Cout) bf16, rows ordered (dy, dx, cin)
    returns (B*H*W, Cout) f32

    Only K W-shifted copies are materialised (one sublane relayout each); the
    per-tap H shifts are free leading-dim slices. Contraction depth K*K*Cred
    feeds the MXU much better than per-tap matmuls and all accumulation happens
    inside one matmul (MRB-friendly on v7x, no per-tap result-FIFO pops)."""
    B, _, _, Cred = t.shape
    pad = (K - 1) // 2
    tp = _pad_hw(t, pad, pad, 0.0)                        # (B, H+K-1, W+K-1, Cred)
    cols = [tp[:, :, dx:dx + W, :] for dx in range(K)]    # K sublane slices total
    patches = [cols[dx][:, dy:dy + H] for dy in range(K) for dx in range(K)]
    im2col = jnp.concatenate(patches, axis=-1)            # (B, H, W, K*K*Cred)
    im2col = im2col.reshape(B * H * W, K * K * Cred)
    return jnp.dot(im2col, w_flat, preferred_element_type=jnp.float32)


# --------------------------------- the kernel ------------------------------- #

def _inception_kernel(x_ref, wpw_ref, w3_ref, w5_ref, wm_ref, sb_ref, o_ref,
                      *, H, W, C1, R3, C3, R5, C5, CM):
    B = x_ref.shape[0]
    Cin = x_ref.shape[1]
    HW = H * W
    Cpw = C1 + R3 + R5
    Ctot = C1 + C3 + C5 + CM

    # ---- NCHW block -> (pixels, channels) relayout, entirely on-chip.
    # Transpose in f32 (best-supported path; also gives the f32 pool input).
    x_hw_c = jnp.transpose(x_ref[...].astype(jnp.float32), (0, 2, 1))  # (B, HW, Cin)
    x_flat = x_hw_c.reshape(B * HW, Cin).astype(jnp.bfloat16)

    # Packed per-channel (scale, bias): columns laid out [pw | 3x3 | 5x5 | max].
    sb = sb_ref[...].astype(jnp.float32)                  # (2, Cpw+C3+C5+CM)
    o3, o5, om = Cpw, Cpw + C3, Cpw + C3 + C5

    # ---- fused 1x1 stage: [1x1 branch | 3x3 reduce | 5x5 reduce] in ONE matmul
    pw = jnp.dot(x_flat, wpw_ref[...], preferred_element_type=jnp.float32)
    pw = jnp.maximum(pw * sb[0:1, :Cpw] + sb[1:2, :Cpw], 0.0)   # f32 epilogue
    y1 = pw[:, :C1]
    t3 = pw[:, C1:C1 + R3].reshape(B, H, W, R3).astype(jnp.bfloat16)
    t5 = pw[:, C1 + R3:].reshape(B, H, W, R5).astype(jnp.bfloat16)

    # ---- 3x3 branch: single im2col matmul (contraction depth 9*R3)
    a3 = _conv_im2col(t3, w3_ref[...], 3, H, W)
    y3 = jnp.maximum(a3 * sb[0:1, o3:o3 + C3] + sb[1:2, o3:o3 + C3], 0.0)

    # ---- 5x5 branch: single im2col matmul (contraction depth 25*R5)
    a5 = _conv_im2col(t5, w5_ref[...], 5, H, W)
    y5 = jnp.maximum(a5 * sb[0:1, o5:o5 + C5] + sb[1:2, o5:o5 + C5], 0.0)

    # ---- max branch: separable 3x3 max-pool (-inf halo, f32 compares for v5e)
    #      fused with its 1x1 conv.
    x_img = x_hw_c.reshape(B, H, W, Cin)                  # f32
    xm = _pad_hw(x_img, 1, 1, -jnp.inf)                   # (B, H+2, W+2, Cin)
    cmax = jnp.maximum(jnp.maximum(xm[:, 0:H], xm[:, 1:H + 1]), xm[:, 2:H + 2])
    pooled = jnp.maximum(jnp.maximum(cmax[:, :, 0:W], cmax[:, :, 1:W + 1]),
                         cmax[:, :, 2:W + 2])
    pm = pooled.reshape(B * HW, Cin).astype(jnp.bfloat16)
    am = jnp.dot(pm, wm_ref[...], preferred_element_type=jnp.float32)
    ym = jnp.maximum(am * sb[0:1, om:] + sb[1:2, om:], 0.0)

    # ---- channel concat + on-chip relayout to NCHW; the output block's last
    #      dim is H*W (lane-dense store) instead of Ctot (masked 20-lane store).
    out = jnp.concatenate([y1, y3, y5, ym], axis=-1)      # (B*HW, Ctot) f32
    o_ref[...] = jnp.transpose(out.reshape(B, HW, Ctot), (0, 2, 1)).astype(o_ref.dtype)


# ------------------------------ Pallas wrapper ------------------------------ #

def _pick_batch_tile(n, per_image_bytes, target_bytes=2 << 20, min_steps=2):
    """Largest divisor of n with tile <= target bytes, keeping >=2 grid steps
    (when n allows) so v7x megacore has work for both TensorCores."""
    best = 1
    for bt in range(1, n + 1):
        if n % bt:
            continue
        if bt * per_image_bytes > target_bytes:
            continue
        if n >= min_steps and n // bt < min_steps:
            continue
        best = bt
    return best


def inception_forward(x_nchw, params):
    """x_nchw: (N, Cin, H, W). Returns (N, Ctot, H, W) f32 (PyTorch layout).

    The wrapper only does free reshapes plus a single bf16 cast of x (drop the
    cast if the upstream producer already emits bf16); all layout shuffling
    (NCHW <-> pixels-major) happens on-chip inside the kernel."""
    N, Cin, H, W = x_nchw.shape
    wpw, w3, w5, wm, sb = (params['wpw'], params['w3'], params['w5'],
                           params['wm'], params['sb'])

    # Channel splits derived from weight shapes (static under jit); packing
    # order [1x1 | 3x3-reduce | 5x5-reduce] is defined once in build_params.
    Cpw = wpw.shape[1]
    R3, C3 = w3.shape[0] // 9, w3.shape[1]
    R5, C5 = w5.shape[0] // 25, w5.shape[1]
    CM = wm.shape[1]
    C1 = Cpw - R3 - R5
    Ctot = C1 + C3 + C5 + CM
    assert sb.shape == (2, Cpw + C3 + C5 + CM), "scale/bias packing mismatch"
    assert wpw.shape[0] == Cin and wm.shape[0] == Cin, "Cin mismatch"

    HW = H * W
    x_flat = x_nchw.reshape(N, Cin, HW).astype(jnp.bfloat16)   # free reshape + one cast pass

    # Batch tile: large enough to approach the HBM roofline, small enough that
    # double-buffered in/out tiles + ~3-4x f32 intermediates fit v7x's 64 MiB
    # VMEM, and keep >=2 grid steps for megacore.
    per_image = Cin * HW * 2 + Ctot * HW * 4
    B_TILE = _pick_batch_tile(N, per_image)
    grid = (N // B_TILE,)

    kernel = functools.partial(_inception_kernel, H=H, W=W, C1=C1, R3=R3, C3=C3,
                               R5=R5, C5=C5, CM=CM)

    def resident(a):   # small weights / scale-bias: full block, resident in VMEM
        return pl.BlockSpec(a.shape, lambda n: (0,) * a.ndim)

    # TODO(synk): for very large H*W add a spatial row-tile grid axis (halo rows
    # via Element-indexed BlockSpecs) so one image need not fit in VMEM.
    out = pl.pallas_call(
        kernel,
        out_shape=jax.ShapeDtypeStruct((N, Ctot, HW), jnp.float32),
        grid=grid,
        in_specs=[pl.BlockSpec((B_TILE, Cin, HW), lambda n: (n, 0, 0)),
                  resident(wpw), resident(w3), resident(w5), resident(wm),
                  resident(sb)],
        out_specs=pl.BlockSpec((B_TILE, Ctot, HW), lambda n: (n, 0, 0)),
        compiler_params=pltpu.CompilerParams(
            dimension_semantics=("parallel",),            # megacore on v7x
            vmem_limit_bytes=32 * 1024 * 1024),           # raise toward ~48MiB (v7x) / ~96MiB (v5e/v6e) for big B_TILE
    )(x_flat, wpw, w3, w5, wm, sb)

    return out.reshape(N, Ctot, H, W)                     # free reshape, already NCHW


# --------------------------- parameter construction ------------------------- #

def make_conv(key, cin, cout, k):
    kw, kb = jax.random.split(key)
    w = jax.random.normal(kw, (cout, cin, k, k), jnp.float32) / jnp.sqrt(cin * k * k)
    b = 0.1 * jax.random.normal(kb, (cout,), jnp.float32)
    return w, b  # OIHW, like PyTorch


def make_bn(key, c):
    k1, k2, k3, k4 = jax.random.split(key, 4)
    gamma = 1.0 + 0.1 * jax.random.normal(k1, (c,), jnp.float32)
    beta = 0.1 * jax.random.normal(k2, (c,), jnp.float32)
    mean = 0.1 * jax.random.normal(k3, (c,), jnp.float32)
    var = 1.0 + 0.1 * jax.random.uniform(k4, (c,), jnp.float32)
    return gamma, beta, mean, var


def fold_bn(conv_b, bn, eps=1e-5):
    gamma, beta, mean, var = bn
    scale = gamma / jnp.sqrt(var + eps)
    bias = beta + scale * (conv_b - mean)
    return scale[None, :], bias[None, :]


def to_pointwise(w_oihw):           # (Cout, Cin, 1, 1) -> (Cin, Cout)
    return jnp.transpose(w_oihw[:, :, 0, 0], (1, 0))


def to_im2col(w_oihw):              # (Cout, Cin, K, K) -> (K*K*Cin, Cout), rows = (dy, dx, cin)
    cout, cin, k, _ = w_oihw.shape
    return jnp.transpose(w_oihw, (2, 3, 1, 0)).reshape(k * k * cin, cout)


def build_params(raw):
    """Fold BN into per-channel (scale, bias), fuse the three 1x1 convs along
    Cout in the order [1x1 | 3x3-reduce | 5x5-reduce] (the kernel reads the
    same order), flatten KxK weights for im2col, pre-cast MXU operands to bf16,
    and pack every scale/bias into ONE (2, .) array laid out [pw | 3x3 | 5x5 | max]."""
    (w1, b1), bn1 = raw['1x1']
    ((w3r, b3rc), bn3r), ((w3, b3c), bn3) = raw['3x3']
    ((w5r, b5rc), bn5r), ((w5, b5c), bn5) = raw['5x5']
    (wm, bmc), bnm = raw['max']

    s1, bi1 = fold_bn(b1, bn1)
    s3r, bi3r = fold_bn(b3rc, bn3r)
    s5r, bi5r = fold_bn(b5rc, bn5r)
    s3, bi3 = fold_bn(b3c, bn3)
    s5, bi5 = fold_bn(b5c, bn5)
    sm, bim = fold_bn(bmc, bnm)

    bf = jnp.bfloat16
    wpw = jnp.concatenate([to_pointwise(w1), to_pointwise(w3r), to_pointwise(w5r)], axis=1)
    sb = jnp.concatenate([
        jnp.concatenate([s1, s3r, s5r, s3, s5, sm], axis=1),
        jnp.concatenate([bi1, bi3r, bi5r, bi3, bi5, bim], axis=1)], axis=0)

    return {
        'wpw': wpw.astype(bf),            # (Cin, C1+R3+R5)
        'w3': to_im2col(w3).astype(bf),   # (9*R3, C3)
        'w5': to_im2col(w5).astype(bf),   # (25*R5, C5)
        'wm': to_pointwise(wm).astype(bf),  # (Cin, CM)
        'sb': sb.astype(jnp.float32),     # (2, Cpw+C3+C5+CM)
    }


# ------------------------------ reference (JAX) ------------------------------ #

def ref_forward(x, raw):
    eps = 1e-5

    def conv(x, w, b, pad):
        y = lax.conv_general_dilated(x, w, (1, 1), [(pad, pad), (pad, pad)],
                                     dimension_numbers=('NCHW', 'OIHW', 'NCHW'))
        return y + b[None, :, None, None]

    def bn_relu(y, bn):
        g, be, m, v = bn
        s = g / jnp.sqrt(v + eps)
        return jnp.maximum(s[None, :, None, None] * (y - m[None, :, None, None])
                           + be[None, :, None, None], 0.0)

    (w1, b1), bn1 = raw['1x1']
    y1 = bn_relu(conv(x, w1, b1, 0), bn1)

    ((w3r, b3r), bn3r), ((w3, b3), bn3) = raw['3x3']
    t = bn_relu(conv(x, w3r, b3r, 0), bn3r)
    y3 = bn_relu(conv(t, w3, b3, 1), bn3)

    ((w5r, b5r), bn5r), ((w5, b5), bn5) = raw['5x5']
    t = bn_relu(conv(x, w5r, b5r, 0), bn5r)
    y5 = bn_relu(conv(t, w5, b5, 2), bn5)

    (wm, bm), bnm = raw['max']
    mp = lax.reduce_window(x, -jnp.inf, lax.max, (1, 1, 3, 3), (1, 1, 1, 1),
                           [(0, 0), (0, 0), (1, 1), (1, 1)])
    ym = bn_relu(conv(mp, wm, bm, 0), bnm)

    return jnp.concatenate([y1, y3, y5, ym], axis=1)


# ----------------------------------- main ------------------------------------ #

if __name__ == "__main__":
    key = jax.random.PRNGKey(0)
    c_in = 4
    c_red = {'3x3': 4, '5x5': 2}
    c_out = {'1x1': 4, '3x3': 8, '5x5': 4, 'max': 4}

    keys = jax.random.split(key, 16)
    kx = keys[0]

    # raw PyTorch-style parameters (deterministic)
    raw = {
        '1x1': (make_conv(keys[1], c_in, c_out['1x1'], 1), make_bn(keys[2], c_out['1x1'])),
        '3x3': (
            (make_conv(keys[3], c_in, c_red['3x3'], 1), make_bn(keys[4], c_red['3x3'])),
            (make_conv(keys[5], c_red['3x3'], c_out['3x3'], 3), make_bn(keys[6], c_out['3x3'])),
        ),
        '5x5': (
            (make_conv(keys[7], c_in, c_red['5x5'], 1), make_bn(keys[8], c_red['5x5'])),
            (make_conv(keys[9], c_red['5x5'], c_out['5x5'], 5), make_bn(keys[10], c_out['5x5'])),
        ),
        'max': (make_conv(keys[11], c_in, c_out['max'], 1), make_bn(keys[12], c_out['max'])),
    }
    params = build_params(raw)

    x = jax.random.normal(kx, (2, c_in, 16, 16), jnp.float32)   # NCHW like PyTorch

    fwd = jax.jit(inception_forward)
    out = jax.block_until_ready(fwd(x, params))

    ref = ref_forward(x, raw)
    assert out.shape == (2, sum(c_out.values()), 16, 16), out.shape
    err = float(jnp.max(jnp.abs(out - ref)))
    # bf16 MXU operands + bf16 x input -> tightened vs. previous 5e-2.
    assert jnp.allclose(out, ref, atol=3e-2, rtol=3e-2), err

    print("KERNEL_OK")
</pallas_src>

<mosaic_0001>
module attributes {stable_mosaic.version = 11 : i64} {
  func.func @_inception_kernel(%arg0: i32, %arg1: memref<1x4x256xbf16, #tpu.memory_space<vmem>>, %arg2: memref<4x10xbf16, #tpu.memory_space<vmem>>, %arg3: memref<36x8xbf16, #tpu.memory_space<vmem>>, %arg4: memref<50x4xbf16, #tpu.memory_space<vmem>>, %arg5: memref<4x4xbf16, #tpu.memory_space<vmem>>, %arg6: memref<2x26xf32, #tpu.memory_space<vmem>>, %arg7: memref<1x20x256xf32, #tpu.memory_space<vmem>>) attributes {dimension_semantics = [#tpu.dimension_semantics<parallel>], iteration_bounds = array<i64: 2>, scalar_prefetch = 0 : i64, scratch_operands = 0 : i64, tpu.core_type = #tpu.core_type<tc>, window_params = [{transform_indices = @transform_0, window_bounds = array<i64: 1, 4, 256>}, {pipeline_mode = #tpu.pipeline_mode<synchronous>, transform_indices = @transform_1, window_bounds = array<i64: 4, 10>}, {pipeline_mode = #tpu.pipeline_mode<synchronous>, transform_indices = @transform_2, window_bounds = array<i64: 36, 8>}, {pipeline_mode = #tpu.pipeline_mode<synchronous>, transform_indices = @transform_3, window_bounds = array<i64: 50, 4>}, {pipeline_mode = #tpu.pipeline_mode<synchronous>, transform_indices = @transform_4, window_bounds = array<i64: 4, 4>}, {pipeline_mode = #tpu.pipeline_mode<synchronous>, transform_indices = @transform_5, window_bounds = array<i64: 2, 26>}, {transform_indices = @transform_6, window_bounds = array<i64: 1, 20, 256>}]} {
    %c0 = arith.constant 0 : index
    %c0_0 = arith.constant 0 : index
    %c0_1 = arith.constant 0 : index
    %0 = vector.load %arg1[%c0, %c0_0, %c0_1] : memref<1x4x256xbf16, #tpu.memory_space<vmem>>, vector<1x4x256xbf16>
    %1 = arith.extf %0 : vector<1x4x256xbf16> to vector<1x4x256xf32>
    %2 = tpu.transpose %1, [0, 2, 1] : vector<1x4x256xf32> -> vector<1x256x4xf32>
    %3 = vector.shape_cast %2 : vector<1x256x4xf32> to vector<256x4xf32>
    %4 = arith.truncf %3 : vector<256x4xf32> to vector<256x4xbf16>
    %c0_2 = arith.constant 0 : index
    %c0_3 = arith.constant 0 : index
    %5 = vector.load %arg6[%c0_2, %c0_3] : memref<2x26xf32, #tpu.memory_space<vmem>>, vector<2x26xf32>
    %c0_4 = arith.constant 0 : index
    %c0_5 = arith.constant 0 : index
    %6 = vector.load %arg2[%c0_4, %c0_5] : memref<4x10xbf16, #tpu.memory_space<vmem>>, vector<4x10xbf16>
    %cst = arith.constant dense<0.000000e+00> : vector<256x10xf32>
    %7 = tpu.matmul %4, %6, %cst {dimension_numbers = #tpu.dot_dimension_numbers<[1], [0], [0], [1], [0, 0, 1, 1], [], []>} : vector<256x4xbf16>, vector<4x10xbf16>, vector<256x10xf32> -> vector<256x10xf32>
    %8 = vector.extract_strided_slice %5 {offsets = [0, 0], sizes = [1, 10], strides = [1, 1]} : vector<2x26xf32> to vector<1x10xf32>
    %9 = vector.broadcast %8 : vector<1x10xf32> to vector<256x10xf32>
    %10 = arith.mulf %7, %9 : vector<256x10xf32>
    %11 = vector.extract_strided_slice %5 {offsets = [1, 0], sizes = [1, 10], strides = [1, 1]} : vector<2x26xf32> to vector<1x10xf32>
    %12 = vector.broadcast %11 : vector<1x10xf32> to vector<256x10xf32>
    %13 = arith.addf %10, %12 : vector<256x10xf32>
    %cst_6 = arith.constant 0.000000e+00 : f32
    %14 = vector.broadcast %cst_6 : f32 to vector<256x10xf32>
    %15 = arith.maximumf %13, %14 : vector<256x10xf32>
    %16 = vector.extract_strided_slice %15 {offsets = [0, 0], sizes = [256, 4], strides = [1, 1]} : vector<256x10xf32> to vector<256x4xf32>
    %17 = vector.extract_strided_slice %15 {offsets = [0, 4], sizes = [256, 4], strides = [1, 1]} : vector<256x10xf32> to vector<256x4xf32>
    %18 = vector.shape_cast %17 : vector<256x4xf32> to vector<1x16x16x4xf32>
    %19 = arith.truncf %18 : vector<1x16x16x4xf32> to vector<1x16x16x4xbf16>
    %20 = vector.extract_strided_slice %15 {offsets = [0, 8], sizes = [256, 2], strides = [1, 1]} : vector<256x10xf32> to vector<256x2xf32>
    %21 = vector.shape_cast %20 : vector<256x2xf32> to vector<1x16x16x2xf32>
    %22 = arith.truncf %21 : vector<1x16x16x2xf32> to vector<1x16x16x2xbf16>
    %c0_7 = arith.constant 0 : index
    %c0_8 = arith.constant 0 : index
    %23 = vector.load %arg3[%c0_7, %c0_8] : memref<36x8xbf16, #tpu.memory_space<vmem>>, vector<36x8xbf16>
    %cst_9 = arith.constant 0.000000e+00 : bf16
    %24 = vector.broadcast %cst_9 : bf16 to vector<1x1x16x4xbf16>
    %25 = tpu.concatenate %24, %19, %24 in 1 : vector<1x1x16x4xbf16>, vector<1x16x16x4xbf16>, vector<1x1x16x4xbf16> -> vector<1x18x16x4xbf16>
    %cst_10 = arith.constant 0.000000e+00 : bf16
    %26 = vector.broadcast %cst_10 : bf16 to vector<1x18x1x4xbf16>
    %27 = tpu.concatenate %26, %25, %26 in 2 : vector<1x18x1x4xbf16>, vector<1x18x16x4xbf16>, vector<1x18x1x4xbf16> -> vector<1x18x18x4xbf16>
    %28 = vector.extract_strided_slice %27 {offsets = [0, 0, 0, 0], sizes = [1, 18, 16, 4], strides = [1, 1, 1, 1]} : vector<1x18x18x4xbf16> to vector<1x18x16x4xbf16>
    %29 = vector.extract_strided_slice %27 {offsets = [0, 0, 1, 0], sizes = [1, 18, 16, 4], strides = [1, 1, 1, 1]} : vector<1x18x18x4xbf16> to vector<1x18x16x4xbf16>
    %30 = vector.extract_strided_slice %27 {offsets = [0, 0, 2, 0], sizes = [1, 18, 16, 4], strides = [1, 1, 1, 1]} : vector<1x18x18x4xbf16> to vector<1x18x16x4xbf16>
    %31 = vector.extract_strided_slice %28 {offsets = [0, 0, 0, 0], sizes = [1, 16, 16, 4], strides = [1, 1, 1, 1]} : vector<1x18x16x4xbf16> to vector<1x16x16x4xbf16>
    %32 = vector.extract_strided_slice %29 {offsets = [0, 0, 0, 0], sizes = [1, 16, 16, 4], strides = [1, 1, 1, 1]} : vector<1x18x16x4xbf16> to vector<1x16x16x4xbf16>
    %33 = vector.extract_strided_slice %30 {offsets = [0, 0, 0, 0], sizes = [1, 16, 16, 4], strides = [1, 1, 1, 1]} : vector<1x18x16x4xbf16> to vector<1x16x16x4xbf16>
    %34 = vector.extract_strided_slice %28 {offsets = [0, 1, 0, 0], sizes = [1, 16, 16, 4], strides = [1, 1, 1, 1]} : vector<1x18x16x4xbf16> to vector<1x16x16x4xbf16>
    %35 = vector.extract_strided_slice %29 {offsets = [0, 1, 0, 0], sizes = [1, 16, 16, 4], strides = [1, 1, 1, 1]} : vector<1x18x16x4xbf16> to vector<1x16x16x4xbf16>
    %36 = vector.extract_strided_slice %30 {offsets = [0, 1, 0, 0], sizes = [1, 16, 16, 4], strides = [1, 1, 1, 1]} : vector<1x18x16x4xbf16> to vector<1x16x16x4xbf16>
    %37 = vector.extract_strided_slice %28 {offsets = [0, 2, 0, 0], sizes = [1, 16, 16, 4], strides = [1, 1, 1, 1]} : vector<1x18x16x4xbf16> to vector<1x16x16x4xbf16>
    %38 = vector.extract_strided_slice %29 {offsets = [0, 2, 0, 0], sizes = [1, 16, 16, 4], strides = [1, 1, 1, 1]} : vector<1x18x16x4xbf16> to vector<1x16x16x4xbf16>
    %39 = vector.extract_strided_slice %30 {offsets = [0, 2, 0, 0], sizes = [1, 16, 16, 4], strides = [1, 1, 1, 1]} : vector<1x18x16x4xbf16> to vector<1x16x16x4xbf16>
    %40 = tpu.concatenate %31, %32, %33, %34, %35, %36, %37, %38, %39 in 3 : vector<1x16x16x4xbf16>, vector<1x16x16x4xbf16>, vector<1x16x16x4xbf16>, vector<1x16x16x4xbf16>, vector<1x16x16x4xbf16>, vector<1x16x16x4xbf16>, vector<1x16x16x4xbf16>, vector<1x16x16x4xbf16>, vector<1x16x16x4xbf16> -> vector<1x16x16x36xbf16>
    %41 = vector.shape_cast %40 : vector<1x16x16x36xbf16> to vector<256x36xbf16>
    %cst_11 = arith.constant dense<0.000000e+00> : vector<256x8xf32>
    %42 = tpu.matmul %41, %23, %cst_11 {dimension_numbers = #tpu.dot_dimension_numbers<[1], [0], [0], [1], [0, 0, 1, 1], [], []>} : vector<256x36xbf16>, vector<36x8xbf16>, vector<256x8xf32> -> vector<256x8xf32>
    %43 = vector.extract_strided_slice %5 {offsets = [0, 10], sizes = [1, 8], strides = [1, 1]} : vector<2x26xf32> to vector<1x8xf32>
    %44 = vector.broadcast %43 : vector<1x8xf32> to vector<256x8xf32>
    %45 = arith.mulf %42, %44 : vector<256x8xf32>
    %46 = vector.extract_strided_slice %5 {offsets = [1, 10], sizes = [1, 8], strides = [1, 1]} : vector<2x26xf32> to vector<1x8xf32>
    %47 = vector.broadcast %46 : vector<1x8xf32> to vector<256x8xf32>
    %48 = arith.addf %45, %47 : vector<256x8xf32>
    %cst_12 = arith.constant 0.000000e+00 : f32
    %49 = vector.broadcast %cst_12 : f32 to vector<256x8xf32>
    %50 = arith.maximumf %48, %49 : vector<256x8xf32>
    %c0_13 = arith.constant 0 : index
    %c0_14 = arith.constant 0 : index
    %51 = vector.load %arg4[%c0_13, %c0_14] : memref<50x4xbf16, #tpu.memory_space<vmem>>, vector<50x4xbf16>
    %cst_15 = arith.constant 0.000000e+00 : bf16
    %52 = vector.broadcast %cst_15 : bf16 to vector<1x2x16x2xbf16>
    %53 = tpu.concatenate %52, %22, %52 in 1 : vector<1x2x16x2xbf16>, vector<1x16x16x2xbf16>, vector<1x2x16x2xbf16> -> vector<1x20x16x2xbf16>
    %cst_16 = arith.constant 0.000000e+00 : bf16
    %54 = vector.broadcast %cst_16 : bf16 to vector<1x20x2x2xbf16>
    %55 = tpu.concatenate %54, %53, %54 in 2 : vector<1x20x2x2xbf16>, vector<1x20x16x2xbf16>, vector<1x20x2x2xbf16> -> vector<1x20x20x2xbf16>
    %56 = vector.extract_strided_slice %55 {offsets = [0, 0, 0, 0], sizes = [1, 20, 16, 2], strides = [1, 1, 1, 1]} : vector<1x20x20x2xbf16> to vector<1x20x16x2xbf16>
    %57 = vector.extract_strided_slice %55 {offsets = [0, 0, 1, 0], sizes = [1, 20, 16, 2], strides = [1, 1, 1, 1]} : vector<1x20x20x2xbf16> to vector<1x20x16x2xbf16>
    %58 = vector.extract_strided_slice %55 {offsets = [0, 0, 2, 0], sizes = [1, 20, 16, 2], strides = [1, 1, 1, 1]} : vector<1x20x20x2xbf16> to vector<1x20x16x2xbf16>
    %59 = vector.extract_strided_slice %55 {offsets = [0, 0, 3, 0], sizes = [1, 20, 16, 2], strides = [1, 1, 1, 1]} : vector<1x20x20x2xbf16> to vector<1x20x16x2xbf16>
    %60 = vector.extract_strided_slice %55 {offsets = [0, 0, 4, 0], sizes = [1, 20, 16, 2], strides = [1, 1, 1, 1]} : vector<1x20x20x2xbf16> to vector<1x20x16x2xbf16>
    %61 = vector.extract_strided_slice %56 {offsets = [0, 0, 0, 0], sizes = [1, 16, 16, 2], strides = [1, 1, 1, 1]} : vector<1x20x16x2xbf16> to vector<1x16x16x2xbf16>
    %62 = vector.extract_strided_slice %57 {offsets = [0, 0, 0, 0], sizes = [1, 16, 16, 2], strides = [1, 1, 1, 1]} : vector<1x20x16x2xbf16> to vector<1x16x16x2xbf16>
    %63 = vector.extract_strided_slice %58 {offsets = [0, 0, 0, 0], sizes = [1, 16, 16, 2], strides = [1, 1, 1, 1]} : vector<1x20x16x2xbf16> to vector<1x16x16x2xbf16>
    %64 = vector.extract_strided_slice %59 {offsets = [0, 0, 0, 0], sizes = [1, 16, 16, 2], strides = [1, 1, 1, 1]} : vector<1x20x16x2xbf16> to vector<1x16x16x2xbf16>
    %65 = vector.extract_strided_slice %60 {offsets = [0, 0, 0, 0], sizes = [1, 16, 16, 2], strides = [1, 1, 1, 1]} : vector<1x20x16x2xbf16> to vector<1x16x16x2xbf16>
    %66 = vector.extract_strided_slice %56 {offsets = [0, 1, 0, 0], sizes = [1, 16, 16, 2], strides = [1, 1, 1, 1]} : vector<1x20x16x2xbf16> to vector<1x16x16x2xbf16>
    %67 = vector.extract_strided_slice %57 {offsets = [0, 1, 0, 0], sizes = [1, 16, 16, 2], strides = [1, 1, 1, 1]} : vector<1x20x16x2xbf16> to vector<1x16x16x2xbf16>
    %68 = vector.extract_strided_slice %58 {offsets = [0, 1, 0, 0], sizes = [1, 16, 16, 2], strides = [1, 1, 1, 1]} : vector<1x20x16x2xbf16> to vector<1x16x16x2xbf16>
    %69 = vector.extract_strided_slice %59 {offsets = [0, 1, 0, 0], sizes = [1, 16, 16, 2], strides = [1, 1, 1, 1]} : vector<1x20x16x2xbf16> to vector<1x16x16x2xbf16>
    %70 = vector.extract_strided_slice %60 {offsets = [0, 1, 0, 0], sizes = [1, 16, 16, 2], strides = [1, 1, 1, 1]} : vector<1x20x16x2xbf16> to vector<1x16x16x2xbf16>
    %71 = vector.extract_strided_slice %56 {offsets = [0, 2, 0, 0], sizes = [1, 16, 16, 2], strides = [1, 1, 1, 1]} : vector<1x20x16x2xbf16> to vector<1x16x16x2xbf16>
    %72 = vector.extract_strided_slice %57 {offsets = [0, 2, 0, 0], sizes = [1, 16, 16, 2], strides = [1, 1, 1, 1]} : vector<1x20x16x2xbf16> to vector<1x16x16x2xbf16>
    %73 = vector.extract_strided_slice %58 {offsets = [0, 2, 0, 0], sizes = [1, 16, 16, 2], strides = [1, 1, 1, 1]} : vector<1x20x16x2xbf16> to vector<1x16x16x2xbf16>
    %74 = vector.extract_strided_slice %59 {offsets = [0, 2, 0, 0], sizes = [1, 16, 16, 2], strides = [1, 1, 1, 1]} : vector<1x20x16x2xbf16> to vector<1x16x16x2xbf16>
    %75 = vector.extract_strided_slice %60 {offsets = [0, 2, 0, 0], sizes = [1, 16, 16, 2], strides = [1, 1, 1, 1]} : vector<1x20x16x2xbf16> to vector<1x16x16x2xbf16>
    %76 = vector.extract_strided_slice %56 {offsets = [0, 3, 0, 0], sizes = [1, 16, 16, 2], strides = [1, 1, 1, 1]} : vector<1x20x16x2xbf16> to vector<1x16x16x2xbf16>
    %77 = vector.extract_strided_slice %57 {offsets = [0, 3, 0, 0], sizes = [1, 16, 16, 2], strides = [1, 1, 1, 1]} : vector<1x20x16x2xbf16> to vector<1x16x16x2xbf16>
    %78 = vector.extract_strided_slice %58 {offsets = [0, 3, 0, 0], sizes = [1, 16, 16, 2], strides = [1, 1, 1, 1]} : vector<1x20x16x2xbf16> to vector<1x16x16x2xbf16>
    %79 = vector.extract_strided_slice %59 {offsets = [0, 3, 0, 0], sizes = [1, 16, 16, 2], strides = [1, 1, 1, 1]} : vector<1x20x16x2xbf16> to vector<1x16x16x2xbf16>
    %80 = vector.extract_strided_slice %60 {offsets = [0, 3, 0, 0], sizes = [1, 16, 16, 2], strides = [1, 1, 1, 1]} : vector<1x20x16x2xbf16> to vector<1x16x16x2xbf16>
    %81 = vector.extract_strided_slice %56 {offsets = [0, 4, 0, 0], sizes = [1, 16, 16, 2], strides = [1, 1, 1, 1]} : vector<1x20x16x2xbf16> to vector<1x16x16x2xbf16>
    %82 = vector.extract_strided_slice %57 {offsets = [0, 4, 0, 0], sizes = [1, 16, 16, 2], strides = [1, 1, 1, 1]} : vector<1x20x16x2xbf16> to vector<1x16x16x2xbf16>
    %83 = vector.extract_strided_slice %58 {offsets = [0, 4, 0, 0], sizes = [1, 16, 16, 2], strides = [1, 1, 1, 1]} : vector<1x20x16x2xbf16> to vector<1x16x16x2xbf16>
    %84 = vector.extract_strided_slice %59 {offsets = [0, 4, 0, 0], sizes = [1, 16, 16, 2], strides = [1, 1, 1, 1]} : vector<1x20x16x2xbf16> to vector<1x16x16x2xbf16>
    %85 = vector.extract_strided_slice %60 {offsets = [0, 4, 0, 0], sizes = [1, 16, 16, 2], strides = [1, 1, 1, 1]} : vector<1x20x16x2xbf16> to vector<1x16x16x2xbf16>
    %86 = tpu.concatenate %61, %62, %63, %64, %65, %66, %67, %68, %69, %70, %71, %72, %73, %74, %75, %76 in 3 : vector<1x16x16x2xbf16>, vector<1x16x16x2xbf16>, vector<1x16x16x2xbf16>, vector<1x16x16x2xbf16>, vector<1x16x16x2xbf16>, vector<1x16x16x2xbf16>, vector<1x16x16x2xbf16>, vector<1x16x16x2xbf16>, vector<1x16x16x2xbf16>, vector<1x16x16x2xbf16>, vector<1x16x16x2xbf16>, vector<1x16x16x2xbf16>, vector<1x16x16x2xbf16>, vector<1x16x16x2xbf16>, vector<1x16x16x2xbf16>, vector<1x16x16x2xbf16> -> vector<1x16x16x32xbf16>
    %87 = tpu.concatenate %77, %78, %79, %80, %81, %82, %83, %84, %85 in 3 : vector<1x16x16x2xbf16>, vector<1x16x16x2xbf16>, vector<1x16x16x2xbf16>, vector<1x16x16x2xbf16>, vector<1x16x16x2xbf16>, vector<1x16x16x2xbf16>, vector<1x16x16x2xbf16>, vector<1x16x16x2xbf16>, vector<1x16x16x2xbf16> -> vector<1x16x16x18xbf16>
    %88 = tpu.concatenate %86, %87 in 3 : vector<1x16x16x32xbf16>, vector<1x16x16x18xbf16> -> vector<1x16x16x50xbf16>
    %89 = vector.shape_cast %88 : vector<1x16x16x50xbf16> to vector<256x50xbf16>
    %cst_17 = arith.constant dense<0.000000e+00> : vector<256x4xf32>
    %90 = tpu.matmul %89, %51, %cst_17 {dimension_numbers = #tpu.dot_dimension_numbers<[1], [0], [0], [1], [0, 0, 1, 1], [], []>} : vector<256x50xbf16>, vector<50x4xbf16>, vector<256x4xf32> -> vector<256x4xf32>
    %91 = vector.extract_strided_slice %5 {offsets = [0, 18], sizes = [1, 4], strides = [1, 1]} : vector<2x26xf32> to vector<1x4xf32>
    %92 = vector.broadcast %91 : vector<1x4xf32> to vector<256x4xf32>
    %93 = arith.mulf %90, %92 : vector<256x4xf32>
    %94 = vector.extract_strided_slice %5 {offsets = [1, 18], sizes = [1, 4], strides = [1, 1]} : vector<2x26xf32> to vector<1x4xf32>
    %95 = vector.broadcast %94 : vector<1x4xf32> to vector<256x4xf32>
    %96 = arith.addf %93, %95 : vector<256x4xf32>
    %cst_18 = arith.constant 0.000000e+00 : f32
    %97 = vector.broadcast %cst_18 : f32 to vector<256x4xf32>
    %98 = arith.maximumf %96, %97 : vector<256x4xf32>
    %99 = vector.shape_cast %2 : vector<1x256x4xf32> to vector<1x16x16x4xf32>
    %cst_19 = arith.constant 0xFF800000 : f32
    %100 = vector.broadcast %cst_19 : f32 to vector<1x1x16x4xf32>
    %101 = tpu.concatenate %100, %99, %100 in 1 : vector<1x1x16x4xf32>, vector<1x16x16x4xf32>, vector<1x1x16x4xf32> -> vector<1x18x16x4xf32>
    %cst_20 = arith.constant 0xFF800000 : f32
    %102 = vector.broadcast %cst_20 : f32 to vector<1x18x1x4xf32>
    %103 = tpu.concatenate %102, %101, %102 in 2 : vector<1x18x1x4xf32>, vector<1x18x16x4xf32>, vector<1x18x1x4xf32> -> vector<1x18x18x4xf32>
    %104 = vector.extract_strided_slice %103 {offsets = [0, 0, 0, 0], sizes = [1, 16, 18, 4], strides = [1, 1, 1, 1]} : vector<1x18x18x4xf32> to vector<1x16x18x4xf32>
    %105 = vector.extract_strided_slice %103 {offsets = [0, 1, 0, 0], sizes = [1, 16, 18, 4], strides = [1, 1, 1, 1]} : vector<1x18x18x4xf32> to vector<1x16x18x4xf32>
    %106 = arith.maximumf %104, %105 : vector<1x16x18x4xf32>
    %107 = vector.extract_strided_slice %103 {offsets = [0, 2, 0, 0], sizes = [1, 16, 18, 4], strides = [1, 1, 1, 1]} : vector<1x18x18x4xf32> to vector<1x16x18x4xf32>
    %108 = arith.maximumf %106, %107 : vector<1x16x18x4xf32>
    %109 = vector.extract_strided_slice %108 {offsets = [0, 0, 0, 0], sizes = [1, 16, 16, 4], strides = [1, 1, 1, 1]} : vector<1x16x18x4xf32> to vector<1x16x16x4xf32>
    %110 = vector.extract_strided_slice %108 {offsets = [0, 0, 1, 0], sizes = [1, 16, 16, 4], strides = [1, 1, 1, 1]} : vector<1x16x18x4xf32> to vector<1x16x16x4xf32>
    %111 = arith.maximumf %109, %110 : vector<1x16x16x4xf32>
    %112 = vector.extract_strided_slice %108 {offsets = [0, 0, 2, 0], sizes = [1, 16, 16, 4], strides = [1, 1, 1, 1]} : vector<1x16x18x4xf32> to vector<1x16x16x4xf32>
    %113 = arith.maximumf %111, %112 : vector<1x16x16x4xf32>
    %114 = vector.shape_cast %113 : vector<1x16x16x4xf32> to vector<256x4xf32>
    %115 = arith.truncf %114 : vector<256x4xf32> to vector<256x4xbf16>
    %c0_21 = arith.constant 0 : index
    %c0_22 = arith.constant 0 : index
    %116 = vector.load %arg5[%c0_21, %c0_22] : memref<4x4xbf16, #tpu.memory_space<vmem>>, vector<4x4xbf16>
    %cst_23 = arith.constant dense<0.000000e+00> : vector<256x4xf32>
    %117 = tpu.matmul %115, %116, %cst_23 {dimension_numbers = #tpu.dot_dimension_numbers<[1], [0], [0], [1], [0, 0, 1, 1], [], []>} : vector<256x4xbf16>, vector<4x4xbf16>, vector<256x4xf32> -> vector<256x4xf32>
    %118 = vector.extract_strided_slice %5 {offsets = [0, 22], sizes = [1, 4], strides = [1, 1]} : vector<2x26xf32> to vector<1x4xf32>
    %119 = vector.broadcast %118 : vector<1x4xf32> to vector<256x4xf32>
    %120 = arith.mulf %117, %119 : vector<256x4xf32>
    %121 = vector.extract_strided_slice %5 {offsets = [1, 22], sizes = [1, 4], strides = [1, 1]} : vector<2x26xf32> to vector<1x4xf32>
    %122 = vector.broadcast %121 : vector<1x4xf32> to vector<256x4xf32>
    %123 = arith.addf %120, %122 : vector<256x4xf32>
    %cst_24 = arith.constant 0.000000e+00 : f32
    %124 = vector.broadcast %cst_24 : f32 to vector<256x4xf32>
    %125 = arith.maximumf %123, %124 : vector<256x4xf32>
    %126 = tpu.concatenate %16, %50, %98, %125 in 1 : vector<256x4xf32>, vector<256x8xf32>, vector<256x4xf32>, vector<256x4xf32> -> vector<256x20xf32>
    %127 = vector.shape_cast %126 : vector<256x20xf32> to vector<1x256x20xf32>
    %128 = tpu.transpose %127, [0, 2, 1] : vector<1x256x20xf32> -> vector<1x20x256xf32>
    %c0_25 = arith.constant 0 : index
    %c0_26 = arith.constant 0 : index
    %c0_27 = arith.constant 0 : index
    %129 = vector.load %arg7[%c0_25, %c0_26, %c0_27] : memref<1x20x256xf32, #tpu.memory_space<vmem>>, vector<1x20x256xf32>
    tpu.vector_store %arg7[%c0_25, %c0_26, %c0_27], %128 {strides = array<i32>} : memref<1x20x256xf32, #tpu.memory_space<vmem>>, vector<1x20x256xf32>,
    return
  }
  func.func @transform_0(%arg0: i32) -> (i32, i32, i32) {
    %c0_i32 = arith.constant 0 : i32
    %c0_i32_0 = arith.constant 0 : i32
    %c0_i32_1 = arith.constant 0 : i32
    return %arg0, %c0_i32, %c0_i32_0 : i32, i32, i32
  }
  func.func @transform_1(%arg0: i32) -> (i32, i32) {
    %c0_i32 = arith.constant 0 : i32
    %c0_i32_0 = arith.constant 0 : i32
    %c0_i32_1 = arith.constant 0 : i32
    return %c0_i32, %c0_i32_0 : i32, i32
  }
  func.func @transform_2(%arg0: i32) -> (i32, i32) {
    %c0_i32 = arith.constant 0 : i32
    %c0_i32_0 = arith.constant 0 : i32
    %c0_i32_1 = arith.constant 0 : i32
    return %c0_i32, %c0_i32_0 : i32, i32
  }
  func.func @transform_3(%arg0: i32) -> (i32, i32) {
    %c0_i32 = arith.constant 0 : i32
    %c0_i32_0 = arith.constant 0 : i32
    %c0_i32_1 = arith.constant 0 : i32
    return %c0_i32, %c0_i32_0 : i32, i32
  }
  func.func @transform_4(%arg0: i32) -> (i32, i32) {
    %c0_i32 = arith.constant 0 : i32
    %c0_i32_0 = arith.constant 0 : i32
    %c0_i32_1 = arith.constant 0 : i32
    return %c0_i32, %c0_i32_0 : i32, i32
  }
  func.func @transform_5(%arg0: i32) -> (i32, i32) {
    %c0_i32 = arith.constant 0 : i32
    %c0_i32_0 = arith.constant 0 : i32
    %c0_i32_1 = arith.constant 0 : i32
    return %c0_i32, %c0_i32_0 : i32, i32
  }
  func.func @transform_6(%arg0: i32) -> (i32, i32, i32) {
    %c0_i32 = arith.constant 0 : i32
    %c0_i32_0 = arith.constant 0 : i32
    %c0_i32_1 = arith.constant 0 : i32
    return %arg0, %c0_i32, %c0_i32_0 : i32, i32, i32
  }
}

</mosaic_0001>

<bundles_post_ra>
// kernel: inception_forward.1
= control target key start
LH: loop header
LB: loop body
LE: loop exit
PB: predicated region body
PF: predicated region fallthrough
CT: control target
= control target key end

     0   :  { %s6847_s21 = smov 0   ;;  %s13053_s0 = inlined_call_operand.vmem [shape: bf16[2,4,256], index: 0, kind: input, shape index: {}]   ;;  %s13054_s1 = inlined_call_operand.vmem [shape: bf16[4,10], index: 1, kind: input, shape index: {}]   ;;  %s13055_s2 = inlined_call_operand.vmem [shape: bf16[36,8], index: 2, kind: input, shape index: {}]   ;;  %s13056_s3 = inlined_call_operand.vmem [shape: bf16[50,4], index: 3, kind: input, shape index: {}]   ;;  %s13057_s4 = inlined_call_operand.vmem [shape: bf16[4,4], index: 4, kind: input, shape index: {}]   ;;  %s13058_s5 = inlined_call_operand.vmem [shape: f32[2,26], index: 5, kind: input, shape index: {}]   ;;  %s13059_s6 = inlined_call_operand.vmem [shape: f32[2,20,256], index: 6, kind: output, shape index: {}]  }
   0x1 LB: > { %s6334_s22 = sadd.s32 4294967295, %s6787_s21   ;;  %p6338_p0 = scmp.ge.s32.totalorder %s6787_s21, 1  ;;  %s6787_s21 = sphi %s6847_s21, %s16_s21  }
   0x2   : > { %p212_p1 = scmp.lt.s32.totalorder %s6787_s21, 3 }
   0x4   : > { %p213_p2 = pnand %p6338_p0, %p212_p1 }
   0x6   : > { %216 = sbr.rel (%p213_p2) target bundleno = 2283 (0x8eb), region = 44 }
   0xd   : > { %vm880_vm0 = vcmask 1040384   ;;  %vm881_vm1 = vsmask.f32 256  ;;  %v6789_v0 = vmov 0   ;;  %v13580_v2 = vmov 0  ;;  %s6790_s23 = smov 24  }
   0xe   : > { %v730_v1 = vrot.slane %v6789_v0, 7  ;;  %vm6856_vm2 = vmand %vm880_vm0, %vm881_vm1  ;;  %v554_v3 = vlaneseq  ;;  %vm1174_vm3 = vcmask 1046528   ;;  %vm2603_vm4 = vcmask 1045504   ;;  %v338_v21 = vld [vmem:[%s13058_s5] sm:$0x3]  ;;  %s6791_s26 = smov 8  }
   0xf   : > { %v13581_v2 = vsel %vm6856_vm2, 4294967295, %v13580_v2  ;;  %vm917_vm5 = vsmask.f32 7424  ;;  %p242_p3 = scmp.lt.s32.totalorder %s6334_s22, 1  ;;  %s6792_s27 = smov 4   ;;  %vm389_vm6 = vcmask 1041408  }
  0x10   : > { %13582 = vst [vmem:[#allocation2_spill] sm:$0xff] %v13581_v2  ;;  %v6862_v4 = vsel %vm6856_vm2, 0, %v730_v1  ;;  %v900_v5 = vsel %vm6856_vm2, %v730_v1, 0  ;;  %v6867_v6 = vsel %vm880_vm0, 0, %v730_v1  ;;  %v6870_v7 = vsel %vm880_vm0, %v730_v1, 0  ;;  %s6793_s28 = smov 28  }
  0x11   : > { %13583 = vst [vmem:[#allocation3_spill] sm:$0xff] %v6862_v4  ;;  %13584 = vst [vmem:[#allocation4_spill] sm:$0xff] %v6867_v6  ;;  %1398 = vrot.lane.b32.xlu1 %v6862_v4, %s6790_s23  ;;  %v1175_v8 = vrot.slane %v6862_v4, 1  ;;  %v1176_v9 = vrot.slane %v900_v5, 1  ;;  %v2604_v10 = vrot.slane %v6867_v6, 2  ;;  %v2605_v11 = vrot.slane %v6870_v7, 2 }
  0x12   : > { %13585 = vst [vmem:[#allocation5_spill] sm:$0xff] %v6870_v7  ;;  %v919_v12 = vshrl.u32 %v6862_v4, 16  ;;  %v921_v13 = vshll.u32 %v6862_v4, 16  ;;  %v926_v14 = vshll.u32 %v900_v5, 16  ;;  %v555_v15 = vshrl.u32 %v554_v3, 7  ;;  %s14929_s22 = smov (!%p242_p3, %s6334_s22), 1 }
  0x13   : > { %v1177_v16 = vsel %vm1174_vm3, %v1175_v8, %v1176_v9  ;;  %v6881_v17 = vsel %vm2603_vm4, %v2604_v10, %v2605_v11  ;;  %v2362_v26 = vrot.slane %v6867_v6, 1  ;;  %v2363_v27 = vrot.slane %v6870_v7, 1  ;;  %s6415_s29 = sshll.u32 %s14929_s22, 2  ;;  %s6794_s30 = smov 32   ;;  %v339_v44 = vld [vmem:[%s13054_s1] sm:$0x3] }
  0x14   : > { %13586 = vst [vmem:[#allocation6_spill] sm:$0xff] %v6881_v17  ;;  %v6672_v18 = vpack.i.bf16 %v6881_v17, %v1177_v16  ;;  %v923_v19 = vrot.slane %v921_v13, 1  ;;  %v928_v20 = vrot.slane %v926_v14, 1  ;;  %v556_v22 = vsub.s32 0, %v555_v15  ;;  %s246_s9 = scalar_lea.vmem %s13053_s0, %s6415_s29  ;;  %s6795_s10 = smov 118   ;;  %6635 = vmatprep.subr.msk.bf16.mxu0 %vm389_vm6, %v339_v44 }
  0x15   : > { %v2364_v28 = vsel %vm1174_vm3, %v2362_v26, %v2363_v27  ;;  %v592_v30 = vsub.s32 1, %v555_v15  ;;  %v6912_v32 = vshll.u32 %v6867_v6, 16  ;;  %v253_v33 = vld [vmem:[%s246_s9] sm:$0xf]  ;;  %v6916_v35 = vshrl.u32 %v6867_v6, 16  ;;  %s6796_s11 = smov 10  }
  0x16   : > { %6673 = vrot.lane.b32.xlu0 %v6672_v18, %s6791_s26  ;;  %v924_v23 = vor.u32 %v923_v19, %v919_v12  ;;  %v6890_v24 = vrot.slane %v338_v21, %v556_v22  ;;  %v6901_v29 = vpack.i.bf16 %v2363_v27, %v2364_v28  ;;  %v254_v34 = vunpack.c.l.bf16 %v253_v33  ;;  %s6797_s12 = smov 12   ;;  %s6798_s15 = smov 2  }
  0x17   : > { %v6906_v31 = vrot.slane %v338_v21, %v592_v30  ;;  %13590 = vst [vmem:[#allocation10_spill] sm:$0xff] %v6912_v32  ;;  %13591 = vst [vmem:[#allocation11_spill] sm:$0xff] %v6916_v35  ;;  %v2156_v36 = vrot.slane %v6912_v32, 1  ;;  %v2158_v37 = vshll.u32 %v6870_v7, 16  ;;  %v6764_v38 = vpack.i.bf16 %v6870_v7, %v6867_v6  ;;  %s6799_s16 = smov 6   ;;  %s6801_s17 = smov 124  }
  0x18   : > { %13587 = vst [vmem:[#allocation7_spill] sm:$0xff] %v6890_v24  ;;  %v929_v25 = vsel %vm917_vm5, %v924_v23, %v928_v20  ;;  %13588 = vst [vmem:[#allocation8_spill] sm:$0xff] %v6901_v29  ;;  %v256_v39 = vcombine.high %v254_v34, %v254_v34  ;;  %v391_v45 = vsel %vm389_vm6, %v339_v44, 0  ;;  %v6934_v46 = vshrl.u32 %v6870_v7, 16  ;;  %s6802_s18 = smov 120   ;;  %s6803_s19 = smov 20  }
  0x19   : > { %1110 = vrot.lane.b32.xlu1 %v929_v25, %s6792_s27  ;;  %13589 = vst [vmem:[#allocation9_spill] sm:$0xff] %v6906_v31  ;;  %v2157_v40 = vor.u32 %v2156_v36, %v6916_v35  ;;  %v2160_v41 = vrot.slane %v2158_v37, 1  ;;  %6490 = vmatpush3.bf16.msra.mxu0 %v391_v45  ;;  %v2438_v47 = vrot.slane %v6916_v35, 1  ;;  %v2439_v48 = vrot.slane %v6912_v32, 2  ;;  %s6804_s20 = smov 16   ;;  %s6805_s14 = smov 14  }
  0x1a   : > { %v6677_v42 = vpack.i.bf16 %v256_v39, %v254_v34  ;;  %13592 = vst [vmem:[#allocation12_spill] sm:$0xff] %v6934_v46  ;;  %v6939_v49 = vrot.slane %v6934_v46, 1  ;;  %v2444_v50 = vrot.slane %v2158_v37, 2  ;;  %vm2437_vm7 = vsmask.f32 6400 }
  0x1b   : > { %v2161_v43 = vsel %vm917_vm5, %v2157_v40, %v2160_v41  ;;  %v2440_v51 = vor.u32 %v2439_v48, %v2438_v47  ;;  %v6800_v59 = vmov -inf   ;;  %vm340_vm8 = vcmask 31744  }
  0x1c   : > { %13593 = vst [vmem:[#allocation13_spill] sm:$0xff] %v6939_v49  ;;  %v2445_v52 = vor.u32 %v2444_v50, %v6939_v49  ;;  %v6957_v60 = vrot.slane %v6800_v59, 7  ;;  %vm1496_vm9 = vcmask 64512   ;;  %vm1529_vm10 = vcmask 97280  }
  0x1d   : > { %1430 = vrot.lane.b32.xlu1 %v929_v25, %s6793_s28  ;;  %vm1562_vm11 = vcmask 130048   ;;  %vm1595_vm12 = vcmask 162816   ;;  %vm13579_vm13 = vcmask 195584   ;;  %vm1661_vm14 = vcmask 228352  }
  0x1e   : > { %v6945_v53 = vsel %vm2437_vm7, %v2440_v51, %v2445_v52  ;;  %13596 = vst [vmem:[#allocation16_spill] sm:$0xff] %v6957_v60  ;;  %v6965_v5 = vsel %vm880_vm0, -inf, %v6957_v60  ;;  %vm13555_vm15 = vcmask 261120   ;;  %vm1742_vm1 = vcmask 293888  }
  0x1f   : > { %13594 = vst [vmem:[#allocation14_spill] sm:$0xff] %v6945_v53 }
  0x21   : > { %1462 = vrot.lane.b32.xlu1 %v1177_v16, %s6794_s30  ;;  %v6977_v16 = vsel %vm880_vm0, %v6957_v60, -inf }
  0x25   : > { %1976 = vrot.lane.b32.xlu1 %v6906_v31, %s6795_s10 }
  0x29   : > { %6760 = vrot.lane.b32.xlu1 %v6901_v29, %s6792_s27 }
  0x2d   : > { %6765 = vrot.lane.b32.xlu1 %v6764_v38, %s6796_s11 }
  0x31   : > { %2722 = vrot.lane.b32.xlu1 %v2161_v43, %s6797_s12 }
  0x34   : > { %6678 = vxpose.xlu0.b32.start.end [1/1] (short) %v6677_v42, 128 }
  0x88   : > { %v6949_v54 = vpop.permute.xlu0 %6673 }
  0x89   : > { %13595 = vst [vmem:[#allocation15_spill] sm:$0xff] %v6949_v54 }
  0x99   : > { %1940 = vrot.lane.b32.xlu0 %v6890_v24, %s6795_s10 }
  0x9d   : > { %2302 = vrot.lane.b32.xlu0 %v2161_v43, %s6798_s15 }
  0xa1   : > { %2573 = vrot.lane.b32.xlu0 %v6945_v53, %s6799_s16 }
  0xb4   : > { %v6951_v55 = vpop.trf.xlu0 }
  0xb5   : > { %v6680_v56 = vunpack.i.l.bf16 %v6951_v55  ;;  %v6683_v57 = vunpack.i.h.bf16 %v6951_v55 }
  0xb7   : > { %v4832_v62 = vrot.slane %v6680_v56, 7  ;;  %v4856_v0 = vrot.slane %v6683_v57, 7 }
  0xb8   : > { %v6955_v58 = vpop.trf.xlu0 }
  0xb9   : > { %v6688_v61 = vunpack.i.h.bf16 %v6955_v58  ;;  %v6685_v63 = vunpack.i.l.bf16 %v6955_v58  ;;  %v4931_v12 = vsel %vm880_vm0, -inf, %v4832_v62  ;;  %v6980_v18 = vsel %vm880_vm0, -inf, %v4856_v0 }
  0xba   : > { %v4964_v21 = vmax.f32 %v6965_v5, %v4931_v12 }
  0xbb   : > { %v4857_v1 = vrot.slane %v6688_v61, 7  ;;  %v4833_v8 = vrot.slane %v6685_v63, 7  ;;  %v322_v9 = vpack.c.bf16 %v6685_v63, %v6680_v56 }
  0xbc   : > { %v6689_v3 = vpop.trf.xlu0 }
  0xbd   : > { %v6968_v10 = vsel %vm880_vm0, %v4856_v0, %v4857_v1  ;;  %v6693_v11 = vunpack.i.h.bf16 %v6689_v3  ;;  %v6690_v13 = vunpack.i.l.bf16 %v6689_v3  ;;  %6491 = vmatprep.mubr.msk.bf16.mxu0 %vm340_vm8, %v322_v9  ;;  %v6973_v14 = vsel %vm880_vm0, %v4832_v62, %v4833_v8 }
  0xbe   : > { %v6983_v20 = vsel %vm880_vm0, %v4833_v8, -inf  ;;  %v6999_v36 = vsel %vm880_vm0, %v4857_v1, -inf  ;;  %v4965_v41 = vmax.f32 %v6957_v60, %v6973_v14 }
  0xbf   : > { %v4859_v15 = vrot.slane %v6693_v11, 7  ;;  %v4835_v19 = vrot.slane %v6690_v13, 7  ;;  %v4966_v37 = vmax.f32 %v6977_v16, %v6983_v20 }
  0xc0   : > { %v6694_v22 = vpop.trf.xlu0 }
  0xc1   : > { %v6987_v23 = vsel %vm880_vm0, -inf, %v4859_v15  ;;  %v6698_v25 = vunpack.i.h.bf16 %v6694_v22  ;;  %v6992_v27 = vsel %vm880_vm0, -inf, %v4835_v19  ;;  %v6695_v28 = vunpack.i.l.bf16 %v6694_v22 }
  0xc2   : > { %13597 = vst [vmem:[#allocation17_spill] sm:$0xff] %v6987_v23  ;;  %v4991_v26 = vmax.f32 %v6980_v18, %v6987_v23  ;;  %v4967_v30 = vmax.f32 %v4931_v12, %v6992_v27  ;;  %v6996_v33 = vmax.f32 %v4964_v21, %v6992_v27 }
  0xc3   : > { %v4860_v34 = vrot.slane %v6698_v25, 7  ;;  %v4836_v38 = vrot.slane %v6695_v28, 7  ;;  %v323_v40 = vpack.c.bf16 %v6695_v28, %v6690_v13  ;;  %v7061_v22 = vpack.c.bf16 %v6698_v25, %v6693_v11 }
  0xc4   : > { %v7003_v39 = vpop.trf.xlu0 }
  0xc5   : > { %v7008_v42 = vsel %vm880_vm0, %v4860_v34, -inf  ;;  %v7011_v43 = vsel %vm880_vm0, %v4859_v15, %v4860_v34  ;;  %v6703_v44 = vunpack.i.h.bf16 %v7003_v39  ;;  %v7015_v45 = vsel %vm880_vm0, %v4835_v19, %v4836_v38  ;;  %6492 = vmatmul.mubr.msk.bf16.vlgmr.msra.gmra.mrb[0].mxu0 %vm340_vm8, %v323_v40 }
  0xc6   : > { %13598 = vst [vmem:[#allocation18_spill] sm:$0xff] %v7011_v43  ;;  %v7018_v47 = vsel %vm880_vm0, %v4836_v38, -inf  ;;  %v4993_v50 = vmax.f32 %v6999_v36, %v7008_v42  ;;  %v4968_v51 = vmax.f32 %v6973_v14, %v7015_v45  ;;  %v13061_v59 = vunpack.i.l.bf16 %v7003_v39 }
  0xc7   : > { %v4969_v52 = vmax.f32 %v6983_v20, %v7018_v47  ;;  %v7030_v56 = vmax.f32 %v4966_v37, %v7018_v47  ;;  %v4862_v58 = vrot.slane %v6703_v44, 7  ;;  %v7036_v63 = vmax.f32 %v4965_v41, %v7015_v45 }
  0xc8   : > { %v7033_v62 = vpop.trf.xlu0  ;;  %v4838_v3 = vrot.slane %v13061_v59, 7  ;;  %v7052_v14 = vpack.c.bf16 %v6688_v61, %v6683_v57  ;;  %v13605_v6 = vunpack.i.l.bf16 %v7003_v39 }
  0xc9   : > { %v7039_v0 = vsel %vm880_vm0, -inf, %v4862_v58  ;;  %v6708_v1 = vunpack.i.h.bf16 %v7033_v62  ;;  %v6705_v13 = vunpack.i.l.bf16 %v7033_v62 }
  0xca   : > { %v4994_v8 = vmax.f32 %v6987_v23, %v7039_v0  ;;  %v7047_v9 = vmax.f32 %v4991_v26, %v7039_v0  ;;  %v7057_v20 = vsel %vm880_vm0, -inf, %v4838_v3 }
  0xcb   : > { %v4863_v12 = vrot.slane %v6708_v1, 7  ;;  %v4970_v26 = vmax.f32 %v6992_v27, %v7057_v20  ;;  %v7066_v28 = vmax.f32 %v4967_v30, %v7057_v20  ;;  %v4839_v57 = vrot.slane %v6705_v13, 7 }
  0xcc   : > { %13599 = vst [vmem:[#allocation19_spill] sm:$0xff] %v7047_v9  ;;  %v7059_v21 = vpop.trf.xlu0  ;;  %v7086_v30 = vpack.c.bf16 %v6708_v1, %v6703_v44 }
  0xcd   : > { %v7069_v55 = vsel %vm880_vm0, %v4863_v12, -inf  ;;  %v7072_v61 = vsel %vm880_vm0, %v4862_v58, %v4863_v12  ;;  %v13060_v11 = vunpack.i.h.bf16 %v7059_v21  ;;  %v7081_v25 = vsel %vm880_vm0, %v4838_v3, %v4839_v57 }
  0xce   : > { %13600 = vst [vmem:[#allocation20_spill] sm:$0xff] %v7072_v61  ;;  %v4996_v34 = vmax.f32 %v7008_v42, %v7069_v55  ;;  %v7077_v37 = vmax.f32 %v4993_v50, %v7069_v55  ;;  %v7084_v27 = vsel %vm880_vm0, %v4839_v57, -inf  ;;  %v7096_v58 = vmax.f32 %v4968_v51, %v7081_v25 }
  0xcf   : > { %v4972_v41 = vmax.f32 %v7018_v47, %v7084_v27  ;;  %v7101_v3 = vmax.f32 %v4969_v52, %v7084_v27  ;;  %v4865_v44 = vrot.slane %v13060_v11, 7  ;;  %v6710_v47 = vunpack.i.l.bf16 %v7059_v21 }
  0xd0   : > { %13601 = vst [vmem:[#allocation21_spill] sm:$0xff] %v7077_v37  ;;  %v7098_v62 = vpop.trf.xlu0  ;;  %v13063_v12 = vrot.slane %v7096_v58, 1 }
  0xd1   : > { %v5117_v50 = vrot.slane %v7101_v3, 1  ;;  %v7111_v51 = vsel %vm880_vm0, -inf, %v4865_v44  ;;  %v13064_v48 = vunpack.i.h.bf16 %v7098_v62  ;;  %v4841_v40 = vrot.slane %v6710_v47, 7 }
  0xd2   : > { %v4997_v19 = vmax.f32 %v7039_v0, %v7111_v51  ;;  %v7118_v1 = vmax.f32 %v4994_v8, %v7111_v51  ;;  %v6715_v11 = vunpack.i.l.bf16 %v7098_v62 }
  0xd3   : > { %v7125_v57 = vsel %vm1174_vm3, %v13063_v12, %v5117_v50  ;;  %v4866_v38 = vrot.slane %v13064_v48, 7  ;;  %v7131_v52 = vsel %vm880_vm0, -inf, %v4841_v40 }
  0xd4   : > { %13602 = vst [vmem:[#allocation22_spill] sm:$0xff] %v7118_v1  ;;  %v7120_v15 = vpop.trf.xlu0  ;;  %v4973_v8 = vmax.f32 %v7057_v20, %v7131_v52  ;;  %v7137_v59 = vmax.f32 %v4970_v26, %v7131_v52  ;;  %v4842_v50 = vrot.slane %v6715_v11, 7  ;;  %v325_v17 = vpack.c.bf16 %v6715_v11, %v6710_v47 }
  0xd5   : > { %v13070_v0 = vunpack.i.h.bf16 %v7120_v15  ;;  %v7140_v7 = vsel %vm880_vm0, %v4866_v38, -inf  ;;  %v7143_v12 = vsel %vm880_vm0, %v4865_v44, %v4866_v38  ;;  %v6720_v44 = vunpack.i.l.bf16 %v7120_v15 }
  0xd6   : > { %13603 = vst [vmem:[#allocation23_spill] sm:$0xff] %v7143_v12  ;;  %v4999_v48 = vmax.f32 %v7069_v55, %v7140_v7  ;;  %v7148_v49 = vmax.f32 %v4996_v34, %v7140_v7  ;;  %v7155_v26 = vsel %vm880_vm0, %v4841_v40, %v4842_v50  ;;  %v7158_v35 = vsel %vm880_vm0, %v4842_v50, -inf }
  0xd7   : > { %v4868_v32 = vrot.slane %v13070_v0, 7  ;;  %v4975_v0 = vmax.f32 %v7084_v27, %v7158_v35  ;;  %v7169_v46 = vmax.f32 %v4972_v41, %v7158_v35  ;;  %v4844_v50 = vrot.slane %v6720_v44, 7 }
  0xd8   : > { %13604 = vst [vmem:[#allocation24_spill] sm:$0xff] %v7148_v49  ;;  %v7152_v20 = vpop.trf.xlu0  ;;  %v324_v38 = vpack.c.bf16 %v6705_v13, %v13605_v6 }
  0xd9   : > { %v7172_v40 = vsel %vm880_vm0, -inf, %v4868_v32  ;;  %v13079_v27 = vunpack.i.h.bf16 %v7152_v20  ;;  %v7186_v29 = vsel %vm880_vm0, -inf, %v4844_v50  ;;  %v6725_v6 = vunpack.i.l.bf16 %v7152_v20 }
  0xda   : > { %v5000_v55 = vmax.f32 %v7111_v51, %v7172_v40  ;;  %v7180_v34 = vmax.f32 %v4997_v19, %v7172_v40  ;;  %6495 = vmatprep.mubr.msk.bf16.mxu0 %vm340_vm8, %v324_v38  ;;  %v4976_v39 = vmax.f32 %v7131_v52, %v7186_v29  ;;  %v7193_v13 = vmax.f32 %v4973_v8, %v7186_v29 }
  0xdb   : > { %6496 = vmatmul.mubr.msk.bf16.gmra.mrb[4].mxu0 %vm340_vm8, %v325_v17  ;;  %v4869_v19 = vrot.slane %v13079_v27, 7  ;;  %v4845_v47 = vrot.slane %v6725_v6, 7  ;;  %v326_v17 = vpack.c.bf16 %v6725_v6, %v6720_v44 }
  0xdc   : > { %13606 = vst [vmem:[#allocation25_spill] sm:$0xff] %v7180_v34  ;;  %v7183_v41 = vpop.trf.xlu0 }
  0xdd   : > { %v13083_v11 = vunpack.i.h.bf16 %v7183_v41  ;;  %v6730_v51 = vunpack.i.l.bf16 %v7183_v41  ;;  %v7201_v38 = vsel %vm880_vm0, %v4869_v19, -inf  ;;  %v7204_v53 = vsel %vm880_vm0, %v4868_v32, %v4869_v19  ;;  %6499 = vmatprep.mubr.msk.bf16.mxu0 %vm340_vm8, %v326_v17 }
  0xde   : > { %13607 = vst [vmem:[#allocation26_spill] sm:$0xff] %v7204_v53  ;;  %v7211_v4 = vsel %vm880_vm0, %v4844_v50, %v4845_v47  ;;  %v7214_v27 = vsel %vm880_vm0, %v4845_v47, -inf  ;;  %v5002_v2 = vmax.f32 %v7140_v7, %v7201_v38  ;;  %v7228_v50 = vmax.f32 %v4999_v48, %v7201_v38 }
  0xdf   : > { %v4871_v52 = vrot.slane %v13083_v11, 7  ;;  %v4978_v19 = vmax.f32 %v7158_v35, %v7214_v27  ;;  %v7225_v44 = vmax.f32 %v4975_v0, %v7214_v27  ;;  %v4847_v47 = vrot.slane %v6730_v51, 7 }
  0xe0   : > { %v7208_v8 = vpop.trf.xlu0 }
  0xe1   : > { %v7232_v6 = vsel %vm880_vm0, -inf, %v4871_v52  ;;  %v13089_v7 = vunpack.i.h.bf16 %v7208_v8  ;;  %v7245_v17 = vsel %vm880_vm0, -inf, %v4847_v47  ;;  %v6735_v31 = vunpack.i.l.bf16 %v7208_v8 }
  0xe2   : > { %v5003_v35 = vmax.f32 %v7172_v40, %v7232_v6  ;;  %v7240_v0 = vmax.f32 %v5000_v55, %v7232_v6  ;;  %v4979_v54 = vmax.f32 %v7186_v29, %v7245_v17  ;;  %v7253_v11 = vmax.f32 %v4976_v39, %v7245_v17 }
  0xe3   : > { %v4872_v32 = vrot.slane %v13089_v7, 7  ;;  %v4848_v24 = vrot.slane %v6735_v31, 7  ;;  %v327_v7 = vpack.c.bf16 %v6735_v31, %v6730_v51 }
  0xe4   : > { %13608 = vst [vmem:[#allocation27_spill] sm:$0xff] %v7240_v0  ;;  %v7242_v48 = vpop.trf.xlu0 }
  0xe5   : > { %13609 = vst [vmem:[#allocation28_spill] sm:$0xff] %v7242_v48  ;;  %v13095_v40 = vunpack.i.h.bf16 %v7242_v48  ;;  %v7257_v55 = vsel %vm880_vm0, %v4872_v32, -inf  ;;  %v7260_v60 = vsel %vm880_vm0, %v4871_v52, %v4872_v32  ;;  %v7274_v1 = vsel %vm880_vm0, %v4847_v47, %v4848_v24  ;;  %6500 = vmatmul.mubr.msk.bf16.gmra.mrb[8].mxu0 %vm340_vm8, %v327_v7 }
  0xe6   : > { %13610 = vst [vmem:[#allocation29_spill] sm:$0xff] %v7260_v60  ;;  %v5005_v0 = vmax.f32 %v7201_v38, %v7257_v55  ;;  %v7267_v29 = vmax.f32 %v5002_v2, %v7257_v55  ;;  %v7277_v52 = vsel %vm880_vm0, %v4848_v24, -inf  ;;  %v6740_v32 = vunpack.i.l.bf16 %v7242_v48 }
  0xe7   : > { %v4874_v39 = vrot.slane %v13095_v40, 7  ;;  %v4981_v38 = vmax.f32 %v7214_v27, %v7277_v52  ;;  %v7286_v40 = vmax.f32 %v4978_v19, %v7277_v52 }
  0xe8   : > { %v7271_v34 = vpop.trf.xlu0  ;;  %v4850_v12 = vrot.slane %v6740_v32, 7 }
  0xe9   : > { %13611 = vst [vmem:[#allocation30_spill] sm:$0xff] %v7271_v34  ;;  %v4945_v47 = vsel %vm880_vm0, -inf, %v4874_v39  ;;  %v13104_v24 = vunpack.i.h.bf16 %v7271_v34  ;;  %v6745_v37 = vunpack.i.l.bf16 %v7271_v34 }
  0xea   : > { %v5006_v51 = vmax.f32 %v7232_v6, %v4945_v47  ;;  %v7293_v53 = vmax.f32 %v5003_v35, %v4945_v47  ;;  %v7298_v27 = vsel %vm880_vm0, -inf, %v4850_v12 }
  0xeb   : > { %v4875_v19 = vrot.slane %v13104_v24, 7  ;;  %v4982_v9 = vmax.f32 %v7245_v17, %v7298_v27  ;;  %v7307_v31 = vmax.f32 %v4979_v54, %v7298_v27  ;;  %v4851_v35 = vrot.slane %v6745_v37, 7 }
  0xec   : > { %13612 = vst [vmem:[#allocation31_spill] sm:$0xff] %v7293_v53  ;;  %v7295_v2 = vpop.trf.xlu0 }
  0xed   : > { %13613 = vst [vmem:[#allocation32_spill] sm:$0xff] %v7295_v2  ;;  %v13110_v7 = vunpack.i.h.bf16 %v7295_v2  ;;  %v4962_v6 = vsel %vm880_vm0, %v4875_v19, -inf  ;;  %v7311_v53 = vsel %vm880_vm0, %v4874_v39, %v4875_v19  ;;  %v6750_v17 = vunpack.i.l.bf16 %v7295_v2 }
  0xee   : > { %v5008_v61 = vmax.f32 %v7257_v55, %v4962_v6  ;;  %v7318_v43 = vmax.f32 %v5005_v0, %v4962_v6  ;;  %v7324_v23 = vsel %vm880_vm0, %v4850_v12, %v4851_v35  ;;  %v4954_v39 = vsel %vm880_vm0, %v4851_v35, -inf }
  0xef   : > { %v4877_v49 = vrot.slane %v13110_v7, 7  ;;  %v4984_v0 = vmax.f32 %v7277_v52, %v4954_v39  ;;  %v7333_v24 = vmax.f32 %v4981_v38, %v4954_v39  ;;  %v4853_v60 = vrot.slane %v6750_v17, 7 }
  0xf0   : > { %13614 = vst [vmem:[#allocation33_spill] sm:$0xff] %v7318_v43  ;;  %v7321_v54 = vpop.trf.xlu0 }
  0xf1   : > { %13615 = vst [vmem:[#allocation34_spill] sm:$0xff] %v7321_v54  ;;  %v4946_v19 = vsel %vm880_vm0, -inf, %v4877_v49  ;;  %v13117_v7 = vunpack.i.h.bf16 %v7321_v54  ;;  %v6755_v48 = vunpack.i.l.bf16 %v7321_v54  ;;  %v7342_v34 = vsel %vm880_vm0, -inf, %v4853_v60 }
  0xf2   : > { %v5009_v2 = vmax.f32 %v4945_v47, %v4946_v19  ;;  %v7335_v43 = vmax.f32 %v5006_v51, %v4946_v19  ;;  %v7356_v19 = vmax.f32 %v4982_v9, %v7342_v34 }
  0xf3   : > { %v4878_v12 = vrot.slane %v13117_v7, 7  ;;  %v4854_v7 = vrot.slane %v6755_v48, 7 }
  0xf4   : > { %13616 = vst [vmem:[#allocation35_spill] sm:$0xff] %v7335_v43  ;;  %v7345_v55 = vmax.f32 %v5009_v2, %v6965_v5  ;;  %v329_v43 = vpack.c.bf16 %v6755_v48, %v6750_v17  ;;  %v5137_v48 = vrot.slane %v7333_v24, 1 }
  0xf5   : > { %v4963_v52 = vsel %vm880_vm0, %v4878_v12, -inf  ;;  %v7349_v38 = vsel %vm880_vm0, %v4877_v49, %v4878_v12  ;;  %v5167_v49 = vrot.slane %v7228_v50, 1  ;;  %v7364_v12 = vsel %vm880_vm0, %v4853_v60, %v4854_v7 }
  0xf6   : > { %13617 = vst [vmem:[#allocation36_spill] sm:$0xff] %v7345_v55  ;;  %v5011_v5 = vmax.f32 %v4962_v6, %v4963_v52  ;;  %v7360_v2 = vmax.f32 %v5008_v61, %v4963_v52  ;;  %v328_v55 = vpack.c.bf16 %v6745_v37, %v6740_v32  ;;  %v4955_v47 = vsel %vm880_vm0, %v4854_v7, -inf }
  0xf7   : > { %v4986_v9 = vmax.f32 %v7324_v23, %v7364_v12  ;;  %v4987_v51 = vmax.f32 %v4954_v39, %v4955_v47  ;;  %v4989_v54 = vmax.f32 %v7364_v12, %v6968_v10  ;;  %v4990_v6 = vmax.f32 %v4955_v47, %v6999_v36 }
  0xf8   : > { %6503 = vmatprep.mubr.msk.bf16.mxu0 %vm340_vm8, %v328_v55  ;;  %v5132_v61 = vrot.slane %v7286_v40, 1  ;;  %v5172_v37 = vrot.slane %v7267_v29, 1  ;;  %v7375_v60 = vmax.f32 %v4984_v0, %v4955_v47  ;;  %v7378_v32 = vmax.f32 %v5011_v5, %v6977_v16 }
  0xf9   : > { %6504 = vmatmul.mubr.msk.bf16.gmra.mrb[12].mxu0 %vm340_vm8, %v329_v43  ;;  %v7383_v7 = vmax.f32 %v4987_v51, %v6999_v36  ;;  %v7386_v17 = vmax.f32 %v4990_v6, %v7008_v42  ;;  %v13618_v39 = vunpack.i.h.bf16 %v7059_v21  ;;  %v13619_v55 = vunpack.i.h.bf16 %v7098_v62 }
  0xfa   : > { %6507 = vmatprep.mubr.msk.bf16.mxu0 %vm340_vm8, %v7052_v14  ;;  %v5142_v16 = vrot.slane %v7375_v60, 1  ;;  %v13620_v43 = vunpack.i.h.bf16 %v7120_v15  ;;  %v13621_v52 = vunpack.i.h.bf16 %v7152_v20  ;;  %v13622_v36 = vrot.slane %v7036_v63, 1 }
  0xfb   : > { %v333_v0 = vpack.c.bf16 %v13619_v55, %v13618_v39  ;;  %v13623_v42 = vrot.slane %v6996_v33, 1  ;;  %v13624_v14 = vrot.slane %v7030_v56, 1  ;;  %v13626_v20 = vrot.slane %v7036_v63, 2 }
  0xfc   : > { %v7399_v47 = vpack.c.bf16 %v13621_v52, %v13620_v43  ;;  %v13625_v21 = vmov %v13622_v36  ;;  %v13627_v6 = vrot.slane %v6996_v33, 2  ;;  %v13628_v55 = vrot.slane %v7030_v56, 2 }
  0xfd   : > { %v5111_v51 = vsel %vm1174_vm3, %v13623_v42, %v13622_v36  ;;  %v5113_v62 = vsel %vm1174_vm3, %v13625_v21, %v13624_v14  ;;  %v13629_v43 = vmov %v13626_v20  ;;  %v13630_v36 = vrot.slane %v7096_v58, 1 }
  0xfe   : > { %v5221_v5 = vmax.f32 %v6996_v33, %v5111_v51  ;;  %v5222_v15 = vmax.f32 %v7036_v63, %v5113_v62  ;;  %v5256_v39 = vsel %vm2603_vm4, %v13627_v6, %v13626_v20  ;;  %v5258_v52 = vsel %vm2603_vm4, %v13629_v43, %v13628_v55 }
  0xff   : > { %v13631_v42 = vrot.slane %v7066_v28, 1  ;;  %v5224_v14 = vmax.f32 %v7096_v58, %v7125_v57  ;;  %v13632_v21 = vrot.slane %v7096_v58, 2  ;;  %v13633_v33 = vrot.slane %v7066_v28, 2 }
 0x100   : > { %v13634_v56 = vrot.slane %v7101_v3, 2  ;;  %v7440_v6 = vmax.f32 %v5221_v5, %v5256_v39  ;;  %v7442_v55 = vmax.f32 %v5222_v15, %v5258_v52  ;;  %v13638_v57 = vmax.f32 %v7015_v45, %v7081_v25 }
 0x101   : > { %v5116_v51 = vsel %vm1174_vm3, %v13631_v42, %v13630_v36  ;;  %v5261_v62 = vsel %vm2603_vm4, %v13633_v33, %v13632_v21  ;;  %v13635_v63 = vmov %v13632_v21  ;;  %v5119_v21 = vrot.slane %v7137_v59, 1  ;;  %6508 = vmatmul.mubr.msk.bf16.gmra.mrb[16].mxu0 %vm340_vm8, %v7061_v22 }
 0x102   : > { %v5263_v20 = vsel %vm2603_vm4, %v13635_v63, %v13634_v56  ;;  %13636 = vst [vmem:[#allocation37_spill] sm:$0xff] %v7440_v6  ;;  %13637 = vst [vmem:[#allocation38_spill] sm:$0xff] %v7442_v55  ;;  %v5223_v43 = vmax.f32 %v7066_v28, %v5116_v51  ;;  %v5019_v36 = vmax.f32 %v13638_v57, %v7155_v26  ;;  %v5264_v3 = vrot.slane %v7137_v59, 2 }
 0x103   : > { %v7449_v42 = vmax.f32 %v5224_v14, %v5263_v20  ;;  %v5267_v58 = vrot.slane %v7169_v46, 2  ;;  %v13641_v45 = vmax.f32 %v7081_v25, %v7155_v26  ;;  %v5124_v51 = vrot.slane %v7193_v13, 1  ;;  %6511 = vmatprep.mubr.msk.bf16.mxu0 %vm340_vm8, %v7086_v30 }
 0x104   : > { %v7456_v15 = vmax.f32 %v5223_v43, %v5261_v62  ;;  %v5120_v39 = vrot.slane %v5019_v36, 1  ;;  %v5265_v28 = vrot.slane %v5019_v36, 2  ;;  %v5269_v14 = vrot.slane %v7193_v13, 2 }
 0x105   : > { %13639 = vst [vmem:[#allocation39_spill] sm:$0xff] %v7449_v42  ;;  %v5022_v52 = vmax.f32 %v13641_v45, %v7211_v4  ;;  %v5272_v33 = vrot.slane %v7225_v44, 2  ;;  %v13642_v22 = vrot.slane %v7169_v46, 1  ;;  %v13643_v30 = vmax.f32 %v7155_v26, %v7211_v4 }
 0x106   : > { %13640 = vst [vmem:[#allocation40_spill] sm:$0xff] %v7456_v15  ;;  %v5121_v56 = vsel %vm1174_vm3, %v5119_v21, %v5120_v39  ;;  %v5266_v25 = vsel %vm2603_vm4, %v5264_v3, %v5265_v28  ;;  %v5268_v57 = vsel %vm2603_vm4, %v5265_v28, %v5267_v58  ;;  %v5129_v21 = vrot.slane %v7253_v11, 1 }
 0x107   : > { %v5123_v63 = vsel %vm1174_vm3, %v5120_v39, %v13642_v22  ;;  %v5225_v20 = vmax.f32 %v7137_v59, %v5121_v56  ;;  %v5125_v45 = vrot.slane %v5022_v52, 1  ;;  %v5270_v5 = vrot.slane %v5022_v52, 2 }
 0x108   : > { %v5226_v43 = vmax.f32 %v5019_v36, %v5123_v63  ;;  %v5025_v62 = vmax.f32 %v13643_v30, %v7274_v1  ;;  %v5274_v46 = vrot.slane %v7253_v11, 2  ;;  %v13646_v36 = vrot.slane %v7225_v44, 1 }
 0x109   : > { %v7484_v35 = vmax.f32 %v5225_v20, %v5266_v25  ;;  %v5126_v59 = vsel %vm1174_vm3, %v5124_v51, %v5125_v45  ;;  %v5271_v26 = vsel %vm2603_vm4, %v5269_v14, %v5270_v5  ;;  %v5273_v56 = vsel %vm2603_vm4, %v5270_v5, %v5272_v33  ;;  %6512 = vmatmul.mubr.msk.bf16.gmra.mrb[20].mxu0 %vm340_vm8, %v333_v0 }
 0x10a   : > { %v7486_v39 = vmax.f32 %v5226_v43, %v5268_v57  ;;  %v5128_v3 = vsel %vm1174_vm3, %v5125_v45, %v13646_v36  ;;  %v5227_v58 = vmax.f32 %v7193_v13, %v5126_v59  ;;  %v5130_v63 = vrot.slane %v5025_v62, 1  ;;  %6515 = vmatprep.mubr.msk.bf16.mxu0 %vm340_vm8, %v7399_v47 }
 0x10b   : > { %13644 = vst [vmem:[#allocation41_spill] sm:$0xff] %v7484_v35  ;;  %v5228_v28 = vmax.f32 %v5022_v52, %v5128_v3  ;;  %v5275_v25 = vrot.slane %v5025_v62, 2  ;;  %v5277_v20 = vrot.slane %v7286_v40, 2  ;;  %v13649_v13 = vmax.f32 %v7211_v4, %v7274_v1 }
 0x10c   : > { %13645 = vst [vmem:[#allocation42_spill] sm:$0xff] %v7486_v39  ;;  %v7498_v43 = vmax.f32 %v5227_v58, %v5271_v26  ;;  %v5134_v52 = vrot.slane %v7307_v31, 1  ;;  %v5131_v5 = vsel %vm1174_vm3, %v5129_v21, %v5130_v63  ;;  %v5133_v14 = vsel %vm1174_vm3, %v5130_v63, %v5132_v61 }
 0x10d   : > { %v7500_v51 = vmax.f32 %v5228_v28, %v5273_v56  ;;  %v5028_v44 = vmax.f32 %v13649_v13, %v7324_v23  ;;  %v5276_v33 = vsel %vm2603_vm4, %v5274_v46, %v5275_v25  ;;  %v5278_v57 = vsel %vm2603_vm4, %v5275_v25, %v5277_v20 }
 0x10e   : > { %13647 = vst [vmem:[#allocation43_spill] sm:$0xff] %v7498_v43  ;;  %v5229_v45 = vmax.f32 %v7253_v11, %v5131_v5  ;;  %v5230_v30 = vmax.f32 %v5025_v62, %v5133_v14  ;;  %v5279_v21 = vrot.slane %v7307_v31, 2  ;;  %v5282_v40 = vrot.slane %v7333_v24, 2  ;;  %v13659_v14 = vld [vmem:[#allocation30_spill] sm:$0xff] }
 0x10f   : > { %13648 = vst [vmem:[#allocation44_spill] sm:$0xff] %v7500_v51  ;;  %v5135_v0 = vrot.slane %v5028_v44, 1  ;;  %v5280_v59 = vrot.slane %v5028_v44, 2  ;;  %v13650_v61 = vmax.f32 %v7274_v1, %v7324_v23  ;;  %v13653_v1 = vunpack.i.h.bf16 %v7183_v41 }
 0x110   : > { %v7525_v36 = vmax.f32 %v5229_v45, %v5276_v33  ;;  %v7527_v47 = vmax.f32 %v5230_v30, %v5278_v57  ;;  %v13654_v56 = vunpack.i.h.bf16 %v7208_v8  ;;  %v5139_v20 = vrot.slane %v7356_v19, 1 }
 0x111   : > { %v5031_v46 = vmax.f32 %v13650_v61, %v7364_v12  ;;  %v5136_v3 = vsel %vm1174_vm3, %v5134_v52, %v5135_v0  ;;  %v5138_v11 = vsel %vm1174_vm3, %v5135_v0, %v5137_v48  ;;  %v5281_v28 = vsel %vm2603_vm4, %v5279_v21, %v5280_v59  ;;  %v13657_v52 = vld [vmem:[#allocation28_spill] sm:$0xff] }
 0x112   : > { %13651 = vst [vmem:[#allocation45_spill] sm:$0xff] %v7525_v36  ;;  %13652 = vst [vmem:[#allocation46_spill] sm:$0xff] %v7527_v47  ;;  %v5231_v62 = vmax.f32 %v7307_v31, %v5136_v3  ;;  %v5232_v58 = vmax.f32 %v5028_v44, %v5138_v11  ;;  %v5283_v26 = vsel %vm2603_vm4, %v5280_v59, %v5282_v40  ;;  %v5284_v31 = vrot.slane %v7356_v19, 2  ;;  %v13674_v12 = vld [vmem:[#allocation20_spill] sm:$0xff] }
 0x113   : > { %v335_v63 = vpack.c.bf16 %v13654_v56, %v13653_v1  ;;  %v5140_v24 = vrot.slane %v5031_v46, 1  ;;  %v5285_v44 = vrot.slane %v5031_v46, 2  ;;  %v13658_v5 = vunpack.i.h.bf16 %v13657_v52  ;;  %v13667_v1 = vld [vmem:[#allocation34_spill] sm:$0xff] }
 0x114   : > { %v7543_v13 = vmax.f32 %v5231_v62, %v5281_v28  ;;  %v7545_v48 = vmax.f32 %v5232_v58, %v5283_v26  ;;  %v13660_v41 = vunpack.i.h.bf16 %v13659_v14  ;;  %v5287_v45 = vrot.slane %v7375_v60, 2  ;;  %v13665_v26 = vld [vmem:[#allocation32_spill] sm:$0xff] }
 0x115   : > { %v5141_v8 = vsel %vm1174_vm3, %v5139_v20, %v5140_v24  ;;  %v5143_v57 = vsel %vm1174_vm3, %v5140_v24, %v5142_v16  ;;  %6516 = vmatmul.mubr.msk.bf16.gmra.mrb[24].mxu0 %vm340_vm8, %v335_v63  ;;  %v5286_v59 = vsel %vm2603_vm4, %v5284_v31, %v5285_v44  ;;  %v13661_v16 = vmax.f32 %v7298_v27, %v7342_v34 }
 0x116   : > { %13655 = vst [vmem:[#allocation47_spill] sm:$0xff] %v7543_v13  ;;  %13656 = vst [vmem:[#allocation48_spill] sm:$0xff] %v7545_v48  ;;  %v336_v33 = vpack.c.bf16 %v13660_v41, %v13658_v5  ;;  %v5233_v0 = vmax.f32 %v7356_v19, %v5141_v8  ;;  %v5234_v21 = vmax.f32 %v5031_v46, %v5143_v57  ;;  %v5147_v3 = vrot.slane %v7383_v7, 1  ;;  %v13662_v19 = vld [vmem:[#allocation33_spill] sm:$0xff]  ;;  %v13671_v41 = vld [vmem:[#allocation18_spill] sm:$0xff] }
 0x117   : > { %v5288_v40 = vsel %vm2603_vm4, %v5285_v44, %v5287_v45  ;;  %v5033_v61 = vmax.f32 %v13661_v16, %v6980_v18  ;;  %v5034_v60 = vmax.f32 %v4986_v9, %v6968_v10  ;;  %v5177_v46 = vrot.slane %v13662_v19, 1  ;;  %v13669_v44 = vld [vmem:[#allocation17_spill] sm:$0xff] }
 0x118   : > { %6519 = vmatprep.mubr.msk.bf16.mxu0 %vm340_vm8, %v336_v33  ;;  %v7574_v11 = vmax.f32 %v5233_v0, %v5286_v59  ;;  %v7576_v62 = vmax.f32 %v5234_v21, %v5288_v40  ;;  %v5292_v58 = vrot.slane %v7383_v7, 2  ;;  %v5182_v28 = vrot.slane %v7360_v2, 1 }
 0x119   : > { %v13666_v27 = vunpack.i.h.bf16 %v13665_v26  ;;  %v13668_v56 = vunpack.i.h.bf16 %v13667_v1  ;;  %v5144_v20 = vrot.slane %v5033_v61, 1  ;;  %v5145_v23 = vrot.slane %v5034_v60, 1  ;;  %v13676_v1 = vld [vmem:[#allocation19_spill] sm:$0xff] }
 0x11a   : > { %13663 = vst [vmem:[#allocation28_spill] sm:$0xff] %v7574_v11  ;;  %13664 = vst [vmem:[#allocation30_spill] sm:$0xff] %v7576_v62  ;;  %v5289_v24 = vrot.slane %v5033_v61, 2  ;;  %v5290_v31 = vrot.slane %v5034_v60, 2  ;;  %v13670_v52 = vmax.f32 %v7342_v34, %v6980_v18  ;;  %v5037_v33 = vmax.f32 %v4989_v54, %v13671_v41 }
 0x11b   : > { %v337_v63 = vpack.c.bf16 %v13668_v56, %v13666_v27  ;;  %v5146_v7 = vsel %vm1174_vm3, %v5144_v20, %v5145_v23  ;;  %v5148_v14 = vsel %vm1174_vm3, %v5145_v23, %v5147_v3  ;;  %v5152_v8 = vrot.slane %v7386_v17, 1 }
 0x11c   : > { %v5036_v5 = vmax.f32 %v13670_v52, %v13669_v44  ;;  %v5235_v57 = vmax.f32 %v5033_v61, %v5146_v7  ;;  %v5236_v45 = vmax.f32 %v5034_v60, %v5148_v14  ;;  %v5291_v0 = vsel %vm2603_vm4, %v5289_v24, %v5290_v31  ;;  %v13677_v44 = vld [vmem:[#allocation21_spill] sm:$0xff] }
 0x11d   : > { %v5293_v21 = vsel %vm2603_vm4, %v5290_v31, %v5292_v58  ;;  %v5150_v18 = vrot.slane %v5037_v33, 1  ;;  %v5295_v40 = vrot.slane %v5037_v33, 2  ;;  %6520 = vmatmul.mubr.msk.bf16.gmra.mrb[28].mxu0 %vm340_vm8, %v337_v63  ;;  %v5297_v54 = vrot.slane %v7386_v17, 2 }
 0x11e   : > { %v5149_v59 = vrot.slane %v5036_v5, 1  ;;  %v5294_v34 = vrot.slane %v5036_v5, 2  ;;  %v7600_v16 = vmax.f32 %v5235_v57, %v5291_v0  ;;  %v7602_v3 = vmax.f32 %v5236_v45, %v5293_v21  ;;  %v13682_v0 = vld [vmem:[#allocation22_spill] sm:$0xff] }
 0x11f   : > { %v13675_v61 = vmax.f32 %v6968_v10, %v13671_v41  ;;  %v5153_v58 = vsel %vm1174_vm3, %v5150_v18, %v5152_v8  ;;  %v5154_v56 = vrot.slane %v13676_v1, 1  ;;  %v5298_v17 = vsel %vm2603_vm4, %v5295_v40, %v5297_v54  ;;  %v13680_v8 = vld [vmem:[#allocation23_spill] sm:$0xff] }
 0x120   : > { %13672 = vst [vmem:[#allocation33_spill] sm:$0xff] %v7600_v16  ;;  %13673 = vst [vmem:[#allocation32_spill] sm:$0xff] %v7602_v3  ;;  %v5151_v26 = vsel %vm1174_vm3, %v5149_v59, %v5150_v18  ;;  %v5296_v27 = vsel %vm2603_vm4, %v5294_v34, %v5295_v40  ;;  %v5238_v23 = vmax.f32 %v5037_v33, %v5153_v58  ;;  %v5299_v31 = vrot.slane %v13676_v1, 2 }
 0x121   : > { %v5040_v60 = vmax.f32 %v13675_v61, %v13674_v12  ;;  %v5237_v20 = vmax.f32 %v5036_v5, %v5151_v26  ;;  %v5302_v52 = vrot.slane %v13677_v44, 2  ;;  %v13681_v57 = vmax.f32 %v13671_v41, %v13674_v12 }
 0x122   : > { %v7620_v14 = vmax.f32 %v5238_v23, %v5298_v17  ;;  %v5159_v5 = vrot.slane %v13682_v0, 1  ;;  %v13683_v21 = vrot.slane %v13677_v44, 1  ;;  %v5304_v26 = vrot.slane %v13682_v0, 2 }
 0x123   : > { %v5155_v24 = vrot.slane %v5040_v60, 1  ;;  %v5300_v10 = vrot.slane %v5040_v60, 2  ;;  %v7618_v7 = vmax.f32 %v5237_v20, %v5296_v27  ;;  %v5043_v45 = vmax.f32 %v13681_v57, %v13680_v8  ;;  %v13684_v27 = vld [vmem:[#allocation24_spill] sm:$0xff]  ;;  %v13685_v20 = vld [vmem:[#allocation26_spill] sm:$0xff] }
 0x124   : > { %13679 = vst [vmem:[#allocation17_spill] sm:$0xff] %v7620_v14  ;;  %v13686_v23 = vmax.f32 %v13674_v12, %v13680_v8 }
 0x125   : > { %13678 = vst [vmem:[#allocation34_spill] sm:$0xff] %v7618_v7  ;;  %v5156_v33 = vsel %vm1174_vm3, %v5154_v56, %v5155_v24  ;;  %v5158_v59 = vsel %vm1174_vm3, %v5155_v24, %v13683_v21  ;;  %v5301_v18 = vsel %vm2603_vm4, %v5299_v31, %v5300_v10  ;;  %v5303_v34 = vsel %vm2603_vm4, %v5300_v10, %v5302_v52  ;;  %v13690_v21 = vld [vmem:[#allocation25_spill] sm:$0xff] }
 0x126   : > { %v5239_v54 = vmax.f32 %v13676_v1, %v5156_v33  ;;  %v5240_v61 = vmax.f32 %v5040_v60, %v5158_v59  ;;  %v5160_v41 = vrot.slane %v5043_v45, 1  ;;  %v5305_v58 = vrot.slane %v5043_v45, 2 }
 0x127   : > { %v5307_v56 = vrot.slane %v13684_v27, 2  ;;  %v5046_v17 = vmax.f32 %v13686_v23, %v13685_v20  ;;  %v13689_v1 = vrot.slane %v13684_v27, 1  ;;  %v5164_v59 = vrot.slane %v13690_v21, 1 }
 0x128   : > { %v7642_v24 = vmax.f32 %v5239_v54, %v5301_v18  ;;  %v7644_v31 = vmax.f32 %v5240_v61, %v5303_v34  ;;  %v5161_v10 = vsel %vm1174_vm3, %v5159_v5, %v5160_v41  ;;  %v5306_v57 = vsel %vm2603_vm4, %v5304_v26, %v5305_v58  ;;  %v13693_v26 = vld [vmem:[#allocation29_spill] sm:$0xff] }
 0x129   : > { %v5163_v60 = vsel %vm1174_vm3, %v5160_v41, %v13689_v1  ;;  %v5241_v44 = vmax.f32 %v13682_v0, %v5161_v10  ;;  %v5308_v33 = vsel %vm2603_vm4, %v5305_v58, %v5307_v56  ;;  %v5165_v18 = vrot.slane %v5046_v17, 1  ;;  %v13695_v56 = vld [vmem:[#allocation27_spill] sm:$0xff] }
 0x12a   : > { %13687 = vst [vmem:[#allocation18_spill] sm:$0xff] %v7642_v24  ;;  %13688 = vst [vmem:[#allocation20_spill] sm:$0xff] %v7644_v31  ;;  %v5242_v52 = vmax.f32 %v5043_v45, %v5163_v60  ;;  %v5309_v34 = vrot.slane %v13690_v21, 2  ;;  %v5310_v61 = vrot.slane %v5046_v17, 2  ;;  %v5312_v0 = vrot.slane %v7228_v50, 2 }
 0x12b   : > { %v7657_v5 = vmax.f32 %v5241_v44, %v5306_v57  ;;  %v5166_v45 = vsel %vm1174_vm3, %v5164_v59, %v5165_v18  ;;  %v5168_v41 = vsel %vm1174_vm3, %v5165_v18, %v5167_v49  ;;  %v13694_v58 = vmax.f32 %v13680_v8, %v13685_v20 }
 0x12c   : > { %v7659_v54 = vmax.f32 %v5242_v52, %v5308_v33  ;;  %v5169_v23 = vrot.slane %v13695_v56, 1  ;;  %v5243_v1 = vmax.f32 %v13690_v21, %v5166_v45  ;;  %v5244_v60 = vmax.f32 %v5046_v17, %v5168_v41 }
 0x12d   : > { %13691 = vst [vmem:[#allocation19_spill] sm:$0xff] %v7657_v5  ;;  %v5049_v27 = vmax.f32 %v13694_v58, %v13693_v26  ;;  %v5311_v44 = vsel %vm2603_vm4, %v5309_v34, %v5310_v61  ;;  %v5313_v52 = vsel %vm2603_vm4, %v5310_v61, %v5312_v0  ;;  %v5314_v49 = vrot.slane %v13695_v56, 2  ;;  %v13699_v0 = vld [vmem:[#allocation31_spill] sm:$0xff] }
 0x12e   : > { %13692 = vst [vmem:[#allocation21_spill] sm:$0xff] %v7659_v54  ;;  %v7677_v33 = vmax.f32 %v5243_v1, %v5311_v44  ;;  %v7679_v8 = vmax.f32 %v5244_v60, %v5313_v52  ;;  %v5317_v59 = vrot.slane %v7267_v29, 2  ;;  %v13698_v18 = vmax.f32 %v13685_v20, %v13693_v26 }
 0x12f   : > { %v5170_v50 = vrot.slane %v5049_v27, 1  ;;  %v5315_v57 = vrot.slane %v5049_v27, 2  ;;  %v5174_v45 = vrot.slane %v13699_v0, 1  ;;  %v5319_v44 = vrot.slane %v13699_v0, 2 }
 0x130   : > { %13696 = vst [vmem:[#allocation23_spill] sm:$0xff] %v7677_v33  ;;  %13697 = vst [vmem:[#allocation22_spill] sm:$0xff] %v7679_v8  ;;  %v5052_v21 = vmax.f32 %v13698_v18, %v7311_v53  ;;  %v5322_v29 = vrot.slane %v13662_v19, 2  ;;  %v13703_v18 = vld [vmem:[#allocation35_spill] sm:$0xff]  ;;  %v13705_v19 = vmax.f32 %v7311_v53, %v7349_v38 }
 0x131   : > { %v5171_v17 = vsel %vm1174_vm3, %v5169_v23, %v5170_v50  ;;  %v5173_v34 = vsel %vm1174_vm3, %v5170_v50, %v5172_v37  ;;  %v5316_v61 = vsel %vm2603_vm4, %v5314_v49, %v5315_v57  ;;  %v5318_v60 = vsel %vm2603_vm4, %v5315_v57, %v5317_v59 }
 0x132   : > { %v5245_v58 = vmax.f32 %v13695_v56, %v5171_v17  ;;  %v5246_v1 = vmax.f32 %v5049_v27, %v5173_v34  ;;  %v5175_v20 = vrot.slane %v5052_v21, 1  ;;  %v5320_v23 = vrot.slane %v5052_v21, 2 }
 0x133   : > { %v13702_v50 = vmax.f32 %v13693_v26, %v7311_v53  ;;  %v5179_v56 = vrot.slane %v13703_v18, 1 }
 0x134   : > { %v7698_v52 = vmax.f32 %v5245_v58, %v5316_v61  ;;  %v7700_v37 = vmax.f32 %v5246_v1, %v5318_v60  ;;  %v5176_v27 = vsel %vm1174_vm3, %v5174_v45, %v5175_v20  ;;  %v5178_v57 = vsel %vm1174_vm3, %v5175_v20, %v5177_v46 }
 0x135   : > { %v5055_v49 = vmax.f32 %v13702_v50, %v7349_v38  ;;  %v5321_v59 = vsel %vm2603_vm4, %v5319_v44, %v5320_v23  ;;  %v5323_v17 = vsel %vm2603_vm4, %v5320_v23, %v5322_v29  ;;  %v5247_v61 = vmax.f32 %v13699_v0, %v5176_v27  ;;  %v13704_v50 = vld [vmem:[#allocation16_spill] sm:$0xff] }
 0x136   : > { %13700 = vst [vmem:[#allocation24_spill] sm:$0xff] %v7698_v52  ;;  %13701 = vst [vmem:[#allocation26_spill] sm:$0xff] %v7700_v37  ;;  %v5248_v58 = vmax.f32 %v5052_v21, %v5178_v57  ;;  %v5324_v1 = vrot.slane %v13703_v18, 2  ;;  %v5327_v45 = vrot.slane %v7360_v2, 2  ;;  %v5058_v46 = vmax.f32 %v13705_v19, %v13704_v50  ;;  %v13708_v38 = vld [vmem:[#allocation36_spill] sm:$0xff] }
 0x137   : > { %v5180_v26 = vrot.slane %v5055_v49, 1  ;;  %v5325_v60 = vrot.slane %v5055_v49, 2  ;;  %v7722_v20 = vmax.f32 %v5247_v61, %v5321_v59  ;;  %v5184_v59 = vrot.slane %v13708_v38, 1 }
 0x138   : > { %v7724_v44 = vmax.f32 %v5248_v58, %v5323_v17  ;;  %v5185_v17 = vrot.slane %v5058_v46, 1  ;;  %v5187_v61 = vrot.slane %v7378_v32, 1 }
 0x139   : > { %13706 = vst [vmem:[#allocation25_spill] sm:$0xff] %v7722_v20  ;;  %v5181_v23 = vsel %vm1174_vm3, %v5179_v56, %v5180_v26  ;;  %v5183_v21 = vsel %vm1174_vm3, %v5180_v26, %v5182_v28  ;;  %v5326_v27 = vsel %vm2603_vm4, %v5324_v1, %v5325_v60  ;;  %v5328_v57 = vsel %vm2603_vm4, %v5325_v60, %v5327_v45 }
 0x13a   : > { %13707 = vst [vmem:[#allocation29_spill] sm:$0xff] %v7724_v44  ;;  %v5249_v0 = vmax.f32 %v13703_v18, %v5181_v23  ;;  %v5250_v29 = vmax.f32 %v5055_v49, %v5183_v21  ;;  %v5329_v28 = vrot.slane %v13708_v38, 2  ;;  %v5330_v18 = vrot.slane %v5058_v46, 2 }
 0x13b   : > { %v5186_v49 = vsel %vm1174_vm3, %v5184_v59, %v5185_v17  ;;  %v5188_v58 = vsel %vm1174_vm3, %v5185_v17, %v5187_v61  ;;  %v5332_v26 = vrot.slane %v7378_v32, 2 }
 0x13c   : > { %v7737_v56 = vmax.f32 %v5249_v0, %v5326_v27  ;;  %v7739_v2 = vmax.f32 %v5250_v29, %v5328_v57  ;;  %v5251_v60 = vmax.f32 %v13708_v38, %v5186_v49  ;;  %v5252_v45 = vmax.f32 %v5058_v46, %v5188_v58  ;;  %v13713_v27 = vld [vmem:[#allocation7_spill] sm:$0xff]  ;;  %v13714_v38 = vld [vmem:[#allocation9_spill] sm:$0xff] }
 0x13d   : > { %v5331_v50 = vsel %vm2603_vm4, %v5329_v28, %v5330_v18  ;;  %v5333_v19 = vsel %vm2603_vm4, %v5330_v18, %v5332_v26 }
 0x13e   : > { %13709 = vst [vmem:[#allocation27_spill] sm:$0xff] %v7737_v56  ;;  %13710 = vst [vmem:[#allocation31_spill] sm:$0xff] %v7739_v2  ;;  %v7750_v23 = vmax.f32 %v5251_v60, %v5331_v50  ;;  %v7752_v21 = vmax.f32 %v5252_v45, %v5333_v19 }
 0x140   : > { %13711 = vst [vmem:[#allocation35_spill] sm:$0xff] %v7750_v23  ;;  %13712 = vst [vmem:[#allocation16_spill] sm:$0xff] %v7752_v21 }
 0x198   : > { %v6493_v29 = vpop.f32.mrb[0].mxu0 }
 0x199   : > { %v560_v32 = vmul.f32 %v6493_v29, %v13713_v27  ;;  %v427_v57 = vpop.f32.mrb[1].mxu0 }
 0x19a   : > { %v558_v59 = vmul.f32 %v13713_v27, %v427_v57  ;;  %v6494_v17 = vpop.f32.mrb[2].mxu0 }
 0x19b   : > { %v7759_v46 = vadd.f32 %v13714_v38, %v560_v32  ;;  %v561_v61 = vmul.f32 %v6494_v17, %v13713_v27  ;;  %v430_v28 = vpop.f32.mrb[3].mxu0 }
 0x19c   : > { %v7763_v18 = vadd.f32 %v13714_v38, %v558_v59  ;;  %v559_v49 = vmul.f32 %v13713_v27, %v430_v28 }
 0x19d   : > { %13715 = vst [vmem:[#allocation36_spill] sm:$0xff] %v7759_v46  ;;  %v7767_v58 = vadd.f32 %v13714_v38, %v561_v61  ;;  %v13122_v60 = vmax.f32 %v7759_v46, 0.0 }
 0x19e   : > { %13716 = vst [vmem:[#allocation49_spill] sm:$0xff] %v7763_v18  ;;  %v7770_v26 = vadd.f32 %v13714_v38, %v559_v49  ;;  %v13123_v50 = vmax.f32 %v7763_v18, 0.0 }
 0x19f   : > { %13717 = vst [vmem:[#allocation50_spill] sm:$0xff] %v7767_v58  ;;  %v13121_v45 = vmax.f32 %v7767_v58, 0.0 }
 0x1a0   : > { %13718 = vst [vmem:[#allocation51_spill] sm:$0xff] %v7770_v26  ;;  %v13124_v19 = vmax.f32 %v7770_v26, 0.0 }
 0x1a1   : > { %v659_v29 = vpack.c.bf16 %v13121_v45, %v13122_v60 }
 0x1a2   : > { %v658_v32 = vpack.c.bf16 %v13124_v19, %v13123_v50 }
 0x1a3   : > { %697 = vrot.lane.b32.xlu1 %v659_v29, %s6801_s17 }
 0x1a4   : > { %695 = vrot.lane.b32.xlu0 %v658_v32, %s6801_s17 }
 0x1a7   : > { %2052 = vrot.lane.b32.xlu1 %v659_v29, %s6802_s18 }
 0x1a8   : > { %2050 = vrot.lane.b32.xlu0 %v658_v32, %s6802_s18 }
 0x1ae   : > { %v6497_v57 = vpop.f32.mrb[4].mxu0 }
 0x1af   : > { %v564_v59 = vmul.f32 %v6497_v57, %v13713_v27  ;;  %v443_v17 = vpop.f32.mrb[5].mxu0 }
 0x1b0   : > { %v562_v61 = vmul.f32 %v13713_v27, %v443_v17  ;;  %v6498_v28 = vpop.f32.mrb[6].mxu0 }
 0x1b1   : > { %v7791_v49 = vadd.f32 %v13714_v38, %v564_v59  ;;  %v565_v45 = vmul.f32 %v6498_v28, %v13713_v27  ;;  %v446_v60 = vpop.f32.mrb[7].mxu0 }
 0x1b2   : > { %v7795_v50 = vadd.f32 %v13714_v38, %v562_v61  ;;  %v563_v29 = vmul.f32 %v13713_v27, %v446_v60 }
 0x1b3   : > { %13719 = vst [vmem:[#allocation52_spill] sm:$0xff] %v7791_v49  ;;  %v13126_v32 = vmax.f32 %v7791_v49, 0.0  ;;  %v7800_v19 = vadd.f32 %v13714_v38, %v565_v45 }
 0x1b4   : > { %13720 = vst [vmem:[#allocation53_spill] sm:$0xff] %v7795_v50  ;;  %v13128_v57 = vmax.f32 %v7795_v50, 0.0  ;;  %v7804_v17 = vadd.f32 %v13714_v38, %v563_v29 }
 0x1b5   : > { %13721 = vst [vmem:[#allocation54_spill] sm:$0xff] %v7800_v19  ;;  %v13125_v59 = vmax.f32 %v7800_v19, 0.0 }
 0x1b6   : > { %13722 = vst [vmem:[#allocation55_spill] sm:$0xff] %v7804_v17  ;;  %v13127_v28 = vmax.f32 %v7804_v17, 0.0 }
 0x1b7   : > { %v661_v61 = vpack.c.bf16 %v13125_v59, %v13126_v32 }
 0x1b8   : > { %v660_v60 = vpack.c.bf16 %v13127_v28, %v13128_v57  ;;  %v6501_v45 = vpop.f32.mrb[8].mxu0 }
 0x1b9   : > { %701 = vrot.lane.b32.xlu1 %v661_v61, %s6801_s17  ;;  %v568_v29 = vmul.f32 %v6501_v45, %v13713_v27  ;;  %v459_v0 = vpop.f32.mrb[9].mxu0 }
 0x1ba   : > { %2054 = vrot.lane.b32.xlu0 %v660_v60, %s6802_s18  ;;  %v566_v1 = vmul.f32 %v13713_v27, %v459_v0  ;;  %v6502_v53 = vpop.f32.mrb[10].mxu0 }
 0x1bb   : > { %v7822_v59 = vadd.f32 %v13714_v38, %v568_v29  ;;  %v569_v32 = vmul.f32 %v6502_v53, %v13713_v27  ;;  %v462_v34 = vpop.f32.mrb[11].mxu0 }
 0x1bc   : > { %v7826_v28 = vadd.f32 %v13714_v38, %v566_v1  ;;  %v567_v57 = vmul.f32 %v13713_v27, %v462_v34 }
 0x1bd   : > { %2056 = vrot.lane.b32.xlu1 %v661_v61, %s6802_s18  ;;  %13723 = vst [vmem:[#allocation56_spill] sm:$0xff] %v7822_v59  ;;  %v13130_v41 = vmax.f32 %v7822_v59, 0.0  ;;  %v7831_v45 = vadd.f32 %v13714_v38, %v569_v32 }
 0x1be   : > { %13724 = vst [vmem:[#allocation57_spill] sm:$0xff] %v7826_v28  ;;  %v13132_v61 = vmax.f32 %v7826_v28, 0.0  ;;  %v7836_v0 = vadd.f32 %v13714_v38, %v567_v57 }
 0x1bf   : > { %13725 = vst [vmem:[#allocation58_spill] sm:$0xff] %v7831_v45  ;;  %v13129_v53 = vmax.f32 %v7831_v45, 0.0 }
 0x1c0   : > { %13726 = vst [vmem:[#allocation59_spill] sm:$0xff] %v7836_v0  ;;  %v13131_v29 = vmax.f32 %v7836_v0, 0.0 }
 0x1c1   : > { %699 = vrot.lane.b32.xlu1 %v660_v60, %s6801_s17  ;;  %v663_v34 = vpack.c.bf16 %v13129_v53, %v13130_v41 }
 0x1c2   : > { %v662_v1 = vpack.c.bf16 %v13131_v29, %v13132_v61 }
 0x1c4   : > { %2058 = vrot.lane.b32.xlu0 %v662_v1, %s6802_s18 }
 0x1c5   : > { %705 = vrot.lane.b32.xlu1 %v663_v34, %s6801_s17 }
 0x1c9   : > { %2060 = vrot.lane.b32.xlu1 %v663_v34, %s6802_s18 }
 0x1cc   : > { %v6505_v32 = vpop.f32.mrb[12].mxu0 }
 0x1cd   : > { %v572_v57 = vmul.f32 %v6505_v32, %v13713_v27  ;;  %v475_v60 = vpop.f32.mrb[13].mxu0  ;;  %703 = vrot.lane.b32.xlu1 %v662_v1, %s6801_s17 }
 0x1ce   : > { %v570_v10 = vmul.f32 %v13713_v27, %v475_v60  ;;  %v6506_v12 = vpop.f32.mrb[14].mxu0 }
 0x1cf   : > { %v7854_v53 = vadd.f32 %v13714_v38, %v572_v57  ;;  %v573_v41 = vmul.f32 %v6506_v12, %v13713_v27  ;;  %v478_v40 = vpop.f32.mrb[15].mxu0 }
 0x1d0   : > { %v7858_v29 = vadd.f32 %v13714_v38, %v570_v10  ;;  %v571_v34 = vmul.f32 %v13713_v27, %v478_v40 }
 0x1d1   : > { %13727 = vst [vmem:[#allocation60_spill] sm:$0xff] %v7854_v53  ;;  %v13134_v61 = vmax.f32 %v7854_v53, 0.0  ;;  %v7864_v32 = vadd.f32 %v13714_v38, %v573_v41 }
 0x1d2   : > { %13728 = vst [vmem:[#allocation61_spill] sm:$0xff] %v7858_v29  ;;  %v13136_v60 = vmax.f32 %v7858_v29, 0.0  ;;  %v7868_v57 = vadd.f32 %v13714_v38, %v571_v34 }
 0x1d3   : > { %13729 = vst [vmem:[#allocation62_spill] sm:$0xff] %v7864_v32  ;;  %v13133_v12 = vmax.f32 %v7864_v32, 0.0 }
 0x1d4   : > { %13730 = vst [vmem:[#allocation63_spill] sm:$0xff] %v7868_v57  ;;  %v13135_v63 = vmax.f32 %v7868_v57, 0.0  ;;  %v6509_v10 = vpop.f32.mrb[16].mxu0 }
 0x1d5   : > { %v491_v9 = vpop.f32.mrb[17].mxu0  ;;  %v665_v40 = vpack.c.bf16 %v13133_v12, %v13134_v61  ;;  %v576_v30 = vmul.f32 %v6509_v10, %v13713_v27 }
 0x1d6   : > { %v574_v1 = vmul.f32 %v13713_v27, %v491_v9  ;;  %v6510_v41 = vpop.f32.mrb[18].mxu0  ;;  %v664_v34 = vpack.c.bf16 %v13135_v63, %v13136_v60 }
 0x1d7   : > { %v577_v25 = vmul.f32 %v6510_v41, %v13713_v27  ;;  %709 = vrot.lane.b32.xlu1 %v665_v40, %s6801_s17  ;;  %v494_v4 = vpop.f32.mrb[19].mxu0  ;;  %v7896_v10 = vadd.f32 %v13714_v38, %v576_v30 }
 0x1d8   : > { %v7885_v22 = vadd.f32 %v13714_v38, %v574_v1  ;;  %v575_v12 = vmul.f32 %v13713_v27, %v494_v4  ;;  %2062 = vrot.lane.b32.xlu0 %v664_v34, %s6802_s18 }
 0x1d9   : > { %v7890_v9 = vadd.f32 %v13714_v38, %v577_v25  ;;  %13734 = vst [vmem:[#allocation67_spill] sm:$0xff] %v7896_v10  ;;  %v13147_v30 = vmax.f32 %v7896_v10, 0.0 }
 0x1da   : > { %13731 = vst [vmem:[#allocation64_spill] sm:$0xff] %v7885_v22  ;;  %v7893_v61 = vadd.f32 %v13714_v38, %v575_v12  ;;  %v13142_v41 = vmax.f32 %v7885_v22, 0.0 }
 0x1db   : > { %13732 = vst [vmem:[#allocation65_spill] sm:$0xff] %v7890_v9  ;;  %2064 = vrot.lane.b32.xlu1 %v665_v40, %s6802_s18  ;;  %v13146_v4 = vmax.f32 %v7890_v9, 0.0 }
 0x1dc   : > { %13733 = vst [vmem:[#allocation66_spill] sm:$0xff] %v7893_v61  ;;  %v13141_v1 = vmax.f32 %v7893_v61, 0.0  ;;  %v6513_v63 = vpop.f32.mrb[20].mxu0 }
 0x1dd   : > { %v507_v60 = vpop.f32.mrb[21].mxu0  ;;  %v667_v61 = vpack.c.bf16 %v13146_v4, %v13147_v30 }
 0x1de   : > { %v578_v58 = vmul.f32 %v13713_v27, %v507_v60  ;;  %v6514_v25 = vpop.f32.mrb[22].mxu0  ;;  %v666_v12 = vpack.c.bf16 %v13141_v1, %v13142_v41 }
 0x1df   : > { %707 = vrot.lane.b32.xlu1 %v664_v34, %s6801_s17  ;;  %v510_v40 = vpop.f32.mrb[23].mxu0  ;;  %v581_v60 = vmul.f32 %v6514_v25, %v13713_v27  ;;  %v580_v34 = vmul.f32 %v6513_v63, %v13713_v27 }
 0x1e0   : > { %v7910_v46 = vadd.f32 %v13714_v38, %v578_v58  ;;  %v579_v18 = vmul.f32 %v13713_v27, %v510_v40  ;;  %2066 = vrot.lane.b32.xlu0 %v666_v12, %s6802_s18 }
 0x1e1   : > { %v7927_v22 = vadd.f32 %v13714_v38, %v581_v60  ;;  %v7935_v63 = vadd.f32 %v13714_v38, %v580_v34 }
 0x1e2   : > { %13735 = vst [vmem:[#allocation68_spill] sm:$0xff] %v7910_v46  ;;  %v7920_v1 = vadd.f32 %v13714_v38, %v579_v18  ;;  %v13151_v58 = vmax.f32 %v7910_v46, 0.0 }
 0x1e3   : > { %713 = vrot.lane.b32.xlu1 %v667_v61, %s6801_s17  ;;  %13737 = vst [vmem:[#allocation70_spill] sm:$0xff] %v7927_v22  ;;  %13738 = vst [vmem:[#allocation71_spill] sm:$0xff] %v7935_v63  ;;  %v13157_v46 = vmax.f32 %v7927_v22, 0.0  ;;  %v13158_v34 = vmax.f32 %v7935_v63, 0.0 }
 0x1e4   : > { %13736 = vst [vmem:[#allocation69_spill] sm:$0xff] %v7920_v1  ;;  %v13150_v40 = vmax.f32 %v7920_v1, 0.0 }
 0x1e5   : > { %v669_v32 = vpack.c.bf16 %v13157_v46, %v13158_v34 }
 0x1e6   : > { %v668_v18 = vpack.c.bf16 %v13150_v40, %v13151_v58 }
 0x1e7   : > { %2068 = vrot.lane.b32.xlu1 %v667_v61, %s6802_s18 }
 0x1e8   : > { %v6517_v41 = vpop.f32.mrb[24].mxu0  ;;  %2070 = vrot.lane.b32.xlu0 %v668_v18, %s6802_s18 }
 0x1e9   : > { %v523_v25 = vpop.f32.mrb[25].mxu0  ;;  %v584_v29 = vmul.f32 %v6517_v41, %v13713_v27 }
 0x1ea   : > { %v582_v10 = vmul.f32 %v13713_v27, %v523_v25  ;;  %v6518_v9 = vpop.f32.mrb[26].mxu0  ;;  %v7943_v25 = vpop.permute.xlu1 %1398 }
 0x1eb   : > { %v526_v4 = vpop.f32.mrb[27].mxu0  ;;  %13740 = vst [vmem:[#allocation73_spill] sm:$0xff] %v7943_v25  ;;  %711 = vrot.lane.b32.xlu1 %v666_v12, %s6801_s17  ;;  %v7981_v41 = vadd.f32 %v13714_v38, %v584_v29 }
 0x1ec   : > { %v7939_v30 = vadd.f32 %v13714_v38, %v582_v10  ;;  %v583_v60 = vmul.f32 %v13713_v27, %v526_v4  ;;  %v585_v4 = vmul.f32 %v6518_v9, %v13713_v27 }
 0x1ed   : > { %13746 = vst [vmem:[#allocation79_spill] sm:$0xff] %v7981_v41 }
 0x1ee   : > { %13739 = vst [vmem:[#allocation72_spill] sm:$0xff] %v7939_v30  ;;  %v7947_v1 = vadd.f32 %v13714_v38, %v583_v60  ;;  %v13160_v61 = vmax.f32 %v7939_v30, 0.0  ;;  %v7963_v57 = vpop.permute.xlu1 %1110 }
 0x1ef   : > { %717 = vrot.lane.b32.xlu1 %v669_v32, %s6801_s17 }
 0x1f0   : > { %13741 = vst [vmem:[#allocation74_spill] sm:$0xff] %v7947_v1  ;;  %v13159_v10 = vmax.f32 %v7947_v1, 0.0  ;;  %v6521_v40 = vpop.f32.mrb[28].mxu0 }
 0x1f1   : > { %v539_v58 = vpop.f32.mrb[29].mxu0  ;;  %v588_v30 = vmul.f32 %v6521_v40, %v13713_v27 }
 0x1f2   : > { %v586_v60 = vmul.f32 %v13713_v27, %v539_v58  ;;  %v6522_v53 = vpop.f32.mrb[30].mxu0  ;;  %v670_v12 = vpack.c.bf16 %v13159_v10, %v13160_v61  ;;  %v7973_v58 = vadd.f32 %v13714_v38, %v585_v4  ;;  %v7978_v10 = vpop.permute.xlu1 %1430 }
 0x1f3   : > { %v542_v9 = vpop.f32.mrb[31].mxu0  ;;  %13745 = vst [vmem:[#allocation78_spill] sm:$0xff] %v7978_v10  ;;  %2072 = vrot.lane.b32.xlu1 %v669_v32, %s6802_s18  ;;  %v589_v32 = vmul.f32 %v6522_v53, %v13713_v27 }
 0x1f4   : > { %v7968_v63 = vadd.f32 %v13714_v38, %v586_v60  ;;  %v587_v46 = vmul.f32 %v13713_v27, %v542_v9  ;;  %2074 = vrot.lane.b32.xlu0 %v670_v12, %s6802_s18  ;;  %13743 = vst [vmem:[#allocation76_spill] sm:$0xff] %v7973_v58  ;;  %v13166_v9 = vmax.f32 %v7973_v58, 0.0 }
 0x1f6   : > { %13742 = vst [vmem:[#allocation75_spill] sm:$0xff] %v7968_v63  ;;  %v7976_v34 = vadd.f32 %v13714_v38, %v587_v46  ;;  %v13164_v60 = vmax.f32 %v7968_v63, 0.0  ;;  %v13167_v46 = vmax.f32 %v7981_v41, 0.0  ;;  %v7994_v29 = vpop.permute.xlu1 %1462 }
 0x1f7   : > { %715 = vrot.lane.b32.xlu1 %v668_v18, %s6801_s17  ;;  %13747 = vst [vmem:[#allocation80_spill] sm:$0xff] %v7994_v29  ;;  %v8009_v18 = vadd.f32 %v13714_v38, %v588_v30 }
 0x1f8   : > { %13744 = vst [vmem:[#allocation77_spill] sm:$0xff] %v7976_v34  ;;  %v13163_v61 = vmax.f32 %v7976_v34, 0.0  ;;  %v671_v1 = vpack.c.bf16 %v13166_v9, %v13167_v46 }
 0x1f9   : > { %13750 = vst [vmem:[#allocation83_spill] sm:$0xff] %v8009_v18  ;;  %v13172_v22 = vmax.f32 %v8009_v18, 0.0 }
 0x1fa   : > { %v672_v4 = vpack.c.bf16 %v13163_v61, %v13164_v60  ;;  %v8004_v61 = vadd.f32 %v13714_v38, %v589_v32  ;;  %v8006_v60 = vpop.permute.xlu1 %1976  ;;  %v8021_v32 = vpop.permute.xlu0 %1940 }
 0x1fb   : > { %721 = vrot.lane.b32.xlu1 %v671_v1, %s6801_s17  ;;  %13749 = vst [vmem:[#allocation82_spill] sm:$0xff] %v8006_v60  ;;  %13752 = vst [vmem:[#allocation85_spill] sm:$0xff] %v8021_v32 }
 0x1fc   : > { %2078 = vrot.lane.b32.xlu0 %v672_v4, %s6802_s18  ;;  %13748 = vst [vmem:[#allocation81_spill] sm:$0xff] %v8004_v61  ;;  %v13171_v53 = vmax.f32 %v8004_v61, 0.0 }
 0x1fe   : > { %v8015_v9 = vpop.permute.xlu1 %6760  ;;  %v673_v40 = vpack.c.bf16 %v13171_v53, %v13172_v22 }
 0x1ff   : > { %2076 = vrot.lane.b32.xlu1 %v671_v1, %s6802_s18  ;;  %13751 = vst [vmem:[#allocation84_spill] sm:$0xff] %v8015_v9  ;;  %v8027_v1 = vpop.permute.xlu0 %2302 }
 0x200   : > { %13754 = vst [vmem:[#allocation87_spill] sm:$0xff] %v8027_v1 }
 0x202   : > { %v8024_v30 = vpop.permute.xlu1 %6765 }
 0x203   : > { %719 = vrot.lane.b32.xlu1 %v670_v12, %s6801_s17  ;;  %13753 = vst [vmem:[#allocation86_spill] sm:$0xff] %v8024_v30  ;;  %v8032_v46 = vpop.permute.xlu0 %2573 }
 0x204   : > { %13756 = vst [vmem:[#allocation89_spill] sm:$0xff] %v8032_v46 }
 0x206   : > { %v8030_v12 = vpop.permute.xlu1 %2722 }
 0x207   : > { %725 = vrot.lane.b32.xlu1 %v673_v40, %s6801_s17  ;;  %13755 = vst [vmem:[#allocation88_spill] sm:$0xff] %v8030_v12 }
 0x20b   : > { %2080 = vrot.lane.b32.xlu1 %v673_v40, %s6802_s18  ;;  %s6807_s18 = smov 22  }
 0x20f   : > { %723 = vrot.lane.b32.xlu1 %v672_v4, %s6801_s17  ;;  %s6806_s17 = smov 18  }
 0x215   : > { %v698_v18 = vpop.permute.xlu1 %697 }
 0x216   : > { %v696_v34 = vpop.permute.xlu0 %695  ;;  %v742_v61 = vshrl.u32 %v698_v18, 16  ;;  %v745_v28 = vshll.u32 %v698_v18, 16 }
 0x217   : > { %v735_v45 = vshrl.u32 %v696_v34, 16  ;;  %v738_v50 = vshll.u32 %v696_v34, 16 }
 0x218   : > { %v744_v41 = vrot.slane %v742_v61, 7 }
 0x219   : > { %v2053_v53 = vpop.permute.xlu1 %2052  ;;  %v737_v19 = vrot.slane %v735_v45, 7 }
 0x21a   : > { %v2085_v22 = vrot.slane %v2053_v53, 7  ;;  %v2051_v63 = vpop.permute.xlu0 %2050  ;;  %v902_v34 = vsel %vm6856_vm2, %v744_v41, 0 }
 0x21b   : > { %v2084_v58 = vrot.slane %v2051_v63, 7  ;;  %v740_v45 = vor.u32 %v738_v50, %v737_v19 }
 0x21c   : > { %v8035_v59 = vsel %vm880_vm0, 0, %v2085_v22  ;;  %v8038_v40 = vsel %vm880_vm0, %v2085_v22, 0  ;;  %v747_v22 = vor.u32 %v745_v28, %v744_v41  ;;  %v8092_v41 = vsel %vm6856_vm2, %v737_v19, 0 }
 0x21d   : > { %13757 = vst [vmem:[#allocation90_spill] sm:$0xff] %v8035_v59  ;;  %13758 = vst [vmem:[#allocation91_spill] sm:$0xff] %v8038_v40  ;;  %v8041_v4 = vsel %vm880_vm0, 0, %v2084_v58  ;;  %2684 = vrot.lane.b32.xlu1 %v8035_v59, %s6796_s11  ;;  %v2368_v0 = vrot.slane %v8035_v59, 1  ;;  %v13185_v63 = vrot.slane %v8038_v40, 1  ;;  %v2610_v61 = vrot.slane %v8035_v59, 2 }
 0x21e   : > { %13759 = vst [vmem:[#allocation92_spill] sm:$0xff] %v8041_v4  ;;  %2682 = vrot.lane.b32.xlu0 %v8041_v4, %s6796_s11  ;;  %v2611_v53 = vrot.slane %v8038_v40, 2  ;;  %v2136_v17 = vsel %vm880_vm0, %v2084_v58, 0  ;;  %v8066_v28 = vsel %vm6856_vm2, 0, %v747_v22  ;;  %v2365_v58 = vrot.slane %v8041_v4, 1 }
 0x21f   : > { %v8054_v49 = vsel %vm1174_vm3, %v2368_v0, %v13185_v63  ;;  %v2607_v0 = vrot.slane %v8041_v4, 2  ;;  %v2608_v63 = vrot.slane %v2136_v17, 2  ;;  %v2366_v27 = vrot.slane %v2136_v17, 1 }
 0x220   : > { %13760 = vst [vmem:[#allocation93_spill] sm:$0xff] %v8054_v49  ;;  %v8060_v18 = vsel %vm2603_vm4, %v2610_v61, %v2611_v53  ;;  %v1181_v50 = vrot.slane %v8066_v28, 1  ;;  %v8082_v53 = vsel %vm6856_vm2, 0, %v740_v45  ;;  %v2164_v22 = vshll.u32 %v8041_v4, 16 }
 0x221   : > { %2411 = vrot.lane.b32.xlu1 %v8054_v49, %s6792_s27  ;;  %13761 = vst [vmem:[#allocation94_spill] sm:$0xff] %v8060_v18  ;;  %v8077_v61 = vsel %vm2603_vm4, %v2607_v0, %v2608_v63  ;;  %v8088_v38 = vsel %vm1174_vm3, %v2365_v58, %v2366_v27  ;;  %v1182_v63 = vrot.slane %v902_v34, 1  ;;  %v2168_v0 = vshll.u32 %v2136_v17, 16 }
 0x222   : > { %2653 = vrot.lane.b32.xlu0 %v8060_v18, %s6791_s26  ;;  %13763 = vst [vmem:[#allocation2_spill] sm:$0xff] %v8077_v61  ;;  %13764 = vst [vmem:[#allocation95_spill] sm:$0xff] %v8088_v38  ;;  %v2450_v60 = vshrl.u32 %v2136_v17, 16  ;;  %v1178_v45 = vrot.slane %v8082_v53, 1  ;;  %v2162_v32 = vshrl.u32 %v8041_v4, 16  ;;  %v2166_v30 = vrot.slane %v2164_v22, 1 }
 0x223   : > { %v1183_v12 = vsel %vm1174_vm3, %v1181_v50, %v1182_v63  ;;  %v1179_v27 = vrot.slane %v8092_v41, 1  ;;  %v2174_v19 = vshll.u32 %v8035_v59, 16  ;;  %v2453_v9 = vrot.slane %v2168_v0, 2 }
 0x224   : > { %v2447_v58 = vrot.slane %v2162_v32, 1  ;;  %v2452_v1 = vrot.slane %v2450_v60, 1  ;;  %v2167_v23 = vor.u32 %v2166_v30, %v2162_v32  ;;  %v2448_v50 = vrot.slane %v2164_v22, 2 }
 0x225   : > { %1258 = vrot.lane.b32.xlu1 %v8066_v28, %s6797_s12  ;;  %v1180_v17 = vsel %vm1174_vm3, %v1178_v45, %v1179_v27  ;;  %v2172_v63 = vshrl.u32 %v8035_v59, 16  ;;  %v945_v21 = vshll.u32 %v8066_v28, 16  ;;  %v2176_v20 = vrot.slane %v2174_v19, 1 }
 0x226   : > { %1368 = vrot.lane.b32.xlu0 %v8066_v28, %s6790_s23  ;;  %v2178_v44 = vshll.u32 %v8038_v40, 16  ;;  %v2170_v45 = vrot.slane %v2168_v0, 1  ;;  %v2454_v27 = vor.u32 %v2453_v9, %v2452_v1  ;;  %v2449_v32 = vor.u32 %v2448_v50, %v2447_v58 }
 0x227   : > { %v947_v30 = vrot.slane %v945_v21, 1  ;;  %v2456_v22 = vrot.slane %v2172_v63, 1  ;;  %v2177_v56 = vor.u32 %v2176_v20, %v2172_v63  ;;  %v2457_v52 = vrot.slane %v2174_v19, 2 }
 0x228   : > { %v8114_v60 = vsel %vm917_vm5, %v2167_v23, %v2170_v45  ;;  %v13766_v37 = vshrl.u32 %v8038_v40, 16  ;;  %v2462_v8 = vrot.slane %v2178_v44, 2  ;;  %v943_v23 = vshrl.u32 %v8066_v28, 16 }
 0x229   : > { %2651 = vrot.lane.b32.xlu1 %v8077_v61, %s6791_s26  ;;  %13765 = vst [vmem:[#allocation96_spill] sm:$0xff] %v8114_v60  ;;  %v950_v9 = vshll.u32 %v902_v34, 16  ;;  %v2180_v1 = vrot.slane %v2178_v44, 1  ;;  %v8127_v21 = vsel %vm2437_vm7, %v2449_v32, %v2454_v27  ;;  %v933_v20 = vshll.u32 %v8082_v53, 16 }
 0x22a   : > { %2409 = vrot.lane.b32.xlu0 %v8088_v38, %s6792_s27  ;;  %v8120_v33 = vrot.slane %v13766_v37, 1  ;;  %13768 = vst [vmem:[#allocation98_spill] sm:$0xff] %v8127_v21  ;;  %v948_v0 = vor.u32 %v947_v30, %v943_v23  ;;  %v2458_v19 = vor.u32 %v2457_v52, %v2456_v22  ;;  %v931_v52 = vshrl.u32 %v8082_v53, 16 }
 0x22b   : > { %v8099_v46 = vpop.permute.xlu1 %701  ;;  %v8133_v37 = vsel %vm917_vm5, %v2177_v56, %v2180_v1  ;;  %v952_v44 = vrot.slane %v950_v9, 1  ;;  %v935_v50 = vrot.slane %v933_v20, 1 }
 0x22c   : > { %13767 = vst [vmem:[#allocation97_spill] sm:$0xff] %v8120_v33  ;;  %13769 = vst [vmem:[#allocation99_spill] sm:$0xff] %v8133_v37  ;;  %v2463_v58 = vor.u32 %v2462_v8, %v8120_v33  ;;  %v938_v8 = vshll.u32 %v8092_v41, 16  ;;  %v756_v30 = vshrl.u32 %v8099_v46, 16  ;;  %v2055_v41 = vpop.permute.xlu0 %2054 }
 0x22d   : > { %1338 = vrot.lane.b32.xlu1 %v1183_v12, %s6803_s19  ;;  %v953_v34 = vsel %vm917_vm5, %v948_v0, %v952_v44  ;;  %v936_v45 = vor.u32 %v935_v50, %v931_v52 }
 0x22e   : > { %1256 = vrot.lane.b32.xlu0 %v8082_v53, %s6797_s12  ;;  %v8143_v63 = vsel %vm2437_vm7, %v2458_v19, %v2463_v58  ;;  %v940_v27 = vrot.slane %v938_v8, 1  ;;  %v2086_v19 = vrot.slane %v2055_v41, 7 }
 0x22f   : > { %v2057_v2 = vpop.permute.xlu1 %2056  ;;  %13770 = vst [vmem:[#allocation100_spill] sm:$0xff] %v8143_v63 }
 0x230   : > { %v2087_v32 = vrot.slane %v2057_v2, 7  ;;  %v941_v22 = vsel %vm917_vm5, %v936_v45, %v940_v27  ;;  %v759_v2 = vshll.u32 %v8099_v46, 16  ;;  %v8181_v46 = vsel %vm880_vm0, 0, %v2086_v19 }
 0x231   : > { %1225 = vrot.lane.b32.xlu1 %v1180_v17, %s6791_s26  ;;  %13775 = vst [vmem:[#allocation105_spill] sm:$0xff] %v8181_v46  ;;  %v8184_v52 = vsel %vm880_vm0, %v2086_v19, 0  ;;  %v8248_v40 = vshll.u32 %v8181_v46, 16  ;;  %v8276_v62 = vshrl.u32 %v8181_v46, 16 }
 0x232   : > { %1227 = vrot.lane.b32.xlu0 %v1183_v12, %s6791_s26  ;;  %v8156_v23 = vsel %vm880_vm0, %v2087_v32, 0  ;;  %v8163_v1 = vsel %vm880_vm0, 0, %v2087_v32  ;;  %13776 = vst [vmem:[#allocation106_spill] sm:$0xff] %v8184_v52  ;;  %v2614_v41 = vrot.slane %v8184_v52, 2 }
 0x233   : > { %v8122_v5 = vpop.permute.xlu1 %699  ;;  %13771 = vst [vmem:[#allocation101_spill] sm:$0xff] %v8156_v23  ;;  %13772 = vst [vmem:[#allocation102_spill] sm:$0xff] %v8163_v1  ;;  %v2374_v0 = vrot.slane %v8163_v1, 1  ;;  %v8168_v20 = vrot.slane %v8156_v23, 1  ;;  %v2616_v45 = vrot.slane %v8163_v1, 2  ;;  %v2617_v27 = vrot.slane %v8156_v23, 2 }
 0x234   : > { %v752_v19 = vshll.u32 %v8122_v5, 16  ;;  %13781 = vst [vmem:[#allocation111_spill] sm:$0xff] %v8248_v40  ;;  %v8251_v54 = vshll.u32 %v8163_v1, 16  ;;  %v2198_v16 = vshll.u32 %v8156_v23, 16  ;;  %v8270_v3 = vshrl.u32 %v8156_v23, 16  ;;  %13785 = vst [vmem:[#allocation115_spill] sm:$0xff] %v8276_v62 }
 0x235   : > { %2304 = vrot.lane.b32.xlu1 %v8114_v60, %s6798_s15  ;;  %13773 = vst [vmem:[#allocation103_spill] sm:$0xff] %v8168_v20  ;;  %v8178_v50 = vsel %vm1174_vm3, %v2374_v0, %v8168_v20  ;;  %v8205_v0 = vsel %vm2603_vm4, %v2616_v45, %v2617_v27  ;;  %v2371_v45 = vrot.slane %v8181_v46, 1  ;;  %v8279_v13 = vshrl.u32 %v8163_v1, 16 }
 0x236   : > { %1432 = vrot.lane.b32.xlu0 %v1183_v12, %s6794_s30  ;;  %13774 = vst [vmem:[#allocation104_spill] sm:$0xff] %v8178_v50  ;;  %13777 = vst [vmem:[#allocation107_spill] sm:$0xff] %v8205_v0  ;;  %v2196_v14 = vrot.slane %v8251_v54, 1  ;;  %v2465_v23 = vrot.slane %v8276_v62, 1  ;;  %v2466_v36 = vrot.slane %v8248_v40, 2 }
 0x237   : > { %v8136_v12 = vpop.permute.xlu1 %705  ;;  %13782 = vst [vmem:[#allocation112_spill] sm:$0xff] %v8251_v54  ;;  %13784 = vst [vmem:[#allocation114_spill] sm:$0xff] %v8270_v3  ;;  %v2474_v39 = vrot.slane %v8279_v13, 1 }
 0x238   : > { %13786 = vst [vmem:[#allocation116_spill] sm:$0xff] %v8279_v13  ;;  %v2467_v15 = vor.u32 %v2466_v36, %v2465_v23  ;;  %v6775_v36 = vld [vmem:[%s13055_s2 + $0x8] sm:$0xff]  }
 0x239   : > { %2575 = vrot.lane.b32.xlu1 %v8127_v21, %s6799_s16 }
 0x23a   : > { %2306 = vrot.lane.b32.xlu0 %v8133_v37, %s6798_s15 }
 0x23b   : > { %v8149_v56 = vpop.permute.xlu1 %2060 }
 0x23d   : > { %1114 = vrot.lane.b32.xlu1 %v953_v34, %s6792_s27 }
 0x23e   : > { %2577 = vrot.lane.b32.xlu0 %v8143_v63, %s6799_s16 }
 0x23f   : > { %v8158_v9 = vpop.permute.xlu1 %703 }
 0x241   : > { %1302 = vrot.lane.b32.xlu1 %v953_v34, %s6804_s20 }
 0x242   : > { %1336 = vrot.lane.b32.xlu0 %v1180_v17, %s6803_s19  ;;  %v758_v17 = vrot.slane %v756_v30, 7 }
 0x244   : > { %v761_v44 = vor.u32 %v759_v2, %v758_v17  ;;  %v8215_v33 = vsel %vm6856_vm2, %v758_v17, 0 }
 0x245   : > { %1112 = vrot.lane.b32.xlu1 %v941_v22, %s6792_s27 }
 0x246   : > { %1400 = vrot.lane.b32.xlu0 %v953_v34, %s6793_s28  ;;  %v749_v34 = vshrl.u32 %v8122_v5, 16  ;;  %v8196_v32 = vsel %vm6856_vm2, 0, %v761_v44  ;;  %v8223_v5 = vrot.slane %v8184_v52, 1 }
 0x247   : > { %v1187_v17 = vrot.slane %v8196_v32, 1  ;;  %v969_v51 = vshll.u32 %v8196_v32, 16 }
 0x248   : > { %v751_v30 = vrot.slane %v749_v34, 7  ;;  %13779 = vst [vmem:[#allocation109_spill] sm:$0xff] %v8223_v5 }
 0x249   : > { %v8170_v58 = vpop.permute.xlu1 %709  ;;  %2688 = vrot.lane.b32.xlu1 %v8163_v1, %s6796_s11 }
 0x24a   : > { %1300 = vrot.lane.b32.xlu0 %v941_v22, %s6804_s20  ;;  %v2613_v22 = vrot.slane %v8181_v46, 2  ;;  %v754_v44 = vor.u32 %v752_v19, %v751_v30  ;;  %v8239_v19 = vsel %vm1174_vm3, %v2371_v45, %v8223_v5  ;;  %v2188_v45 = vshll.u32 %v8184_v52, 16 }
 0x24b   : > { %13780 = vst [vmem:[#allocation110_spill] sm:$0xff] %v8239_v19  ;;  %v2186_v5 = vrot.slane %v8248_v40, 1  ;;  %v6774_v40 = vld [vmem:[%s13055_s2] sm:$0xff]  }
 0x24c   : > { %v8211_v34 = vsel %vm2603_vm4, %v2613_v22, %v2614_v41  ;;  %v8229_v27 = vsel %vm6856_vm2, 0, %v754_v44  ;;  %v1188_v22 = vrot.slane %v8215_v33, 1  ;;  %v8245_v44 = vsel %vm6856_vm2, %v751_v30, 0  ;;  %6523 = vmatprep.subr.bf16.mxu1 %v6774_v40 }
 0x24d   : > { %v8186_v8 = vpop.permute.xlu1 %2064  ;;  %2415 = vrot.lane.b32.xlu1 %v8178_v50, %s6792_s27  ;;  %13778 = vst [vmem:[#allocation108_spill] sm:$0xff] %v8211_v34  ;;  %v1184_v31 = vrot.slane %v8229_v27, 1  ;;  %v1185_v30 = vrot.slane %v8245_v44, 1  ;;  %v2190_v48 = vrot.slane %v2188_v45, 1  ;;  %v2471_v43 = vrot.slane %v2188_v45, 2  ;;  %6524 = vmatpush3.bf16.msra.mxu1 %v6774_v40 }
 0x24e   : > { %2686 = vrot.lane.b32.xlu0 %v8181_v46, %s6796_s11  ;;  %v1189_v24 = vsel %vm1174_vm3, %v1187_v17, %v1188_v22  ;;  %v8266_v17 = vshrl.u32 %v8184_v52, 16  ;;  %v2187_v52 = vor.u32 %v2186_v5, %v8276_v62  ;;  %v2475_v5 = vrot.slane %v8251_v54, 2  ;;  %6525 = vmatprep.subr.bf16.mxu1 %v6775_v36 }
 0x24f   : > { %v1186_v22 = vsel %vm1174_vm3, %v1184_v31, %v1185_v30  ;;  %v2197_v31 = vor.u32 %v2196_v14, %v8279_v13  ;;  %v2200_v30 = vrot.slane %v2198_v16, 1  ;;  %v8296_v14 = vrot.slane %v8270_v3, 1 }
 0x250   : > { %13783 = vst [vmem:[#allocation113_spill] sm:$0xff] %v8266_v17  ;;  %v8287_v47 = vrot.slane %v8266_v17, 1  ;;  %v2480_v62 = vrot.slane %v2198_v16, 2  ;;  %v974_v45 = vshll.u32 %v8215_v33, 16  ;;  %v8304_v17 = vsel %vm917_vm5, %v2187_v52, %v2190_v48 }
 0x251   : > { %v8200_v2 = vpop.permute.xlu1 %707  ;;  %1262 = vrot.lane.b32.xlu1 %v8196_v32, %s6797_s12  ;;  %13788 = vst [vmem:[#allocation118_spill] sm:$0xff] %v8296_v14  ;;  %13789 = vst [vmem:[#allocation119_spill] sm:$0xff] %v8304_v17  ;;  %v967_v54 = vshrl.u32 %v8196_v32, 16  ;;  %v971_v3 = vrot.slane %v969_v51, 1  ;;  %v2476_v33 = vor.u32 %v2475_v5, %v2474_v39  ;;  %v957_v23 = vshll.u32 %v8229_v27, 16  ;;  %6526 = vmatpush3.bf16.msra.mxu1 %v6775_v36 }
 0x252   : > { %2657 = vrot.lane.b32.xlu0 %v8205_v0, %s6791_s26  ;;  %13787 = vst [vmem:[#allocation117_spill] sm:$0xff] %v8287_v47  ;;  %v2472_v13 = vor.u32 %v2471_v43, %v8287_v47  ;;  %v2481_v48 = vor.u32 %v2480_v62, %v8296_v14  ;;  %v976_v43 = vrot.slane %v974_v45, 1  ;;  %v2059_v45 = vpop.permute.xlu0 %2058  ;;  %v770_v36 = vshrl.u32 %v8136_v12, 16 }
 0x253   : > { %v972_v40 = vor.u32 %v971_v3, %v967_v54  ;;  %v959_v62 = vrot.slane %v957_v23, 1  ;;  %v962_v3 = vshll.u32 %v8245_v44, 16  ;;  %v955_v54 = vshrl.u32 %v8229_v27, 16 }
 0x254   : > { %v8322_v51 = vsel %vm2437_vm7, %v2467_v15, %v2472_v13  ;;  %v8330_v39 = vsel %vm2437_vm7, %v2476_v33, %v2481_v48  ;;  %v6776_v15 = vld [vmem:[%s13055_s2 + $0x10] ss:$0 sps:$4 sm:$0x33]   ;;  %v2089_v33 = vrot.slane %v8149_v56, 7  ;;  %v2088_v44 = vrot.slane %v2059_v45, 7 }
 0x255   : > { %v8217_v20 = vpop.permute.xlu1 %713  ;;  %2655 = vrot.lane.b32.xlu1 %v8211_v34, %s6791_s26  ;;  %13791 = vst [vmem:[#allocation121_spill] sm:$0xff] %v8322_v51  ;;  %13792 = vst [vmem:[#allocation122_spill] sm:$0xff] %v8330_v39  ;;  %v977_v13 = vsel %vm917_vm5, %v972_v40, %v976_v43  ;;  %6636 = vmatprep.subr.msk.bf16.mxu1 %vm389_vm6, %v6776_v15  ;;  %v964_v5 = vrot.slane %v962_v3, 1  ;;  %v773_v23 = vshll.u32 %v8136_v12, 16  ;;  %v1776_v55 = vsel %vm389_vm6, %v6776_v15, 0 }
 0x256   : > { %1372 = vrot.lane.b32.xlu0 %v8196_v32, %s6790_s23  ;;  %v8356_v40 = vpop.permute.xlu0 %2062  ;;  %v8361_v56 = vsel %vm880_vm0, 0, %v2089_v33  ;;  %v8386_v47 = vsel %vm880_vm0, %v2088_v44, 0  ;;  %6528 = vmatpush3.bf16.msra.mxu1 %v1776_v55 }
 0x257   : > { %13795 = vst [vmem:[#allocation125_spill] sm:$0xff] %v8361_v56  ;;  %v2622_v3 = vrot.slane %v8361_v56, 2  ;;  %v2380_v12 = vrot.slane %v8361_v56, 1  ;;  %13800 = vst [vmem:[#allocation130_spill] sm:$0xff] %v8386_v47  ;;  %v8462_v1 = vshrl.u32 %v8361_v56, 16 }
 0x259   : > { %v8233_v41 = vpop.permute.xlu1 %2068  ;;  %1370 = vrot.lane.b32.xlu1 %v8229_v27, %s6790_s23  ;;  %13815 = vst [vmem:[#allocation145_spill] sm:$0xff] %v8462_v1 }
 0x25a   : > { %2413 = vrot.lane.b32.xlu0 %v8239_v19, %s6792_s27 }
 0x25d   : > { %v8255_v7 = vpop.permute.xlu1 %711  ;;  %1342 = vrot.lane.b32.xlu1 %v1189_v24, %s6803_s19 }
 0x25e   : > { %1260 = vrot.lane.b32.xlu0 %v8229_v27, %s6797_s12 }
 0x261   : > { %v8272_v11 = vpop.permute.xlu1 %717  ;;  %1229 = vrot.lane.b32.xlu1 %v1186_v22, %s6791_s26 }
 0x262   : > { %1231 = vrot.lane.b32.xlu0 %v1189_v24, %s6791_s26 }
 0x265   : > { %v8290_v35 = vpop.permute.xlu1 %2072  ;;  %1434 = vrot.lane.b32.xlu1 %v1186_v22, %s6794_s30 }
 0x266   : > { %1436 = vrot.lane.b32.xlu0 %v1189_v24, %s6794_s30  ;;  %v8313_v24 = vsel %vm917_vm5, %v2197_v31, %v2200_v30  ;;  %v960_v30 = vor.u32 %v959_v62, %v955_v54  ;;  %v8364_v62 = vsel %vm880_vm0, 0, %v2088_v44 }
 0x267   : > { %13790 = vst [vmem:[#allocation120_spill] sm:$0xff] %v8313_v24  ;;  %13796 = vst [vmem:[#allocation126_spill] sm:$0xff] %v8364_v62  ;;  %v2377_v44 = vrot.slane %v8364_v62, 1 }
 0x268   : > { %v965_v48 = vsel %vm917_vm5, %v960_v30, %v964_v5  ;;  %v8373_v5 = vpop.permute.xlu0 %2066 }
 0x269   : > { %v8308_v16 = vpop.permute.xlu1 %715  ;;  %2308 = vrot.lane.b32.xlu1 %v8304_v17, %s6798_s15 }
 0x26a   : > { %2310 = vrot.lane.b32.xlu0 %v8313_v24, %s6798_s15 }
 0x26c   : > { %v8390_v14 = vpop.permute.xlu0 %2070 }
 0x26d   : > { %v8325_v52 = vpop.permute.xlu1 %721  ;;  %2579 = vrot.lane.b32.xlu1 %v8322_v51, %s6799_s16 }
 0x26e   : > { %2581 = vrot.lane.b32.xlu0 %v8330_v39, %s6799_s16  ;;  %v8491_v39 = vshrl.u32 %v8364_v62, 16 }
 0x270   : > { %13821 = vst [vmem:[#allocation151_spill] sm:$0xff] %v8491_v39 }
 0x271   : > { %1118 = vrot.lane.b32.xlu1 %v977_v13, %s6792_s27  ;;  %v8343_v31 = vpop.permute.xlu1 %2076 }
 0x272   : > { %1340 = vrot.lane.b32.xlu0 %v1186_v22, %s6803_s19  ;;  %v8354_v22 = vsel %vm880_vm0, %v2089_v33, 0 }
 0x273   : > { %13794 = vst [vmem:[#allocation124_spill] sm:$0xff] %v8354_v22  ;;  %v2623_v54 = vrot.slane %v8354_v22, 2  ;;  %v8377_v45 = vrot.slane %v8354_v22, 1  ;;  %v8454_v25 = vshrl.u32 %v8354_v22, 16 }
 0x275   : > { %1306 = vrot.lane.b32.xlu1 %v977_v13, %s6804_s20  ;;  %v8350_v43 = vpop.permute.xlu1 %719  ;;  %13798 = vst [vmem:[#allocation128_spill] sm:$0xff] %v8377_v45  ;;  %v8394_v42 = vsel %vm1174_vm3, %v2380_v12, %v8377_v45  ;;  %v8411_v12 = vpop.permute.xlu0 %2074  ;;  %13814 = vst [vmem:[#allocation144_spill] sm:$0xff] %v8454_v25 }
 0x276   : > { %1404 = vrot.lane.b32.xlu0 %v977_v13, %s6793_s28  ;;  %13793 = vst [vmem:[#allocation123_spill] sm:$0xff] %v8350_v43  ;;  %v772_v13 = vrot.slane %v770_v36, 7  ;;  %v763_v36 = vshrl.u32 %v8158_v9, 16  ;;  %13801 = vst [vmem:[#allocation131_spill] sm:$0xff] %v8394_v42 }
 0x277   : > { %13805 = vst [vmem:[#allocation135_spill] sm:$0xff] %v8411_v12 }
 0x278   : > { %v775_v33 = vor.u32 %v773_v23, %v772_v13  ;;  %v765_v46 = vrot.slane %v763_v36, 7  ;;  %v2620_v36 = vrot.slane %v8386_v47, 2  ;;  %v8424_v29 = vsel %vm6856_vm2, %v772_v13, 0 }
 0x279   : > { %1116 = vrot.lane.b32.xlu1 %v965_v48, %s6792_s27  ;;  %v8371_v30 = vpop.permute.xlu1 %725  ;;  %v1194_v15 = vrot.slane %v8424_v29, 1 }
 0x27a   : > { %1304 = vrot.lane.b32.xlu0 %v965_v48, %s6804_s20  ;;  %13797 = vst [vmem:[#allocation127_spill] sm:$0xff] %v8371_v30  ;;  %v8398_v23 = vsel %vm6856_vm2, 0, %v775_v33  ;;  %v2619_v33 = vrot.slane %v8364_v62, 2 }
 0x27b   : > { %13802 = vst [vmem:[#allocation132_spill] sm:$0xff] %v8398_v23  ;;  %v1193_v55 = vrot.slane %v8398_v23, 1  ;;  %v993_v63 = vshll.u32 %v8398_v23, 16 }
 0x27c   : > { %v8433_v10 = vsel %vm2603_vm4, %v2619_v33, %v2620_v36 }
 0x27d   : > { %1402 = vrot.lane.b32.xlu1 %v965_v48, %s6793_s28  ;;  %v8383_v48 = vsel %vm2603_vm4, %v2622_v3, %v2623_v54  ;;  %v8400_v4 = vpop.permute.xlu1 %2080  ;;  %v8406_v3 = vrot.slane %v8386_v47, 1  ;;  %v766_v54 = vshll.u32 %v8158_v9, 16  ;;  %13809 = vst [vmem:[#allocation139_spill] sm:$0xff] %v8433_v10 }
 0x27e   : > { %2690 = vrot.lane.b32.xlu0 %v8364_v62, %s6796_s11  ;;  %13799 = vst [vmem:[#allocation129_spill] sm:$0xff] %v8383_v48  ;;  %13803 = vst [vmem:[#allocation133_spill] sm:$0xff] %v8400_v4 }
 0x27f   : > { %13804 = vst [vmem:[#allocation134_spill] sm:$0xff] %v8406_v3  ;;  %v768_v45 = vor.u32 %v766_v54, %v765_v46  ;;  %v8419_v6 = vsel %vm1174_vm3, %v2377_v44, %v8406_v3  ;;  %v8430_v54 = vpop.permute.xlu0 %2078  ;;  %v8436_v44 = vshll.u32 %v8361_v56, 16 }
 0x280   : > { %13806 = vst [vmem:[#allocation136_spill] sm:$0xff] %v8419_v6  ;;  %13808 = vst [vmem:[#allocation138_spill] sm:$0xff] %v8430_v54 }
 0x281   : > { %2692 = vrot.lane.b32.xlu1 %v8361_v56, %s6796_s11  ;;  %v8428_v9 = vpop.permute.xlu1 %723  ;;  %13810 = vst [vmem:[#allocation140_spill] sm:$0xff] %v8436_v44  ;;  %v8441_v13 = vsel %vm6856_vm2, 0, %v768_v45  ;;  %v2216_v36 = vrot.slane %v8436_v44, 1  ;;  %v1195_v45 = vsel %vm1174_vm3, %v1193_v55, %v1194_v15  ;;  %v2492_v15 = vrot.slane %v8462_v1, 1 }
 0x282   : > { %2661 = vrot.lane.b32.xlu0 %v8383_v48, %s6791_s26  ;;  %13807 = vst [vmem:[#allocation137_spill] sm:$0xff] %v8428_v9  ;;  %13811 = vst [vmem:[#allocation141_spill] sm:$0xff] %v8441_v13  ;;  %v2218_v48 = vshll.u32 %v8354_v22, 16  ;;  %v1190_v59 = vrot.slane %v8441_v13, 1  ;;  %v8474_v55 = vshll.u32 %v8364_v62, 16  ;;  %v2493_v56 = vrot.slane %v8436_v44, 2 }
 0x283   : > { %v2217_v18 = vor.u32 %v2216_v36, %v8462_v1  ;;  %v2483_v62 = vrot.slane %v8491_v39, 1  ;;  %v979_v51 = vshrl.u32 %v8441_v13, 16 }
 0x284   : > { %13818 = vst [vmem:[#allocation148_spill] sm:$0xff] %v8474_v55  ;;  %v2220_v22 = vrot.slane %v2218_v48, 1  ;;  %v2206_v44 = vrot.slane %v8474_v55, 1 }
 0x285   : > { %2419 = vrot.lane.b32.xlu1 %v8394_v42, %s6792_s27 }
 0x286   : > { %1376 = vrot.lane.b32.xlu0 %v8398_v23, %s6790_s23 }
 0x289   : > { %1266 = vrot.lane.b32.xlu1 %v8398_v23, %s6797_s12 }
 0x28a   : > { %2417 = vrot.lane.b32.xlu0 %v8419_v6, %s6792_s27 }
 0x28d   : > { %2659 = vrot.lane.b32.xlu1 %v8433_v10, %s6791_s26 }
 0x28e   : > { %1264 = vrot.lane.b32.xlu0 %v8441_v13, %s6797_s12 }
 0x28f   : > { %v8448_v3 = vpop.permute.xlu1 %2684 }
 0x290   : > { %13812 = vst [vmem:[#allocation142_spill] sm:$0xff] %v8448_v3  ;;  %v8450_v33 = vpop.permute.xlu0 %2682  ;;  %v905_v3 = vsel %vm6856_vm2, %v765_v46, 0  ;;  %v8479_v46 = vrot.slane %v8454_v25, 1  ;;  %v2208_v25 = vshll.u32 %v8386_v47, 16 }
 0x291   : > { %13813 = vst [vmem:[#allocation143_spill] sm:$0xff] %v8450_v33  ;;  %1374 = vrot.lane.b32.xlu1 %v8441_v13, %s6790_s23  ;;  %v1191_v10 = vrot.slane %v905_v3, 1 }
 0x292   : > { %1235 = vrot.lane.b32.xlu0 %v1195_v45, %s6791_s26  ;;  %13819 = vst [vmem:[#allocation149_spill] sm:$0xff] %v8479_v46 }
 0x293   : > { %v8466_v33 = vpop.permute.xlu1 %2411  ;;  %v1192_v34 = vsel %vm1174_vm3, %v1190_v59, %v1191_v10  ;;  %v998_v59 = vshll.u32 %v8424_v29, 16  ;;  %v991_v29 = vshrl.u32 %v8398_v23, 16 }
 0x294   : > { %13816 = vst [vmem:[#allocation146_spill] sm:$0xff] %v8466_v33  ;;  %v8468_v0 = vpop.permute.xlu0 %2653  ;;  %v2498_v33 = vrot.slane %v2218_v48, 2  ;;  %v8497_v48 = vsel %vm917_vm5, %v2217_v18, %v2220_v22  ;;  %v2207_v18 = vor.u32 %v2206_v44, %v8491_v39  ;;  %v2210_v22 = vrot.slane %v2208_v25, 1 }
 0x295   : > { %13817 = vst [vmem:[#allocation147_spill] sm:$0xff] %v8468_v0  ;;  %1346 = vrot.lane.b32.xlu1 %v1195_v45, %s6803_s19  ;;  %v8483_v0 = vshrl.u32 %v8386_v47, 16  ;;  %13822 = vst [vmem:[#allocation152_spill] sm:$0xff] %v8497_v48 }
 0x296   : > { %1440 = vrot.lane.b32.xlu0 %v1195_v45, %s6794_s30  ;;  %v2494_v45 = vor.u32 %v2493_v56, %v2492_v15  ;;  %v2499_v61 = vor.u32 %v2498_v33, %v8479_v46  ;;  %v2484_v56 = vrot.slane %v8474_v55, 2  ;;  %v2489_v33 = vrot.slane %v2208_v25, 2 }
 0x297   : > { %13820 = vst [vmem:[#allocation150_spill] sm:$0xff] %v8483_v0  ;;  %v8485_v36 = vpop.permute.xlu1 %1258  ;;  %v8508_v47 = vrot.slane %v8483_v0, 1  ;;  %v981_v46 = vshll.u32 %v8441_v13, 16  ;;  %v8527_v55 = vsel %vm917_vm5, %v2207_v18, %v2210_v22  ;;  %v986_v0 = vshll.u32 %v905_v3, 16 }
 0x298   : > { %v8487_v1 = vpop.permute.xlu0 %1368  ;;  %v8516_v15 = vsel %vm2437_vm7, %v2494_v45, %v2499_v61  ;;  %13827 = vst [vmem:[#allocation157_spill] sm:$0xff] %v8527_v55  ;;  %v2485_v25 = vor.u32 %v2484_v56, %v2483_v62  ;;  %v1000_v61 = vrot.slane %v998_v59, 1  ;;  %v2091_v3 = vrot.slane %v8186_v8, 7 }
 0x299   : > { %1233 = vrot.lane.b32.xlu1 %v1192_v34, %s6791_s26  ;;  %13824 = vst [vmem:[#allocation154_spill] sm:$0xff] %v8508_v47  ;;  %13826 = vst [vmem:[#allocation156_spill] sm:$0xff] %v8516_v15  ;;  %v2490_v39 = vor.u32 %v2489_v33, %v8508_v47  ;;  %v983_v45 = vrot.slane %v981_v46, 1  ;;  %v988_v46 = vrot.slane %v986_v0, 1  ;;  %v784_v22 = vshrl.u32 %v8170_v58, 16 }
 0x29a   : > { %2314 = vrot.lane.b32.xlu0 %v8497_v48, %s6798_s15  ;;  %v8555_v33 = vsel %vm880_vm0, %v2091_v3, 0  ;;  %v8562_v8 = vsel %vm880_vm0, 0, %v2091_v3 }
 0x29b   : > { %v8504_v10 = vpop.permute.xlu1 %2651  ;;  %v8539_v18 = vsel %vm2437_vm7, %v2485_v25, %v2490_v39  ;;  %v984_v59 = vor.u32 %v983_v45, %v979_v51  ;;  %v2090_v39 = vrot.slane %v8356_v40, 7  ;;  %13830 = vst [vmem:[#allocation160_spill] sm:$0xff] %v8555_v33  ;;  %v787_v51 = vshll.u32 %v8170_v58, 16  ;;  %13832 = vst [vmem:[#allocation162_spill] sm:$0xff] %v8562_v8 }
 0x29c   : > { %13823 = vst [vmem:[#allocation153_spill] sm:$0xff] %v8504_v10  ;;  %v8510_v42 = vpop.permute.xlu0 %2409  ;;  %v995_v10 = vrot.slane %v993_v63, 1  ;;  %13828 = vst [vmem:[#allocation158_spill] sm:$0xff] %v8539_v18  ;;  %v786_v40 = vrot.slane %v784_v22, 7  ;;  %v2629_v45 = vrot.slane %v8555_v33, 2  ;;  %v8633_v21 = vshll.u32 %v8562_v8, 16 }
 0x29d   : > { %13825 = vst [vmem:[#allocation155_spill] sm:$0xff] %v8510_v42  ;;  %1438 = vrot.lane.b32.xlu1 %v1192_v34, %s6794_s30  ;;  %v989_v56 = vsel %vm917_vm5, %v984_v59, %v988_v46  ;;  %v2238_v48 = vshll.u32 %v8555_v33, 16  ;;  %v8673_v37 = vshrl.u32 %v8562_v8, 16 }
 0x29e   : > { %2585 = vrot.lane.b32.xlu0 %v8516_v15, %s6799_s16  ;;  %v996_v63 = vor.u32 %v995_v10, %v991_v29  ;;  %v777_v29 = vshrl.u32 %v8200_v2, 16  ;;  %v789_v3 = vor.u32 %v787_v51, %v786_v40  ;;  %v8597_v51 = vsel %vm6856_vm2, %v786_v40, 0  ;;  %13845 = vst [vmem:[#allocation172_spill] sm:$0xff] %v8633_v21 }
 0x29f   : > { %v8522_v42 = vpop.permute.xlu1 %1338  ;;  %13853 = vst [vmem:[#allocation178_spill] sm:$0xff] %v8673_v37 }
 0x2a0   : > { %v8524_v44 = vpop.permute.xlu0 %1256  ;;  %v1001_v62 = vsel %vm917_vm5, %v996_v63, %v1000_v61  ;;  %v8568_v61 = vsel %vm880_vm0, 0, %v2090_v39  ;;  %v2628_v63 = vrot.slane %v8562_v8, 2  ;;  %v8577_v59 = vrot.slane %v777_v29, 7  ;;  %v13839_v29 = vld [vmem:[#allocation3_spill] sm:$0xff] }
 0x2a1   : > { %2312 = vrot.lane.b32.xlu1 %v8527_v55, %s6798_s15  ;;  %13834 = vst [vmem:[#allocation164_spill] sm:$0xff] %v8568_v61  ;;  %v8694_v55 = vrot.slane %v2238_v48, 2 }
 0x2a2   : > { %1344 = vrot.lane.b32.xlu0 %v1192_v34, %s6803_s19  ;;  %v8583_v22 = vsel %vm2603_vm4, %v2628_v63, %v2629_v45  ;;  %v13312_v63 = vrot.slane %v8373_v5, 7 }
 0x2a3   : > { %v8533_v15 = vpop.permute.xlu1 %1225  ;;  %13836 = vst [vmem:[#allocation166_spill] sm:$0xff] %v8583_v22 }
 0x2a4   : > { %v8536_v50 = vpop.permute.xlu0 %1227 }
 0x2a5   : > { %2583 = vrot.lane.b32.xlu1 %v8539_v18, %s6799_s16  ;;  %v8630_v18 = vrot.slane %v8555_v33, 1 }
 0x2a6   : > { %1408 = vrot.lane.b32.xlu0 %v1001_v62, %s6793_s28 }
 0x2a7   : > { %v8545_v34 = vpop.permute.xlu1 %2304  ;;  %13844 = vst [vmem:[#allocation171_spill] sm:$0xff] %v8630_v18 }
 0x2a8   : > { %13829 = vst [vmem:[#allocation159_spill] sm:$0xff] %v8545_v34  ;;  %v8548_v10 = vpop.permute.xlu0 %1432  ;;  %v8587_v34 = vsel %vm880_vm0, %v2090_v39, 0 }
 0x2a9   : > { %1122 = vrot.lane.b32.xlu1 %v1001_v62, %s6792_s27  ;;  %13838 = vst [vmem:[#allocation167_spill] sm:$0xff] %v8587_v34  ;;  %v8612_v40 = vrot.slane %v8587_v34, 1 }
 0x2aa   : > { %1308 = vrot.lane.b32.xlu0 %v989_v56, %s6804_s20 }
 0x2ab   : > { %v8558_v0 = vpop.permute.xlu1 %2575  ;;  %13841 = vst [vmem:[#allocation168_spill] sm:$0xff] %v8612_v40 }
 0x2ac   : > { %13831 = vst [vmem:[#allocation161_spill] sm:$0xff] %v8558_v0  ;;  %v8565_v25 = vpop.permute.xlu0 %2306 }
 0x2ad   : > { %13833 = vst [vmem:[#allocation163_spill] sm:$0xff] %v8565_v25  ;;  %1310 = vrot.lane.b32.xlu1 %v1001_v62, %s6804_s20  ;;  %v13837_v62 = vld [vmem:[#allocation15_spill] sm:$0xff]  ;;  %v780_v25 = vshll.u32 %v8200_v2, 16 }
 0x2ae   : > { %2694 = vrot.lane.b32.xlu0 %v8568_v61, %s6796_s11  ;;  %v6675_v0 = vunpack.i.l.bf16 %v13837_v62  ;;  %v2386_v62 = vrot.slane %v8562_v8, 1 }
 0x2af   : > { %v8575_v58 = vpop.permute.xlu1 %1114  ;;  %v782_v39 = vor.u32 %v780_v25, %v8577_v59  ;;  %v8616_v25 = vshrl.u32 %v8555_v33, 16 }
 0x2b0   : > { %v8579_v46 = vpop.permute.xlu0 %2577  ;;  %v8666_v38 = vsel %vm1174_vm3, %v2386_v62, %v8630_v18  ;;  %v2625_v62 = vrot.slane %v8568_v61, 2  ;;  %v2510_v18 = vrot.slane %v8673_v37, 1 }
 0x2b1   : > { %13835 = vst [vmem:[#allocation165_spill] sm:$0xff] %v8579_v46  ;;  %1120 = vrot.lane.b32.xlu1 %v989_v56, %s6792_s27  ;;  %v1465_v46 = vsel %vm340_vm8, %v13839_v29, %v7963_v57  ;;  %v2383_v57 = vrot.slane %v8568_v61, 1  ;;  %v1200_v29 = vrot.slane %v8597_v51, 1  ;;  %13842 = vst [vmem:[#allocation169_spill] sm:$0xff] %v8616_v25  ;;  %v8681_v33 = vrot.slane %v8616_v25, 1 }
 0x2b2   : > { %2665 = vrot.lane.b32.xlu0 %v8583_v22, %s6791_s26  ;;  %v8607_v22 = vsel %vm6856_vm2, 0, %v789_v3  ;;  %v1498_v2 = vsel %vm1496_vm9, %v1465_v46, %v6675_v0  ;;  %v8637_v0 = vsel %vm6856_vm2, 0, %v782_v39  ;;  %v13846_v46 = vrot.slane %v8233_v41, 7  ;;  %13852 = vst [vmem:[#allocation177_spill] sm:$0xff] %v8666_v38 }
 0x2b3   : > { %v8600_v45 = vpop.permute.xlu1 %1302  ;;  %13840 = vst [vmem:[#allocation3_spill] sm:$0xff] %v8607_v22  ;;  %v8656_v39 = vsel %vm1174_vm3, %v2383_v57, %v8612_v40  ;;  %v2236_v57 = vrot.slane %v8633_v21, 1  ;;  %v1531_v40 = vsel %vm1529_vm10, %v1498_v2, %v8524_v44  ;;  %13854 = vst [vmem:[#allocation179_spill] sm:$0xff] %v8681_v33  ;;  %v2240_v25 = vrot.slane %v2238_v48, 1 }
 0x2b4   : > { %v1337_v47 = vpop.permute.xlu0 %1336  ;;  %v8642_v49 = vsel %vm880_vm0, 0, %v13846_v46  ;;  %13850 = vst [vmem:[#allocation175_spill] sm:$0xff] %v8656_v39  ;;  %v13856_v44 = vrot.slane %v8411_v12, 7 }
 0x2b5   : > { %1406 = vrot.lane.b32.xlu1 %v989_v56, %s6793_s28  ;;  %v8624_v56 = vsel %vm880_vm0, 0, %v13312_v63  ;;  %13847 = vst [vmem:[#allocation173_spill] sm:$0xff] %v8642_v49  ;;  %v13848_v63 = vrot.slane %v8390_v14, 7 }
 0x2b6   : > { %1380 = vrot.lane.b32.xlu0 %v8607_v22, %s6790_s23  ;;  %13843 = vst [vmem:[#allocation170_spill] sm:$0xff] %v8624_v56 }
 0x2b7   : > { %v8626_v3 = vpop.permute.xlu1 %1112  ;;  %v8647_v6 = vsel %vm880_vm0, 0, %v13848_v63  ;;  %v1199_v63 = vrot.slane %v8607_v22, 1 }
 0x2b8   : > { %13849 = vst [vmem:[#allocation174_spill] sm:$0xff] %v8647_v6  ;;  %v1401_v19 = vpop.permute.xlu0 %1400 }
 0x2b9   : > { %2696 = vrot.lane.b32.xlu1 %v8562_v8, %s6796_s11 }
 0x2ba   : > { %2421 = vrot.lane.b32.xlu0 %v8656_v39, %s6792_s27 }
 0x2bb   : > { %v8662_v24 = vpop.permute.xlu1 %2688 }
 0x2bc   : > { %13851 = vst [vmem:[#allocation176_spill] sm:$0xff] %v8662_v24  ;;  %v1301_v39 = vpop.permute.xlu0 %1300  ;;  %v2626_v24 = vrot.slane %v8587_v34, 2 }
 0x2bd   : > { %v1564_v46 = vsel %vm1562_vm11, %v1531_v40, %v1301_v39  ;;  %2423 = vrot.lane.b32.xlu1 %v8666_v38, %s6792_s27  ;;  %v2511_v40 = vrot.slane %v8633_v21, 2  ;;  %v2237_v38 = vor.u32 %v2236_v57, %v8673_v37  ;;  %v13863_v57 = vrot.slane %v8343_v31, 7 }
 0x2be   : > { %v1597_v2 = vsel %vm1595_vm12, %v1564_v46, %v1337_v47  ;;  %1268 = vrot.lane.b32.xlu0 %v8637_v0, %s6797_s12  ;;  %v8699_v47 = vsel %vm880_vm0, 0, %v13856_v44  ;;  %v13858_v46 = vrot.slane %v8290_v35, 7  ;;  %v1201_v44 = vsel %vm1174_vm3, %v1199_v63, %v1200_v29 }
 0x2bf   : > { %v8689_v39 = vpop.permute.xlu1 %2415  ;;  %v1630_v8 = vsel %vm13579_vm13, %v1597_v2, %v8487_v1  ;;  %13857 = vst [vmem:[#allocation181_spill] sm:$0xff] %v8699_v47  ;;  %v8717_v2 = vsel %vm880_vm0, 0, %v13863_v57  ;;  %v2512_v57 = vor.u32 %v2511_v40, %v2510_v18  ;;  %v2517_v63 = vor.u32 %v8694_v55, %v8681_v33 }
 0x2c0   : > { %13855 = vst [vmem:[#allocation180_spill] sm:$0xff] %v8689_v39  ;;  %v8704_v17 = vsel %vm880_vm0, 0, %v13858_v46  ;;  %v13860_v39 = vrot.slane %v8430_v54, 7  ;;  %v8711_v1 = vpop.permute.xlu0 %2686  ;;  %v1663_v48 = vsel %vm1661_vm14, %v1630_v8, %v1401_v19  ;;  %13864 = vst [vmem:[#allocation185_spill] sm:$0xff] %v8717_v2  ;;  %v8735_v8 = vsel %vm2603_vm4, %v2625_v62, %v2626_v24 }
 0x2c1   : > { %13859 = vst [vmem:[#allocation182_spill] sm:$0xff] %v8704_v17  ;;  %13862 = vst [vmem:[#allocation184_spill] sm:$0xff] %v8711_v1  ;;  %1270 = vrot.lane.b32.xlu1 %v8607_v22, %s6797_s12  ;;  %v1696_v46 = vsel %vm13555_vm15, %v1663_v48, %v8548_v10  ;;  %v13866_v1 = vrot.slane %v8400_v4, 7  ;;  %v8740_v10 = vsel %vm917_vm5, %v2237_v38, %v2240_v25  ;;  %v8745_v48 = vshrl.u32 %v8642_v49, 16 }
 0x2c2   : > { %v8709_v21 = vsel %vm880_vm0, 0, %v13860_v39  ;;  %v8725_v39 = vshrl.u32 %v8624_v56, 16  ;;  %1239 = vrot.lane.b32.xlu0 %v1201_v44, %s6791_s26  ;;  %6529 = vmatprep.mubr.msk.bf16.mxu1 %vm1742_vm1, %v1696_v46  ;;  %13868 = vst [vmem:[#allocation188_spill] sm:$0xff] %v8735_v8  ;;  %13869 = vst [vmem:[#allocation189_spill] sm:$0xff] %v8740_v10  ;;  %v8753_v24 = vshrl.u32 %v8704_v17, 16  ;;  %v8756_v18 = vshrl.u32 %v8717_v2, 16 }
 0x2c3   : > { %13861 = vst [vmem:[#allocation183_spill] sm:$0xff] %v8709_v21  ;;  %v8730_v19 = vsel %vm880_vm0, 0, %v13866_v1  ;;  %v8737_v29 = vpop.permute.xlu1 %1262  ;;  %13870 = vst [vmem:[#allocation190_spill] sm:$0xff] %v8745_v48  ;;  %v8748_v1 = vshrl.u32 %v8647_v6, 16  ;;  %v8759_v38 = vshrl.u32 %v8699_v47, 16  ;;  %v8762_v25 = vshrl.u32 %v8709_v21, 16 }
 0x2c4   : > { %13865 = vst [vmem:[#allocation186_spill] sm:$0xff] %v8725_v39  ;;  %13867 = vst [vmem:[#allocation187_spill] sm:$0xff] %v8730_v19  ;;  %v8750_v37 = vpop.permute.xlu0 %2657  ;;  %v8767_v55 = vshll.u32 %v8642_v49, 16  ;;  %v8770_v62 = vshll.u32 %v8624_v56, 16  ;;  %v8773_v40 = vshrl.u32 %v8730_v19, 16  ;;  %v13363_v46 = vrot.slane %v8725_v39, 7 }
 0x2c5   : > { %13871 = vst [vmem:[#allocation191_spill] sm:$0xff] %v8748_v1  ;;  %13872 = vst [vmem:[#allocation192_spill] sm:$0xff] %v8750_v37  ;;  %2663 = vrot.lane.b32.xlu1 %v8735_v8, %s6791_s26  ;;  %v8778_v37 = vshll.u32 %v8704_v17, 16  ;;  %v8781_v33 = vshll.u32 %v8647_v6, 16  ;;  %v8784_v4 = vshll.u32 %v8717_v2, 16  ;;  %v8787_v8 = vshll.u32 %v8699_v47, 16 }
 0x2c6   : > { %13873 = vst [vmem:[#allocation193_spill] sm:$0xff] %v8753_v24  ;;  %13874 = vst [vmem:[#allocation194_spill] sm:$0xff] %v8756_v18  ;;  %1444 = vrot.lane.b32.xlu0 %v1201_v44, %s6794_s30  ;;  %v8792_v60 = vshll.u32 %v8709_v21, 16  ;;  %v8797_v9 = vor.u32 %v13363_v46, %v8770_v62  ;;  %v13366_v30 = vrot.slane %v8748_v1, 7  ;;  %v8810_v46 = vshll.u32 %v8730_v19, 16 }
 0x2c7   : > { %13875 = vst [vmem:[#allocation195_spill] sm:$0xff] %v8759_v38  ;;  %13876 = vst [vmem:[#allocation196_spill] sm:$0xff] %v8762_v25  ;;  %v8789_v54 = vpop.permute.xlu1 %2655  ;;  %v13886_v12 = vrot.slane %v8745_v48, 7  ;;  %v13888_v21 = vrot.slane %v8759_v38, 7  ;;  %v13890_v19 = vrot.slane %v8753_v24, 7 }
 0x2c8   : > { %13877 = vst [vmem:[#allocation197_spill] sm:$0xff] %v8773_v40  ;;  %13878 = vst [vmem:[#allocation198_spill] sm:$0xff] %v8781_v33  ;;  %v8801_v23 = vpop.permute.xlu0 %1372  ;;  %v8815_v13 = vor.u32 %v13366_v30, %v8781_v33 }
 0x2c9   : > { %13879 = vst [vmem:[#allocation199_spill] sm:$0xff] %v8784_v4  ;;  %13880 = vst [vmem:[#allocation200_spill] sm:$0xff] %v8787_v8  ;;  %1378 = vrot.lane.b32.xlu1 %v8637_v0, %s6790_s23  ;;  %v8828_v43 = vor.u32 %v13888_v21, %v8787_v8  ;;  %v8833_v30 = vor.u32 %v13890_v19, %v8778_v37  ;;  %v907_v21 = vsel %vm6856_vm2, %v8577_v59, 0  ;;  %v13896_v19 = vrot.slane %v8773_v40, 7 }
 0x2ca   : > { %13881 = vst [vmem:[#allocation201_spill] sm:$0xff] %v8789_v54  ;;  %13882 = vst [vmem:[#allocation202_spill] sm:$0xff] %v8792_v60  ;;  %2318 = vrot.lane.b32.xlu0 %v8740_v10, %s6798_s15  ;;  %v13894_v54 = vrot.slane %v8762_v25, 7  ;;  %v1017_v59 = vshll.u32 %v8607_v22, 16 }
 0x2cb   : > { %13883 = vst [vmem:[#allocation203_spill] sm:$0xff] %v8797_v9  ;;  %13884 = vst [vmem:[#allocation204_spill] sm:$0xff] %v8810_v46  ;;  %v8820_v9 = vor.u32 %v13886_v12, %v8767_v55 }
 0x2cc   : > { %13885 = vst [vmem:[#allocation205_spill] sm:$0xff] %v8815_v13  ;;  %13889 = vst [vmem:[#allocation207_spill] sm:$0xff] %v8828_v43  ;;  %v13892_v13 = vrot.slane %v8756_v18, 7  ;;  %v8848_v43 = vpop.permute.xlu1 %1370  ;;  %v8855_v10 = vpop.permute.xlu0 %2413  ;;  %v1019_v25 = vrot.slane %v1017_v59, 1 }
 0x2cd   : > { %13887 = vst [vmem:[#allocation206_spill] sm:$0xff] %v8820_v9  ;;  %13891 = vst [vmem:[#allocation208_spill] sm:$0xff] %v8833_v30  ;;  %v8843_v9 = vor.u32 %v13894_v54, %v8792_v60  ;;  %v8853_v30 = vor.u32 %v13896_v19, %v8810_v46  ;;  %1350 = vrot.lane.b32.xlu1 %v1201_v44, %s6803_s19  ;;  %v8863_v54 = vsel %vm2437_vm7, %v2512_v57, %v2517_v63 }
 0x2ce   : > { %v8838_v12 = vor.u32 %v13892_v13, %v8784_v4  ;;  %13898 = vst [vmem:[#allocation212_spill] sm:$0xff] %v8855_v10  ;;  %v1196_v13 = vrot.slane %v8637_v0, 1  ;;  %13900 = vst [vmem:[#allocation214_spill] sm:$0xff] %v8863_v54  ;;  %2589 = vrot.lane.b32.xlu0 %v8863_v54, %s6799_s16  ;;  %v2228_v10 = vshll.u32 %v8587_v34, 16  ;;  %v1022_v63 = vshll.u32 %v8597_v51, 16 }
 0x2cf   : > { %13895 = vst [vmem:[#allocation210_spill] sm:$0xff] %v8843_v9  ;;  %13897 = vst [vmem:[#allocation211_spill] sm:$0xff] %v8853_v30  ;;  %v1197_v9 = vrot.slane %v907_v21, 1  ;;  %v8872_v30 = vshrl.u32 %v8587_v34, 16  ;;  %v8881_v46 = vshrl.u32 %v8568_v61, 16  ;;  %v1015_v54 = vshrl.u32 %v8607_v22, 16 }
 0x2d0   : > { %13893 = vst [vmem:[#allocation209_spill] sm:$0xff] %v8838_v12  ;;  %v8859_v12 = vshll.u32 %v8568_v61, 16  ;;  %v8868_v19 = vpop.permute.xlu1 %1342  ;;  %v8874_v40 = vpop.permute.xlu0 %1260  ;;  %v2230_v60 = vrot.slane %v2228_v10, 1  ;;  %v2507_v61 = vrot.slane %v2228_v10, 2  ;;  %v1024_v18 = vrot.slane %v1022_v63, 1 }
 0x2d1   : > { %13901 = vst [vmem:[#allocation215_spill] sm:$0xff] %v8872_v30  ;;  %v1198_v44 = vsel %vm1174_vm3, %v1196_v13, %v1197_v9  ;;  %13902 = vst [vmem:[#allocation216_spill] sm:$0xff] %v8881_v46  ;;  %v2501_v38 = vrot.slane %v8881_v46, 1  ;;  %v8893_v8 = vrot.slane %v8872_v30, 1  ;;  %v1020_v59 = vor.u32 %v1019_v25, %v1015_v54 }
 0x2d2   : > { %13899 = vst [vmem:[#allocation213_spill] sm:$0xff] %v8859_v12  ;;  %v2226_v57 = vrot.slane %v8859_v12, 1  ;;  %1237 = vrot.lane.b32.xlu1 %v1198_v44, %s6791_s26  ;;  %1348 = vrot.lane.b32.xlu0 %v1198_v44, %s6803_s19  ;;  %v2502_v51 = vrot.slane %v8859_v12, 2  ;;  %v1005_v22 = vshll.u32 %v8637_v0, 16  ;;  %v13904_v4 = vrot.slane %v8233_v41, 7 }
 0x2d3   : > { %13903 = vst [vmem:[#allocation217_spill] sm:$0xff] %v8893_v8  ;;  %v798_v12 = vshrl.u32 %v8217_v20, 16  ;;  %v2508_v54 = vor.u32 %v2507_v61, %v8893_v8  ;;  %v2634_v41 = vrot.slane %v8642_v49, 2  ;;  %v1010_v30 = vshll.u32 %v907_v21, 16 }
 0x2d4   : > { %v8885_v34 = vpop.permute.xlu1 %1229  ;;  %v8888_v9 = vpop.permute.xlu0 %1231  ;;  %v2227_v13 = vor.u32 %v2226_v57, %v8881_v46  ;;  %v8900_v1 = vsel %vm880_vm0, %v13904_v4, 0  ;;  %v2503_v25 = vor.u32 %v2502_v51, %v2501_v38  ;;  %v1025_v4 = vsel %vm917_vm5, %v1020_v59, %v1024_v18 }
 0x2d5   : > { %13905 = vst [vmem:[#allocation218_spill] sm:$0xff] %v8900_v1  ;;  %v1007_v63 = vrot.slane %v1005_v22, 1  ;;  %v800_v38 = vrot.slane %v798_v12, 7  ;;  %v801_v51 = vshll.u32 %v8217_v20, 16  ;;  %v1012_v21 = vrot.slane %v1010_v30, 1 }
 0x2d6   : > { %1442 = vrot.lane.b32.xlu1 %v1198_v44, %s6794_s30  ;;  %2698 = vrot.lane.b32.xlu0 %v8624_v56, %s6796_s11  ;;  %v8910_v10 = vsel %vm917_vm5, %v2227_v13, %v2230_v60  ;;  %v2635_v44 = vrot.slane %v8900_v1, 2  ;;  %v1003_v60 = vshrl.u32 %v8637_v0, 16  ;;  %v8925_v61 = vsel %vm2437_vm7, %v2503_v25, %v2508_v54 }
 0x2d7   : > { %13908 = vst [vmem:[#allocation221_spill] sm:$0xff] %v8925_v61  ;;  %v803_v12 = vor.u32 %v801_v51, %v800_v38  ;;  %v791_v25 = vshrl.u32 %v8255_v7, 16  ;;  %v1467_v30 = vsel %vm340_vm8, %v8082_v53, %v8626_v3  ;;  %v2389_v51 = vrot.slane %v8624_v56, 1 }
 0x2d8   : > { %v8904_v57 = vpop.permute.xlu1 %1434  ;;  %v8907_v46 = vpop.permute.xlu0 %1436  ;;  %v8930_v18 = vsel %vm2603_vm4, %v2634_v41, %v2635_v44  ;;  %v1008_v22 = vor.u32 %v1007_v63, %v1003_v60  ;;  %v13912_v41 = vrot.slane %v8373_v5, 7  ;;  %v1500_v5 = vsel %vm1496_vm9, %v1467_v30, %v8533_v15 }
 0x2d9   : > { %13909 = vst [vmem:[#allocation222_spill] sm:$0xff] %v8930_v18  ;;  %v8959_v63 = vsel %vm6856_vm2, 0, %v803_v12  ;;  %v794_v3 = vshll.u32 %v8255_v7, 16  ;;  %v1469_v12 = vsel %vm340_vm8, %v8066_v28, %v8575_v58  ;;  %v1533_v15 = vsel %vm1529_vm10, %v1500_v5, %v8485_v36 }
 0x2da   : > { %2316 = vrot.lane.b32.xlu1 %v8910_v10, %s6798_s15  ;;  %1412 = vrot.lane.b32.xlu0 %v1025_v4, %s6793_s28  ;;  %v8943_v54 = vsel %vm917_vm5, %v1008_v22, %v1012_v21  ;;  %v8948_v20 = vsel %vm880_vm0, %v13912_v41, 0  ;;  %v8961_v22 = vrot.slane %v791_v25, 7  ;;  %v2392_v41 = vrot.slane %v8642_v49, 1 }
 0x2db   : > { %13913 = vst [vmem:[#allocation225_spill] sm:$0xff] %v8948_v20  ;;  %v8968_v53 = vrot.slane %v8948_v20, 1  ;;  %v8982_v30 = vrot.slane %v8900_v1, 1  ;;  %v1566_v28 = vsel %vm1562_vm11, %v1533_v15, %v8600_v45  ;;  %v1502_v36 = vsel %vm1496_vm9, %v1469_v12, %v8536_v50 }
 0x2dc   : > { %v8919_v33 = vpop.permute.xlu1 %2308  ;;  %v8922_v13 = vpop.permute.xlu0 %2310  ;;  %v9000_v5 = vsel %vm6856_vm2, %v800_v38, 0  ;;  %v1205_v38 = vrot.slane %v8959_v63, 1  ;;  %v1599_v12 = vsel %vm1595_vm12, %v1566_v28, %v8522_v42  ;;  %v2258_v28 = vshll.u32 %v8900_v1, 16 }
 0x2dd   : > { %13906 = vst [vmem:[#allocation219_spill] sm:$0xff] %v8919_v33  ;;  %13907 = vst [vmem:[#allocation220_spill] sm:$0xff] %v8922_v13  ;;  %v8988_v7 = vsel %vm1174_vm3, %v2389_v51, %v8968_v53  ;;  %v1206_v15 = vrot.slane %v9000_v5, 1  ;;  %v812_v13 = vshrl.u32 %v8272_v11, 16 }
 0x2de   : > { %2587 = vrot.lane.b32.xlu1 %v8925_v61, %s6799_s16  ;;  %2669 = vrot.lane.b32.xlu0 %v8930_v18, %s6791_s26  ;;  %13914 = vst [vmem:[#allocation226_spill] sm:$0xff] %v8968_v53  ;;  %13915 = vst [vmem:[#allocation227_spill] sm:$0xff] %v8982_v30  ;;  %v13978_v18 = vld [vmem:[#allocation194_spill] sm:$0xff] }
 0x2df   : > { %13916 = vst [vmem:[#allocation228_spill] sm:$0xff] %v8988_v7 }
 0x2e0   : > { %v8935_v59 = vpop.permute.xlu1 %2579  ;;  %v8937_v33 = vpop.permute.xlu0 %2581 }
 0x2e1   : > { %13910 = vst [vmem:[#allocation223_spill] sm:$0xff] %v8935_v59  ;;  %13911 = vst [vmem:[#allocation224_spill] sm:$0xff] %v8937_v33  ;;  %v796_v59 = vor.u32 %v794_v3, %v8961_v22  ;;  %v9006_v3 = vsel %vm1174_vm3, %v2392_v41, %v8982_v30  ;;  %v13927_v33 = vrot.slane %v8290_v35, 7  ;;  %v2248_v35 = vshll.u32 %v8948_v20, 16 }
 0x2e2   : > { %2700 = vrot.lane.b32.xlu1 %v8642_v49, %s6796_s11  ;;  %1312 = vrot.lane.b32.xlu0 %v8943_v54, %s6804_s20 }
 0x2e3   : > { %v9010_v45 = vsel %vm6856_vm2, 0, %v796_v59  ;;  %v1632_v59 = vsel %vm13579_vm13, %v1599_v12, %v8848_v43  ;;  %v1207_v43 = vsel %vm1174_vm3, %v1205_v38, %v1206_v15  ;;  %v2256_v12 = vrot.slane %v8767_v55, 1 }
 0x2e4   : > { %v8955_v44 = vpop.permute.xlu1 %1118  ;;  %v1341_v60 = vpop.permute.xlu0 %1340  ;;  %v2528_v38 = vrot.slane %v8745_v48, 1  ;;  %v2250_v49 = vrot.slane %v2248_v35, 1 }
 0x2e6   : > { %1126 = vrot.lane.b32.xlu1 %v1025_v4, %s6792_s27  ;;  %1384 = vrot.lane.b32.xlu0 %v8959_v63, %s6790_s23 }
 0x2e8   : > { %v8973_v21 = vpop.permute.xlu1 %1306  ;;  %v1405_v25 = vpop.permute.xlu0 %1404 }
 0x2ea   : > { %1314 = vrot.lane.b32.xlu1 %v1025_v4, %s6804_s20  ;;  %2425 = vrot.lane.b32.xlu0 %v8988_v7, %s6792_s27  ;;  %v1535_v4 = vsel %vm1529_vm10, %v1502_v36, %v8874_v40 }
 0x2ec   : > { %v8996_v58 = vpop.permute.xlu1 %1116  ;;  %v1305_v51 = vpop.permute.xlu0 %1304 }
 0x2ed   : > { %v1568_v50 = vsel %vm1562_vm11, %v1535_v4, %v1305_v51  ;;  %v9027_v4 = vshrl.u32 %v8900_v1, 16 }
 0x2ee   : > { %2427 = vrot.lane.b32.xlu1 %v9006_v3, %s6792_s27  ;;  %v1601_v40 = vsel %vm1595_vm12, %v1568_v50, %v1341_v60  ;;  %1272 = vrot.lane.b32.xlu0 %v9010_v45, %s6797_s12 }
 0x2ef   : > { %v1634_v41 = vsel %vm13579_vm13, %v1601_v40, %v8801_v23  ;;  %13917 = vst [vmem:[#allocation229_spill] sm:$0xff] %v9027_v4  ;;  %v9055_v15 = vrot.slane %v9027_v4, 1  ;;  %v814_v4 = vrot.slane %v812_v13, 7 }
 0x2f0   : > { %v1403_v36 = vpop.permute.xlu1 %1402  ;;  %v9030_v42 = vpop.permute.xlu0 %2690  ;;  %v1667_v60 = vsel %vm1661_vm14, %v1634_v41, %v1405_v25 }
 0x2f1   : > { %v1665_v51 = vsel %vm1661_vm14, %v1632_v59, %v1403_v36  ;;  %13918 = vst [vmem:[#allocation230_spill] sm:$0xff] %v9030_v42  ;;  %v1700_v50 = vsel %vm13555_vm15, %v1667_v60, %v8907_v46  ;;  %v2529_v46 = vrot.slane %v8767_v55, 2  ;;  %13921 = vst [vmem:[#allocation233_spill] sm:$0xff] %v9055_v15  ;;  %v2534_v59 = vrot.slane %v2258_v28, 2 }
 0x2f2   : > { %1124 = vrot.lane.b32.xlu1 %v8943_v54, %s6792_s27  ;;  %v1698_v23 = vsel %vm13555_vm15, %v1665_v51, %v8904_v57  ;;  %1243 = vrot.lane.b32.xlu0 %v1207_v43, %s6791_s26  ;;  %v2257_v57 = vor.u32 %v2256_v12, %v8745_v48  ;;  %v2260_v36 = vrot.slane %v2258_v28, 1  ;;  %v2631_v60 = vrot.slane %v8624_v56, 2 }
 0x2f3   : > { %6530 = vmatmul.mubr.msk.bf16.vlgmr.msra.gmra.mrb[0].mxu1 %vm1742_vm1, %v1698_v23  ;;  %v2632_v23 = vrot.slane %v8948_v20, 2  ;;  %v2535_v12 = vor.u32 %v2534_v59, %v9055_v15  ;;  %v909_v28 = vsel %vm6856_vm2, %v8961_v22, 0  ;;  %v1027_v15 = vshrl.u32 %v9010_v45, 16 }
 0x2f4   : > { %6533 = vmatprep.mubr.msk.bf16.mxu1 %vm1742_vm1, %v1700_v50  ;;  %v9045_v25 = vpop.permute.xlu1 %2692  ;;  %v9047_v40 = vpop.permute.xlu0 %2661  ;;  %v9067_v55 = vsel %vm917_vm5, %v2257_v57, %v2260_v36  ;;  %v2530_v50 = vor.u32 %v2529_v46, %v2528_v38  ;;  %v1202_v38 = vrot.slane %v9010_v45, 1  ;;  %v1041_v57 = vshll.u32 %v8959_v63, 16 }
 0x2f5   : > { %13919 = vst [vmem:[#allocation231_spill] sm:$0xff] %v9045_v25  ;;  %13920 = vst [vmem:[#allocation232_spill] sm:$0xff] %v9047_v40  ;;  %v9080_v42 = vsel %vm2603_vm4, %v2631_v60, %v2632_v23  ;;  %v1203_v46 = vrot.slane %v909_v28, 1  ;;  %v1046_v23 = vshll.u32 %v9000_v5, 16  ;;  %v1034_v48 = vshll.u32 %v909_v28, 16 }
 0x2f6   : > { %1274 = vrot.lane.b32.xlu1 %v8959_v63, %s6797_s12  ;;  %1448 = vrot.lane.b32.xlu0 %v1207_v43, %s6794_s30  ;;  %13924 = vst [vmem:[#allocation236_spill] sm:$0xff] %v9080_v42  ;;  %v1043_v60 = vrot.slane %v1041_v57, 1 }
 0x2f7   : > { %v1204_v36 = vsel %vm1174_vm3, %v1202_v38, %v1203_v46  ;;  %v9110_v38 = vsel %vm880_vm0, %v13927_v33, 0  ;;  %v1048_v5 = vrot.slane %v1046_v23, 1  ;;  %v9117_v46 = vshrl.u32 %v8948_v20, 16 }
 0x2f8   : > { %v9058_v41 = vpop.permute.xlu1 %2419  ;;  %v9060_v51 = vpop.permute.xlu0 %1376  ;;  %13928 = vst [vmem:[#allocation239_spill] sm:$0xff] %v9110_v38  ;;  %v2640_v23 = vrot.slane %v8704_v17, 2  ;;  %v2519_v20 = vrot.slane %v8725_v39, 1 }
 0x2f9   : > { %13922 = vst [vmem:[#allocation234_spill] sm:$0xff] %v9058_v41  ;;  %v1029_v41 = vshll.u32 %v9010_v45, 16  ;;  %13929 = vst [vmem:[#allocation240_spill] sm:$0xff] %v9117_v46  ;;  %v9141_v53 = vrot.slane %v9117_v46, 1 }
 0x2fa   : > { %1410 = vrot.lane.b32.xlu1 %v8943_v54, %s6793_s28  ;;  %2322 = vrot.lane.b32.xlu0 %v9067_v55, %s6798_s15  ;;  %v9085_v54 = vsel %vm2437_vm7, %v2530_v50, %v2535_v12  ;;  %v1039_v12 = vshrl.u32 %v8959_v63, 16 }
 0x2fb   : > { %13925 = vst [vmem:[#allocation237_spill] sm:$0xff] %v9085_v54  ;;  %v1031_v1 = vrot.slane %v1029_v41, 1  ;;  %13931 = vst [vmem:[#allocation242_spill] sm:$0xff] %v9141_v53  ;;  %v2525_v41 = vrot.slane %v2248_v35, 2 }
 0x2fc   : > { %v9072_v40 = vpop.permute.xlu1 %1266  ;;  %v9077_v25 = vpop.permute.xlu0 %2417 }
 0x2fd   : > { %13923 = vst [vmem:[#allocation235_spill] sm:$0xff] %v9077_v25  ;;  %v1032_v56 = vor.u32 %v1031_v1, %v1027_v15  ;;  %v805_v1 = vshrl.u32 %v8308_v16, 16 }
 0x2fe   : > { %2667 = vrot.lane.b32.xlu1 %v9080_v42, %s6791_s26  ;;  %2593 = vrot.lane.b32.xlu0 %v9085_v54, %s6799_s16  ;;  %v13981_v42 = vld [vmem:[#allocation132_spill] sm:$0xff] }
 0x300   : > { %v9091_v22 = vpop.permute.xlu1 %2659  ;;  %v9093_v59 = vpop.permute.xlu0 %1264 }
 0x301   : > { %13926 = vst [vmem:[#allocation238_spill] sm:$0xff] %v9091_v22  ;;  %v1044_v22 = vor.u32 %v1043_v60, %v1039_v12  ;;  %v2246_v60 = vrot.slane %v8770_v62, 1  ;;  %v2641_v12 = vrot.slane %v9110_v38, 2 }
 0x302   : > { %1382 = vrot.lane.b32.xlu1 %v9010_v45, %s6790_s23  ;;  %1352 = vrot.lane.b32.xlu0 %v1204_v36, %s6803_s19 }
 0x303   : > { %v9126_v33 = vsel %vm917_vm5, %v1044_v22, %v1048_v5  ;;  %v2247_v22 = vor.u32 %v2246_v60, %v8725_v39  ;;  %v2520_v5 = vrot.slane %v8770_v62, 2  ;;  %v9145_v28 = vsel %vm2603_vm4, %v2640_v23, %v2641_v12 }
 0x304   : > { %v9100_v50 = vpop.permute.xlu1 %1374  ;;  %v9103_v25 = vpop.permute.xlu0 %1235  ;;  %13932 = vst [vmem:[#allocation243_spill] sm:$0xff] %v9145_v28  ;;  %v815_v60 = vshll.u32 %v8272_v11, 16  ;;  %v13934_v11 = vrot.slane %v8390_v14, 7  ;;  %v2395_v14 = vrot.slane %v8647_v6, 1 }
 0x305   : > { %v9155_v46 = vsel %vm917_vm5, %v2247_v22, %v2250_v49  ;;  %v2521_v13 = vor.u32 %v2520_v5, %v2519_v20  ;;  %v808_v22 = vshll.u32 %v8308_v16, 16  ;;  %v1471_v16 = vsel %vm340_vm8, %v8229_v27, %v8996_v58 }
 0x306   : > { %1354 = vrot.lane.b32.xlu1 %v1207_v43, %s6803_s19  ;;  %2702 = vrot.lane.b32.xlu0 %v8647_v6, %s6796_s11  ;;  %v817_v23 = vor.u32 %v815_v60, %v814_v4  ;;  %v9167_v15 = vsel %vm880_vm0, %v13934_v11, 0  ;;  %v1504_v27 = vsel %vm1496_vm9, %v1471_v16, %v8885_v34  ;;  %v9242_v16 = vrot.slane %v9110_v38, 1 }
 0x307   : > { %13935 = vst [vmem:[#allocation245_spill] sm:$0xff] %v9167_v15  ;;  %v1537_v34 = vsel %vm1529_vm10, %v1504_v27, %v8737_v29 }
 0x308   : > { %v9114_v57 = vpop.permute.xlu1 %1346  ;;  %v9120_v43 = vpop.permute.xlu0 %1440  ;;  %v9178_v12 = vsel %vm6856_vm2, 0, %v817_v23  ;;  %13944 = vst [vmem:[#allocation254_spill] sm:$0xff] %v9242_v16  ;;  %v1570_v29 = vsel %vm1562_vm11, %v1537_v34, %v8973_v21  ;;  %v2547_v21 = vrot.slane %v8778_v37, 2 }
 0x30a   : > { %1241 = vrot.lane.b32.xlu1 %v1204_v36, %s6791_s26  ;;  %1416 = vrot.lane.b32.xlu0 %v9126_v33, %s6793_s28 }
 0x30c   : > { %v9132_v8 = vpop.permute.xlu1 %1233  ;;  %v9136_v30 = vpop.permute.xlu0 %2314 }
 0x30d   : > { %13930 = vst [vmem:[#allocation241_spill] sm:$0xff] %v9136_v30  ;;  %v1036_v30 = vrot.slane %v1034_v48, 1 }
 0x30e   : > { %1446 = vrot.lane.b32.xlu1 %v1204_v36, %s6794_s30  ;;  %2673 = vrot.lane.b32.xlu0 %v9145_v28, %s6791_s26  ;;  %v2526_v36 = vor.u32 %v2525_v41, %v9141_v53  ;;  %v13958_v53 = vld [vmem:[#allocation198_spill] sm:$0xff] }
 0x30f   : > { %v9162_v48 = vsel %vm917_vm5, %v1032_v56, %v1036_v30  ;;  %v9180_v56 = vrot.slane %v805_v1, 7  ;;  %v9186_v30 = vrot.slane %v9167_v15, 1  ;;  %v9212_v1 = vsel %vm6856_vm2, %v814_v4, 0 }
 0x310   : > { %v9150_v39 = vpop.permute.xlu1 %1438  ;;  %v9152_v62 = vpop.permute.xlu0 %2585  ;;  %v9174_v35 = vsel %vm2437_vm7, %v2521_v13, %v2526_v36  ;;  %v1473_v13 = vsel %vm340_vm8, %v8196_v32, %v8955_v44  ;;  %v1211_v4 = vrot.slane %v9178_v12, 1 }
 0x311   : > { %13933 = vst [vmem:[#allocation244_spill] sm:$0xff] %v9152_v62  ;;  %13937 = vst [vmem:[#allocation247_spill] sm:$0xff] %v9174_v35  ;;  %v810_v60 = vor.u32 %v808_v22, %v9180_v56  ;;  %v9201_v36 = vsel %vm1174_vm3, %v2395_v14, %v9186_v30  ;;  %v1506_v32 = vsel %vm1496_vm9, %v1473_v13, %v8888_v9  ;;  %v1212_v9 = vrot.slane %v9212_v1, 1 }
 0x312   : > { %2320 = vrot.lane.b32.xlu1 %v9155_v46, %s6798_s15  ;;  %1316 = vrot.lane.b32.xlu0 %v9162_v48, %s6804_s20  ;;  %13938 = vst [vmem:[#allocation248_spill] sm:$0xff] %v9186_v30  ;;  %13940 = vst [vmem:[#allocation250_spill] sm:$0xff] %v9201_v36  ;;  %v1539_v58 = vsel %vm1529_vm10, %v1506_v32, %v9093_v59  ;;  %v2398_v13 = vrot.slane %v8704_v17, 1 }
 0x313   : > { %v9218_v11 = vsel %vm6856_vm2, 0, %v810_v60  ;;  %v9234_v60 = vshrl.u32 %v9110_v38, 16 }
 0x314   : > { %v9171_v49 = vpop.permute.xlu1 %2312  ;;  %v1345_v20 = vpop.permute.xlu0 %1344  ;;  %13941 = vst [vmem:[#allocation251_spill] sm:$0xff] %v9218_v11 }
 0x315   : > { %13936 = vst [vmem:[#allocation246_spill] sm:$0xff] %v9171_v49  ;;  %13942 = vst [vmem:[#allocation252_spill] sm:$0xff] %v9234_v60  ;;  %v9272_v34 = vrot.slane %v9234_v60, 1  ;;  %v829_v60 = vshll.u32 %v8325_v52, 16 }
 0x316   : > { %2591 = vrot.lane.b32.xlu1 %v9174_v35, %s6799_s16  ;;  %1388 = vrot.lane.b32.xlu0 %v9178_v12, %s6790_s23 }
 0x317   : > { %13946 = vst [vmem:[#allocation256_spill] sm:$0xff] %v9272_v34 }
 0x318   : > { %v9191_v5 = vpop.permute.xlu1 %2583  ;;  %v1409_v41 = vpop.permute.xlu0 %1408 }
 0x319   : > { %13939 = vst [vmem:[#allocation249_spill] sm:$0xff] %v9191_v5  ;;  %v2278_v5 = vshll.u32 %v9110_v38, 16 }
 0x31a   : > { %2704 = vrot.lane.b32.xlu1 %v8704_v17, %s6796_s11  ;;  %2429 = vrot.lane.b32.xlu0 %v9201_v36, %s6792_s27 }
 0x31b   : > { %v2552_v49 = vrot.slane %v2278_v5, 2 }
 0x31c   : > { %v9208_v23 = vpop.permute.xlu1 %1122  ;;  %v1309_v44 = vpop.permute.xlu0 %1308 }
 0x31d   : > { %v1572_v14 = vsel %vm1562_vm11, %v1539_v58, %v1309_v44  ;;  %v9248_v44 = vsel %vm1174_vm3, %v1211_v4, %v1212_v9  ;;  %v2276_v58 = vrot.slane %v8778_v37, 1  ;;  %v2546_v4 = vrot.slane %v8753_v24, 1 }
 0x31e   : > { %1130 = vrot.lane.b32.xlu1 %v9126_v33, %s6792_s27  ;;  %1276 = vrot.lane.b32.xlu0 %v9218_v11, %s6797_s12  ;;  %v1605_v32 = vsel %vm1595_vm12, %v1572_v14, %v1345_v20  ;;  %v1477_v54 = vsel %vm340_vm8, %v13981_v42, %v9208_v23 }
 0x31f   : > { %v1638_v20 = vsel %vm13579_vm13, %v1605_v32, %v9060_v51  ;;  %v2277_v9 = vor.u32 %v2276_v58, %v8753_v24  ;;  %v1603_v51 = vsel %vm1595_vm12, %v1570_v29, %v8868_v19  ;;  %v2548_v29 = vor.u32 %v2547_v21, %v2546_v4 }
 0x320   : > { %v9231_v22 = vpop.permute.xlu1 %1310  ;;  %v9238_v59 = vpop.permute.xlu0 %2694  ;;  %v1671_v62 = vsel %vm1661_vm14, %v1638_v20, %v1409_v41  ;;  %v1208_v20 = vrot.slane %v9218_v11, 1  ;;  %v2638_v21 = vrot.slane %v9167_v15, 2  ;;  %v1510_v23 = vsel %vm1496_vm9, %v1477_v54, %v9103_v25 }
 0x321   : > { %13943 = vst [vmem:[#allocation253_spill] sm:$0xff] %v9238_v59  ;;  %v2280_v59 = vrot.slane %v2278_v5, 1  ;;  %v1704_v5 = vsel %vm13555_vm15, %v1671_v62, %v9120_v43  ;;  %v1065_v43 = vshll.u32 %v9178_v12, 16 }
 0x322   : > { %1318 = vrot.lane.b32.xlu1 %v9126_v33, %s6804_s20  ;;  %1247 = vrot.lane.b32.xlu0 %v9248_v44, %s6791_s26  ;;  %v9264_v33 = vsel %vm1174_vm3, %v2398_v13, %v9242_v16  ;;  %v1636_v13 = vsel %vm13579_vm13, %v1603_v51, %v9100_v50  ;;  %v2553_v50 = vor.u32 %v2552_v49, %v9272_v34  ;;  %v2268_v34 = vshll.u32 %v9167_v15, 16 }
 0x323   : > { %v9287_v38 = vsel %vm917_vm5, %v2277_v9, %v2280_v59  ;;  %v911_v59 = vsel %vm6856_vm2, %v9180_v56, 0  ;;  %v2637_v56 = vrot.slane %v8647_v6, 2 }
 0x324   : > { %v9256_v27 = vpop.permute.xlu1 %1120  ;;  %v9260_v14 = vpop.permute.xlu0 %2665  ;;  %v9308_v49 = vsel %vm2437_vm7, %v2548_v29, %v2553_v50  ;;  %v1209_v62 = vrot.slane %v911_v59, 1 }
 0x325   : > { %13945 = vst [vmem:[#allocation255_spill] sm:$0xff] %v9260_v14  ;;  %13949 = vst [vmem:[#allocation259_spill] sm:$0xff] %v9308_v49  ;;  %v9331_v50 = vsel %vm2603_vm4, %v2637_v56, %v2638_v21  ;;  %v13953_v56 = vrot.slane %v8343_v31, 7 }
 0x326   : > { %2431 = vrot.lane.b32.xlu1 %v9264_v33, %s6792_s27  ;;  %1452 = vrot.lane.b32.xlu0 %v9248_v44, %s6794_s30  ;;  %v1210_v51 = vsel %vm1174_vm3, %v1208_v20, %v1209_v62  ;;  %13951 = vst [vmem:[#allocation261_spill] sm:$0xff] %v9331_v50  ;;  %v1053_v62 = vshll.u32 %v9218_v11, 16 }
 0x327   : > { %v9350_v21 = vsel %vm880_vm0, %v13953_v56, 0  ;;  %v9366_v56 = vshrl.u32 %v9167_v15, 16 }
 0x328   : > { %v1407_v32 = vpop.permute.xlu1 %1406  ;;  %v9282_v37 = vpop.permute.xlu0 %1380  ;;  %13954 = vst [vmem:[#allocation263_spill] sm:$0xff] %v9350_v21  ;;  %v1055_v31 = vrot.slane %v1053_v62, 1  ;;  %v2298_v17 = vshll.u32 %v9350_v21, 16 }
 0x329   : > { %v1669_v58 = vsel %vm1661_vm14, %v1636_v13, %v1407_v32  ;;  %v1067_v13 = vrot.slane %v1065_v43, 1  ;;  %v1070_v32 = vshll.u32 %v9212_v1, 16  ;;  %13956 = vst [vmem:[#allocation265_spill] sm:$0xff] %v9366_v56 }
 0x32a   : > { %1128 = vrot.lane.b32.xlu1 %v9162_v48, %s6792_s27  ;;  %v1702_v19 = vsel %vm13555_vm15, %v1669_v58, %v9150_v39  ;;  %2326 = vrot.lane.b32.xlu0 %v9287_v38, %s6798_s15 }
 0x32b   : > { %6534 = vmatmul.mubr.msk.bf16.gmra.mrb[4].mxu1 %vm1742_vm1, %v1702_v19  ;;  %v1063_v19 = vshrl.u32 %v9178_v12, 16 }
 0x32c   : > { %6537 = vmatprep.mubr.msk.bf16.mxu1 %vm1742_vm1, %v1704_v5  ;;  %v9298_v41 = vpop.permute.xlu1 %2696  ;;  %v9303_v39 = vpop.permute.xlu0 %2421  ;;  %v1072_v5 = vrot.slane %v1070_v32, 1 }
 0x32d   : > { %13947 = vst [vmem:[#allocation257_spill] sm:$0xff] %v9298_v41  ;;  %13948 = vst [vmem:[#allocation258_spill] sm:$0xff] %v9303_v39  ;;  %v1051_v39 = vshrl.u32 %v9218_v11, 16 }
 0x32e   : > { %1278 = vrot.lane.b32.xlu1 %v9178_v12, %s6797_s12  ;;  %2597 = vrot.lane.b32.xlu0 %v9308_v49, %s6799_s16 }
 0x32f   : > { %v1056_v30 = vor.u32 %v1055_v31, %v1051_v39  ;;  %v2543_v39 = vrot.slane %v2268_v34, 2  ;;  %v13962_v31 = vld [vmem:[#allocation123_spill] sm:$0xff] }
 0x330   : > { %v9314_v4 = vpop.permute.xlu1 %2423  ;;  %v9316_v9 = vpop.permute.xlu0 %1268  ;;  %v819_v6 = vshrl.u32 %v13962_v31, 16 }
 0x331   : > { %13950 = vst [vmem:[#allocation260_spill] sm:$0xff] %v9314_v4 }
 0x332   : > { %1414 = vrot.lane.b32.xlu1 %v9162_v48, %s6793_s28  ;;  %1356 = vrot.lane.b32.xlu0 %v1210_v51, %s6803_s19  ;;  %v1068_v48 = vor.u32 %v1067_v13, %v1063_v19  ;;  %v826_v19 = vshrl.u32 %v8325_v52, 16 }
 0x334   : > { %v9325_v58 = vpop.permute.xlu1 %1270  ;;  %v9328_v29 = vpop.permute.xlu0 %1239  ;;  %v9344_v43 = vsel %vm917_vm5, %v1068_v48, %v1072_v5  ;;  %v2646_v48 = vrot.slane %v8717_v2, 2  ;;  %v2647_v5 = vrot.slane %v9350_v21, 2  ;;  %v828_v16 = vrot.slane %v826_v19, 7  ;;  %v13961_v19 = vld [vmem:[#allocation191_spill] sm:$0xff] }
 0x336   : > { %2671 = vrot.lane.b32.xlu1 %v9331_v50, %s6791_s26  ;;  %2706 = vrot.lane.b32.xlu0 %v8699_v47, %s6796_s11  ;;  %v9377_v62 = vsel %vm2603_vm4, %v2646_v48, %v2647_v5  ;;  %v2538_v48 = vrot.slane %v13958_v53, 2  ;;  %v831_v5 = vor.u32 %v829_v60, %v828_v16  ;;  %v2570_v50 = vrot.slane %v2298_v17, 2 }
 0x337   : > { %13959 = vst [vmem:[#allocation198_spill] sm:$0xff] %v9377_v62 }
 0x338   : > { %v9337_v20 = vpop.permute.xlu1 %2663  ;;  %v9339_v1 = vpop.permute.xlu0 %1444 }
 0x339   : > { %13952 = vst [vmem:[#allocation262_spill] sm:$0xff] %v9337_v20  ;;  %v1058_v20 = vshll.u32 %v911_v59, 16 }
 0x33a   : > { %1386 = vrot.lane.b32.xlu1 %v9218_v11, %s6790_s23  ;;  %1134 = vrot.lane.b32.xlu0 %v9344_v43, %s6792_s27 }
 0x33b   : > { %v1060_v59 = vrot.slane %v1058_v20, 1  ;;  %v13963_v20 = vld [vmem:[#allocation135_spill] sm:$0xff] }
 0x33c   : > { %v9354_v13 = vpop.permute.xlu1 %1378  ;;  %v9356_v32 = vpop.permute.xlu0 %2318 }
 0x33d   : > { %13955 = vst [vmem:[#allocation264_spill] sm:$0xff] %v9356_v32  ;;  %v2537_v32 = vrot.slane %v13961_v19, 1  ;;  %v9395_v52 = vsel %vm917_vm5, %v1056_v30, %v1060_v59  ;;  %v9414_v59 = vsel %vm6856_vm2, 0, %v831_v5 }
 0x33e   : > { %1358 = vrot.lane.b32.xlu1 %v9248_v44, %s6803_s19  ;;  %1420 = vrot.lane.b32.xlu0 %v9344_v43, %s6793_s28  ;;  %v2266_v44 = vrot.slane %v13958_v53, 1  ;;  %13967 = vst [vmem:[#allocation268_spill] sm:$0xff] %v9414_v59 }
 0x340   : > { %v9368_v41 = vpop.permute.xlu1 %1350  ;;  %v9371_v24 = vpop.permute.xlu0 %2589  ;;  %v2267_v15 = vor.u32 %v2266_v44, %v13961_v19  ;;  %v2270_v44 = vrot.slane %v2268_v34, 1  ;;  %v2401_v34 = vrot.slane %v8699_v47, 1 }
 0x341   : > { %13957 = vst [vmem:[#allocation266_spill] sm:$0xff] %v9371_v24  ;;  %v9385_v24 = vrot.slane %v9366_v56, 1  ;;  %v13964_v56 = vrot.slane %v13963_v20, 7 }
 0x342   : > { %1245 = vrot.lane.b32.xlu1 %v1210_v51, %s6791_s26  ;;  %2677 = vrot.lane.b32.xlu0 %v9377_v62, %s6791_s26  ;;  %v9409_v60 = vsel %vm917_vm5, %v2267_v15, %v2270_v44  ;;  %v822_v15 = vshll.u32 %v13962_v31, 16  ;;  %v9444_v31 = vsel %vm6856_vm2, %v828_v16, 0 }
 0x343   : > { %13960 = vst [vmem:[#allocation267_spill] sm:$0xff] %v9385_v24  ;;  %v9400_v62 = vsel %vm880_vm0, %v13964_v56, 0  ;;  %v2544_v30 = vor.u32 %v2543_v39, %v9385_v24  ;;  %v821_v56 = vrot.slane %v819_v6, 7  ;;  %v9462_v24 = vrot.slane %v9350_v21, 1 }
 0x344   : > { %v9382_v14 = vpop.permute.xlu1 %1237  ;;  %v9387_v4 = vpop.permute.xlu0 %1348  ;;  %13965 = vst [vmem:[#allocation123_spill] sm:$0xff] %v9400_v62  ;;  %v9420_v20 = vrot.slane %v9400_v62, 1 }
 0x345   : > { %v824_v6 = vor.u32 %v822_v15, %v821_v56  ;;  %13975 = vst [vmem:[#allocation276_spill] sm:$0xff] %v9462_v24  ;;  %v913_v42 = vsel %vm6856_vm2, %v821_v56, 0  ;;  %v1089_v56 = vshll.u32 %v9414_v59, 16 }
 0x346   : > { %1450 = vrot.lane.b32.xlu1 %v1210_v51, %s6794_s30  ;;  %1320 = vrot.lane.b32.xlu0 %v9395_v52, %s6804_s20  ;;  %v2539_v51 = vor.u32 %v2538_v48, %v2537_v32  ;;  %13968 = vst [vmem:[#allocation269_spill] sm:$0xff] %v9420_v20  ;;  %v9436_v5 = vsel %vm1174_vm3, %v2401_v34, %v9420_v20  ;;  %v1218_v34 = vrot.slane %v9444_v31, 1  ;;  %v1215_v54 = vrot.slane %v913_v42, 1 }
 0x348   : > { %v9404_v19 = vpop.permute.xlu1 %1442  ;;  %v9406_v53 = vpop.permute.xlu0 %2698  ;;  %v9430_v39 = vsel %vm2437_vm7, %v2539_v51, %v2544_v30  ;;  %v9450_v51 = vsel %vm6856_vm2, 0, %v824_v6  ;;  %v1217_v30 = vrot.slane %v9414_v59, 1  ;;  %v9465_v6 = vshrl.u32 %v9350_v21, 16 }
 0x349   : > { %13966 = vst [vmem:[#allocation135_spill] sm:$0xff] %v9406_v53  ;;  %13970 = vst [vmem:[#allocation271_spill] sm:$0xff] %v9430_v39 }
 0x34a   : > { %2324 = vrot.lane.b32.xlu1 %v9409_v60, %s6798_s15  ;;  %1392 = vrot.lane.b32.xlu0 %v9414_v59, %s6790_s23  ;;  %13973 = vst [vmem:[#allocation274_spill] sm:$0xff] %v9450_v51  ;;  %13976 = vst [vmem:[#allocation277_spill] sm:$0xff] %v9465_v6  ;;  %v9470_v20 = vsel %vm1174_vm3, %v1217_v30, %v1218_v34  ;;  %v9490_v21 = vrot.slane %v9465_v6, 1  ;;  %v13982_v6 = vld [vmem:[#allocation141_spill] sm:$0xff] }
 0x34b   : > { %v1475_v11 = vsel %vm340_vm8, %v13982_v6, %v9256_v27  ;;  %v1543_v27 = vsel %vm1529_vm10, %v1510_v23, %v9316_v9  ;;  %v2643_v9 = vrot.slane %v8699_v47, 2  ;;  %v1094_v23 = vshll.u32 %v9444_v31, 16 }
 0x34c   : > { %v9425_v32 = vpop.permute.xlu1 %2316  ;;  %v9427_v48 = vpop.permute.xlu0 %1412  ;;  %v1077_v31 = vshll.u32 %v9450_v51, 16 }
 0x34d   : > { %13969 = vst [vmem:[#allocation270_spill] sm:$0xff] %v9425_v32 }
 0x34e   : > { %2595 = vrot.lane.b32.xlu1 %v9430_v39, %s6799_s16  ;;  %2433 = vrot.lane.b32.xlu0 %v9436_v5, %s6792_s27 }
 0x350   : > { %v9440_v44 = vpop.permute.xlu1 %2587  ;;  %v9446_v32 = vpop.permute.xlu0 %2669 }
 0x351   : > { %13971 = vst [vmem:[#allocation272_spill] sm:$0xff] %v9440_v44  ;;  %13972 = vst [vmem:[#allocation273_spill] sm:$0xff] %v9446_v32  ;;  %v2404_v44 = vrot.slane %v8717_v2, 1  ;;  %v13977_v32 = vld [vmem:[#allocation199_spill] sm:$0xff] }
 0x352   : > { %2708 = vrot.lane.b32.xlu1 %v8717_v2, %s6796_s11  ;;  %1280 = vrot.lane.b32.xlu0 %v9450_v51, %s6797_s12  ;;  %v2296_v53 = vrot.slane %v13977_v32, 1  ;;  %v2565_v34 = vrot.slane %v13977_v32, 2  ;;  %13979 = vst [vmem:[#allocation199_spill] sm:$0xff] %v9490_v21 }
 0x353   : > { %v9482_v28 = vsel %vm1174_vm3, %v2404_v44, %v9462_v24  ;;  %v2300_v44 = vrot.slane %v2298_v17, 1 }
 0x354   : > { %v9458_v15 = vpop.permute.xlu1 %2700  ;;  %v1313_v16 = vpop.permute.xlu0 %1312  ;;  %v2297_v30 = vor.u32 %v2296_v53, %v13978_v18 }
 0x355   : > { %13974 = vst [vmem:[#allocation275_spill] sm:$0xff] %v9458_v15  ;;  %v1576_v25 = vsel %vm1562_vm11, %v1543_v27, %v1313_v16  ;;  %v1087_v27 = vshrl.u32 %v9414_v59, 16 }
 0x356   : > { %1322 = vrot.lane.b32.xlu1 %v9344_v43, %s6804_s20  ;;  %1251 = vrot.lane.b32.xlu0 %v9470_v20, %s6791_s26  ;;  %v2564_v43 = vrot.slane %v13978_v18, 1  ;;  %v9504_v53 = vsel %vm917_vm5, %v2297_v30, %v2300_v44  ;;  %v2571_v18 = vor.u32 %v2570_v50, %v9490_v21  ;;  %v1508_v50 = vsel %vm1496_vm9, %v1475_v11, %v9132_v8 }
 0x357   : > { %v1541_v8 = vsel %vm1529_vm10, %v1508_v50, %v9072_v40  ;;  %v1609_v44 = vsel %vm1595_vm12, %v1576_v25, %v9387_v4 }
 0x358   : > { %v9476_v15 = vpop.permute.xlu1 %1126  ;;  %v9478_v2 = vpop.permute.xlu0 %1384  ;;  %v2566_v32 = vor.u32 %v2565_v34, %v2564_v43  ;;  %v1214_v43 = vrot.slane %v9450_v51, 1  ;;  %v1574_v40 = vsel %vm1562_vm11, %v1541_v8, %v9231_v22  ;;  %v1642_v4 = vsel %vm13579_vm13, %v1609_v44, %v9282_v37 }
 0x359   : > { %v1607_v22 = vsel %vm1595_vm12, %v1574_v40, %v9114_v57  ;;  %v1082_v40 = vshll.u32 %v913_v42, 16 }
 0x35a   : > { %2435 = vrot.lane.b32.xlu1 %v9482_v28, %s6792_s27  ;;  %1456 = vrot.lane.b32.xlu0 %v9470_v20, %s6794_s30  ;;  %v9528_v6 = vsel %vm2437_vm7, %v2566_v32, %v2571_v18  ;;  %v2644_v18 = vrot.slane %v9400_v62, 2  ;;  %v1216_v16 = vsel %vm1174_vm3, %v1214_v43, %v1215_v54  ;;  %v1091_v32 = vrot.slane %v1089_v56, 1  ;;  %v13985_v56 = vld [vmem:[#allocation183_spill] sm:$0xff] }
 0x35b   : > { %v1096_v54 = vrot.slane %v1094_v23, 1  ;;  %v1640_v37 = vsel %vm13579_vm13, %v1607_v22, %v9354_v13  ;;  %v1079_v13 = vrot.slane %v1077_v31, 1  ;;  %v1084_v42 = vrot.slane %v1082_v40, 1 }
 0x35c   : > { %v9494_v49 = vpop.permute.xlu1 %1314  ;;  %v9496_v24 = vpop.permute.xlu0 %2425  ;;  %v1092_v43 = vor.u32 %v1091_v32, %v1087_v27  ;;  %v13987_v32 = vld [vmem:[#allocation127_spill] sm:$0xff] }
 0x35d   : > { %13980 = vst [vmem:[#allocation278_spill] sm:$0xff] %v9496_v24  ;;  %v840_v27 = vshrl.u32 %v13987_v32, 16 }
 0x35e   : > { %1132 = vrot.lane.b32.xlu1 %v9395_v52, %s6792_s27  ;;  %2330 = vrot.lane.b32.xlu0 %v9504_v53, %s6798_s15  ;;  %v9579_v57 = vsel %vm917_vm5, %v1092_v43, %v1096_v54  ;;  %v1075_v43 = vshrl.u32 %v9450_v51, 16 }
 0x35f   : > { %v842_v54 = vrot.slane %v840_v27, 7  ;;  %v13992_v27 = vld [vmem:[#allocation200_spill] sm:$0xff] }
 0x360   : > { %v9512_v17 = vpop.permute.xlu1 %2427  ;;  %v9518_v30 = vpop.permute.xlu0 %1272  ;;  %v2556_v24 = vrot.slane %v13992_v27, 2 }
 0x361   : > { %13983 = vst [vmem:[#allocation132_spill] sm:$0xff] %v9512_v17 }
 0x362   : > { %1282 = vrot.lane.b32.xlu1 %v9414_v59, %s6797_s12  ;;  %2601 = vrot.lane.b32.xlu0 %v9528_v6, %s6799_s16 }
 0x364   : > { %v9534_v34 = vpop.permute.xlu1 %1124  ;;  %v9538_v11 = vpop.permute.xlu0 %1243 }
 0x366   : > { %1418 = vrot.lane.b32.xlu1 %v9395_v52, %s6793_s28  ;;  %1360 = vrot.lane.b32.xlu0 %v1216_v16, %s6803_s19  ;;  %v9559_v52 = vsel %vm2603_vm4, %v2643_v9, %v2644_v18  ;;  %v1675_v9 = vsel %vm1661_vm14, %v1642_v4, %v9427_v48 }
 0x367   : > { %13984 = vst [vmem:[#allocation141_spill] sm:$0xff] %v9559_v52  ;;  %v1708_v48 = vsel %vm13555_vm15, %v1675_v9, %v9339_v1  ;;  %v9600_v1 = vshrl.u32 %v9400_v62, 16 }
 0x368   : > { %v9551_v50 = vpop.permute.xlu1 %1274  ;;  %v9556_v25 = vpop.permute.xlu0 %1448 }
 0x36a   : > { %2675 = vrot.lane.b32.xlu1 %v9559_v52, %s6791_s26  ;;  %2710 = vrot.lane.b32.xlu0 %v13985_v56, %s6796_s11 }
 0x36c   : > { %v1411_v8 = vpop.permute.xlu1 %1410  ;;  %v9573_v44 = vpop.permute.xlu0 %2322 }
 0x36d   : > { %v1673_v18 = vsel %vm1661_vm14, %v1640_v37, %v1411_v8  ;;  %13986 = vst [vmem:[#allocation279_spill] sm:$0xff] %v9573_v44  ;;  %v1080_v37 = vor.u32 %v1079_v13, %v1075_v43  ;;  %v843_v8 = vshll.u32 %v13987_v32, 16  ;;  %v9619_v43 = vrot.slane %v9600_v1, 1 }
 0x36e   : > { %1390 = vrot.lane.b32.xlu1 %v9450_v51, %s6790_s23  ;;  %v1706_v23 = vsel %vm13555_vm15, %v1673_v18, %v9404_v19  ;;  %1138 = vrot.lane.b32.xlu0 %v9579_v57, %s6792_s27  ;;  %v13990_v19 = vld [vmem:[#allocation137_spill] sm:$0xff] }
 0x36f   : > { %6538 = vmatmul.mubr.msk.bf16.gmra.mrb[8].mxu1 %vm1742_vm1, %v1706_v23  ;;  %v833_v31 = vshrl.u32 %v13990_v19, 16  ;;  %13991 = vst [vmem:[#allocation137_spill] sm:$0xff] %v9600_v1  ;;  %v2286_v23 = vrot.slane %v13992_v27, 1  ;;  %v845_v21 = vor.u32 %v843_v8, %v842_v54  ;;  %v9611_v13 = vsel %vm917_vm5, %v1080_v37, %v1084_v42  ;;  %13993 = vst [vmem:[#allocation200_spill] sm:$0xff] %v9619_v43 }
 0x370   : > { %6541 = vmatprep.mubr.msk.bf16.mxu1 %vm1742_vm1, %v1708_v48  ;;  %v9589_v4 = vpop.permute.xlu1 %2667  ;;  %v9592_v22 = vpop.permute.xlu0 %2593  ;;  %v2288_v48 = vshll.u32 %v9400_v62, 16  ;;  %v836_v32 = vshll.u32 %v13990_v19, 16  ;;  %v13995_v62 = vld [vmem:[#allocation195_spill] sm:$0xff] }
 0x371   : > { %13988 = vst [vmem:[#allocation127_spill] sm:$0xff] %v9589_v4  ;;  %13989 = vst [vmem:[#allocation280_spill] sm:$0xff] %v9592_v22  ;;  %v2287_v8 = vor.u32 %v2286_v23, %v13995_v62  ;;  %v899_v19 = vsel %vm6856_vm2, 0, %v845_v21 }
 0x372   : > { %1362 = vrot.lane.b32.xlu1 %v9470_v20, %s6803_s19  ;;  %1424 = vrot.lane.b32.xlu0 %v9579_v57, %s6793_s28  ;;  %v835_v20 = vrot.slane %v833_v31, 7  ;;  %v2555_v31 = vrot.slane %v13995_v62, 1  ;;  %v2561_v37 = vrot.slane %v2288_v48, 2  ;;  %v2290_v22 = vrot.slane %v2288_v48, 1 }
 0x373   : > { %v1333_v21 = vrot.slane %v899_v19, 1  ;;  %v1291_v48 = vshll.u32 %v899_v19, 16 }
 0x374   : > { %v9603_v9 = vpop.permute.xlu1 %1382  ;;  %v9605_v18 = vpop.permute.xlu0 %1352  ;;  %v838_v42 = vor.u32 %v836_v32, %v835_v20  ;;  %v9637_v62 = vsel %vm917_vm5, %v2287_v8, %v2290_v22  ;;  %v2557_v27 = vor.u32 %v2556_v24, %v2555_v31  ;;  %v2562_v32 = vor.u32 %v2561_v37, %v9619_v43 }
 0x375   : > { %v915_v24 = vsel %vm6856_vm2, %v835_v20, 0 }
 0x376   : > { %1249 = vrot.lane.b32.xlu1 %v1216_v16, %s6791_s26  ;;  %1324 = vrot.lane.b32.xlu0 %v9611_v13, %s6804_s20  ;;  %v9655_v8 = vsel %vm2437_vm7, %v2557_v27, %v2562_v32  ;;  %v1221_v26 = vrot.slane %v915_v24, 1 }
 0x377   : > { %13997 = vst [vmem:[#allocation283_spill] sm:$0xff] %v9655_v8 }
 0x378   : > { %v9616_v40 = vpop.permute.xlu1 %1354  ;;  %v9621_v4 = vpop.permute.xlu0 %2702 }
 0x379   : > { %13994 = vst [vmem:[#allocation281_spill] sm:$0xff] %v9621_v4  ;;  %v916_v4 = vsel %vm6856_vm2, %v842_v54, 0 }
 0x37a   : > { %1454 = vrot.lane.b32.xlu1 %v1216_v16, %s6794_s30  ;;  %1396 = vrot.lane.b32.xlu0 %v899_v19, %s6790_s23  ;;  %v9642_v16 = vsel %vm6856_vm2, 0, %v838_v42  ;;  %v1334_v54 = vrot.slane %v916_v4, 1  ;;  %v1293_v42 = vrot.slane %v1291_v48, 1  ;;  %v1296_v44 = vshll.u32 %v916_v4, 16 }
 0x37b   : > { %v1220_v37 = vrot.slane %v9642_v16, 1  ;;  %v1101_v43 = vshll.u32 %v9642_v16, 16  ;;  %v1099_v4 = vshrl.u32 %v9642_v16, 16  ;;  %vm3085_vm2 = vcmask 15360  }
 0x37c   : > { %v9630_v1 = vpop.permute.xlu1 %1241  ;;  %v9634_v23 = vpop.permute.xlu0 %1416  ;;  %v1335_v31 = vsel %vm1174_vm3, %v1333_v21, %v1334_v54  ;;  %v1298_v48 = vrot.slane %v1296_v44, 1  ;;  %v1106_v54 = vshll.u32 %v915_v24, 16 }
 0x37d   : > { %v1222_v27 = vsel %vm1174_vm3, %v1220_v37, %v1221_v26  ;;  %v1103_v21 = vrot.slane %v1101_v43, 1  ;;  %v14002_v26 = vld [vmem:[#allocation96_spill] sm:$0xff] }
 0x37e   : > { %2328 = vrot.lane.b32.xlu1 %v9637_v62, %s6798_s15  ;;  %1284 = vrot.lane.b32.xlu0 %v9642_v16, %s6797_s12 }
 0x380   : > { %v9648_v17 = vpop.permute.xlu1 %1446  ;;  %v9652_v22 = vpop.permute.xlu0 %2673 }
 0x381   : > { %13996 = vst [vmem:[#allocation282_spill] sm:$0xff] %v9652_v22  ;;  %v1289_v22 = vshrl.u32 %v899_v19, 16 }
 0x382   : > { %2599 = vrot.lane.b32.xlu1 %v9655_v8, %s6799_s16  ;;  %1460 = vrot.lane.b32.xlu0 %v1335_v31, %s6794_s30 }
 0x383   : > { %v1294_v32 = vor.u32 %v1293_v42, %v1289_v22  ;;  %v1108_v22 = vrot.slane %v1106_v54, 1  ;;  %v1479_v54 = vsel %vm340_vm8, %v8637_v0, %v9534_v34  ;;  %v14006_v34 = vld [vmem:[#allocation157_spill] sm:$0xff] }
 0x384   : > { %v9663_v20 = vpop.permute.xlu1 %2320  ;;  %v1317_v47 = vpop.permute.xlu0 %1316 }
 0x385   : > { %13998 = vst [vmem:[#allocation284_spill] sm:$0xff] %v9663_v20  ;;  %v1299_v20 = vsel %vm917_vm5, %v1294_v32, %v1298_v48 }
 0x386   : > { %1326 = vrot.lane.b32.xlu1 %v9579_v57, %s6804_s20  ;;  %1364 = vrot.lane.b32.xlu0 %v1222_v27, %s6803_s19  ;;  %v1104_v57 = vor.u32 %v1103_v21, %v1099_v4 }
 0x388   : > { %v9669_v51 = vpop.permute.xlu1 %2591  ;;  %v9672_v59 = vpop.permute.xlu0 %1388  ;;  %v1109_v44 = vsel %vm917_vm5, %v1104_v57, %v1108_v22 }
 0x389   : > { %13999 = vst [vmem:[#allocation285_spill] sm:$0xff] %v9669_v51 }
 0x38a   : > { %1136 = vrot.lane.b32.xlu1 %v9611_v13, %s6792_s27  ;;  %1428 = vrot.lane.b32.xlu0 %v1299_v20, %s6793_s28 }
 0x38c   : > { %v9678_v43 = vpop.permute.xlu1 %2704  ;;  %v9680_v37 = vpop.permute.xlu0 %2429 }
 0x38d   : > { %14000 = vst [vmem:[#allocation286_spill] sm:$0xff] %v9678_v43  ;;  %14001 = vst [vmem:[#allocation287_spill] sm:$0xff] %v9680_v37 }
 0x38e   : > { %1286 = vrot.lane.b32.xlu1 %v899_v19, %s6797_s12  ;;  %1328 = vrot.lane.b32.xlu0 %v1109_v44, %s6804_s20  ;;  %v14003_v19 = vld [vmem:[#allocation3_spill] sm:$0xff] }
 0x38f   : > { %v1481_v48 = vsel %vm340_vm8, %v14003_v19, %v9476_v15  ;;  %v1512_v19 = vsel %vm1496_vm9, %v1479_v54, %v9382_v14 }
 0x390   : > { %v9685_v24 = vpop.permute.xlu1 %1130  ;;  %v9687_v42 = vpop.permute.xlu0 %1276  ;;  %v1514_v57 = vsel %vm1496_vm9, %v1481_v48, %v9328_v29  ;;  %v1545_v29 = vsel %vm1529_vm10, %v1512_v19, %v9325_v58 }
 0x391   : > { %v1547_v15 = vsel %vm1529_vm10, %v1514_v57, %v9518_v30 }
 0x392   : > { %1422 = vrot.lane.b32.xlu1 %v9611_v13, %s6793_s28  ;;  %2724 = vrot.lane.b32.xlu0 %v14002_v26, %s6797_s12  ;;  %v14004_v13 = vld [vmem:[#allocation119_spill] sm:$0xff]  ;;  %v1580_v0 = vsel %vm1562_vm11, %v1547_v15, %v1317_v47  ;;  %v1578_v47 = vsel %vm1562_vm11, %v1545_v29, %v9494_v49  ;;  %v14009_v15 = vld [vmem:[#allocation138_spill] sm:$0xff] }
 0x393   : > { %v1613_v30 = vsel %vm1595_vm12, %v1580_v0, %v9605_v18  ;;  %v1611_v58 = vsel %vm1595_vm12, %v1578_v47, %v9368_v41  ;;  %v14010_v19 = vrot.slane %v14009_v15, 7  ;;  %v14012_v29 = vld [vmem:[#allocation202_spill] sm:$0xff] }
 0x394   : > { %v9693_v32 = vpop.permute.xlu1 %1318  ;;  %v9695_v21 = vpop.permute.xlu0 %1247  ;;  %v1644_v18 = vsel %vm13579_vm13, %v1611_v58, %v9603_v9  ;;  %v2716_v9 = vrot.slane %v14012_v29, 1 }
 0x396   : > { %1394 = vrot.lane.b32.xlu1 %v9642_v16, %s6790_s23  ;;  %2728 = vrot.lane.b32.xlu0 %v14004_v13, %s6797_s12 }
 0x398   : > { %v9707_v4 = vpop.permute.xlu1 %2431  ;;  %v9711_v22 = vpop.permute.xlu0 %1452 }
 0x399   : > { %14005 = vst [vmem:[#allocation96_spill] sm:$0xff] %v9707_v4 }
 0x39a   : > { %1366 = vrot.lane.b32.xlu1 %v1335_v31, %s6803_s19  ;;  %2732 = vrot.lane.b32.xlu0 %v14006_v34, %s6797_s12  ;;  %v1646_v31 = vsel %vm13579_vm13, %v1613_v30, %v9478_v2  ;;  %v9752_v2 = vsel %vm880_vm0, %v14010_v19, 0 }
 0x39b   : > { %v1679_v49 = vsel %vm1661_vm14, %v1646_v31, %v9634_v23  ;;  %14011 = vst [vmem:[#allocation157_spill] sm:$0xff] %v9752_v2  ;;  %v13493_v47 = vshll.u32 %v9752_v2, 16 }
 0x39c   : > { %v9721_v43 = vpop.permute.xlu1 %1128  ;;  %v9725_v48 = vpop.permute.xlu0 %2326  ;;  %v1712_v23 = vsel %vm13555_vm15, %v1679_v49, %v9556_v25  ;;  %v5414_v49 = vld [vmem:[%s13057_s4] sm:$0x3] }
 0x39d   : > { %14007 = vst [vmem:[#allocation3_spill] sm:$0xff] %v9725_v48  ;;  %v2720_v25 = vrot.slane %v13493_v47, 1  ;;  %6638 = vmatprep.subr.msk.bf16.mxu1 %vm389_vm6, %v5414_v49  ;;  %v5464_v15 = vsel %vm389_vm6, %v5414_v49, 0  ;;  %v14022_v47 = vld [vmem:[#allocation152_spill] sm:$0xff]  ;;  %vm3207_vm6 = vcmask 80896  }
 0x39e   : > { %1253 = vrot.lane.b32.xlu1 %v1222_v27, %s6791_s26  ;;  %2736 = vrot.lane.b32.xlu0 %v8910_v10, %s6797_s12 }
 0x39f   : > { %6602 = vmatpush3.bf16.msra.mxu1 %v5464_v15 }
 0x3a0   : > { %v9734_v14 = vpop.permute.xlu1 %1278  ;;  %v9738_v54 = vpop.permute.xlu0 %2597 }
 0x3a1   : > { %14008 = vst [vmem:[#allocation119_spill] sm:$0xff] %v9738_v54 }
 0x3a2   : > { %1458 = vrot.lane.b32.xlu1 %v1222_v27, %s6794_s30  ;;  %2740 = vrot.lane.b32.xlu0 %v9155_v46, %s6797_s12 }
 0x3a4   : > { %v1415_v57 = vpop.permute.xlu1 %1414  ;;  %v9755_v0 = vpop.permute.xlu0 %1356 }
 0x3a5   : > { %v1677_v27 = vsel %vm1661_vm14, %v1644_v18, %v1415_v57 }
 0x3a6   : > { %1330 = vrot.lane.b32.xlu1 %v1299_v20, %s6804_s20  ;;  %v1710_v41 = vsel %vm13555_vm15, %v1677_v27, %v9648_v17  ;;  %2744 = vrot.lane.b32.xlu0 %v9409_v60, %s6797_s12  ;;  %v14015_v17 = vld [vmem:[#allocation196_spill] sm:$0xff] }
 0x3a7   : > { %6542 = vmatmul.mubr.msk.bf16.gmra.mrb[12].mxu1 %vm1742_vm1, %v1710_v41  ;;  %v2717_v31 = vor.u32 %v2716_v9, %v14015_v17  ;;  %v14018_v41 = vld [vmem:[#allocation95_spill] sm:$0xff] }
 0x3a8   : > { %6545 = vmatprep.mubr.msk.bf16.mxu1 %vm1742_vm1, %v1712_v23  ;;  %v9767_v30 = vpop.permute.xlu1 %2671  ;;  %v9770_v20 = vpop.permute.xlu0 %2706 }
 0x3a9   : > { %14013 = vst [vmem:[#allocation138_spill] sm:$0xff] %v9767_v30  ;;  %14014 = vst [vmem:[#allocation202_spill] sm:$0xff] %v9770_v20  ;;  %v9784_v57 = vsel %vm917_vm5, %v2717_v31, %v2720_v25  ;;  %v14020_v31 = vld [vmem:[#allocation120_spill] sm:$0xff]  ;;  %v14021_v25 = vld [vmem:[#allocation110_spill] sm:$0xff] }
 0x3aa   : > { %1140 = vrot.lane.b32.xlu1 %v1109_v44, %s6792_s27  ;;  %2748 = vrot.lane.b32.xlu0 %v9637_v62, %s6797_s12  ;;  %14016 = vst [vmem:[#allocation288_spill] sm:$0xff] %v9784_v57  ;;  %v14023_v30 = vld [vmem:[#allocation136_spill] sm:$0xff]  ;;  %v14026_v20 = vld [vmem:[#allocation175_spill] sm:$0xff] }
 0x3ac   : > { %v9776_v58 = vpop.permute.xlu1 %1386  ;;  %v9780_v18 = vpop.permute.xlu0 %1134 }
 0x3ae   : > { %1426 = vrot.lane.b32.xlu1 %v1109_v44, %s6793_s28  ;;  %2752 = vrot.lane.b32.xlu0 %v9784_v57, %s6797_s12  ;;  %v14017_v44 = vld [vmem:[#allocation99_spill] sm:$0xff]  ;;  %v14036_v57 = vld [vmem:[#allocation8_spill] sm:$0xff] }
 0x3b0   : > { %v9793_v19 = vpop.permute.xlu1 %1358  ;;  %v1421_v27 = vpop.permute.xlu0 %1420 }
 0x3b2   : > { %2726 = vrot.lane.b32.xlu1 %v14017_v44, %s6797_s12  ;;  %2760 = vrot.lane.b32.xlu0 %v14018_v41, %s6805_s14 }
 0x3b4   : > { %v9799_v9 = vpop.permute.xlu1 %1245  ;;  %v9801_v23 = vpop.permute.xlu0 %2677 }
 0x3b5   : > { %14019 = vst [vmem:[#allocation99_spill] sm:$0xff] %v9801_v23  ;;  %v14025_v23 = vld [vmem:[#allocation189_spill] sm:$0xff] }
 0x3b6   : > { %2730 = vrot.lane.b32.xlu1 %v14020_v31, %s6797_s12  ;;  %2764 = vrot.lane.b32.xlu0 %v14021_v25, %s6805_s14 }
 0x3b8   : > { %v1451_v49 = vpop.permute.xlu1 %1450  ;;  %v1321_v15 = vpop.permute.xlu0 %1320 }
 0x3ba   : > { %2734 = vrot.lane.b32.xlu1 %v14022_v47, %s6797_s12  ;;  %2768 = vrot.lane.b32.xlu0 %v14023_v30, %s6805_s14 }
 0x3bc   : > { %v9811_v37 = vpop.permute.xlu1 %2324  ;;  %v9813_v51 = vpop.permute.xlu0 %1392 }
 0x3bd   : > { %14024 = vst [vmem:[#allocation120_spill] sm:$0xff] %v9811_v37 }
 0x3be   : > { %2738 = vrot.lane.b32.xlu1 %v14025_v23, %s6797_s12  ;;  %2772 = vrot.lane.b32.xlu0 %v14026_v20, %s6805_s14 }
 0x3c0   : > { %v9819_v54 = vpop.permute.xlu1 %2595  ;;  %v9821_v4 = vpop.permute.xlu0 %2433 }
 0x3c1   : > { %14027 = vst [vmem:[#allocation152_spill] sm:$0xff] %v9819_v54  ;;  %14028 = vst [vmem:[#allocation189_spill] sm:$0xff] %v9821_v4  ;;  %v1485_v4 = vsel %vm340_vm8, %v8959_v63, %v9685_v24  ;;  %v1483_v63 = vsel %vm340_vm8, %v9010_v45, %v9721_v43 }
 0x3c2   : > { %2742 = vrot.lane.b32.xlu1 %v9067_v55, %s6797_s12  ;;  %2776 = vrot.lane.b32.xlu0 %v8988_v7, %s6805_s14  ;;  %v1516_v41 = vsel %vm1496_vm9, %v1483_v63, %v9630_v1  ;;  %v14042_v63 = vld [vmem:[#allocation121_spill] sm:$0xff] }
 0x3c4   : > { %v9827_v48 = vpop.permute.xlu1 %2708  ;;  %v9829_v37 = vpop.permute.xlu0 %1280 }
 0x3c5   : > { %14029 = vst [vmem:[#allocation289_spill] sm:$0xff] %v9827_v48 }
 0x3c6   : > { %v9831_v30 = vpop.f32.mrb[0].mxu1  ;;  %2746 = vrot.lane.b32.xlu1 %v9287_v38, %s6797_s12  ;;  %2780 = vrot.lane.b32.xlu0 %v9201_v36, %s6805_s14  ;;  %v9854_v36 = vrot.slane %v9752_v2, 1 }
 0x3c7   : > { %14030 = vst [vmem:[#allocation290_spill] sm:$0xff] %v9831_v30  ;;  %v9837_v54 = vpop.f32.mrb[1].mxu1  ;;  %v2755_v30 = vrot.slane %v13985_v56, 1 }
 0x3c8   : > { %14031 = vst [vmem:[#allocation291_spill] sm:$0xff] %v9837_v54  ;;  %v9842_v20 = vpop.f32.mrb[2].mxu1  ;;  %v9844_v7 = vpop.permute.xlu1 %1322  ;;  %14034 = vst [vmem:[#allocation294_spill] sm:$0xff] %v9854_v36  ;;  %v1518_v54 = vsel %vm1496_vm9, %v1485_v4, %v9538_v11  ;;  %v1549_v4 = vsel %vm1529_vm10, %v1516_v41, %v9551_v50  ;;  %v14041_v41 = vld [vmem:[#allocation104_spill] sm:$0xff] }
 0x3c9   : > { %14032 = vst [vmem:[#allocation292_spill] sm:$0xff] %v9842_v20  ;;  %v9846_v48 = vpop.permute.xlu0 %1251  ;;  %v9848_v25 = vpop.f32.mrb[3].mxu1  ;;  %v1551_v20 = vsel %vm1529_vm10, %v1518_v54, %v9687_v42  ;;  %v9875_v11 = vsel %vm1174_vm3, %v2755_v30, %v9854_v36  ;;  %v14038_v54 = vld [vmem:[#allocation93_spill] sm:$0xff]  ;;  %v14039_v30 = vld [vmem:[#allocation98_spill] sm:$0xff] }
 0x3ca   : > { %14033 = vst [vmem:[#allocation293_spill] sm:$0xff] %v9848_v25  ;;  %2750 = vrot.lane.b32.xlu1 %v9504_v53, %s6797_s12  ;;  %2784 = vrot.lane.b32.xlu0 %v9436_v5, %s6805_s14  ;;  %v1584_v45 = vsel %vm1562_vm11, %v1551_v20, %v1321_v15  ;;  %v1582_v20 = vsel %vm1562_vm11, %v1549_v4, %v9693_v32 }
 0x3cb   : > { %v1617_v1 = vsel %vm1595_vm12, %v1584_v45, %v9755_v0  ;;  %v1615_v0 = vsel %vm1595_vm12, %v1582_v20, %v9616_v40  ;;  %v14047_v20 = vld [vmem:[#allocation177_spill] sm:$0xff] }
 0x3cc   : > { %v9863_v24 = vpop.permute.xlu1 %2435  ;;  %v1650_v15 = vsel %vm13579_vm13, %v1617_v1, %v9672_v59  ;;  %v1648_v45 = vsel %vm13579_vm13, %v1615_v0, %v9776_v58  ;;  %v14043_v1 = vld [vmem:[#allocation131_spill] sm:$0xff]  ;;  %v2790_v0 = vrot.slane %v14015_v17, 1 }
 0x3cd   : > { %14035 = vst [vmem:[#allocation295_spill] sm:$0xff] %v9863_v24  ;;  %v9865_v25 = vpop.permute.xlu0 %1456  ;;  %v1683_v4 = vsel %vm1661_vm14, %v1650_v15, %v1421_v27  ;;  %v14044_v24 = vld [vmem:[#allocation158_spill] sm:$0xff]  ;;  %v9928_v15 = vshrl.u32 %v9752_v2, 16 }
 0x3ce   : > { %6770 = vrot.lane.b32.xlu1 %v14036_v57, %s6805_s14  ;;  %2788 = vrot.lane.b32.xlu0 %v9875_v11, %s6805_s14  ;;  %v1716_v40 = vsel %vm13555_vm15, %v1683_v4, %v9711_v22  ;;  %v14050_v4 = vshll.u32 %v9752_v2, 16 }
 0x3cf   : > { %14048 = vst [vmem:[#allocation177_spill] sm:$0xff] %v9928_v15 }
 0x3d0   : > { %v1133_v43 = vpop.permute.xlu1 %1132 }
 0x3d1   : > { %v9882_v42 = vpop.permute.xlu0 %2330 }
 0x3d2   : > { %14037 = vst [vmem:[#allocation8_spill] sm:$0xff] %v9882_v42  ;;  %2762 = vrot.lane.b32.xlu1 %v14038_v54, %s6805_s14  ;;  %2801 = vrot.lane.b32.xlu0 %v14039_v30, %s6804_s20  ;;  %v14072_v30 = vld [vmem:[#allocation261_spill] sm:$0xff] }
 0x3d4   : > { %v9892_v57 = vpop.permute.xlu1 %1282 }
 0x3d5   : > { %v9896_v50 = vpop.permute.xlu0 %2601 }
 0x3d6   : > { %14040 = vst [vmem:[#allocation93_spill] sm:$0xff] %v9896_v50  ;;  %2766 = vrot.lane.b32.xlu1 %v14041_v41, %s6805_s14  ;;  %2805 = vrot.lane.b32.xlu0 %v14042_v63, %s6804_s20 }
 0x3d8   : > { %v1419_v32 = vpop.permute.xlu1 %1418 }
 0x3d9   : > { %v1681_v36 = vsel %vm1661_vm14, %v1648_v45, %v1419_v32  ;;  %v1361_v59 = vpop.permute.xlu0 %1360  ;;  %v2791_v45 = vrot.slane %v14012_v29, 2  ;;  %v9941_v32 = vrot.slane %v9928_v15, 1 }
 0x3da   : > { %2770 = vrot.lane.b32.xlu1 %v14043_v1, %s6805_s14  ;;  %v1714_v50 = vsel %vm13555_vm15, %v1681_v36, %v1451_v49  ;;  %2809 = vrot.lane.b32.xlu0 %v14044_v24, %s6804_s20 }
 0x3db   : > { %6546 = vmatmul.mubr.msk.bf16.gmra.mrb[16].mxu1 %vm1742_vm1, %v1714_v50  ;;  %14049 = vst [vmem:[#allocation296_spill] sm:$0xff] %v9941_v32  ;;  %v2792_v42 = vor.u32 %v2791_v45, %v2790_v0  ;;  %v14054_v45 = vld [vmem:[#allocation100_spill] sm:$0xff] }
 0x3dc   : > { %6549 = vmatprep.mubr.msk.bf16.mxu1 %vm1742_vm1, %v1716_v40  ;;  %v9917_v58 = vpop.permute.xlu1 %2675  ;;  %v2796_v40 = vrot.slane %v14050_v4, 2  ;;  %v14051_v4 = vld [vmem:[#allocation14_spill] sm:$0xff] }
 0x3dd   : > { %14045 = vst [vmem:[#allocation104_spill] sm:$0xff] %v9917_v58  ;;  %v9919_v27 = vpop.permute.xlu0 %2710 }
 0x3de   : > { %14046 = vst [vmem:[#allocation131_spill] sm:$0xff] %v9919_v27  ;;  %2774 = vrot.lane.b32.xlu1 %v14047_v20, %s6805_s14  ;;  %2813 = vrot.lane.b32.xlu0 %v8925_v61, %s6804_s20  ;;  %v2797_v17 = vor.u32 %v2796_v40, %v9941_v32  ;;  %v14055_v40 = vld [vmem:[#allocation2_spill] sm:$0xff] }
 0x3e0   : > { %v1391_v36 = vpop.permute.xlu1 %1390 }
 0x3e1   : > { %v9925_v49 = vpop.permute.xlu0 %1138 }
 0x3e2   : > { %2778 = vrot.lane.b32.xlu1 %v9006_v3, %s6805_s14  ;;  %2817 = vrot.lane.b32.xlu0 %v9174_v35, %s6804_s20 }
 0x3e4   : > { %v9934_v22 = vpop.permute.xlu1 %1362 }
 0x3e5   : > { %v1425_v50 = vpop.permute.xlu0 %1424 }
 0x3e6   : > { %2782 = vrot.lane.b32.xlu1 %v9264_v33, %s6805_s14  ;;  %2821 = vrot.lane.b32.xlu0 %v9430_v39, %s6804_s20  ;;  %v9959_v39 = vsel %vm2437_vm7, %v2792_v42, %v2797_v17  ;;  %v1489_v17 = vsel %vm340_vm8, %v9178_v12, %v9780_v18  ;;  %v14057_v42 = vld [vmem:[#allocation122_spill] sm:$0xff]  ;;  %v14060_v18 = vld [vmem:[#allocation156_spill] sm:$0xff] }
 0x3e7   : > { %14052 = vst [vmem:[#allocation14_spill] sm:$0xff] %v9959_v39 }
 0x3e8   : > { %v9947_v58 = vpop.permute.xlu1 %1249 }
 0x3e9   : > { %v1325_v27 = vpop.permute.xlu0 %1324 }
 0x3ea   : > { %2786 = vrot.lane.b32.xlu1 %v9482_v28, %s6805_s14  ;;  %2825 = vrot.lane.b32.xlu0 %v9655_v8, %s6804_s20  ;;  %v14059_v8 = vld [vmem:[#allocation108_spill] sm:$0xff] }
 0x3ec   : > { %v1455_v29 = vpop.permute.xlu1 %1454 }
 0x3ed   : > { %v9954_v15 = vpop.permute.xlu0 %1396 }
 0x3ee   : > { %2799 = vrot.lane.b32.xlu1 %v14051_v4, %s6804_s20  ;;  %2829 = vrot.lane.b32.xlu0 %v9959_v39, %s6804_s20 }
 0x3f0   : > { %v9963_v35 = vpop.permute.xlu1 %2328 }
 0x3f1   : > { %14053 = vst [vmem:[#allocation297_spill] sm:$0xff] %v9963_v35  ;;  %v9965_v0 = vpop.permute.xlu0 %1284  ;;  %v14058_v35 = vld [vmem:[#allocation251_spill] sm:$0xff] }
 0x3f2   : > { %2803 = vrot.lane.b32.xlu1 %v14054_v45, %s6804_s20  ;;  %2836 = vrot.lane.b32.xlu0 %v14055_v40, %s6806_s17  ;;  %v1487_v39 = vsel %vm340_vm8, %v14058_v35, %v1133_v43  ;;  %v14061_v43 = vld [vmem:[#allocation139_spill] sm:$0xff] }
 0x3f3   : > { %v1520_v12 = vsel %vm1496_vm9, %v1487_v39, %v9799_v9  ;;  %v14063_v39 = vld [vmem:[#allocation214_spill] sm:$0xff]  ;;  %v14064_v9 = vld [vmem:[#allocation188_spill] sm:$0xff] }
 0x3f4   : > { %v9971_v32 = vpop.permute.xlu1 %2599 }
 0x3f5   : > { %14056 = vst [vmem:[#allocation100_spill] sm:$0xff] %v9971_v32  ;;  %v9973_v4 = vpop.permute.xlu0 %1460  ;;  %v1522_v32 = vsel %vm1496_vm9, %v1489_v17, %v9695_v21  ;;  %v1553_v21 = vsel %vm1529_vm10, %v1520_v12, %v9734_v14 }
 0x3f6   : > { %2807 = vrot.lane.b32.xlu1 %v14057_v42, %s6804_s20  ;;  %2840 = vrot.lane.b32.xlu0 %v14059_v8, %s6806_s17  ;;  %v1555_v24 = vsel %vm1529_vm10, %v1522_v32, %v9829_v37 }
 0x3f7   : > { %v1588_v35 = vsel %vm1562_vm11, %v1555_v24, %v1325_v27  ;;  %v1586_v27 = vsel %vm1562_vm11, %v1553_v21, %v9844_v7 }
 0x3f8   : > { %v9984_v61 = vpop.permute.xlu1 %1326  ;;  %v1621_v63 = vsel %vm1595_vm12, %v1588_v35, %v1361_v59 }
 0x3f9   : > { %v9988_v40 = vpop.permute.xlu0 %1364  ;;  %v1654_v12 = vsel %vm13579_vm13, %v1621_v63, %v9813_v51  ;;  %v14071_v63 = vld [vmem:[#allocation259_spill] sm:$0xff] }
 0x3fa   : > { %2811 = vrot.lane.b32.xlu1 %v14060_v18, %s6804_s20  ;;  %2844 = vrot.lane.b32.xlu0 %v14061_v43, %s6806_s17 }
 0x3fc   : > { %v1137_v8 = vpop.permute.xlu1 %1136 }
 0x3fd   : > { %v10001_v17 = vpop.permute.xlu0 %1428 }
 0x3fe   : > { %v10004_v37 = vpop.f32.mrb[4].mxu1  ;;  %2815 = vrot.lane.b32.xlu1 %v14063_v39, %s6804_s20  ;;  %2848 = vrot.lane.b32.xlu0 %v14064_v9, %s6806_s17  ;;  %v1619_v9 = vsel %vm1595_vm12, %v1586_v27, %v9793_v19 }
 0x3ff   : > { %14062 = vst [vmem:[#allocation122_spill] sm:$0xff] %v10004_v37  ;;  %v10010_v24 = vpop.f32.mrb[5].mxu1  ;;  %v14068_v37 = vld [vmem:[#allocation237_spill] sm:$0xff]  ;;  %v1652_v7 = vsel %vm13579_vm13, %v1619_v9, %v1391_v36  ;;  %v2831_v9 = vrot.slane %v13985_v56, 2 }
 0x400   : > { %14065 = vst [vmem:[#allocation251_spill] sm:$0xff] %v10010_v24  ;;  %v10014_v32 = vpop.f32.mrb[6].mxu1  ;;  %v1287_v14 = vpop.permute.xlu1 %1286  ;;  %v14069_v24 = vld [vmem:[#allocation236_spill] sm:$0xff] }
 0x401   : > { %14066 = vst [vmem:[#allocation156_spill] sm:$0xff] %v10014_v32  ;;  %v1329_v59 = vpop.permute.xlu0 %1328  ;;  %v10018_v35 = vpop.f32.mrb[7].mxu1  ;;  %v1687_v32 = vsel %vm1661_vm14, %v1654_v12, %v1425_v50 }
 0x402   : > { %14067 = vst [vmem:[#allocation214_spill] sm:$0xff] %v10018_v35  ;;  %2819 = vrot.lane.b32.xlu1 %v14068_v37, %s6804_s20  ;;  %2852 = vrot.lane.b32.xlu0 %v14069_v24, %s6806_s17  ;;  %v1720_v19 = vsel %vm13555_vm15, %v1687_v32, %v9865_v25  ;;  %v14075_v25 = vld [vmem:[#allocation6_spill] sm:$0xff] }
 0x404   : > { %v1423_v21 = vpop.permute.xlu1 %1422 }
 0x405   : > { %v1685_v43 = vsel %vm1661_vm14, %v1652_v7, %v1423_v21  ;;  %v10029_v51 = vpop.permute.xlu0 %2724  ;;  %v14078_v7 = vld [vmem:[#allocation268_spill] sm:$0xff] }
 0x406   : > { %14070 = vst [vmem:[#allocation237_spill] sm:$0xff] %v10029_v51  ;;  %2823 = vrot.lane.b32.xlu1 %v14071_v63, %s6804_s20  ;;  %v1718_v35 = vsel %vm13555_vm15, %v1685_v43, %v1455_v29  ;;  %2856 = vrot.lane.b32.xlu0 %v14072_v30, %s6806_s17  ;;  %v2832_v29 = vrot.slane %v9752_v2, 2  ;;  %v1493_v21 = vsel %vm340_vm8, %v14078_v7, %v9925_v49  ;;  %v14080_v51 = vld [vmem:[#allocation274_spill] sm:$0xff]  ;;  %v14083_v7 = vld [vmem:[#allocation107_spill] sm:$0xff] }
 0x407   : > { %6550 = vmatmul.mubr.msk.bf16.gmra.mrb[20].mxu1 %vm1742_vm1, %v1718_v35 }
 0x408   : > { %6553 = vmatprep.mubr.msk.bf16.mxu1 %vm1742_vm1, %v1720_v19  ;;  %v1395_v36 = vpop.permute.xlu1 %1394  ;;  %v10053_v32 = vsel %vm2603_vm4, %v2831_v9, %v2832_v29  ;;  %v14079_v19 = vld [vmem:[#allocation94_spill] sm:$0xff]  ;;  %v1526_v29 = vsel %vm1496_vm9, %v1493_v21, %v9846_v48 }
 0x409   : > { %v10040_v50 = vpop.permute.xlu0 %2728  ;;  %14076 = vst [vmem:[#allocation6_spill] sm:$0xff] %v10053_v32 }
 0x40a   : > { %14073 = vst [vmem:[#allocation236_spill] sm:$0xff] %v10040_v50  ;;  %2827 = vrot.lane.b32.xlu1 %v9528_v6, %s6804_s20  ;;  %2860 = vrot.lane.b32.xlu0 %v9559_v52, %s6806_s17  ;;  %v14149_v52 = vld [vmem:[#allocation133_spill] sm:$0xff] }
 0x40c   : > { %v1367_v43 = vpop.permute.xlu1 %1366 }
 0x40d   : > { %v10048_v27 = vpop.permute.xlu0 %2732 }
 0x40e   : > { %14074 = vst [vmem:[#allocation259_spill] sm:$0xff] %v10048_v27  ;;  %2834 = vrot.lane.b32.xlu1 %v14075_v25, %s6806_s17  ;;  %2864 = vrot.lane.b32.xlu0 %v10053_v32, %s6806_s17  ;;  %v1491_v27 = vsel %vm340_vm8, %v14080_v51, %v1137_v8  ;;  %v14081_v25 = vld [vmem:[#allocation90_spill] sm:$0xff] }
 0x40f   : > { %v1524_v49 = vsel %vm1496_vm9, %v1491_v27, %v9947_v58  ;;  %v14084_v51 = vld [vmem:[#allocation102_spill] sm:$0xff]  ;;  %v14087_v58 = vld [vmem:[#allocation125_spill] sm:$0xff] }
 0x410   : > { %v1254_v12 = vpop.permute.xlu1 %1253  ;;  %v1557_v48 = vsel %vm1529_vm10, %v1524_v49, %v9892_v57 }
 0x411   : > { %v10057_v35 = vpop.permute.xlu0 %2736 }
 0x412   : > { %14077 = vst [vmem:[#allocation298_spill] sm:$0xff] %v10057_v35  ;;  %2838 = vrot.lane.b32.xlu1 %v14079_v19, %s6806_s17  ;;  %2869 = vrot.lane.b32.xlu0 %v14081_v25, %s6803_s19  ;;  %v1559_v35 = vsel %vm1529_vm10, %v1526_v29, %v9965_v0  ;;  %v14086_v29 = vld [vmem:[#allocation129_spill] sm:$0xff]  ;;  %v14146_v25 = vld [vmem:[#allocation28_spill] sm:$0xff] }
 0x413   : > { %v1592_v8 = vsel %vm1562_vm11, %v1559_v35, %v1329_v59  ;;  %v1590_v59 = vsel %vm1562_vm11, %v1557_v48, %v9984_v61  ;;  %v14090_v61 = vld [vmem:[#allocation162_spill] sm:$0xff] }
 0x414   : > { %v1459_v9 = vpop.permute.xlu1 %1458  ;;  %v1625_v0 = vsel %vm1595_vm12, %v1592_v8, %v9988_v40  ;;  %v14089_v8 = vld [vmem:[#allocation166_spill] sm:$0xff] }
 0x415   : > { %v10070_v50 = vpop.permute.xlu0 %2740  ;;  %v1658_v35 = vsel %vm13579_vm13, %v1625_v0, %v9954_v15 }
 0x416   : > { %14082 = vst [vmem:[#allocation268_spill] sm:$0xff] %v10070_v50  ;;  %2842 = vrot.lane.b32.xlu1 %v14083_v7, %s6806_s17  ;;  %2873 = vrot.lane.b32.xlu0 %v14084_v51, %s6803_s19  ;;  %v1691_v0 = vsel %vm1661_vm14, %v1658_v35, %v10001_v17  ;;  %v14099_v35 = vld [vmem:[#allocation78_spill] sm:$0xff] }
 0x418   : > { %v1331_v2 = vpop.permute.xlu1 %1330 }
 0x419   : > { %v10083_v21 = vpop.permute.xlu0 %2744 }
 0x41a   : > { %14085 = vst [vmem:[#allocation94_spill] sm:$0xff] %v10083_v21  ;;  %2846 = vrot.lane.b32.xlu1 %v14086_v29, %s6806_s17  ;;  %2877 = vrot.lane.b32.xlu0 %v14087_v58, %s6803_s19  ;;  %v1623_v58 = vsel %vm1595_vm12, %v1590_v59, %v9934_v22  ;;  %v14092_v22 = vld [vmem:[#allocation222_spill] sm:$0xff]  ;;  %v14093_v59 = vld [vmem:[#allocation173_spill] sm:$0xff] }
 0x41b   : > { %v1656_v15 = vsel %vm13579_vm13, %v1623_v58, %v1395_v36  ;;  %v14095_v36 = vld [vmem:[#allocation73_spill] sm:$0xff]  ;;  %v14097_v58 = vld [vmem:[#allocation243_spill] sm:$0xff] }
 0x41c   : > { %v1141_v27 = vpop.permute.xlu1 %1140 }
 0x41d   : > { %v1495_v57 = vsel %vm340_vm8, %v9642_v16, %v1141_v27  ;;  %v10097_v49 = vpop.permute.xlu0 %2748 }
 0x41e   : > { %14088 = vst [vmem:[#allocation274_spill] sm:$0xff] %v10097_v49  ;;  %v1528_v40 = vsel %vm1496_vm9, %v1495_v57, %v1254_v12  ;;  %2850 = vrot.lane.b32.xlu1 %v14089_v8, %s6806_s17  ;;  %2881 = vrot.lane.b32.xlu0 %v14090_v61, %s6803_s19 }
 0x41f   : > { %v1561_v51 = vsel %vm1529_vm10, %v1528_v40, %v1287_v14 }
 0x420   : > { %v1594_v48 = vsel %vm1562_vm11, %v1561_v51, %v1331_v2  ;;  %v1427_v16 = vpop.permute.xlu1 %1426  ;;  %v1724_v2 = vsel %vm13555_vm15, %v1691_v0, %v9973_v4 }
 0x421   : > { %v1689_v12 = vsel %vm1661_vm14, %v1656_v15, %v1427_v16  ;;  %v10112_v27 = vpop.permute.xlu0 %2752  ;;  %v1627_v57 = vsel %vm1595_vm12, %v1594_v48, %v1367_v43  ;;  %v14102_v48 = vld [vmem:[#allocation198_spill] sm:$0xff]  ;;  %v14103_v16 = vld [vmem:[#allocation80_spill] sm:$0xff] }
 0x422   : > { %14091 = vst [vmem:[#allocation107_spill] sm:$0xff] %v10112_v27  ;;  %2854 = vrot.lane.b32.xlu1 %v14092_v22, %s6806_s17  ;;  %v1722_v14 = vsel %vm13555_vm15, %v1689_v12, %v1459_v9  ;;  %2885 = vrot.lane.b32.xlu0 %v14093_v59, %s6803_s19  ;;  %v1660_v43 = vsel %vm13579_vm13, %v1627_v57, %v14095_v36  ;;  %v14098_v9 = vld [vmem:[#allocation182_spill] sm:$0xff]  ;;  %v14104_v12 = vld [vmem:[#allocation185_spill] sm:$0xff] }
 0x423   : > { %6554 = vmatmul.mubr.msk.bf16.gmra.mrb[24].mxu1 %vm1742_vm1, %v1722_v14  ;;  %v1693_v40 = vsel %vm1661_vm14, %v1660_v43, %v14099_v35  ;;  %v14105_v57 = vld [vmem:[#allocation38_spill] sm:$0xff]  ;;  %v14106_v14 = vld [vmem:[#allocation37_spill] sm:$0xff]  ;;  %v14110_v35 = vld [vmem:[#allocation92_spill] sm:$0xff] }
 0x424   : > { %6557 = vmatprep.mubr.msk.bf16.mxu1 %vm1742_vm1, %v1724_v2  ;;  %v10124_v17 = vpop.permute.xlu1 %2726  ;;  %v1726_v0 = vsel %vm13555_vm15, %v1693_v40, %v14103_v16  ;;  %v14107_v2 = vpack.c.bf16 %v14105_v57, %v14106_v14  ;;  %v14115_v57 = vld [vmem:[#allocation39_spill] sm:$0xff]  ;;  %v14116_v14 = vld [vmem:[#allocation40_spill] sm:$0xff]  ;;  %vm13574_vm15 = vcmask 211968  }
 0x425   : > { %14094 = vst [vmem:[#allocation129_spill] sm:$0xff] %v10124_v17  ;;  %v10128_v51 = vpop.permute.xlu0 %2760  ;;  %v14118_v17 = vld [vmem:[#allocation42_spill] sm:$0xff] }
 0x426   : > { %14096 = vst [vmem:[#allocation166_spill] sm:$0xff] %v10128_v51  ;;  %2858 = vrot.lane.b32.xlu1 %v14097_v58, %s6806_s17  ;;  %2889 = vrot.lane.b32.xlu0 %v14098_v9, %s6803_s19  ;;  %v14111_v51 = vld [vmem:[#allocation187_spill] sm:$0xff] }
 0x428   : > { %v10136_v15 = vpop.permute.xlu1 %2730 }
 0x429   : > { %14100 = vst [vmem:[#allocation162_spill] sm:$0xff] %v10136_v15  ;;  %v10138_v4 = vpop.permute.xlu0 %2764 }
 0x42a   : > { %14101 = vst [vmem:[#allocation222_spill] sm:$0xff] %v10138_v4  ;;  %2862 = vrot.lane.b32.xlu1 %v14102_v48, %s6806_s17  ;;  %2893 = vrot.lane.b32.xlu0 %v14104_v12, %s6803_s19 }
 0x42b   : > { %6558 = vmatmul.mubr.msk.bf16.gmra.mrb[28].mxu1 %vm1742_vm1, %v1726_v0  ;;  %v14114_v0 = vld [vmem:[#allocation105_spill] sm:$0xff]  ;;  %vm3402_vm1 = vcmask 179200  }
 0x42c   : > { %6603 = vmatprep.mubr.msk.bf16.mxu1 %vm340_vm8, %v14107_v2  ;;  %v10151_v36 = vpop.permute.xlu1 %2734  ;;  %v14117_v2 = vpack.c.bf16 %v14115_v57, %v14116_v14  ;;  %v14126_v14 = vld [vmem:[#allocation164_spill] sm:$0xff] }
 0x42d   : > { %14108 = vst [vmem:[#allocation173_spill] sm:$0xff] %v10151_v36  ;;  %v10153_v43 = vpop.permute.xlu0 %2768 }
 0x42e   : > { %14109 = vst [vmem:[#allocation73_spill] sm:$0xff] %v10153_v43  ;;  %2867 = vrot.lane.b32.xlu1 %v14110_v35, %s6803_s19  ;;  %2897 = vrot.lane.b32.xlu0 %v14111_v51, %s6803_s19  ;;  %v14119_v35 = vld [vmem:[#allocation41_spill] sm:$0xff] }
 0x42f   : > { %v14120_v36 = vpack.c.bf16 %v14118_v17, %v14119_v35  ;;  %v14127_v17 = vld [vmem:[#allocation44_spill] sm:$0xff]  ;;  %v14131_v43 = vld [vmem:[#allocation45_spill] sm:$0xff] }
 0x430   : > { %v10159_v40 = vpop.permute.xlu1 %2738 }
 0x431   : > { %14112 = vst [vmem:[#allocation243_spill] sm:$0xff] %v10159_v40  ;;  %v10161_v16 = vpop.permute.xlu0 %2772 }
 0x432   : > { %14113 = vst [vmem:[#allocation182_spill] sm:$0xff] %v10161_v16  ;;  %2871 = vrot.lane.b32.xlu1 %v14114_v0, %s6803_s19  ;;  %2911 = vrot.lane.b32.xlu0 %v14017_v44, %s6807_s18  ;;  %v14123_v16 = vld [vmem:[#allocation126_spill] sm:$0xff] }
 0x433   : > { %6604 = vmatmul.mubr.msk.bf16.vlgmr.msra.gmra.mrb[32].mxu1 %vm340_vm8, %v14117_v2  ;;  %v14130_v2 = vld [vmem:[#allocation46_spill] sm:$0xff] }
 0x434   : > { %6607 = vmatprep.mubr.msk.bf16.mxu1 %vm340_vm8, %v14120_v36  ;;  %v10175_v40 = vpop.permute.xlu1 %2742  ;;  %v14128_v36 = vld [vmem:[#allocation43_spill] sm:$0xff]  ;;  %v14132_v4 = vpack.c.bf16 %v14130_v2, %v14131_v43  ;;  %v14139_v43 = vld [vmem:[#allocation174_spill] sm:$0xff] }
 0x435   : > { %14121 = vst [vmem:[#allocation78_spill] sm:$0xff] %v10175_v40  ;;  %v10177_v15 = vpop.permute.xlu0 %2776  ;;  %v14129_v35 = vpack.c.bf16 %v14127_v17, %v14128_v36  ;;  %v14135_v40 = vld [vmem:[#allocation170_spill] sm:$0xff]  ;;  %v14142_v2 = vld [vmem:[#allocation47_spill] sm:$0xff] }
 0x436   : > { %14122 = vst [vmem:[#allocation198_spill] sm:$0xff] %v10177_v15  ;;  %2875 = vrot.lane.b32.xlu1 %v14123_v16, %s6803_s19  ;;  %2915 = vrot.lane.b32.xlu0 %v14020_v31, %s6807_s18 }
 0x438   : > { %v10183_v44 = vpop.permute.xlu1 %2746 }
 0x439   : > { %14124 = vst [vmem:[#allocation80_spill] sm:$0xff] %v10183_v44  ;;  %v10185_v57 = vpop.permute.xlu0 %2780 }
 0x43a   : > { %14125 = vst [vmem:[#allocation185_spill] sm:$0xff] %v10185_v57  ;;  %2879 = vrot.lane.b32.xlu1 %v14126_v14, %s6803_s19  ;;  %2919 = vrot.lane.b32.xlu0 %v14022_v47, %s6807_s18 }
 0x43b   : > { %6608 = vmatmul.mubr.msk.bf16.gmra.mrb[36].mxu1 %vm340_vm8, %v14129_v35  ;;  %v14141_v35 = vld [vmem:[#allocation48_spill] sm:$0xff] }
 0x43c   : > { %6611 = vmatprep.mubr.msk.bf16.mxu1 %vm340_vm8, %v14132_v4  ;;  %v10199_v31 = vpop.permute.xlu1 %2750 }
 0x43d   : > { %14133 = vst [vmem:[#allocation38_spill] sm:$0xff] %v10199_v31  ;;  %v10201_v44 = vpop.permute.xlu0 %2784  ;;  %v14143_v31 = vpack.c.bf16 %v14141_v35, %v14142_v2  ;;  %v14155_v35 = vld [vmem:[#allocation204_spill] sm:$0xff] }
 0x43e   : > { %14134 = vst [vmem:[#allocation37_spill] sm:$0xff] %v10201_v44  ;;  %2883 = vrot.lane.b32.xlu1 %v14135_v40, %s6803_s19  ;;  %2923 = vrot.lane.b32.xlu0 %v14025_v23, %s6807_s18  ;;  %v2903_v2 = vrot.slane %v14155_v35, 1 }
 0x440   : > { %v10207_v47 = vpop.permute.xlu1 %6770 }
 0x441   : > { %14136 = vst [vmem:[#allocation39_spill] sm:$0xff] %v10207_v47  ;;  %v10209_v17 = vpop.permute.xlu0 %2788  ;;  %v14145_v47 = vld [vmem:[#allocation30_spill] sm:$0xff] }
 0x442   : > { %14137 = vst [vmem:[#allocation40_spill] sm:$0xff] %v10209_v17  ;;  %v10211_v36 = vpop.f32.mrb[8].mxu1  ;;  %2887 = vrot.lane.b32.xlu1 %v14139_v43, %s6803_s19  ;;  %2927 = vrot.lane.b32.xlu0 %v9067_v55, %s6807_s18  ;;  %v14147_v32 = vpack.c.bf16 %v14145_v47, %v14146_v25  ;;  %v14150_v43 = vrot.slane %v14149_v52, 7  ;;  %v14158_v47 = vld [vmem:[#allocation197_spill] sm:$0xff] }
 0x443   : > { %14138 = vst [vmem:[#allocation42_spill] sm:$0xff] %v10211_v36  ;;  %v10217_v4 = vpop.f32.mrb[9].mxu1  ;;  %6612 = vmatmul.mubr.msk.bf16.gmra.mrb[40].mxu1 %vm340_vm8, %v14143_v31  ;;  %v14154_v31 = vld [vmem:[#allocation181_spill] sm:$0xff] }
 0x444   : > { %14140 = vst [vmem:[#allocation41_spill] sm:$0xff] %v10217_v4  ;;  %v10223_v23 = vpop.f32.mrb[10].mxu1  ;;  %6615 = vmatprep.mubr.msk.bf16.mxu1 %vm340_vm8, %v14147_v32  ;;  %v10229_v36 = vpop.permute.xlu1 %2762  ;;  %v10234_v55 = vsel %vm880_vm0, %v14150_v43, 0  ;;  %v2904_v43 = vor.u32 %v2903_v2, %v14158_v47 }
 0x445   : > { %14144 = vst [vmem:[#allocation44_spill] sm:$0xff] %v10223_v23  ;;  %14148 = vst [vmem:[#allocation43_spill] sm:$0xff] %v10229_v36  ;;  %v10236_v4 = vpop.permute.xlu0 %2801  ;;  %v10238_v30 = vpop.f32.mrb[11].mxu1  ;;  %v14159_v23 = vld [vmem:[#allocation32_spill] sm:$0xff] }
 0x446   : > { %14151 = vst [vmem:[#allocation46_spill] sm:$0xff] %v10234_v55  ;;  %14152 = vst [vmem:[#allocation45_spill] sm:$0xff] %v10236_v4  ;;  %2891 = vrot.lane.b32.xlu1 %v14154_v31, %s6803_s19  ;;  %2931 = vrot.lane.b32.xlu0 %v9287_v38, %s6807_s18  ;;  %v14162_v38 = vld [vmem:[#allocation17_spill] sm:$0xff]  ;;  %v14163_v4 = vld [vmem:[#allocation34_spill] sm:$0xff] }
 0x447   : > { %14153 = vst [vmem:[#allocation170_spill] sm:$0xff] %v10238_v30  ;;  %v14160_v30 = vld [vmem:[#allocation33_spill] sm:$0xff] }
 0x448   : > { %v10245_v32 = vpop.permute.xlu1 %2766  ;;  %v14161_v36 = vpack.c.bf16 %v14159_v23, %v14160_v30  ;;  %v14171_v23 = vld [vmem:[#allocation18_spill] sm:$0xff] }
 0x449   : > { %14156 = vst [vmem:[#allocation48_spill] sm:$0xff] %v10245_v32  ;;  %v10248_v52 = vpop.permute.xlu0 %2805  ;;  %v14164_v32 = vpack.c.bf16 %v14162_v38, %v14163_v4  ;;  %v14170_v4 = vld [vmem:[#allocation20_spill] sm:$0xff]  ;;  %v14180_v38 = vld [vmem:[#allocation22_spill] sm:$0xff] }
 0x44a   : > { %14157 = vst [vmem:[#allocation47_spill] sm:$0xff] %v10248_v52  ;;  %2895 = vrot.lane.b32.xlu1 %v13985_v56, %s6803_s19  ;;  %2935 = vrot.lane.b32.xlu0 %v9504_v53, %s6807_s18  ;;  %v14166_v52 = vshll.u32 %v10234_v55, 16  ;;  %v14172_v2 = vpack.c.bf16 %v14170_v4, %v14171_v23  ;;  %v14181_v4 = vld [vmem:[#allocation23_spill] sm:$0xff]  ;;  %s6808_s19 = smov 26  }
 0x44b   : > { %6616 = vmatmul.mubr.msk.bf16.gmra.mrb[44].mxu1 %vm340_vm8, %v14161_v36  ;;  %v14182_v23 = vpack.c.bf16 %v14180_v38, %v14181_v4  ;;  %v14191_v38 = vld [vmem:[#allocation25_spill] sm:$0xff] }
 0x44c   : > { %6619 = vmatprep.mubr.msk.bf16.mxu1 %vm340_vm8, %v14164_v32  ;;  %v10263_v25 = vpop.permute.xlu1 %2770  ;;  %v2907_v56 = vrot.slane %v14166_v52, 1 }
 0x44d   : > { %14165 = vst [vmem:[#allocation30_spill] sm:$0xff] %v10263_v25  ;;  %v10267_v31 = vpop.permute.xlu0 %2809 }
 0x44e   : > { %2909 = vrot.lane.b32.xlu1 %v14002_v26, %s6807_s18  ;;  %v10272_v53 = vsel %vm917_vm5, %v2904_v43, %v2907_v56  ;;  %v14173_v56 = vld [vmem:[#allocation21_spill] sm:$0xff]  ;;  %v14174_v26 = vld [vmem:[#allocation19_spill] sm:$0xff] }
 0x44f   : > { %14167 = vst [vmem:[#allocation28_spill] sm:$0xff] %v10272_v53  ;;  %2939 = vrot.lane.b32.xlu0 %v10272_v53, %s6807_s18  ;;  %v14175_v32 = vpack.c.bf16 %v14173_v56, %v14174_v26 }
 0x450   : > { %v10276_v30 = vpop.permute.xlu1 %2774 }
 0x451   : > { %14168 = vst [vmem:[#allocation133_spill] sm:$0xff] %v10276_v30  ;;  %v10278_v36 = vpop.permute.xlu0 %2813  ;;  %v14226_v30 = vshll.u32 %v10234_v55, 16 }
 0x452   : > { %14169 = vst [vmem:[#allocation204_spill] sm:$0xff] %v10278_v36  ;;  %2913 = vrot.lane.b32.xlu1 %v14004_v13, %s6807_s18  ;;  %v14253_v36 = vld [vmem:[#allocation2_spill] sm:$0xff] }
 0x453   : > { %2947 = vrot.lane.b32.xlu0 %v14038_v54, %s6790_s23  ;;  %6620 = vmatmul.mubr.msk.bf16.gmra.mrb[48].mxu1 %vm340_vm8, %v14172_v2  ;;  %v14183_v2 = vld [vmem:[#allocation26_spill] sm:$0xff] }
 0x454   : > { %6623 = vmatprep.mubr.msk.bf16.mxu1 %vm340_vm8, %v14175_v32  ;;  %v10292_v52 = vpop.permute.xlu1 %2778  ;;  %v14190_v32 = vld [vmem:[#allocation29_spill] sm:$0xff] }
 0x455   : > { %14176 = vst [vmem:[#allocation32_spill] sm:$0xff] %v10292_v52  ;;  %v10294_v43 = vpop.permute.xlu0 %2817  ;;  %v14192_v4 = vpack.c.bf16 %v14190_v32, %v14191_v38  ;;  %v2942_v32 = vrot.slane %v14111_v51, 1  ;;  %v10356_v38 = vrot.slane %v10234_v55, 1 }
 0x456   : > { %14177 = vst [vmem:[#allocation33_spill] sm:$0xff] %v10294_v43  ;;  %2917 = vrot.lane.b32.xlu1 %v14006_v34, %s6807_s18  ;;  %v14184_v34 = vld [vmem:[#allocation24_spill] sm:$0xff] }
 0x457   : > { %2951 = vrot.lane.b32.xlu0 %v14041_v41, %s6790_s23  ;;  %v14185_v56 = vpack.c.bf16 %v14183_v2, %v14184_v34 }
 0x458   : > { %v10300_v13 = vpop.permute.xlu1 %2782 }
 0x459   : > { %14178 = vst [vmem:[#allocation17_spill] sm:$0xff] %v10300_v13  ;;  %v10302_v54 = vpop.permute.xlu0 %2821 }
 0x45a   : > { %14179 = vst [vmem:[#allocation34_spill] sm:$0xff] %v10302_v54  ;;  %2921 = vrot.lane.b32.xlu1 %v8910_v10, %s6807_s18 }
 0x45b   : > { %2955 = vrot.lane.b32.xlu0 %v14043_v1, %s6790_s23  ;;  %6624 = vmatmul.mubr.msk.bf16.gmra.mrb[52].mxu1 %vm340_vm8, %v14182_v23  ;;  %v14193_v23 = vld [vmem:[#allocation31_spill] sm:$0xff] }
 0x45c   : > { %6627 = vmatprep.mubr.msk.bf16.mxu1 %vm340_vm8, %v14185_v56  ;;  %v10316_v41 = vpop.permute.xlu1 %2786  ;;  %v14200_v56 = vld [vmem:[#allocation288_spill] sm:$0xff] }
 0x45d   : > { %14186 = vst [vmem:[#allocation20_spill] sm:$0xff] %v10316_v41  ;;  %v10318_v26 = vpop.permute.xlu0 %2825 }
 0x45e   : > { %14187 = vst [vmem:[#allocation18_spill] sm:$0xff] %v10318_v26  ;;  %2925 = vrot.lane.b32.xlu1 %v9155_v46, %s6807_s18  ;;  %v14194_v46 = vld [vmem:[#allocation27_spill] sm:$0xff] }
 0x45f   : > { %2959 = vrot.lane.b32.xlu0 %v14047_v20, %s6790_s23  ;;  %v14195_v2 = vpack.c.bf16 %v14193_v23, %v14194_v46 }
 0x460   : > { %v10324_v10 = vpop.permute.xlu1 %2799 }
 0x461   : > { %14188 = vst [vmem:[#allocation21_spill] sm:$0xff] %v10324_v10  ;;  %v10326_v1 = vpop.permute.xlu0 %2829 }
 0x462   : > { %14189 = vst [vmem:[#allocation19_spill] sm:$0xff] %v10326_v1  ;;  %2929 = vrot.lane.b32.xlu1 %v9409_v60, %s6807_s18 }
 0x463   : > { %2963 = vrot.lane.b32.xlu0 %v9006_v3, %s6790_s23  ;;  %6628 = vmatmul.mubr.msk.bf16.gmra.mrb[56].mxu1 %vm340_vm8, %v14192_v4  ;;  %v14201_v4 = vld [vmem:[#allocation16_spill] sm:$0xff] }
 0x464   : > { %6631 = vmatprep.mubr.msk.bf16.mxu1 %vm340_vm8, %v14195_v2  ;;  %v10340_v20 = vpop.permute.xlu1 %2803  ;;  %v14206_v2 = vld [vmem:[#allocation95_spill] sm:$0xff] }
 0x465   : > { %14196 = vst [vmem:[#allocation22_spill] sm:$0xff] %v10340_v20  ;;  %v10342_v34 = vpop.permute.xlu0 %2836 }
 0x466   : > { %14197 = vst [vmem:[#allocation23_spill] sm:$0xff] %v10342_v34  ;;  %2933 = vrot.lane.b32.xlu1 %v9637_v62, %s6807_s18  ;;  %v14202_v62 = vld [vmem:[#allocation35_spill] sm:$0xff] }
 0x467   : > { %2967 = vrot.lane.b32.xlu0 %v9264_v33, %s6790_s23  ;;  %v14203_v23 = vpack.c.bf16 %v14201_v4, %v14202_v62  ;;  %v14209_v4 = vld [vmem:[#allocation110_spill] sm:$0xff] }
 0x468   : > { %v10348_v3 = vpop.permute.xlu1 %2807 }
 0x469   : > { %14198 = vst [vmem:[#allocation26_spill] sm:$0xff] %v10348_v3  ;;  %v10350_v60 = vpop.permute.xlu0 %2840 }
 0x46a   : > { %14199 = vst [vmem:[#allocation24_spill] sm:$0xff] %v10350_v60  ;;  %2937 = vrot.lane.b32.xlu1 %v14200_v56, %s6807_s18  ;;  %v10372_v60 = vsel %vm1174_vm3, %v2942_v32, %v10356_v38  ;;  %v14211_v32 = vld [vmem:[#allocation136_spill] sm:$0xff]  ;;  %vm3146_vm3 = vcmask 48128  }
 0x46b   : > { %2971 = vrot.lane.b32.xlu0 %v9482_v28, %s6790_s23  ;;  %6632 = vmatmul.mubr.msk.bf16.gmra.mrb[60].mxu1 %vm340_vm8, %v14203_v23 }
 0x46c   : > { %v10364_v33 = vpop.permute.xlu1 %2811 }
 0x46d   : > { %14204 = vst [vmem:[#allocation29_spill] sm:$0xff] %v10364_v33  ;;  %v10366_v46 = vpop.permute.xlu0 %2844 }
 0x46e   : > { %14205 = vst [vmem:[#allocation25_spill] sm:$0xff] %v10366_v46  ;;  %2945 = vrot.lane.b32.xlu1 %v14206_v2, %s6790_s23 }
 0x46f   : > { %2975 = vrot.lane.b32.xlu0 %v10372_v60, %s6790_s23 }
 0x470   : > { %v10376_v28 = vpop.permute.xlu1 %2815 }
 0x471   : > { %14207 = vst [vmem:[#allocation31_spill] sm:$0xff] %v10376_v28  ;;  %v10378_v20 = vpop.permute.xlu0 %2848  ;;  %v14219_v28 = vld [vmem:[#allocation228_spill] sm:$0xff] }
 0x472   : > { %14208 = vst [vmem:[#allocation27_spill] sm:$0xff] %v10378_v20  ;;  %2949 = vrot.lane.b32.xlu1 %v14209_v4, %s6790_s23  ;;  %v14214_v4 = vld [vmem:[#allocation175_spill] sm:$0xff] }
 0x473   : > { %2988 = vrot.lane.b32.xlu0 %v14054_v45, %s6808_s19 }
 0x474   : > { %v10384_v62 = vpop.permute.xlu1 %2819 }
 0x475   : > { %14210 = vst [vmem:[#allocation288_spill] sm:$0xff] %v10384_v62  ;;  %v10386_v23 = vpop.permute.xlu0 %2852 }
 0x476   : > { %2953 = vrot.lane.b32.xlu1 %v14211_v32, %s6790_s23 }
 0x477   : > { %2992 = vrot.lane.b32.xlu0 %v14057_v42, %s6808_s19 }
 0x478   : > { %v10392_v2 = vpop.permute.xlu1 %2823 }
 0x479   : > { %14212 = vst [vmem:[#allocation16_spill] sm:$0xff] %v10392_v2  ;;  %v10394_v20 = vpop.permute.xlu0 %2856 }
 0x47a   : > { %v10396_v46 = vpop.f32.mrb[12].mxu1  ;;  %2957 = vrot.lane.b32.xlu1 %v14214_v4, %s6790_s23 }
 0x47b   : > { %14213 = vst [vmem:[#allocation35_spill] sm:$0xff] %v10396_v46  ;;  %2996 = vrot.lane.b32.xlu0 %v14060_v18, %s6808_s19  ;;  %v10402_v45 = vpop.f32.mrb[13].mxu1  ;;  %v10421_v18 = vshrl.u32 %v10234_v55, 16 }
 0x47c   : > { %14215 = vst [vmem:[#allocation95_spill] sm:$0xff] %v10402_v45  ;;  %v10404_v34 = vpop.f32.mrb[14].mxu1  ;;  %v10406_v32 = vpop.permute.xlu1 %2827 }
 0x47d   : > { %14216 = vst [vmem:[#allocation110_spill] sm:$0xff] %v10404_v34  ;;  %14217 = vst [vmem:[#allocation136_spill] sm:$0xff] %v10406_v32  ;;  %v10408_v10 = vpop.permute.xlu0 %2860  ;;  %v10410_v42 = vpop.f32.mrb[15].mxu1  ;;  %v14222_v34 = vld [vmem:[#allocation250_spill] sm:$0xff] }
 0x47e   : > { %14218 = vst [vmem:[#allocation175_spill] sm:$0xff] %v10410_v42  ;;  %2961 = vrot.lane.b32.xlu1 %v14219_v28, %s6790_s23  ;;  %14221 = vst [vmem:[#allocation299_spill] sm:$0xff] %v10421_v18  ;;  %v2978_v28 = vrot.slane %v14155_v35, 2 }
 0x47f   : > { %3000 = vrot.lane.b32.xlu0 %v14063_v39, %s6808_s19  ;;  %v2977_v39 = vrot.slane %v14158_v47, 1 }
 0x480   : > { %v10416_v4 = vpop.permute.xlu1 %2834 }
 0x481   : > { %14220 = vst [vmem:[#allocation228_spill] sm:$0xff] %v10416_v4  ;;  %v10418_v46 = vpop.permute.xlu0 %2864  ;;  %v10436_v4 = vrot.slane %v10421_v18, 1 }
 0x482   : > { %2965 = vrot.lane.b32.xlu1 %v14222_v34, %s6790_s23  ;;  %v2983_v34 = vrot.slane %v14226_v30, 2  ;;  %v14231_v30 = vld [vmem:[#allocation98_spill] sm:$0xff] }
 0x483   : > { %3004 = vrot.lane.b32.xlu0 %v14068_v37, %s6808_s19  ;;  %14225 = vst [vmem:[#allocation301_spill] sm:$0xff] %v10436_v4 }
 0x484   : > { %v10427_v42 = vpop.permute.xlu1 %2838 }
 0x485   : > { %14223 = vst [vmem:[#allocation250_spill] sm:$0xff] %v10427_v42  ;;  %v10429_v45 = vpop.permute.xlu0 %2869 }
 0x486   : > { %14224 = vst [vmem:[#allocation300_spill] sm:$0xff] %v10429_v45  ;;  %2969 = vrot.lane.b32.xlu1 %v9436_v5, %s6790_s23  ;;  %v2979_v5 = vor.u32 %v2978_v28, %v2977_v39  ;;  %v2984_v45 = vor.u32 %v2983_v34, %v10436_v4  ;;  %v14234_v28 = vld [vmem:[#allocation121_spill] sm:$0xff] }
 0x487   : > { %3008 = vrot.lane.b32.xlu0 %v14071_v63, %s6808_s19 }
 0x488   : > { %v10442_v37 = vpop.permute.xlu1 %2842  ;;  %v10458_v63 = vsel %vm2437_vm7, %v2979_v5, %v2984_v45  ;;  %v14235_v45 = vld [vmem:[#allocation158_spill] sm:$0xff]  ;;  %vm3337_vm7 = vcmask 146432  }
 0x489   : > { %14227 = vst [vmem:[#allocation302_spill] sm:$0xff] %v10442_v37  ;;  %v10444_v42 = vpop.permute.xlu0 %2873 }
 0x48a   : > { %14228 = vst [vmem:[#allocation303_spill] sm:$0xff] %v10444_v42  ;;  %2973 = vrot.lane.b32.xlu1 %v9875_v11, %s6790_s23  ;;  %s6809_s23 = smov 30  }
 0x48b   : > { %3012 = vrot.lane.b32.xlu0 %v9528_v6, %s6808_s19 }
 0x48c   : > { %v10451_v35 = vpop.permute.xlu1 %2846 }
 0x48d   : > { %14229 = vst [vmem:[#allocation304_spill] sm:$0xff] %v10451_v35  ;;  %v10453_v33 = vpop.permute.xlu0 %2877  ;;  %v14239_v35 = vld [vmem:[#allocation271_spill] sm:$0xff] }
 0x48e   : > { %14230 = vst [vmem:[#allocation305_spill] sm:$0xff] %v10453_v33  ;;  %2986 = vrot.lane.b32.xlu1 %v14231_v30, %s6808_s19  ;;  %v14242_v33 = vld [vmem:[#allocation283_spill] sm:$0xff] }
 0x48f   : > { %3016 = vrot.lane.b32.xlu0 %v10458_v63, %s6808_s19 }
 0x490   : > { %v10462_v37 = vpop.permute.xlu1 %2850 }
 0x491   : > { %14232 = vst [vmem:[#allocation98_spill] sm:$0xff] %v10462_v37  ;;  %v10464_v39 = vpop.permute.xlu0 %2881  ;;  %v14236_v37 = vld [vmem:[#allocation221_spill] sm:$0xff] }
 0x492   : > { %14233 = vst [vmem:[#allocation306_spill] sm:$0xff] %v10464_v39  ;;  %2990 = vrot.lane.b32.xlu1 %v14234_v28, %s6808_s19  ;;  %v14237_v39 = vld [vmem:[#allocation247_spill] sm:$0xff] }
 0x493   : > { %3023 = vrot.lane.b32.xlu0 %v14079_v19, %s6793_s28 }
 0x494   : > { %v10470_v6 = vpop.permute.xlu1 %2854 }
 0x495   : > { %v10472_v34 = vpop.permute.xlu0 %2885 }
 0x496   : > { %2994 = vrot.lane.b32.xlu1 %v14235_v45, %s6808_s19 }
 0x497   : > { %3027 = vrot.lane.b32.xlu0 %v14083_v7, %s6793_s28 }
 0x498   : > { %v10478_v5 = vpop.permute.xlu1 %2858 }
 0x499   : > { %v10480_v30 = vpop.permute.xlu0 %2889 }
 0x49a   : > { %2998 = vrot.lane.b32.xlu1 %v14236_v37, %s6808_s19 }
 0x49b   : > { %3031 = vrot.lane.b32.xlu0 %v14086_v29, %s6793_s28 }
 0x49c   : > { %v10486_v19 = vpop.permute.xlu1 %2862 }
 0x49d   : > { %v10488_v28 = vpop.permute.xlu0 %2893 }
 0x49e   : > { %3002 = vrot.lane.b32.xlu1 %v14237_v39, %s6808_s19 }
 0x49f   : > { %3035 = vrot.lane.b32.xlu0 %v14089_v8, %s6793_s28  ;;  %v14243_v8 = vld [vmem:[#allocation264_spill] sm:$0xff] }
 0x4a0   : > { %v10494_v7 = vpop.permute.xlu1 %2867  ;;  %v3103_v39 = vsel %vm3085_vm2, %v14090_v61, %v14243_v8 }
 0x4a1   : > { %14238 = vst [vmem:[#allocation121_spill] sm:$0xff] %v10494_v7  ;;  %v10496_v45 = vpop.permute.xlu0 %2897 }
 0x4a2   : > { %3006 = vrot.lane.b32.xlu1 %v14239_v35, %s6808_s19 }
 0x4a3   : > { %3039 = vrot.lane.b32.xlu0 %v14092_v22, %s6793_s28  ;;  %v14246_v22 = vld [vmem:[#allocation14_spill] sm:$0xff] }
 0x4a4   : > { %v10502_v29 = vpop.permute.xlu1 %2871 }
 0x4a5   : > { %14240 = vst [vmem:[#allocation158_spill] sm:$0xff] %v10502_v29  ;;  %v10504_v37 = vpop.permute.xlu0 %2911  ;;  %v3018_v29 = vrot.slane %v14111_v51, 2 }
 0x4a6   : > { %14241 = vst [vmem:[#allocation221_spill] sm:$0xff] %v10504_v37  ;;  %3010 = vrot.lane.b32.xlu1 %v14242_v33, %s6808_s19  ;;  %v3019_v37 = vrot.slane %v10234_v55, 2  ;;  %v14247_v33 = vld [vmem:[#allocation260_spill] sm:$0xff] }
 0x4a7   : > { %3043 = vrot.lane.b32.xlu0 %v14097_v58, %s6793_s28  ;;  %v3133_v7 = vsel %vm340_vm8, %v3103_v39, %v14247_v33  ;;  %v14248_v58 = vld [vmem:[#allocation266_spill] sm:$0xff]  ;;  %v14255_v33 = vld [vmem:[#allocation132_spill] sm:$0xff] }
 0x4a8   : > { %v10513_v42 = vpop.permute.xlu1 %2875  ;;  %v10527_v8 = vsel %vm3146_vm3, %v3133_v7, %v14248_v58  ;;  %v3020_v39 = vsel %vm2603_vm4, %v3018_v29, %v3019_v37  ;;  %v14260_v29 = vld [vmem:[#allocation3_spill] sm:$0xff]  ;;  %vm3272_vm4 = vcmask 113664  }
 0x4a9   : > { %14244 = vst [vmem:[#allocation247_spill] sm:$0xff] %v10513_v42  ;;  %v10515_v35 = vpop.permute.xlu0 %2915  ;;  %v14249_v42 = vld [vmem:[#allocation279_spill] sm:$0xff]  ;;  %v3111_v37 = vsel %vm3085_vm2, %v14098_v9, %v14260_v29 }
 0x4aa   : > { %14245 = vst [vmem:[#allocation271_spill] sm:$0xff] %v10515_v35  ;;  %3014 = vrot.lane.b32.xlu1 %v14246_v22, %s6808_s19  ;;  %v3107_v35 = vsel %vm3085_vm2, %v14093_v59, %v14249_v42 }
 0x4ab   : > { %3047 = vrot.lane.b32.xlu0 %v14102_v48, %s6793_s28  ;;  %v14254_v48 = vld [vmem:[#allocation255_spill] sm:$0xff]  ;;  %v3137_v58 = vsel %vm340_vm8, %v3107_v35, %v14255_v33 }
 0x4ac   : > { %v10532_v25 = vpop.permute.xlu1 %2879  ;;  %v3194_v7 = vsel %vm1496_vm9, %v10527_v8, %v14254_v48 }
 0x4ad   : > { %14250 = vst [vmem:[#allocation283_spill] sm:$0xff] %v10532_v25  ;;  %v10534_v3 = vpop.permute.xlu0 %2919  ;;  %v14257_v25 = vld [vmem:[#allocation135_spill] sm:$0xff] }
 0x4ae   : > { %14251 = vst [vmem:[#allocation264_spill] sm:$0xff] %v10534_v3  ;;  %v10536_v4 = vpop.f32.mrb[16].mxu1  ;;  %3021 = vrot.lane.b32.xlu1 %v14253_v36, %s6793_s28  ;;  %v14258_v3 = vld [vmem:[#allocation280_spill] sm:$0xff] }
 0x4af   : > { %14252 = vst [vmem:[#allocation14_spill] sm:$0xff] %v10536_v4  ;;  %3051 = vrot.lane.b32.xlu0 %v3020_v39, %s6793_s28  ;;  %v10547_v42 = vpop.f32.mrb[17].mxu1  ;;  %v3227_v4 = vsel %vm3207_vm6, %v3194_v7, %v14257_v25  ;;  %v10553_v36 = vsel %vm3146_vm3, %v3137_v58, %v14258_v3  ;;  %v14265_v7 = vld [vmem:[#allocation108_spill] sm:$0xff]  ;;  %v14266_v58 = vld [vmem:[#allocation273_spill] sm:$0xff] }
 0x4b0   : > { %14256 = vst [vmem:[#allocation260_spill] sm:$0xff] %v10547_v42  ;;  %14259 = vst [vmem:[#allocation266_spill] sm:$0xff] %v10553_v36  ;;  %v10558_v47 = vpop.f32.mrb[18].mxu1  ;;  %v10560_v48 = vpop.permute.xlu1 %2883  ;;  %v3259_v35 = vsel %vm1529_vm10, %v3227_v4, %v10070_v50  ;;  %v3198_v29 = vsel %vm1496_vm9, %v10553_v36, %v14266_v58 }
 0x4b1   : > { %14261 = vst [vmem:[#allocation279_spill] sm:$0xff] %v10558_v47  ;;  %14262 = vst [vmem:[#allocation2_spill] sm:$0xff] %v10560_v48  ;;  %v10564_v39 = vpop.permute.xlu0 %2923  ;;  %v10566_v33 = vpop.f32.mrb[19].mxu1  ;;  %v3292_v3 = vsel %vm3272_vm4, %v3259_v35, %v10177_v15  ;;  %v14267_v47 = vld [vmem:[#allocation96_spill] sm:$0xff]  ;;  %v14269_v48 = vld [vmem:[#allocation119_spill] sm:$0xff] }
 0x4b2   : > { %14263 = vst [vmem:[#allocation255_spill] sm:$0xff] %v10564_v39  ;;  %14264 = vst [vmem:[#allocation132_spill] sm:$0xff] %v10566_v33  ;;  %3025 = vrot.lane.b32.xlu1 %v14265_v7, %s6793_s28  ;;  %v3141_v42 = vsel %vm340_vm8, %v3111_v37, %v14267_v47  ;;  %v3324_v4 = vsel %vm1562_vm11, %v3292_v3, %v10294_v43  ;;  %v14268_v33 = vld [vmem:[#allocation281_spill] sm:$0xff]  ;;  %v14271_v39 = vld [vmem:[#allocation8_spill] sm:$0xff] }
 0x4b3   : > { %3055 = vrot.lane.b32.xlu0 %v14114_v0, %s6809_s23  ;;  %v3231_v35 = vsel %vm3207_vm6, %v3198_v29, %v14268_v33  ;;  %v10585_v7 = vsel %vm3146_vm3, %v3141_v42, %v14269_v48  ;;  %v3115_v58 = vsel %vm3085_vm2, %v14104_v12, %v14271_v39  ;;  %v3357_v47 = vsel %vm3337_vm7, %v3324_v4, %v10386_v23  ;;  %v14272_v39 = vld [vmem:[#allocation139_spill] sm:$0xff]  ;;  %v14273_v23 = vld [vmem:[#allocation282_spill] sm:$0xff] }
 0x4b4   : > { %14270 = vst [vmem:[#allocation280_spill] sm:$0xff] %v10585_v7  ;;  %v10592_v37 = vpop.permute.xlu1 %2887  ;;  %v3263_v3 = vsel %vm1529_vm10, %v3231_v35, %v10083_v21  ;;  %v3389_v36 = vsel %vm1595_vm12, %v3357_v47, %v10472_v34  ;;  %v3202_v4 = vsel %vm1496_vm9, %v10585_v7, %v14273_v23  ;;  %v14274_v33 = vld [vmem:[#allocation295_spill] sm:$0xff]  ;;  %v14275_v47 = vld [vmem:[#allocation202_spill] sm:$0xff] }
 0x4b5   : > { %v2928_v29 = vpop.permute.xlu0 %2927  ;;  %v3296_v42 = vsel %vm3272_vm4, %v3263_v3, %v10185_v57  ;;  %v3145_v35 = vsel %vm340_vm8, %v3115_v58, %v14274_v33  ;;  %v14276_v3 = vld [vmem:[#allocation93_spill] sm:$0xff]  ;;  %v14389_v57 = vld [vmem:[#allocation118_spill] sm:$0xff] }
 0x4b6   : > { %v10601_v48 = vsel %vm3402_vm1, %v3389_v36, %v2928_v29  ;;  %3029 = vrot.lane.b32.xlu1 %v14272_v39, %s6793_s28  ;;  %v3328_v34 = vsel %vm1562_vm11, %v3296_v42, %v10302_v54  ;;  %v3235_v36 = vsel %vm3207_vm6, %v3202_v4, %v14275_v47  ;;  %v10618_v29 = vsel %vm3146_vm3, %v3145_v35, %v14276_v3  ;;  %v14278_v35 = vld [vmem:[#allocation188_spill] sm:$0xff]  ;;  %v14279_v3 = vld [vmem:[#allocation99_spill] sm:$0xff]  ;;  %v14360_v47 = vld [vmem:[#allocation226_spill] sm:$0xff] }
 0x4b7   : > { %3059 = vrot.lane.b32.xlu0 %v14123_v16, %s6809_s23  ;;  %14277 = vst [vmem:[#allocation3_spill] sm:$0xff] %v10618_v29  ;;  %v3361_v39 = vsel %vm3337_vm7, %v3328_v34, %v10394_v20  ;;  %v3267_v33 = vsel %vm1529_vm10, %v3235_v36, %v10097_v49  ;;  %v3206_v20 = vsel %vm1496_vm9, %v10618_v29, %v14279_v3 }
 0x4b8   : > { %v10622_v23 = vpop.permute.xlu1 %2891  ;;  %v3393_v58 = vsel %vm1595_vm12, %v3361_v39, %v10480_v30  ;;  %v3300_v7 = vsel %vm3272_vm4, %v3267_v33, %v10201_v44  ;;  %v14280_v30 = vld [vmem:[#allocation131_spill] sm:$0xff]  ;;  %v14319_v44 = vld [vmem:[#allocation125_spill] sm:$0xff] }
 0x4b9   : > { %v2932_v42 = vpop.permute.xlu0 %2931  ;;  %v3332_v34 = vsel %vm1562_vm11, %v3300_v7, %v10318_v26  ;;  %v3239_v36 = vsel %vm3207_vm6, %v3206_v20, %v14280_v30 }
 0x4ba   : > { %v10631_v4 = vsel %vm3402_vm1, %v3393_v58, %v2932_v42  ;;  %3033 = vrot.lane.b32.xlu1 %v14278_v35, %s6793_s28  ;;  %v3365_v39 = vsel %vm3337_vm7, %v3332_v34, %v10408_v10  ;;  %v3271_v58 = vsel %vm1529_vm10, %v3239_v36, %v10112_v27  ;;  %v14304_v27 = vld [vmem:[#allocation90_spill] sm:$0xff] }
 0x4bb   : > { %3063 = vrot.lane.b32.xlu0 %v14126_v14, %s6809_s23  ;;  %v3397_v42 = vsel %vm1595_vm12, %v3365_v39, %v10488_v28  ;;  %v3304_v7 = vsel %vm3272_vm4, %v3271_v58, %v10209_v17  ;;  %v14283_v58 = vld [vmem:[#allocation174_spill] sm:$0xff]  ;;  %v14297_v17 = vld [vmem:[#allocation127_spill] sm:$0xff] }
 0x4bc   : > { %v10646_v33 = vpop.permute.xlu1 %2895  ;;  %v3336_v10 = vsel %vm1562_vm11, %v3304_v7, %v10326_v1  ;;  %v14293_v1 = vld [vmem:[#allocation120_spill] sm:$0xff] }
 0x4bd   : > { %v2936_v35 = vpop.permute.xlu0 %2935  ;;  %v3369_v20 = vsel %vm3337_vm7, %v3336_v10, %v10418_v46  ;;  %v14288_v10 = vld [vmem:[#allocation181_spill] sm:$0xff] }
 0x4be   : > { %v10655_v3 = vsel %vm3402_vm1, %v3397_v42, %v2936_v35  ;;  %3037 = vrot.lane.b32.xlu1 %v14069_v24, %s6793_s28  ;;  %v3401_v34 = vsel %vm1595_vm12, %v3369_v20, %v10496_v45  ;;  %v14282_v24 = vld [vmem:[#allocation261_spill] sm:$0xff]  ;;  %v14285_v35 = vld [vmem:[#allocation284_spill] sm:$0xff]  ;;  %v14289_v20 = vld [vmem:[#allocation278_spill] sm:$0xff] }
 0x4bf   : > { %3067 = vrot.lane.b32.xlu0 %v14135_v40, %s6809_s23  ;;  %v3105_v46 = vsel %vm3085_vm2, %v14135_v40, %v14285_v35  ;;  %v14287_v45 = vld [vmem:[#allocation141_spill] sm:$0xff]  ;;  %v3109_v40 = vsel %vm3085_vm2, %v14283_v58, %v14293_v1 }
 0x4c0   : > { %v10665_v28 = vpop.permute.xlu1 %2909 }
 0x4c1   : > { %14281 = vst [vmem:[#allocation108_spill] sm:$0xff] %v10665_v28  ;;  %v2940_v36 = vpop.permute.xlu0 %2939  ;;  %v14309_v28 = vld [vmem:[#allocation78_spill] sm:$0xff] }
 0x4c2   : > { %v10670_v39 = vsel %vm3402_vm1, %v3401_v34, %v2940_v36  ;;  %3041 = vrot.lane.b32.xlu1 %v14282_v24, %s6793_s28  ;;  %v3135_v34 = vsel %vm340_vm8, %v3105_v46, %v14289_v20  ;;  %v14291_v24 = vld [vmem:[#allocation285_spill] sm:$0xff]  ;;  %v14298_v20 = vld [vmem:[#allocation287_spill] sm:$0xff] }
 0x4c3   : > { %3071 = vrot.lane.b32.xlu0 %v14283_v58, %s6809_s23  ;;  %v14302_v58 = vld [vmem:[#allocation297_spill] sm:$0xff] }
 0x4c4   : > { %v10676_v42 = vpop.permute.xlu1 %2913 }
 0x4c5   : > { %14284 = vst [vmem:[#allocation273_spill] sm:$0xff] %v10676_v42  ;;  %v10681_v7 = vpop.permute.xlu0 %2947  ;;  %v10693_v42 = vsel %vm3146_vm3, %v3135_v34, %v14291_v24  ;;  %v3139_v34 = vsel %vm340_vm8, %v3109_v40, %v14298_v20  ;;  %v14306_v40 = vld [vmem:[#allocation4_spill] sm:$0xff]  ;;  %v14307_v20 = vld [vmem:[#allocation138_spill] sm:$0xff] }
 0x4c6   : > { %14286 = vst [vmem:[#allocation96_spill] sm:$0xff] %v10681_v7  ;;  %3045 = vrot.lane.b32.xlu1 %v14287_v45, %s6793_s28  ;;  %14292 = vst [vmem:[#allocation8_spill] sm:$0xff] %v10693_v42  ;;  %v14295_v45 = vld [vmem:[#allocation6_spill] sm:$0xff]  ;;  %v14296_v7 = vld [vmem:[#allocation183_spill] sm:$0xff]  ;;  %v3196_v46 = vsel %vm1496_vm9, %v10693_v42, %v14297_v17 }
 0x4c7   : > { %3075 = vrot.lane.b32.xlu0 %v14288_v10, %s6809_s23 }
 0x4c8   : > { %v10689_v36 = vpop.permute.xlu1 %2917 }
 0x4c9   : > { %14290 = vst [vmem:[#allocation119_spill] sm:$0xff] %v10689_v36  ;;  %v10698_v35 = vpop.permute.xlu0 %2951  ;;  %v14300_v36 = vld [vmem:[#allocation152_spill] sm:$0xff] }
 0x4ca   : > { %14294 = vst [vmem:[#allocation139_spill] sm:$0xff] %v10698_v35  ;;  %3049 = vrot.lane.b32.xlu1 %v14295_v45, %s6793_s28  ;;  %v10713_v1 = vsel %vm3146_vm3, %v3139_v34, %v14300_v36  ;;  %v3113_v45 = vsel %vm3085_vm2, %v14288_v10, %v14302_v58  ;;  %v14308_v34 = vld [vmem:[#allocation189_spill] sm:$0xff] }
 0x4cb   : > { %3079 = vrot.lane.b32.xlu0 %v14296_v7, %s6809_s23  ;;  %14301 = vst [vmem:[#allocation295_spill] sm:$0xff] %v10713_v1  ;;  %v14305_v7 = vld [vmem:[#allocation275_spill] sm:$0xff]  ;;  %v3200_v36 = vsel %vm1496_vm9, %v10713_v1, %v14307_v20 }
 0x4cc   : > { %v10709_v24 = vpop.permute.xlu1 %2921  ;;  %v3229_v17 = vsel %vm3207_vm6, %v3196_v46, %v14305_v7 }
 0x4cd   : > { %14299 = vst [vmem:[#allocation282_spill] sm:$0xff] %v10709_v24  ;;  %v10718_v35 = vpop.permute.xlu0 %2955  ;;  %v3143_v24 = vsel %vm340_vm8, %v3113_v45, %v14308_v34  ;;  %v3261_v10 = vsel %vm1529_vm10, %v3229_v17, %v14309_v28  ;;  %v14315_v45 = vld [vmem:[#allocation286_spill] sm:$0xff] }
 0x4ce   : > { %14303 = vst [vmem:[#allocation93_spill] sm:$0xff] %v10718_v35  ;;  %3053 = vrot.lane.b32.xlu1 %v14304_v27, %s6809_s23  ;;  %v14311_v35 = vld [vmem:[#allocation100_spill] sm:$0xff]  ;;  %v3294_v46 = vsel %vm3272_vm4, %v3261_v10, %v10292_v52  ;;  %v3233_v17 = vsel %vm3207_vm6, %v3200_v36, %v14315_v45 }
 0x4cf   : > { %3083 = vrot.lane.b32.xlu0 %v14306_v40, %s6809_s23  ;;  %v10737_v30 = vsel %vm3146_vm3, %v3143_v24, %v14311_v35  ;;  %v3326_v20 = vsel %vm1562_vm11, %v3294_v46, %v10384_v62  ;;  %v14314_v40 = vld [vmem:[#allocation102_spill] sm:$0xff]  ;;  %v14316_v35 = vld [vmem:[#allocation113_spill] sm:$0xff]  ;;  %v14317_v24 = vld [vmem:[#allocation104_spill] sm:$0xff] }
 0x4d0   : > { %v10733_v58 = vpop.permute.xlu1 %2925  ;;  %14312 = vst [vmem:[#allocation99_spill] sm:$0xff] %v10737_v30  ;;  %v3359_v34 = vsel %vm3337_vm7, %v3326_v20, %v10470_v6  ;;  %v3204_v10 = vsel %vm1496_vm9, %v10737_v30, %v14317_v24  ;;  %v14320_v24 = vld [vmem:[#allocation289_spill] sm:$0xff] }
 0x4d1   : > { %14310 = vst [vmem:[#allocation188_spill] sm:$0xff] %v10733_v58  ;;  %v10741_v29 = vpop.permute.xlu0 %2959  ;;  %v14318_v58 = vld [vmem:[#allocation80_spill] sm:$0xff]  ;;  %v3391_v46 = vsel %vm1595_vm12, %v3359_v34, %v10592_v37  ;;  %v14321_v34 = vld [vmem:[#allocation150_spill] sm:$0xff] }
 0x4d2   : > { %14313 = vst [vmem:[#allocation261_spill] sm:$0xff] %v10741_v29  ;;  %3057 = vrot.lane.b32.xlu1 %v14314_v40, %s6809_s23  ;;  %v3265_v29 = vsel %vm1529_vm10, %v3233_v17, %v14318_v58  ;;  %v3237_v17 = vsel %vm3207_vm6, %v3204_v10, %v14320_v24 }
 0x4d3   : > { %3567 = vrot.lane.b32.xlu0 %v14316_v35, %s6798_s15  ;;  %v3298_v36 = vsel %vm3272_vm4, %v3265_v29, %v10300_v13  ;;  %v14322_v29 = vld [vmem:[#allocation38_spill] sm:$0xff] }
 0x4d4   : > { %v2930_v26 = vpop.permute.xlu1 %2929  ;;  %v3330_v20 = vsel %vm1562_vm11, %v3298_v36, %v10392_v2 }
 0x4d5   : > { %v10763_v45 = vsel %vm3402_vm1, %v3391_v46, %v2930_v26  ;;  %v2964_v6 = vpop.permute.xlu0 %2963  ;;  %v3363_v37 = vsel %vm3337_vm7, %v3330_v20, %v10478_v5  ;;  %v3269_v26 = vsel %vm1529_vm10, %v3237_v17, %v14322_v29 }
 0x4d6   : > { %3061 = vrot.lane.b32.xlu1 %v14319_v44, %s6809_s23  ;;  %v3395_v46 = vsel %vm1595_vm12, %v3363_v37, %v10622_v23  ;;  %v3302_v36 = vsel %vm3272_vm4, %v3269_v26, %v10316_v41  ;;  %v14324_v23 = vld [vmem:[#allocation215_spill] sm:$0xff] }
 0x4d7   : > { %3571 = vrot.lane.b32.xlu0 %v14321_v34, %s6798_s15  ;;  %v3334_v5 = vsel %vm1562_vm11, %v3302_v36, %v10406_v32 }
 0x4d8   : > { %v2934_v30 = vpop.permute.xlu1 %2933  ;;  %v3367_v17 = vsel %vm3337_vm7, %v3334_v5, %v10486_v19 }
 0x4d9   : > { %v10782_v2 = vsel %vm3402_vm1, %v3395_v46, %v2934_v30  ;;  %v2968_v10 = vpop.permute.xlu0 %2967  ;;  %v3399_v30 = vsel %vm1595_vm12, %v3367_v17, %v10646_v33  ;;  %v14330_v33 = vld [vmem:[#allocation265_spill] sm:$0xff] }
 0x4da   : > { %v10786_v20 = vpop.f32.mrb[20].mxu1  ;;  %3065 = vrot.lane.b32.xlu1 %v14090_v61, %s6809_s23  ;;  %v14328_v61 = vld [vmem:[#allocation240_spill] sm:$0xff] }
 0x4db   : > { %14323 = vst [vmem:[#allocation174_spill] sm:$0xff] %v10786_v20  ;;  %3575 = vrot.lane.b32.xlu0 %v14324_v23, %s6798_s15  ;;  %v10794_v37 = vpop.f32.mrb[21].mxu1 }
 0x4dc   : > { %14325 = vst [vmem:[#allocation284_spill] sm:$0xff] %v10794_v37  ;;  %v10798_v26 = vpop.f32.mrb[22].mxu1  ;;  %v2938_v46 = vpop.permute.xlu1 %2937  ;;  %v14338_v37 = vld [vmem:[#allocation91_spill] sm:$0xff] }
 0x4dd   : > { %14326 = vst [vmem:[#allocation141_spill] sm:$0xff] %v10798_v26  ;;  %v10801_v36 = vsel %vm3402_vm1, %v3399_v30, %v2938_v46  ;;  %v2972_v20 = vpop.permute.xlu0 %2971  ;;  %v10803_v32 = vpop.f32.mrb[23].mxu1 }
 0x4de   : > { %14327 = vst [vmem:[#allocation181_spill] sm:$0xff] %v10803_v32  ;;  %3069 = vrot.lane.b32.xlu1 %v14093_v59, %s6809_s23  ;;  %v14333_v59 = vld [vmem:[#allocation137_spill] sm:$0xff] }
 0x4df   : > { %3579 = vrot.lane.b32.xlu0 %v14328_v61, %s6798_s15 }
 0x4e0   : > { %v10809_v19 = vpop.permute.xlu1 %2945 }
 0x4e1   : > { %14329 = vst [vmem:[#allocation278_spill] sm:$0xff] %v10809_v19  ;;  %v2976_v5 = vpop.permute.xlu0 %2975 }
 0x4e2   : > { %3073 = vrot.lane.b32.xlu1 %v14098_v9, %s6809_s23 }
 0x4e3   : > { %3583 = vrot.lane.b32.xlu0 %v14330_v33, %s6798_s15 }
 0x4e4   : > { %v10815_v17 = vpop.permute.xlu1 %2949 }
 0x4e5   : > { %14331 = vst [vmem:[#allocation285_spill] sm:$0xff] %v10815_v17  ;;  %v10817_v30 = vpop.permute.xlu0 %2988  ;;  %v14342_v17 = vld [vmem:[#allocation114_spill] sm:$0xff] }
 0x4e6   : > { %14332 = vst [vmem:[#allocation120_spill] sm:$0xff] %v10817_v30  ;;  %3077 = vrot.lane.b32.xlu1 %v14104_v12, %s6809_s23  ;;  %v14339_v12 = vshrl.u32 %v14338_v37, 16 }
 0x4e7   : > { %3587 = vrot.lane.b32.xlu0 %v14333_v59, %s6798_s15 }
 0x4e8   : > { %v10823_v46 = vpop.permute.xlu1 %2953 }
 0x4e9   : > { %14334 = vst [vmem:[#allocation6_spill] sm:$0xff] %v10823_v46  ;;  %v10825_v26 = vpop.permute.xlu0 %2992 }
 0x4ea   : > { %14335 = vst [vmem:[#allocation127_spill] sm:$0xff] %v10825_v26  ;;  %3081 = vrot.lane.b32.xlu1 %v14111_v51, %s6809_s23 }
 0x4eb   : > { %3591 = vrot.lane.b32.xlu0 %v14200_v56, %s6798_s15  ;;  %v14343_v56 = vld [vmem:[#allocation12_spill] sm:$0xff] }
 0x4ec   : > { %v10831_v9 = vpop.permute.xlu1 %2957 }
 0x4ed   : > { %14336 = vst [vmem:[#allocation287_spill] sm:$0xff] %v10831_v9  ;;  %v10833_v32 = vpop.permute.xlu0 %2996 }
 0x4ee   : > { %14337 = vst [vmem:[#allocation152_spill] sm:$0xff] %v10833_v32  ;;  %3565 = vrot.lane.b32.xlu1 %v14339_v12, %s6798_s15  ;;  %v3454_v32 = vsel %vm13579_vm13, %v10601_v48, %v2964_v6  ;;  %v3458_v48 = vsel %vm13579_vm13, %v10631_v4, %v2968_v10  ;;  %v14353_v10 = vld [vmem:[#allocation229_spill] sm:$0xff] }
 0x4ef   : > { %3595 = vrot.lane.b32.xlu0 %v10272_v53, %s6798_s15 }
 0x4f0   : > { %v10840_v46 = vpop.permute.xlu1 %2961 }
 0x4f1   : > { %14340 = vst [vmem:[#allocation297_spill] sm:$0xff] %v10840_v46  ;;  %v10842_v26 = vpop.permute.xlu0 %3000  ;;  %v14345_v46 = vld [vmem:[#allocation144_spill] sm:$0xff] }
 0x4f2   : > { %14341 = vst [vmem:[#allocation90_spill] sm:$0xff] %v10842_v26  ;;  %3569 = vrot.lane.b32.xlu1 %v14342_v17, %s6798_s15  ;;  %v14346_v26 = vld [vmem:[#allocation109_spill] sm:$0xff] }
 0x4f3   : > { %3599 = vrot.lane.b32.xlu0 %v14343_v56, %s6798_s15 }
 0x4f4   : > { %v2966_v9 = vpop.permute.xlu1 %2965 }
 0x4f5   : > { %v3005_v30 = vpop.permute.xlu0 %3004 }
 0x4f6   : > { %v10851_v12 = vsel %vm13574_vm15, %v3454_v32, %v3005_v30  ;;  %v10853_v19 = vpop.f32.mrb[24].mxu1  ;;  %3573 = vrot.lane.b32.xlu1 %v14345_v46, %s6798_s15  ;;  %v14350_v30 = vld [vmem:[#allocation169_spill] sm:$0xff] }
 0x4f7   : > { %14344 = vst [vmem:[#allocation138_spill] sm:$0xff] %v10853_v19  ;;  %3603 = vrot.lane.b32.xlu0 %v14346_v26, %s6792_s27  ;;  %v10859_v41 = vpop.f32.mrb[25].mxu1  ;;  %v14351_v19 = vld [vmem:[#allocation134_spill] sm:$0xff] }
 0x4f8   : > { %14347 = vst [vmem:[#allocation189_spill] sm:$0xff] %v10859_v41  ;;  %v10861_v29 = vpop.f32.mrb[26].mxu1  ;;  %v2970_v24 = vpop.permute.xlu1 %2969 }
 0x4f9   : > { %14348 = vst [vmem:[#allocation100_spill] sm:$0xff] %v10861_v29  ;;  %v3009_v6 = vpop.permute.xlu0 %3008  ;;  %v10865_v13 = vpop.f32.mrb[27].mxu1  ;;  %v3462_v29 = vsel %vm13579_vm13, %v10655_v3, %v2972_v20  ;;  %v3466_v3 = vsel %vm13579_vm13, %v10670_v39, %v2976_v5  ;;  %v14364_v39 = vld [vmem:[#allocation277_spill] sm:$0xff]  ;;  %v14365_v5 = vld [vmem:[#allocation248_spill] sm:$0xff] }
 0x4fa   : > { %14349 = vst [vmem:[#allocation102_spill] sm:$0xff] %v10865_v13  ;;  %v10868_v32 = vsel %vm13574_vm15, %v3458_v48, %v3009_v6  ;;  %3577 = vrot.lane.b32.xlu1 %v14350_v30, %s6798_s15  ;;  %v14354_v48 = vld [vmem:[#allocation168_spill] sm:$0xff] }
 0x4fb   : > { %3607 = vrot.lane.b32.xlu0 %v14351_v19, %s6792_s27 }
 0x4fc   : > { %v2974_v58 = vpop.permute.xlu1 %2973 }
 0x4fd   : > { %v3013_v41 = vpop.permute.xlu0 %3012 }
 0x4fe   : > { %v10877_v1 = vsel %vm13574_vm15, %v3462_v29, %v3013_v41  ;;  %v10879_v4 = vpop.f32.mrb[28].mxu1  ;;  %3581 = vrot.lane.b32.xlu1 %v14353_v10, %s6798_s15 }
 0x4ff   : > { %14352 = vst [vmem:[#allocation113_spill] sm:$0xff] %v10879_v4  ;;  %3611 = vrot.lane.b32.xlu0 %v14354_v48, %s6792_s27  ;;  %v10885_v6 = vpop.f32.mrb[29].mxu1  ;;  %v14359_v4 = vld [vmem:[#allocation252_spill] sm:$0xff] }
 0x500   : > { %14355 = vst [vmem:[#allocation104_spill] sm:$0xff] %v10885_v6  ;;  %v10887_v13 = vpop.f32.mrb[30].mxu1  ;;  %v10889_v49 = vpop.permute.xlu1 %2986 }
 0x501   : > { %14356 = vst [vmem:[#allocation125_spill] sm:$0xff] %v10887_v13  ;;  %14357 = vst [vmem:[#allocation150_spill] sm:$0xff] %v10889_v49  ;;  %v3017_v20 = vpop.permute.xlu0 %3016  ;;  %v10893_v41 = vpop.f32.mrb[31].mxu1 }
 0x502   : > { %14358 = vst [vmem:[#allocation215_spill] sm:$0xff] %v10893_v41  ;;  %v10896_v29 = vsel %vm13574_vm15, %v3466_v3, %v3017_v20  ;;  %3585 = vrot.lane.b32.xlu1 %v14359_v4, %s6798_s15 }
 0x503   : > { %3615 = vrot.lane.b32.xlu0 %v14360_v47, %s6792_s27 }
 0x504   : > { %v10902_v6 = vpop.permute.xlu1 %2990 }
 0x505   : > { %14361 = vst [vmem:[#allocation240_spill] sm:$0xff] %v10902_v6  ;;  %v10904_v13 = vpop.permute.xlu0 %3023  ;;  %v14371_v6 = vld [vmem:[#allocation177_spill] sm:$0xff] }
 0x506   : > { %14362 = vst [vmem:[#allocation265_spill] sm:$0xff] %v10904_v13  ;;  %v10906_v49 = vpop.f32.mrb[32].mxu1  ;;  %3589 = vrot.lane.b32.xlu1 %v14364_v39, %s6798_s15 }
 0x507   : > { %14363 = vst [vmem:[#allocation137_spill] sm:$0xff] %v10906_v49  ;;  %3619 = vrot.lane.b32.xlu0 %v14365_v5, %s6792_s27  ;;  %v10912_v3 = vpop.f32.mrb[33].mxu1  ;;  %v14372_v49 = vld [vmem:[#allocation269_spill] sm:$0xff] }
 0x508   : > { %14366 = vst [vmem:[#allocation91_spill] sm:$0xff] %v10912_v3  ;;  %v10914_v20 = vpop.f32.mrb[34].mxu1  ;;  %v10916_v41 = vpop.permute.xlu1 %2994 }
 0x509   : > { %14367 = vst [vmem:[#allocation114_spill] sm:$0xff] %v10914_v20  ;;  %14368 = vst [vmem:[#allocation144_spill] sm:$0xff] %v10916_v41  ;;  %v10918_v62 = vpop.permute.xlu0 %3027  ;;  %v10920_v52 = vpop.f32.mrb[35].mxu1 }
 0x50a   : > { %14369 = vst [vmem:[#allocation109_spill] sm:$0xff] %v10918_v62  ;;  %14370 = vst [vmem:[#allocation169_spill] sm:$0xff] %v10920_v52  ;;  %3593 = vrot.lane.b32.xlu1 %v14371_v6, %s6798_s15  ;;  %v14411_v6 = vld [vmem:[#allocation256_spill] sm:$0xff] }
 0x50b   : > { %3623 = vrot.lane.b32.xlu0 %v14372_v49, %s6792_s27 }
 0x50c   : > { %v10926_v13 = vpop.permute.xlu1 %2998 }
 0x50d   : > { %14373 = vst [vmem:[#allocation134_spill] sm:$0xff] %v10926_v13  ;;  %v10928_v28 = vpop.permute.xlu0 %3031  ;;  %v14381_v13 = vrot.slane %v14338_v37, 1 }
 0x50e   : > { %14374 = vst [vmem:[#allocation229_spill] sm:$0xff] %v10928_v28  ;;  %v10930_v54 = vpop.f32.mrb[36].mxu1  ;;  %3597 = vrot.lane.b32.xlu1 %v10421_v18, %s6798_s15  ;;  %v3460_v28 = vsel %vm13579_vm13, %v10782_v2, %v2970_v24 }
 0x50f   : > { %14375 = vst [vmem:[#allocation168_spill] sm:$0xff] %v10930_v54  ;;  %3627 = vrot.lane.b32.xlu0 %v9875_v11, %s6792_s27  ;;  %v10936_v20 = vpop.f32.mrb[37].mxu1  ;;  %v3456_v11 = vsel %vm13579_vm13, %v10763_v45, %v2966_v9 }
 0x510   : > { %14376 = vst [vmem:[#allocation252_spill] sm:$0xff] %v10936_v20  ;;  %v10938_v52 = vpop.f32.mrb[38].mxu1  ;;  %v10940_v3 = vpop.permute.xlu1 %3002 }
 0x511   : > { %14377 = vst [vmem:[#allocation226_spill] sm:$0xff] %v10938_v52  ;;  %14378 = vst [vmem:[#allocation277_spill] sm:$0xff] %v10940_v3  ;;  %v10942_v41 = vpop.permute.xlu0 %3035  ;;  %v10944_v62 = vpop.f32.mrb[39].mxu1 }
 0x512   : > { %14379 = vst [vmem:[#allocation248_spill] sm:$0xff] %v10942_v41  ;;  %14380 = vst [vmem:[#allocation269_spill] sm:$0xff] %v10944_v62  ;;  %3601 = vrot.lane.b32.xlu1 %v14381_v13, %s6792_s27  ;;  %v14383_v41 = vld [vmem:[#allocation103_spill] sm:$0xff]  ;;  %v14384_v62 = vld [vmem:[#allocation97_spill] sm:$0xff] }
 0x513   : > { %3631 = vrot.lane.b32.xlu0 %v10372_v60, %s6792_s27 }
 0x514   : > { %v3007_v54 = vpop.permute.xlu1 %3006 }
 0x515   : > { %v10954_v20 = vsel %vm13574_vm15, %v3456_v11, %v3007_v54  ;;  %v3040_v52 = vpop.permute.xlu0 %3039 }
 0x516   : > { %v10956_v3 = vpop.f32.mrb[40].mxu1  ;;  %3605 = vrot.lane.b32.xlu1 %v14383_v41, %s6792_s27 }
 0x517   : > { %14382 = vst [vmem:[#allocation307_spill] sm:$0xff] %v10956_v3  ;;  %3637 = vrot.lane.b32.xlu0 %v14384_v62, %s6799_s16  ;;  %v10962_v13 = vpop.f32.mrb[41].mxu1  ;;  %v14388_v3 = vld [vmem:[#allocation128_spill] sm:$0xff]  ;;  %v3464_v62 = vsel %vm13579_vm13, %v10801_v36, %v2974_v58 }
 0x518   : > { %14385 = vst [vmem:[#allocation103_spill] sm:$0xff] %v10962_v13  ;;  %v10966_v7 = vpop.f32.mrb[42].mxu1  ;;  %v3011_v45 = vpop.permute.xlu1 %3010 }
 0x519   : > { %14386 = vst [vmem:[#allocation97_spill] sm:$0xff] %v10966_v7  ;;  %v10969_v54 = vsel %vm13574_vm15, %v3460_v28, %v3011_v45  ;;  %v3044_v9 = vpop.permute.xlu0 %3043  ;;  %v10971_v11 = vpop.f32.mrb[43].mxu1  ;;  %v14391_v28 = vld [vmem:[#allocation171_spill] sm:$0xff]  ;;  %v14392_v45 = vld [vmem:[#allocation149_spill] sm:$0xff] }
 0x51a   : > { %14387 = vst [vmem:[#allocation308_spill] sm:$0xff] %v10971_v11  ;;  %3609 = vrot.lane.b32.xlu1 %v14388_v3, %s6792_s27 }
 0x51b   : > { %3641 = vrot.lane.b32.xlu0 %v14389_v57, %s6799_s16 }
 0x51c   : > { %v3015_v13 = vpop.permute.xlu1 %3014 }
 0x51d   : > { %v10980_v2 = vsel %vm13574_vm15, %v3464_v62, %v3015_v13  ;;  %v3048_v24 = vpop.permute.xlu0 %3047  ;;  %v14397_v13 = vld [vmem:[#allocation227_spill] sm:$0xff]  ;;  %vm3532_vm15 = vcmask 244736  }
 0x51e   : > { %v10982_v7 = vpop.f32.mrb[44].mxu1  ;;  %3613 = vrot.lane.b32.xlu1 %v14391_v28, %s6792_s27  ;;  %v14398_v62 = vld [vmem:[#allocation179_spill] sm:$0xff] }
 0x51f   : > { %14390 = vst [vmem:[#allocation128_spill] sm:$0xff] %v10982_v7  ;;  %3645 = vrot.lane.b32.xlu0 %v14392_v45, %s6799_s16  ;;  %v10988_v11 = vpop.f32.mrb[45].mxu1 }
 0x520   : > { %14393 = vst [vmem:[#allocation118_spill] sm:$0xff] %v10988_v11  ;;  %v10990_v42 = vpop.f32.mrb[46].mxu1  ;;  %v10992_v21 = vpop.permute.xlu1 %3021  ;;  %v14402_v11 = vld [vmem:[#allocation254_spill] sm:$0xff] }
 0x521   : > { %14394 = vst [vmem:[#allocation171_spill] sm:$0xff] %v10990_v42  ;;  %14395 = vst [vmem:[#allocation149_spill] sm:$0xff] %v10992_v21  ;;  %v3052_v58 = vpop.permute.xlu0 %3051  ;;  %v10994_v36 = vpop.f32.mrb[47].mxu1  ;;  %v14403_v42 = vld [vmem:[#allocation233_spill] sm:$0xff] }
 0x522   : > { %14396 = vst [vmem:[#allocation309_spill] sm:$0xff] %v10994_v36  ;;  %3617 = vrot.lane.b32.xlu1 %v14397_v13, %s6792_s27 }
 0x523   : > { %3649 = vrot.lane.b32.xlu0 %v14398_v62, %s6799_s16 }
 0x524   : > { %v11000_v7 = vpop.permute.xlu1 %3025 }
 0x525   : > { %14399 = vst [vmem:[#allocation227_spill] sm:$0xff] %v11000_v7  ;;  %v11002_v14 = vpop.permute.xlu0 %3055  ;;  %v14409_v7 = vld [vmem:[#allocation115_spill] sm:$0xff] }
 0x526   : > { %14400 = vst [vmem:[#allocation179_spill] sm:$0xff] %v11002_v14  ;;  %v11004_v18 = vpop.f32.mrb[48].mxu1  ;;  %3621 = vrot.lane.b32.xlu1 %v14402_v11, %s6792_s27  ;;  %v3673_v14 = vrot.slane %v14409_v7, 7 }
 0x527   : > { %14401 = vst [vmem:[#allocation310_spill] sm:$0xff] %v11004_v18  ;;  %3653 = vrot.lane.b32.xlu0 %v14403_v42, %s6799_s16  ;;  %v11010_v21 = vpop.f32.mrb[49].mxu1  ;;  %v14410_v18 = vld [vmem:[#allocation276_spill] sm:$0xff] }
 0x528   : > { %14404 = vst [vmem:[#allocation254_spill] sm:$0xff] %v11010_v21  ;;  %v11012_v36 = vpop.f32.mrb[50].mxu1  ;;  %v11014_v43 = vpop.permute.xlu1 %3029  ;;  %v14414_v21 = vld [vmem:[#allocation111_spill] sm:$0xff] }
 0x529   : > { %14405 = vst [vmem:[#allocation233_spill] sm:$0xff] %v11012_v36  ;;  %14406 = vst [vmem:[#allocation311_spill] sm:$0xff] %v11014_v43  ;;  %v11016_v16 = vpop.permute.xlu0 %3059  ;;  %v11018_v15 = vpop.f32.mrb[51].mxu1  ;;  %v3674_v36 = vor.u32 %v3673_v14, %v14414_v21  ;;  %v14416_v43 = vld [vmem:[#allocation294_spill] sm:$0xff] }
 0x52a   : > { %14407 = vst [vmem:[#allocation312_spill] sm:$0xff] %v11016_v16  ;;  %14408 = vst [vmem:[#allocation313_spill] sm:$0xff] %v11018_v15  ;;  %3625 = vrot.lane.b32.xlu1 %v14410_v18, %s6792_s27 }
 0x52b   : > { %3657 = vrot.lane.b32.xlu0 %v14411_v6, %s6799_s16 }
 0x52c   : > { %v11025_v0 = vpop.permute.xlu1 %3033 }
 0x52d   : > { %14412 = vst [vmem:[#allocation115_spill] sm:$0xff] %v11025_v0  ;;  %v11027_v50 = vpop.permute.xlu0 %3063 }
 0x52e   : > { %14413 = vst [vmem:[#allocation276_spill] sm:$0xff] %v11027_v50  ;;  %v11030_v56 = vpop.f32.mrb[52].mxu1  ;;  %3629 = vrot.lane.b32.xlu1 %v14416_v43, %s6792_s27 }
 0x52f   : > { %14415 = vst [vmem:[#allocation256_spill] sm:$0xff] %v11030_v56  ;;  %3703 = vrot.lane.b32.xlu0 %v3674_v36, %s6791_s26  ;;  %v11035_v7 = vpop.f32.mrb[53].mxu1  ;;  %v3519_v56 = vsel %vm1661_vm14, %v10851_v12, %v3040_v52  ;;  %v3523_v52 = vsel %vm1661_vm14, %v10868_v32, %v3044_v9  ;;  %v14433_v9 = vld [vmem:[#allocation217_spill] sm:$0xff] }
 0x530   : > { %14417 = vst [vmem:[#allocation111_spill] sm:$0xff] %v11035_v7  ;;  %v11037_v15 = vpop.f32.mrb[54].mxu1  ;;  %v11039_v16 = vpop.permute.xlu1 %3037 }
 0x531   : > { %14418 = vst [vmem:[#allocation294_spill] sm:$0xff] %v11037_v15  ;;  %14419 = vst [vmem:[#allocation314_spill] sm:$0xff] %v11039_v16  ;;  %v11041_v53 = vpop.permute.xlu0 %3067  ;;  %v11043_v0 = vpop.f32.mrb[55].mxu1  ;;  %v14424_v16 = vld [vmem:[#allocation117_spill] sm:$0xff] }
 0x532   : > { %14420 = vst [vmem:[#allocation315_spill] sm:$0xff] %v11041_v53  ;;  %14421 = vst [vmem:[#allocation316_spill] sm:$0xff] %v11043_v0  ;;  %3633 = vrot.lane.b32.xlu1 %v10356_v38, %s6792_s27  ;;  %v14425_v0 = vld [vmem:[#allocation106_spill] sm:$0xff] }
 0x533   : > { %3705 = vrot.lane.b32.xlu0 %v3673_v14, %s6791_s26 }
 0x534   : > { %v3042_v21 = vpop.permute.xlu1 %3041 }
 0x535   : > { %v3072_v36 = vpop.permute.xlu0 %3071 }
 0x536   : > { %v11051_v7 = vsel %vm3532_vm15, %v3519_v56, %v3072_v36  ;;  %v11053_v15 = vpop.f32.mrb[56].mxu1  ;;  %3639 = vrot.lane.b32.xlu1 %v14424_v16, %s6799_s16  ;;  %v14430_v36 = vld [vmem:[#allocation154_spill] sm:$0xff] }
 0x537   : > { %14422 = vst [vmem:[#allocation317_spill] sm:$0xff] %v11051_v7  ;;  %14423 = vst [vmem:[#allocation318_spill] sm:$0xff] %v11053_v15  ;;  %3763 = vrot.lane.b32.xlu0 %v14425_v0, %s6796_s11  ;;  %v11059_v53 = vpop.f32.mrb[57].mxu1 }
 0x538   : > { %14426 = vst [vmem:[#allocation117_spill] sm:$0xff] %v11059_v53  ;;  %v11061_v14 = vpop.f32.mrb[58].mxu1  ;;  %v3046_v50 = vpop.permute.xlu1 %3045 }
 0x539   : > { %14427 = vst [vmem:[#allocation106_spill] sm:$0xff] %v11061_v14  ;;  %v3076_v12 = vpop.permute.xlu0 %3075  ;;  %v11065_v25 = vpop.f32.mrb[59].mxu1  ;;  %v3527_v14 = vsel %vm1661_vm14, %v10877_v1, %v3048_v24  ;;  %v3531_v1 = vsel %vm1661_vm14, %v10896_v29, %v3052_v58  ;;  %v14443_v58 = vld [vmem:[#allocation267_spill] sm:$0xff] }
 0x53a   : > { %14428 = vst [vmem:[#allocation319_spill] sm:$0xff] %v11065_v25  ;;  %v11068_v56 = vsel %vm3532_vm15, %v3523_v52, %v3076_v12  ;;  %3643 = vrot.lane.b32.xlu1 %v14430_v36, %s6799_s16 }
 0x53b   : > { %14429 = vst [vmem:[#allocation320_spill] sm:$0xff] %v11068_v56  ;;  %3795 = vrot.lane.b32.xlu0 %v14316_v35, %s6797_s12  ;;  %v14448_v56 = vld [vmem:[#allocation112_spill] sm:$0xff] }
 0x53c   : > { %v3050_v15 = vpop.permute.xlu1 %3049 }
 0x53d   : > { %v3080_v53 = vpop.permute.xlu0 %3079 }
 0x53e   : > { %v11077_v7 = vsel %vm3532_vm15, %v3527_v14, %v3080_v53  ;;  %v11079_v32 = vpop.f32.mrb[60].mxu1  ;;  %3647 = vrot.lane.b32.xlu1 %v14433_v9, %s6799_s16  ;;  %v14438_v14 = vld [vmem:[#allocation151_spill] sm:$0xff] }
 0x53f   : > { %14431 = vst [vmem:[#allocation154_spill] sm:$0xff] %v11077_v7  ;;  %14432 = vst [vmem:[#allocation321_spill] sm:$0xff] %v11079_v32  ;;  %3827 = vrot.lane.b32.xlu0 %v14346_v26, %s6805_s14  ;;  %v11085_v52 = vpop.f32.mrb[61].mxu1  ;;  %v3677_v25 = vrot.slane %v14438_v14, 7  ;;  %v14440_v7 = vld [vmem:[#allocation242_spill] sm:$0xff] }
 0x540   : > { %14434 = vst [vmem:[#allocation217_spill] sm:$0xff] %v11085_v52  ;;  %v11087_v12 = vpop.f32.mrb[62].mxu1  ;;  %v11089_v35 = vpop.permute.xlu1 %3053 }
 0x541   : > { %14435 = vst [vmem:[#allocation322_spill] sm:$0xff] %v11087_v12  ;;  %14436 = vst [vmem:[#allocation323_spill] sm:$0xff] %v11089_v35  ;;  %v3084_v24 = vpop.permute.xlu0 %3083  ;;  %v11093_v53 = vpop.f32.mrb[63].mxu1  ;;  %v14442_v12 = vld [vmem:[#allocation148_spill] sm:$0xff]  ;;  %v14454_v35 = vld [vmem:[#allocation101_spill] sm:$0xff] }
 0x542   : > { %14437 = vst [vmem:[#allocation324_spill] sm:$0xff] %v11093_v53  ;;  %v11097_v32 = vsel %vm3532_vm15, %v3531_v1, %v3084_v24  ;;  %3651 = vrot.lane.b32.xlu1 %v14440_v7, %s6799_s16  ;;  %v3678_v29 = vor.u32 %v3677_v25, %v14442_v12  ;;  %v14445_v1 = vld [vmem:[#allocation116_spill] sm:$0xff] }
 0x543   : > { %14439 = vst [vmem:[#allocation151_spill] sm:$0xff] %v11097_v32  ;;  %3859 = vrot.lane.b32.xlu0 %v14424_v16, %s6804_s20  ;;  %v3675_v24 = vrot.slane %v14445_v1, 7  ;;  %v14446_v32 = vld [vmem:[#allocation200_spill] sm:$0xff] }
 0x544   : > { %v11103_v26 = vpop.permute.xlu1 %3057 }
 0x545   : > { %14441 = vst [vmem:[#allocation242_spill] sm:$0xff] %v11103_v26  ;;  %v11105_v52 = vpop.permute.xlu0 %3567  ;;  %v3676_v12 = vor.u32 %v3675_v24, %v14448_v56 }
 0x546   : > { %3655 = vrot.lane.b32.xlu1 %v14443_v58, %s6799_s16 }
 0x547   : > { %3711 = vrot.lane.b32.xlu0 %v3678_v29, %s6791_s26  ;;  %v14449_v29 = vld [vmem:[#allocation130_spill] sm:$0xff] }
 0x548   : > { %v11111_v14 = vpop.permute.xlu1 %3061 }
 0x549   : > { %14444 = vst [vmem:[#allocation148_spill] sm:$0xff] %v11111_v14  ;;  %v11114_v53 = vpop.permute.xlu0 %3571 }
 0x54a   : > { %3659 = vrot.lane.b32.xlu1 %v14446_v32, %s6799_s16 }
 0x54b   : > { %3713 = vrot.lane.b32.xlu0 %v3677_v25, %s6791_s26  ;;  %v3521_v25 = vsel %vm1661_vm14, %v10954_v20, %v3042_v21  ;;  %v14457_v21 = vld [vmem:[#allocation216_spill] sm:$0xff] }
 0x54c   : > { %v11119_v16 = vpop.permute.xlu1 %3065 }
 0x54d   : > { %14447 = vst [vmem:[#allocation267_spill] sm:$0xff] %v11119_v16  ;;  %v11122_v26 = vpop.permute.xlu0 %3575 }
 0x54e   : > { %3707 = vrot.lane.b32.xlu1 %v3676_v12, %s6791_s26 }
 0x54f   : > { %3767 = vrot.lane.b32.xlu0 %v14449_v29, %s6796_s11 }
 0x550   : > { %v11127_v14 = vpop.permute.xlu1 %3069 }
 0x551   : > { %14450 = vst [vmem:[#allocation116_spill] sm:$0xff] %v11127_v14  ;;  %v11129_v1 = vpop.permute.xlu0 %3579 }
 0x552   : > { %14451 = vst [vmem:[#allocation200_spill] sm:$0xff] %v11129_v1  ;;  %3709 = vrot.lane.b32.xlu1 %v3675_v24, %s6791_s26  ;;  %v3525_v24 = vsel %vm1661_vm14, %v10969_v54, %v3046_v50 }
 0x553   : > { %3799 = vrot.lane.b32.xlu0 %v14321_v34, %s6797_s12 }
 0x554   : > { %v3074_v56 = vpop.permute.xlu1 %3073 }
 0x555   : > { %v11137_v16 = vsel %vm3532_vm15, %v3521_v25, %v3074_v56  ;;  %v11139_v12 = vpop.permute.xlu0 %3583  ;;  %v3681_v25 = vrot.slane %v14457_v21, 7  ;;  %v14461_v21 = vld [vmem:[#allocation145_spill] sm:$0xff] }
 0x556   : > { %14452 = vst [vmem:[#allocation112_spill] sm:$0xff] %v11137_v16  ;;  %14453 = vst [vmem:[#allocation130_spill] sm:$0xff] %v11139_v12  ;;  %3765 = vrot.lane.b32.xlu1 %v14454_v35, %s6796_s11  ;;  %v14473_v16 = vld [vmem:[#allocation178_spill] sm:$0xff] }
 0x557   : > { %3831 = vrot.lane.b32.xlu0 %v14351_v19, %s6805_s14  ;;  %v3529_v19 = vsel %vm1661_vm14, %v10980_v2, %v3050_v15  ;;  %v14463_v2 = vld [vmem:[#allocation140_spill] sm:$0xff] }
 0x558   : > { %v3078_v14 = vpop.permute.xlu1 %3077 }
 0x559   : > { %v11148_v34 = vsel %vm3532_vm15, %v3525_v24, %v3078_v14  ;;  %v11150_v20 = vpop.permute.xlu0 %3587  ;;  %v14460_v14 = vld [vmem:[#allocation213_spill] sm:$0xff] }
 0x55a   : > { %14455 = vst [vmem:[#allocation101_spill] sm:$0xff] %v11148_v34  ;;  %14456 = vst [vmem:[#allocation325_spill] sm:$0xff] %v11150_v20  ;;  %3797 = vrot.lane.b32.xlu1 %v14342_v17, %s6797_s12  ;;  %v3682_v24 = vor.u32 %v3681_v25, %v14460_v14  ;;  %v14478_v20 = vld [vmem:[#allocation172_spill] sm:$0xff] }
 0x55b   : > { %3863 = vrot.lane.b32.xlu0 %v14430_v36, %s6804_s20  ;;  %v3679_v36 = vrot.slane %v14461_v21, 7  ;;  %v14466_v21 = vld [vmem:[#allocation124_spill] sm:$0xff] }
 0x55c   : > { %v3082_v56 = vpop.permute.xlu1 %3081 }
 0x55d   : > { %v11160_v50 = vsel %vm3532_vm15, %v3529_v19, %v3082_v56  ;;  %v11162_v54 = vpop.permute.xlu0 %3591  ;;  %v3680_v19 = vor.u32 %v3679_v36, %v14463_v2 }
 0x55e   : > { %14458 = vst [vmem:[#allocation216_spill] sm:$0xff] %v11160_v50  ;;  %14459 = vst [vmem:[#allocation326_spill] sm:$0xff] %v11162_v54  ;;  %3829 = vrot.lane.b32.xlu1 %v14383_v41, %s6805_s14  ;;  %v14465_v41 = vld [vmem:[#allocation167_spill] sm:$0xff] }
 0x55f   : > { %3719 = vrot.lane.b32.xlu0 %v3682_v24, %s6791_s26  ;;  %v14471_v50 = vld [vmem:[#allocation203_spill] sm:$0xff] }
 0x560   : > { %v11168_v17 = vpop.permute.xlu1 %3565 }
 0x561   : > { %v11171_v34 = vpop.permute.xlu0 %3595 }
 0x562   : > { %14462 = vst [vmem:[#allocation213_spill] sm:$0xff] %v11171_v34  ;;  %3861 = vrot.lane.b32.xlu1 %v14389_v57, %s6804_s20 }
 0x563   : > { %3721 = vrot.lane.b32.xlu0 %v3681_v25, %s6791_s26 }
 0x564   : > { %v11176_v15 = vpop.permute.xlu1 %3569 }
 0x565   : > { %v11179_v56 = vpop.permute.xlu0 %3599 }
 0x566   : > { %14464 = vst [vmem:[#allocation145_spill] sm:$0xff] %v11179_v56  ;;  %3715 = vrot.lane.b32.xlu1 %v3680_v19, %s6791_s26  ;;  %v3683_v56 = vrot.slane %v14473_v16, 7 }
 0x567   : > { %3771 = vrot.lane.b32.xlu0 %v14465_v41, %s6796_s11 }
 0x568   : > { %v11184_v14 = vpop.permute.xlu1 %3573 }
 0x569   : > { %v11186_v24 = vpop.permute.xlu0 %3603 }
 0x56a   : > { %3717 = vrot.lane.b32.xlu1 %v3679_v36, %s6791_s26 }
 0x56b   : > { %3803 = vrot.lane.b32.xlu0 %v14324_v23, %s6797_s12 }
 0x56c   : > { %v11191_v57 = vpop.permute.xlu1 %3577 }
 0x56d   : > { %v11193_v25 = vpop.permute.xlu0 %3607 }
 0x56e   : > { %3769 = vrot.lane.b32.xlu1 %v14466_v21, %s6796_s11 }
 0x56f   : > { %3835 = vrot.lane.b32.xlu0 %v14354_v48, %s6805_s14 }
 0x570   : > { %v11199_v2 = vpop.permute.xlu1 %3581 }
 0x571   : > { %14467 = vst [vmem:[#allocation140_spill] sm:$0xff] %v11199_v2  ;;  %v11201_v19 = vpop.permute.xlu0 %3611 }
 0x572   : > { %14468 = vst [vmem:[#allocation124_spill] sm:$0xff] %v11201_v19  ;;  %3801 = vrot.lane.b32.xlu1 %v14345_v46, %s6797_s12  ;;  %v14475_v46 = vld [vmem:[#allocation186_spill] sm:$0xff] }
 0x573   : > { %3867 = vrot.lane.b32.xlu0 %v14433_v9, %s6804_s20  ;;  %v14476_v9 = vrot.slane %v14475_v46, 7 }
 0x574   : > { %v11207_v23 = vpop.permute.xlu1 %3585 }
 0x575   : > { %14469 = vst [vmem:[#allocation327_spill] sm:$0xff] %v11207_v23  ;;  %v11209_v36 = vpop.permute.xlu0 %3615 }
 0x576   : > { %14470 = vst [vmem:[#allocation328_spill] sm:$0xff] %v11209_v36  ;;  %3833 = vrot.lane.b32.xlu1 %v14388_v3, %s6805_s14  ;;  %v3684_v3 = vor.u32 %v3683_v56, %v14478_v20  ;;  %v14484_v20 = vld [vmem:[#allocation160_spill] sm:$0xff] }
 0x577   : > { %3727 = vrot.lane.b32.xlu0 %v14471_v50, %s6791_s26  ;;  %v14480_v50 = vld [vmem:[#allocation225_spill] sm:$0xff] }
 0x578   : > { %v11215_v48 = vpop.permute.xlu1 %3589 }
 0x579   : > { %14472 = vst [vmem:[#allocation203_spill] sm:$0xff] %v11215_v48  ;;  %v11218_v34 = vpop.permute.xlu0 %3619 }
 0x57a   : > { %14474 = vst [vmem:[#allocation178_spill] sm:$0xff] %v11218_v34  ;;  %3865 = vrot.lane.b32.xlu1 %v14392_v45, %s6804_s20 }
 0x57b   : > { %3729 = vrot.lane.b32.xlu0 %v14476_v9, %s6791_s26 }
 0x57c   : > { %v11225_v54 = vpop.permute.xlu1 %3593 }
 0x57d   : > { %14477 = vst [vmem:[#allocation186_spill] sm:$0xff] %v11225_v54  ;;  %v11228_v12 = vpop.permute.xlu0 %3623 }
 0x57e   : > { %14479 = vst [vmem:[#allocation172_spill] sm:$0xff] %v11228_v12  ;;  %3723 = vrot.lane.b32.xlu1 %v3684_v3, %s6791_s26 }
 0x57f   : > { %3775 = vrot.lane.b32.xlu0 %v14480_v50, %s6796_s11 }
 0x580   : > { %v11233_v16 = vpop.permute.xlu1 %3597 }
 0x581   : > { %14481 = vst [vmem:[#allocation329_spill] sm:$0xff] %v11233_v16  ;;  %v11235_v48 = vpop.permute.xlu0 %3627  ;;  %v14485_v16 = vld [vmem:[#allocation205_spill] sm:$0xff] }
 0x582   : > { %14482 = vst [vmem:[#allocation330_spill] sm:$0xff] %v11235_v48  ;;  %3725 = vrot.lane.b32.xlu1 %v3683_v56, %s6791_s26 }
 0x583   : > { %3807 = vrot.lane.b32.xlu0 %v14328_v61, %s6797_s12 }
 0x584   : > { %v11240_v45 = vpop.permute.xlu1 %3601 }
 0x585   : > { %v11242_v46 = vpop.permute.xlu0 %3631 }
 0x586   : > { %14483 = vst [vmem:[#allocation331_spill] sm:$0xff] %v11242_v46  ;;  %3773 = vrot.lane.b32.xlu1 %v14484_v20, %s6796_s11 }
 0x587   : > { %3839 = vrot.lane.b32.xlu0 %v14360_v47, %s6805_s14 }
 0x588   : > { %v11248_v9 = vpop.permute.xlu1 %3605 }
 0x589   : > { %v11250_v3 = vpop.permute.xlu0 %3637 }
 0x58a   : > { %3805 = vrot.lane.b32.xlu1 %v14350_v30, %s6797_s12  ;;  %v14486_v30 = vld [vmem:[#allocation191_spill] sm:$0xff] }
 0x58b   : > { %3871 = vrot.lane.b32.xlu0 %v14440_v7, %s6804_s20  ;;  %v14487_v7 = vrot.slane %v14486_v30, 7 }
 0x58c   : > { %v11256_v61 = vpop.permute.xlu1 %3609 }
 0x58d   : > { %v11258_v56 = vpop.permute.xlu0 %3641 }
 0x58e   : > { %3837 = vrot.lane.b32.xlu1 %v14391_v28, %s6805_s14  ;;  %v14489_v28 = vld [vmem:[#allocation206_spill] sm:$0xff] }
 0x58f   : > { %3735 = vrot.lane.b32.xlu0 %v14485_v16, %s6791_s26  ;;  %v14490_v16 = vld [vmem:[#allocation245_spill] sm:$0xff] }
 0x590   : > { %v11264_v47 = vpop.permute.xlu1 %3613 }
 0x591   : > { %v11266_v46 = vpop.permute.xlu0 %3645 }
 0x592   : > { %3869 = vrot.lane.b32.xlu1 %v14398_v62, %s6804_s20  ;;  %v14493_v62 = vld [vmem:[#allocation190_spill] sm:$0xff] }
 0x593   : > { %3737 = vrot.lane.b32.xlu0 %v14487_v7, %s6791_s26  ;;  %v14494_v23 = vrot.slane %v14493_v62, 7  ;;  %v14500_v62 = vld [vmem:[#allocation207_spill] sm:$0xff] }
 0x594   : > { %v11273_v54 = vpop.permute.xlu1 %3617 }
 0x595   : > { %14488 = vst [vmem:[#allocation160_spill] sm:$0xff] %v11273_v54  ;;  %v11275_v48 = vpop.permute.xlu0 %3649 }
 0x596   : > { %3731 = vrot.lane.b32.xlu1 %v14489_v28, %s6791_s26  ;;  %v14497_v28 = vld [vmem:[#allocation218_spill] sm:$0xff] }
 0x597   : > { %3779 = vrot.lane.b32.xlu0 %v14490_v16, %s6796_s11 }
 0x598   : > { %v11281_v12 = vpop.permute.xlu1 %3621 }
 0x599   : > { %14491 = vst [vmem:[#allocation205_spill] sm:$0xff] %v11281_v12  ;;  %v11283_v34 = vpop.permute.xlu0 %3653 }
 0x59a   : > { %14492 = vst [vmem:[#allocation191_spill] sm:$0xff] %v11283_v34  ;;  %3733 = vrot.lane.b32.xlu1 %v14494_v23, %s6791_s26 }
 0x59b   : > { %3811 = vrot.lane.b32.xlu0 %v14330_v33, %s6797_s12 }
 0x59c   : > { %v11290_v30 = vpop.permute.xlu1 %3625 }
 0x59d   : > { %14495 = vst [vmem:[#allocation206_spill] sm:$0xff] %v11290_v30  ;;  %v11292_v7 = vpop.permute.xlu0 %3657 }
 0x59e   : > { %14496 = vst [vmem:[#allocation190_spill] sm:$0xff] %v11292_v7  ;;  %3777 = vrot.lane.b32.xlu1 %v14497_v28, %s6796_s11  ;;  %v14518_v28 = vld [vmem:[#allocation157_spill] sm:$0xff] }
 0x59f   : > { %3843 = vrot.lane.b32.xlu0 %v14365_v5, %s6805_s14 }
 0x5a0   : > { %v11298_v16 = vpop.permute.xlu1 %3629 }
 0x5a1   : > { %14498 = vst [vmem:[#allocation332_spill] sm:$0xff] %v11298_v16  ;;  %v3704_v12 = vpop.permute.xlu0 %3703 }
 0x5a2   : > { %3809 = vrot.lane.b32.xlu1 %v14353_v10, %s6797_s12  ;;  %v14501_v10 = vld [vmem:[#allocation195_spill] sm:$0xff] }
 0x5a3   : > { %3875 = vrot.lane.b32.xlu0 %v14443_v58, %s6804_s20  ;;  %v14502_v58 = vrot.slane %v14501_v10, 7 }
 0x5a4   : > { %v11304_v33 = vpop.permute.xlu1 %3633 }
 0x5a5   : > { %14499 = vst [vmem:[#allocation333_spill] sm:$0xff] %v11304_v33  ;;  %v11306_v23 = vpop.permute.xlu0 %3705 }
 0x5a6   : > { %3841 = vrot.lane.b32.xlu1 %v14397_v13, %s6805_s14  ;;  %v14503_v13 = vld [vmem:[#allocation208_spill] sm:$0xff] }
 0x5a7   : > { %3743 = vrot.lane.b32.xlu0 %v14500_v62, %s6791_s26  ;;  %v14504_v62 = vld [vmem:[#allocation123_spill] sm:$0xff] }
 0x5a8   : > { %v11312_v5 = vpop.permute.xlu1 %3639 }
 0x5a9   : > { %v11314_v16 = vpop.permute.xlu0 %3763 }
 0x5aa   : > { %3873 = vrot.lane.b32.xlu1 %v14403_v42, %s6804_s20  ;;  %v14506_v42 = vld [vmem:[#allocation193_spill] sm:$0xff] }
 0x5ab   : > { %3745 = vrot.lane.b32.xlu0 %v14502_v58, %s6791_s26  ;;  %v14507_v50 = vrot.slane %v14506_v42, 7 }
 0x5ac   : > { %v11321_v33 = vpop.permute.xlu1 %3643 }
 0x5ad   : > { %v11323_v30 = vpop.permute.xlu0 %3795 }
 0x5ae   : > { %3739 = vrot.lane.b32.xlu1 %v14503_v13, %s6791_s26  ;;  %v14509_v13 = vld [vmem:[#allocation239_spill] sm:$0xff] }
 0x5af   : > { %3783 = vrot.lane.b32.xlu0 %v14504_v62, %s6796_s11 }
 0x5b0   : > { %v11329_v7 = vpop.permute.xlu1 %3647 }
 0x5b1   : > { %14505 = vst [vmem:[#allocation207_spill] sm:$0xff] %v11329_v7  ;;  %v11331_v36 = vpop.permute.xlu0 %3827 }
 0x5b2   : > { %3741 = vrot.lane.b32.xlu1 %v14507_v50, %s6791_s26 }
 0x5b3   : > { %3815 = vrot.lane.b32.xlu0 %v14333_v59, %s6797_s12 }
 0x5b4   : > { %v11338_v10 = vpop.permute.xlu1 %3651 }
 0x5b5   : > { %14508 = vst [vmem:[#allocation195_spill] sm:$0xff] %v11338_v10  ;;  %v11340_v58 = vpop.permute.xlu0 %3859  ;;  %v14515_v10 = vld [vmem:[#allocation194_spill] sm:$0xff] }
 0x5b6   : > { %3781 = vrot.lane.b32.xlu1 %v14509_v13, %s6796_s11 }
 0x5b7   : > { %3847 = vrot.lane.b32.xlu0 %v14372_v49, %s6805_s14 }
 0x5b8   : > { %v11346_v62 = vpop.permute.xlu1 %3655 }
 0x5b9   : > { %14510 = vst [vmem:[#allocation208_spill] sm:$0xff] %v11346_v62  ;;  %v3712_v1 = vpop.permute.xlu0 %3711  ;;  %v14513_v62 = vld [vmem:[#allocation209_spill] sm:$0xff] }
 0x5ba   : > { %3813 = vrot.lane.b32.xlu1 %v14359_v4, %s6797_s12  ;;  %v14512_v4 = vld [vmem:[#allocation199_spill] sm:$0xff] }
 0x5bb   : > { %3879 = vrot.lane.b32.xlu0 %v14446_v32, %s6804_s20 }
 0x5bc   : > { %v11352_v59 = vpop.permute.xlu1 %3659 }
 0x5bd   : > { %14511 = vst [vmem:[#allocation193_spill] sm:$0xff] %v11352_v59  ;;  %v11354_v50 = vpop.permute.xlu0 %3713 }
 0x5be   : > { %3845 = vrot.lane.b32.xlu1 %v14402_v11, %s6805_s14  ;;  %v14514_v11 = vld [vmem:[#allocation296_spill] sm:$0xff] }
 0x5bf   : > { %3663 = vrot.lane.b32.xlu0 %v14246_v22, %s6799_s16 }
 0x5c0   : > { %v11360_v49 = vpop.permute.xlu1 %3707 }
 0x5c1   : > { %v11362_v42 = vpop.permute.xlu0 %3767 }
 0x5c2   : > { %3877 = vrot.lane.b32.xlu1 %v14411_v6, %s6804_s20  ;;  %v14516_v6 = vrot.slane %v14515_v10, 7  ;;  %v14520_v10 = vld [vmem:[#allocation163_spill] sm:$0xff] }
 0x5c3   : > { %3661 = vrot.lane.b32.xlu0 %v14512_v4, %s6799_s16 }
 0x5c4   : > { %v11368_v32 = vpop.permute.xlu1 %3709 }
 0x5c5   : > { %v11370_v59 = vpop.permute.xlu0 %3799 }
 0x5c6   : > { %3747 = vrot.lane.b32.xlu1 %v14513_v62, %s6791_s26  ;;  %v14517_v62 = vld [vmem:[#allocation263_spill] sm:$0xff] }
 0x5c7   : > { %3665 = vrot.lane.b32.xlu0 %v14514_v11, %s6799_s16 }
 0x5c8   : > { %v11376_v22 = vpop.permute.xlu1 %3765 }
 0x5c9   : > { %v11378_v13 = vpop.permute.xlu0 %3831 }
 0x5ca   : > { %3749 = vrot.lane.b32.xlu1 %v14516_v6, %s6791_s26  ;;  %v3091_v6 = vsel %vm3085_vm2, %v14304_v27, %v14520_v10 }
 0x5cb   : > { %3789 = vrot.lane.b32.xlu0 %v14111_v51, %s6796_s11 }
 0x5cc   : > { %v11385_v34 = vpop.permute.xlu1 %3797 }
 0x5cd   : > { %v11387_v54 = vpop.permute.xlu0 %3863 }
 0x5ce   : > { %3785 = vrot.lane.b32.xlu1 %v14517_v62, %s6796_s11 }
 0x5cf   : > { %3787 = vrot.lane.b32.xlu0 %v14518_v28, %s6796_s11  ;;  %v14522_v28 = vld [vmem:[#allocation146_spill] sm:$0xff] }
 0x5d0   : > { %v11393_v2 = vpop.permute.xlu1 %3829  ;;  %v3121_v62 = vsel %vm340_vm8, %v3091_v6, %v14522_v28  ;;  %v14526_v28 = vld [vmem:[#allocation180_spill] sm:$0xff] }
 0x5d1   : > { %14519 = vst [vmem:[#allocation199_spill] sm:$0xff] %v11393_v2  ;;  %v3720_v7 = vpop.permute.xlu0 %3719  ;;  %v14525_v2 = vld [vmem:[#allocation220_spill] sm:$0xff] }
 0x5d2   : > { %3817 = vrot.lane.b32.xlu1 %v14364_v39, %s6797_s12  ;;  %v14523_v39 = vld [vmem:[#allocation165_spill] sm:$0xff]  ;;  %v3095_v27 = vsel %vm3085_vm2, %v14314_v40, %v14525_v2 }
 0x5d3   : > { %3791 = vrot.lane.b32.xlu0 %v10234_v55, %s6796_s11  ;;  %v11414_v55 = vsel %vm3146_vm3, %v3121_v62, %v14523_v39  ;;  %v14527_v62 = vld [vmem:[#allocation224_spill] sm:$0xff]  ;;  %v14529_v40 = vld [vmem:[#allocation241_spill] sm:$0xff] }
 0x5d4   : > { %v11402_v51 = vpop.permute.xlu1 %3861  ;;  %14524 = vst [vmem:[#allocation296_spill] sm:$0xff] %v11414_v55  ;;  %v3099_v2 = vsel %vm3085_vm2, %v14319_v44, %v14529_v40  ;;  %v14534_v44 = vld [vmem:[#allocation11_spill] sm:$0xff]  ;;  %v14535_v40 = vld [vmem:[#allocation244_spill] sm:$0xff] }
 0x5d5   : > { %14521 = vst [vmem:[#allocation209_spill] sm:$0xff] %v11402_v51  ;;  %v11404_v19 = vpop.permute.xlu0 %3721  ;;  %v4000_v51 = vsel %vm1496_vm9, %v11414_v55, %v3704_v12  ;;  %v14530_v12 = vld [vmem:[#allocation184_spill] sm:$0xff] }
 0x5d6   : > { %3849 = vrot.lane.b32.xlu1 %v14410_v18, %s6805_s14  ;;  %v4061_v39 = vsel %vm3207_vm6, %v4000_v51, %v14530_v12 }
 0x5d7   : > { %3853 = vrot.lane.b32.xlu0 %v10372_v60, %s6805_s14  ;;  %v3125_v60 = vsel %vm340_vm8, %v3095_v27, %v14526_v28  ;;  %v14531_v28 = vld [vmem:[#allocation210_spill] sm:$0xff] }
 0x5d8   : > { %v11419_v10 = vpop.permute.xlu1 %3715  ;;  %v11433_v6 = vsel %vm3146_vm3, %v3125_v60, %v14527_v62  ;;  %v14533_v62 = vld [vmem:[#allocation236_spill] sm:$0xff] }
 0x5d9   : > { %v11423_v18 = vpop.permute.xlu0 %3771  ;;  %14528 = vst [vmem:[#allocation194_spill] sm:$0xff] %v11433_v6  ;;  %v4109_v41 = vsel %vm1529_vm10, %v4061_v39, %v14533_v62 }
 0x5da   : > { %3881 = vrot.lane.b32.xlu1 %v14512_v4, %s6804_s20  ;;  %v4008_v4 = vsel %vm1496_vm9, %v11433_v6, %v3712_v1  ;;  %v3892_v1 = vsel %vm3085_vm2, %v14338_v37, %v11168_v17  ;;  %v14538_v37 = vld [vmem:[#allocation211_spill] sm:$0xff] }
 0x5db   : > { %3851 = vrot.lane.b32.xlu0 %v14416_v43, %s6805_s14  ;;  %v14532_v43 = vld [vmem:[#allocation234_spill] sm:$0xff]  ;;  %v3928_v39 = vsel %vm340_vm8, %v3892_v1, %v11240_v45 }
 0x5dc   : > { %v11440_v55 = vpop.permute.xlu1 %3717  ;;  %v3129_v60 = vsel %vm340_vm8, %v3099_v2, %v14532_v43  ;;  %v14540_v45 = vld [vmem:[#allocation10_spill] sm:$0xff] }
 0x5dd   : > { %v3804_v27 = vpop.permute.xlu0 %3803  ;;  %v11455_v12 = vsel %vm3146_vm3, %v3129_v60, %v14535_v40  ;;  %v3964_v60 = vsel %vm3146_vm3, %v3928_v39, %v11250_v3  ;;  %v14537_v40 = vld [vmem:[#allocation222_spill] sm:$0xff]  ;;  %v14542_v39 = vld [vmem:[#allocation253_spill] sm:$0xff] }
 0x5de   : > { %3751 = vrot.lane.b32.xlu1 %v14531_v28, %s6791_s26  ;;  %v14536_v28 = vld [vmem:[#allocation230_spill] sm:$0xff]  ;;  %v4157_v51 = vsel %vm3272_vm4, %v4109_v41, %v14537_v40  ;;  %v4002_v17 = vsel %vm1496_vm9, %v3964_v60, %v11306_v23  ;;  %v3896_v41 = vsel %vm3085_vm2, %v14454_v35, %v11176_v15 }
 0x5df   : > { %3855 = vrot.lane.b32.xlu0 %v10356_v38, %s6805_s14  ;;  %v4067_v6 = vsel %vm3207_vm6, %v4008_v4, %v14536_v28  ;;  %v4016_v38 = vsel %vm1496_vm9, %v11455_v12, %v3720_v7  ;;  %v14539_v4 = vld [vmem:[#allocation259_spill] sm:$0xff]  ;;  %v14541_v7 = vrot.slane %v14534_v44, 7  ;;  %v4063_v3 = vsel %vm3207_vm6, %v4002_v17, %v11314_v16  ;;  %v14544_v16 = vld [vmem:[#allocation73_spill] sm:$0xff]  ;;  %v14545_v17 = vld [vmem:[#allocation196_spill] sm:$0xff] }
 0x5e0   : > { %v11462_v2 = vpop.permute.xlu1 %3769  ;;  %v4115_v62 = vsel %vm1529_vm10, %v4067_v6, %v14539_v4  ;;  %v4073_v23 = vsel %vm3207_vm6, %v4016_v38, %v14542_v39  ;;  %v3932_v6 = vsel %vm340_vm8, %v3896_v41, %v11248_v9  ;;  %v14546_v39 = vrot.slane %v14545_v17, 7 }
 0x5e1   : > { %v3836_v43 = vpop.permute.xlu0 %3835  ;;  %v3702_v1 = vor.u32 %v14541_v7, %v14540_v45  ;;  %v4111_v45 = vsel %vm1529_vm10, %v4063_v3, %v11323_v30  ;;  %v3968_v35 = vsel %vm3146_vm3, %v3932_v6, %v11258_v56  ;;  %v4163_v38 = vsel %vm3272_vm4, %v4115_v62, %v14544_v16 }
 0x5e2   : > { %3755 = vrot.lane.b32.xlu1 %v14538_v37, %s6791_s26  ;;  %v14543_v37 = vld [vmem:[#allocation47_spill] sm:$0xff]  ;;  %v4159_v15 = vsel %vm3272_vm4, %v4111_v45, %v11331_v36  ;;  %v3900_v9 = vsel %vm3085_vm2, %v14466_v21, %v11184_v14  ;;  %v4010_v56 = vsel %vm1496_vm9, %v3968_v35, %v11354_v50  ;;  %v14549_v45 = vld [vmem:[#allocation197_spill] sm:$0xff] }
 0x5e3   : > { %3667 = vrot.lane.b32.xlu0 %v10458_v63, %s6799_s16  ;;  %v4205_v4 = vsel %vm1562_vm11, %v4157_v51, %v14543_v37  ;;  %v4207_v30 = vsel %vm1562_vm11, %v4159_v15, %v11340_v58  ;;  %v14547_v51 = vld [vmem:[#allocation298_spill] sm:$0xff]  ;;  %v3936_v62 = vsel %vm340_vm8, %v3900_v9, %v11256_v61  ;;  %v4069_v41 = vsel %vm3207_vm6, %v4010_v56, %v11362_v42  ;;  %v14551_v15 = vld [vmem:[#allocation13_spill] sm:$0xff]  ;;  %v14552_v9 = vld [vmem:[#allocation204_spill] sm:$0xff] }
 0x5e4   : > { %v11490_v60 = vpop.permute.xlu1 %3801  ;;  %v4121_v36 = vsel %vm1529_vm10, %v4073_v23, %v14547_v51  ;;  %v4255_v14 = vshll.u32 %v4205_v4, 16  ;;  %v3972_v21 = vsel %vm3146_vm3, %v3936_v62, %v11266_v46  ;;  %v4211_v58 = vsel %vm1562_vm11, %v4163_v38, %v10267_v31  ;;  %v14548_v23 = vld [vmem:[#allocation182_spill] sm:$0xff] }
 0x5e5   : > { %v3868_v7 = vpop.permute.xlu0 %3867  ;;  %v4117_v50 = vsel %vm1529_vm10, %v4069_v41, %v11370_v59  ;;  %v4169_v42 = vsel %vm3272_vm4, %v4121_v36, %v14548_v23  ;;  %v14550_v46 = vrot.slane %v14549_v45, 7  ;;  %v4018_v59 = vsel %vm1496_vm9, %v3972_v21, %v11404_v19  ;;  %v14553_v36 = vld [vmem:[#allocation135_spill] sm:$0xff]  ;;  %v14668_v23 = vld [vmem:[#allocation206_spill] sm:$0xff] }
 0x5e6   : > { %3753 = vrot.lane.b32.xlu1 %v14546_v39, %s6791_s26  ;;  %v4165_v61 = vsel %vm3272_vm4, %v4117_v50, %v11378_v13  ;;  %v4075_v13 = vsel %vm3207_vm6, %v4018_v59, %v11423_v18  ;;  %v4257_v17 = vrot.slane %v4255_v14, 1  ;;  %v14554_v50 = vld [vmem:[#allocation28_spill] sm:$0xff]  ;;  %v4253_v18 = vshrl.u32 %v4205_v4, 16 }
 0x5e7   : > { %3759 = vrot.lane.b32.xlu0 %v3702_v1, %s6791_s26  ;;  %v4259_v1 = vshll.u32 %v4207_v30, 16  ;;  %v4213_v35 = vsel %vm1562_vm11, %v4165_v61, %v11387_v54  ;;  %v4217_v30 = vsel %vm1562_vm11, %v4169_v42, %v14552_v9  ;;  %v4123_v56 = vsel %vm1529_vm10, %v4075_v13, %v3804_v27  ;;  %v14556_v61 = vld [vmem:[#allocation268_spill] sm:$0xff]  ;;  %v14660_v9 = vld [vmem:[#allocation149_spill] sm:$0xff] }
 0x5e8   : > { %v11521_v3 = vpop.permute.xlu1 %3833  ;;  %v4279_v41 = vshll.u32 %v4213_v35, 16  ;;  %v4171_v21 = vsel %vm3272_vm4, %v4123_v56, %v3836_v43  ;;  %v14558_v35 = vld [vmem:[#allocation105_spill] sm:$0xff] }
 0x5e9   : > { %v3728_v39 = vpop.permute.xlu0 %3727  ;;  %v4261_v19 = vrot.slane %v4259_v1, 1  ;;  %v4219_v14 = vsel %vm1562_vm11, %v4171_v21, %v3868_v7  ;;  %v4295_v1 = vshll.u32 %v4217_v30, 16  ;;  %v14559_v7 = vld [vmem:[#allocation177_spill] sm:$0xff]  ;;  %v14560_v21 = vld [vmem:[#allocation198_spill] sm:$0xff] }
 0x5ea   : > { %v4024_v6 = vsel %vm1496_vm9, %v10527_v8, %v3728_v39  ;;  %3757 = vrot.lane.b32.xlu1 %v14550_v46, %s6791_s26  ;;  %v4275_v8 = vshll.u32 %v4211_v58, 16  ;;  %v14555_v39 = vld [vmem:[#allocation12_spill] sm:$0xff]  ;;  %v14557_v46 = vld [vmem:[#allocation219_spill] sm:$0xff]  ;;  %v4281_v13 = vrot.slane %v4279_v41, 1  ;;  %v4299_v4 = vshll.u32 %v4219_v14, 16  ;;  %v14562_v41 = vld [vmem:[#allocation246_spill] sm:$0xff] }
 0x5eb   : > { %3671 = vrot.lane.b32.xlu0 %v14551_v15, %s6799_s16  ;;  %v4079_v54 = vsel %vm3207_vm6, %v4024_v6, %v14553_v36  ;;  %v4258_v6 = vor.u32 %v4257_v17, %v4253_v18  ;;  %v3093_v43 = vsel %vm3085_vm2, %v14558_v35, %v14557_v46  ;;  %v4273_v36 = vshrl.u32 %v4211_v58, 16  ;;  %v14561_v18 = vld [vmem:[#allocation212_spill] sm:$0xff]  ;;  %v14563_v14 = vld [vmem:[#allocation126_spill] sm:$0xff] }
 0x5ec   : > { %v11546_v38 = vpop.permute.xlu1 %3865  ;;  %v4127_v27 = vsel %vm1529_vm10, %v4079_v54, %v14556_v61  ;;  %v4277_v45 = vrot.slane %v4275_v8, 1  ;;  %v3097_v61 = vsel %vm3085_vm2, %v14563_v14, %v14562_v41  ;;  %v4301_v35 = vrot.slane %v4299_v4, 1  ;;  %v14567_v4 = vld [vmem:[#allocation235_spill] sm:$0xff]  ;;  %v14570_v41 = vld [vmem:[#allocation164_spill] sm:$0xff] }
 0x5ed   : > { %v3730_v62 = vpop.permute.xlu0 %3729  ;;  %v4262_v56 = vsel %vm917_vm5, %v4258_v6, %v4261_v19  ;;  %v4175_v54 = vsel %vm3272_vm4, %v4127_v27, %v14560_v21  ;;  %v14564_v19 = vld [vmem:[#allocation33_spill] sm:$0xff]  ;;  %v14565_v27 = vld [vmem:[#allocation299_spill] sm:$0xff] }
 0x5ee   : > { %3821 = vrot.lane.b32.xlu1 %v14554_v50, %s6797_s12  ;;  %v4278_v8 = vor.u32 %v4277_v45, %v4273_v36  ;;  %v4297_v50 = vrot.slane %v4295_v1, 1  ;;  %v4223_v58 = vsel %vm1562_vm11, %v4175_v54, %v14564_v19  ;;  %v14566_v45 = vld [vmem:[#allocation223_spill] sm:$0xff]  ;;  %v6777_v54 = vld [vmem:[%s13056_s3] sm:$0xff]   ;;  %v14571_v19 = vld [vmem:[#allocation176_spill] sm:$0xff] }
 0x5ef   : > { %3825 = vrot.lane.b32.xlu0 %v14555_v39, %s6797_s12  ;;  %v3123_v39 = vsel %vm340_vm8, %v3093_v43, %v14561_v18  ;;  %v3904_v43 = vsel %vm3085_vm2, %v14484_v20, %v11191_v57  ;;  %v14568_v57 = vld [vmem:[#allocation249_spill] sm:$0xff]  ;;  %6561 = vmatprep.subr.bf16.mxu0 %v6777_v54 }
 0x5f0   : > { %v11561_v42 = vpop.permute.xlu1 %3723  ;;  %v4282_v6 = vsel %vm917_vm5, %v4278_v8, %v4281_v13  ;;  %v11586_v1 = vsel %vm3146_vm3, %v3123_v39, %v14566_v45  ;;  %v3940_v36 = vsel %vm340_vm8, %v3904_v43, %v11264_v47  ;;  %v4315_v47 = vshll.u32 %v4223_v58, 16  ;;  %v14569_v39 = vld [vmem:[#allocation270_spill] sm:$0xff]  ;;  %6562 = vmatpush3.bf16.msra.mxu0 %v6777_v54  ;;  %v14575_v54 = vld [vmem:[#allocation272_spill] sm:$0xff] }
 0x5f1   : > { %v3776_v59 = vpop.permute.xlu0 %3775  ;;  %v3976_v8 = vsel %vm3146_vm3, %v3940_v36, %v11275_v48  ;;  %v14574_v36 = vld [vmem:[#allocation231_spill] sm:$0xff] }
 0x5f2   : > { %3819 = vrot.lane.b32.xlu1 %v14559_v7, %s6797_s12  ;;  %v4293_v7 = vshrl.u32 %v4217_v30, 16  ;;  %v4004_v30 = vsel %vm1496_vm9, %v11586_v1, %v11360_v49  ;;  %v6778_v49 = vld [vmem:[%s13056_s3 + $0x8] sm:$0xff]   ;;  %v4026_v14 = vsel %vm1496_vm9, %v3976_v8, %v3730_v62  ;;  %v4313_v8 = vshrl.u32 %v4223_v58, 16 }
 0x5f3   : > { %4413 = vrot.lane.b32.xlu0 %v4262_v56, %s6794_s30  ;;  %v3127_v56 = vsel %vm340_vm8, %v3097_v61, %v14567_v4  ;;  %v4064_v48 = vsel %vm3207_vm6, %v4004_v30, %v14571_v19  ;;  %6563 = vmatprep.subr.bf16.mxu0 %v6778_v49  ;;  %v4317_v4 = vrot.slane %v4315_v47, 1  ;;  %v3898_v58 = vsel %vm3085_vm2, %v14449_v29, %v11114_v53 }
 0x5f4   : > { %v11572_v17 = vpop.permute.xlu1 %3725  ;;  %v4298_v21 = vor.u32 %v4297_v50, %v4293_v7  ;;  %v11606_v20 = vsel %vm3146_vm3, %v3127_v56, %v14568_v57  ;;  %v3101_v50 = vsel %vm3085_vm2, %v14570_v41, %v14569_v39  ;;  %6564 = vmatpush3.bf16.msra.mxu0 %v6778_v49  ;;  %v14576_v39 = vld [vmem:[#allocation48_spill] sm:$0xff]  ;;  %v14578_v49 = vld [vmem:[#allocation266_spill] sm:$0xff] }
 0x5f5   : > { %v3808_v46 = vpop.permute.xlu0 %3807 }
 0x5f6   : > { %3823 = vrot.lane.b32.xlu1 %v14565_v27, %s6797_s12  ;;  %v4302_v61 = vsel %vm917_vm5, %v4298_v21, %v4301_v35  ;;  %v4012_v27 = vsel %vm1496_vm9, %v11606_v20, %v11419_v10  ;;  %v3894_v10 = vsel %vm3085_vm2, %v14425_v0, %v11105_v52  ;;  %v6779_v21 = vld [vmem:[%s13056_s3 + $0x10] sm:$0xff]  }
 0x5f7   : > { %4417 = vrot.lane.b32.xlu0 %v4282_v6, %s6794_s30  ;;  %v4081_v6 = vsel %vm3207_vm6, %v4026_v14, %v3776_v59  ;;  %v14573_v59 = vld [vmem:[#allocation162_spill] sm:$0xff]  ;;  %v3930_v0 = vsel %vm340_vm8, %v3894_v10, %v11186_v24  ;;  %6565 = vmatprep.subr.bf16.mxu0 %v6779_v21  ;;  %v6780_v10 = vld [vmem:[%s13056_s3 + $0x18] ss:$0 sps:$4 sm:$0x11]  }
 0x5f8   : > { %v11599_v13 = vpop.permute.xlu1 %3773  ;;  %v4129_v62 = vsel %vm1529_vm10, %v4081_v6, %v3808_v46  ;;  %v4112_v56 = vsel %vm1529_vm10, %v4064_v48, %v14573_v59  ;;  %v4070_v46 = vsel %vm3207_vm6, %v4012_v27, %v14574_v36  ;;  %v4318_v48 = vor.u32 %v4317_v4, %v4313_v8  ;;  %v14579_v27 = vld [vmem:[#allocation301_spill] sm:$0xff]  ;;  %6566 = vmatpush3.bf16.msra.mxu0 %v6779_v21  ;;  %v14582_v4 = vld [vmem:[#allocation30_spill] sm:$0xff] }
 0x5f9   : > { %v3840_v18 = vpop.permute.xlu0 %3839  ;;  %v4160_v41 = vsel %vm3272_vm4, %v4112_v56, %v14576_v39  ;;  %v3934_v6 = vsel %vm340_vm8, %v3898_v58, %v11193_v25  ;;  %v14583_v56 = vld [vmem:[#allocation167_spill] sm:$0xff]  ;;  %v14585_v21 = vld [vmem:[#allocation281_spill] sm:$0xff]  ;;  %6637 = vmatprep.subr.msk.bf16.mxu0 %vm880_vm0, %v6780_v10 }
 0x5fa   : > { %3885 = vrot.lane.b32.xlu1 %v10458_v63, %s6804_s20  ;;  %v14572_v63 = vld [vmem:[#allocation258_spill] sm:$0xff]  ;;  %v4177_v45 = vsel %vm3272_vm4, %v4129_v62, %v3840_v18  ;;  %v3966_v18 = vsel %vm3146_vm3, %v3930_v0, %v11312_v5  ;;  %v3970_v29 = vsel %vm3146_vm3, %v3934_v6, %v11321_v33  ;;  %v3902_v33 = vsel %vm3085_vm2, %v14583_v56, %v11122_v26  ;;  %v14588_v26 = vld [vmem:[#allocation124_spill] sm:$0xff]  ;;  %v14590_v58 = vld [vmem:[#allocation207_spill] sm:$0xff] }
 0x5fb   : > { %4421 = vrot.lane.b32.xlu0 %v4302_v61, %s6794_s30  ;;  %v3131_v35 = vsel %vm340_vm8, %v3101_v50, %v14572_v63  ;;  %v14577_v50 = vld [vmem:[#allocation173_spill] sm:$0xff]  ;;  %v4006_v5 = vsel %vm1496_vm9, %v3966_v18, %v11368_v32  ;;  %v14581_v32 = vld [vmem:[#allocation26_spill] sm:$0xff] }
 0x5fc   : > { %v11628_v7 = vpop.permute.xlu1 %3805  ;;  %v11648_v57 = vsel %vm3146_vm3, %v3131_v35, %v14575_v54  ;;  %v4118_v14 = vsel %vm1529_vm10, %v4070_v46, %v14577_v50  ;;  %v4066_v62 = vsel %vm3207_vm6, %v4006_v5, %v11376_v22  ;;  %v14580_v63 = vld [vmem:[#allocation257_spill] sm:$0xff]  ;;  %v14584_v46 = vld [vmem:[#allocation199_spill] sm:$0xff] }
 0x5fd   : > { %v3872_v43 = vpop.permute.xlu0 %3871  ;;  %v4166_v25 = vsel %vm3272_vm4, %v4118_v14, %v14582_v4  ;;  %v3938_v14 = vsel %vm340_vm8, %v3902_v33, %v14588_v26  ;;  %v14598_v26 = vld [vmem:[#allocation34_spill] sm:$0xff] }
 0x5fe   : > { %v4225_v30 = vsel %vm1562_vm11, %v4177_v45, %v3872_v43  ;;  %3883 = vrot.lane.b32.xlu1 %v14514_v11, %s6804_s20  ;;  %v4020_v11 = vsel %vm1496_vm9, %v11648_v57, %v11561_v42  ;;  %v4208_v45 = vsel %vm1562_vm11, %v4160_v41, %v14581_v32  ;;  %v4114_v43 = vsel %vm1529_vm10, %v4066_v62, %v11385_v34 }
 0x5ff   : > { %v4319_v52 = vshll.u32 %v4225_v30, 16  ;;  %v4076_v35 = vsel %vm3207_vm6, %v4020_v11, %v14580_v63  ;;  %v4162_v30 = vsel %vm3272_vm4, %v4114_v43, %v14584_v46  ;;  %v4014_v34 = vsel %vm1496_vm9, %v3970_v29, %v11440_v55  ;;  %v14587_v11 = vld [vmem:[#allocation243_spill] sm:$0xff]  ;;  %v14595_v46 = vld [vmem:[#allocation185_spill] sm:$0xff] }
 0x600   : > { %v3838_v47 = vpop.permute.xlu1 %3837  ;;  %v4072_v18 = vsel %vm3207_vm6, %v4014_v34, %v11462_v2  ;;  %v4124_v41 = vsel %vm1529_vm10, %v4076_v35, %v14587_v11  ;;  %v4532_v55 = vsel %vm880_vm0, %v6780_v10, 0  ;;  %v4265_v2 = vshll.u32 %v4208_v45, 16  ;;  %v14665_v11 = vld [vmem:[#allocation263_spill] sm:$0xff] }
 0x601   : > { %v4321_v61 = vrot.slane %v4319_v52, 1  ;;  %v3736_v24 = vpop.permute.xlu0 %3735  ;;  %v14586_v52 = vld [vmem:[#allocation209_spill] sm:$0xff]  ;;  %6568 = vmatpush3.bf16.msra.mxu0 %v4532_v55  ;;  %v3974_v5 = vsel %vm3146_vm3, %v3938_v14, %v14590_v58  ;;  %v14599_v58 = vld [vmem:[#allocation140_spill] sm:$0xff]  ;;  %vm14658_vm0 = vcmask 211968  }
 0x602   : > { %v4032_v42 = vsel %vm1496_vm9, %v14578_v49, %v3736_v24  ;;  %3887 = vrot.lane.b32.xlu1 %v14579_v27, %s6804_s20  ;;  %v4210_v8 = vsel %vm1562_vm11, %v4162_v30, %v14586_v52  ;;  %v4022_v10 = vsel %vm1496_vm9, %v3974_v5, %v11572_v17  ;;  %v4267_v30 = vrot.slane %v4265_v2, 1  ;;  %v14597_v17 = vld [vmem:[#allocation275_spill] sm:$0xff] }
 0x603   : > { %v4322_v53 = vsel %vm917_vm5, %v4318_v48, %v4321_v61  ;;  %v4085_v54 = vsel %vm3207_vm6, %v4032_v42, %v14585_v21  ;;  %v14589_v61 = vld [vmem:[#allocation29_spill] sm:$0xff]  ;;  %v4120_v48 = vsel %vm1529_vm10, %v4072_v18, %v11490_v60  ;;  %v14591_v42 = vld [vmem:[#allocation94_spill] sm:$0xff]  ;;  %v4269_v62 = vshll.u32 %v4210_v8, 16  ;;  %v14593_v60 = vld [vmem:[#allocation8_spill] sm:$0xff] }
 0x604   : > { %4425 = vrot.lane.b32.xlu0 %v4322_v53, %s6794_s30  ;;  %v3870_v22 = vpop.permute.xlu1 %3869  ;;  %v4214_v24 = vsel %vm1562_vm11, %v4166_v25, %v14589_v61  ;;  %v4168_v49 = vsel %vm3272_vm4, %v4120_v48, %v11521_v3  ;;  %v14592_v53 = vld [vmem:[#allocation133_spill] sm:$0xff]  ;;  %v14594_v3 = vrot.slane %v14534_v44, 7  ;;  %v4078_v33 = vsel %vm3207_vm6, %v4022_v10, %v11599_v13  ;;  %v14596_v21 = vld [vmem:[#allocation31_spill] sm:$0xff] }
 0x605   : > { %v3738_v0 = vpop.permute.xlu0 %3737  ;;  %v4216_v35 = vsel %vm1562_vm11, %v4168_v49, %v11546_v38  ;;  %v4172_v29 = vsel %vm3272_vm4, %v4124_v41, %v14592_v53  ;;  %v4285_v56 = vshll.u32 %v4214_v24, 16  ;;  %v4126_v52 = vsel %vm1529_vm10, %v4078_v33, %v11628_v7  ;;  %v14600_v7 = vld [vmem:[#allocation218_spill] sm:$0xff]  ;;  %v14604_v33 = vld [vmem:[#allocation32_spill] sm:$0xff] }
 0x606   : > { %3669 = vrot.lane.b32.xlu1 %v14579_v27, %s6799_s16  ;;  %v4133_v27 = vsel %vm1529_vm10, %v4085_v54, %v14591_v42  ;;  %v4289_v34 = vshll.u32 %v4216_v35, 16  ;;  %v4220_v54 = vsel %vm1562_vm11, %v4172_v29, %v14596_v21  ;;  %v4271_v18 = vrot.slane %v4269_v62, 1  ;;  %v14601_v49 = vld [vmem:[#allocation78_spill] sm:$0xff] }
 0x607   : > { %v4181_v38 = vsel %vm3272_vm4, %v4133_v27, %v14595_v46  ;;  %v4174_v41 = vsel %vm3272_vm4, %v4126_v52, %v3838_v47  ;;  %v4263_v13 = vshrl.u32 %v4208_v45, 16  ;;  %v4287_v2 = vrot.slane %v4285_v56, 1 }
 0x608   : > { %v3732_v6 = vpop.permute.xlu1 %3731  ;;  %v4229_v14 = vsel %vm1562_vm11, %v4181_v38, %v14598_v26  ;;  %v4222_v48 = vsel %vm1562_vm11, %v4174_v41, %v3870_v22  ;;  %v3908_v5 = vsel %vm3085_vm2, %v14600_v7, %v14599_v58  ;;  %v4305_v47 = vshll.u32 %v4220_v54, 16  ;;  %v14603_v22 = vld [vmem:[#allocation191_spill] sm:$0xff]  ;;  %v14606_v58 = vld [vmem:[#allocation200_spill] sm:$0xff]  ;;  %v14607_v7 = vld [vmem:[#allocation225_spill] sm:$0xff] }
 0x609   : > { %v4028_v43 = vsel %vm1496_vm9, %v14593_v60, %v3732_v6  ;;  %v3780_v25 = vpop.permute.xlu0 %3779  ;;  %v4268_v27 = vor.u32 %v4267_v30, %v4263_v13  ;;  %v14602_v6 = vld [vmem:[#allocation160_spill] sm:$0xff]  ;;  %v4291_v62 = vrot.slane %v4289_v34, 1  ;;  %v4283_v29 = vshrl.u32 %v4214_v24, 16 }
 0x60a   : > { %3761 = vrot.lane.b32.xlu1 %v14594_v3, %s6791_s26  ;;  %v4082_v8 = vsel %vm3207_vm6, %v4028_v43, %v14597_v17  ;;  %v3944_v45 = vsel %vm340_vm8, %v3908_v5, %v14602_v6  ;;  %v4335_v3 = vshll.u32 %v4229_v14, 16  ;;  %v4307_v34 = vrot.slane %v4305_v47, 1  ;;  %s6810_s26 = smov 110  }
 0x60b   : > { %v4130_v42 = vsel %vm1529_vm10, %v4082_v8, %v14601_v49  ;;  %v3980_v60 = vsel %vm3146_vm3, %v3944_v45, %v14603_v22  ;;  %v4272_v10 = vsel %vm917_vm5, %v4268_v27, %v4271_v18  ;;  %v4288_v38 = vor.u32 %v4287_v2, %v4283_v29  ;;  %v14605_v18 = vld [vmem:[#allocation288_spill] sm:$0xff]  ;;  %v14609_v27 = vld [vmem:[#allocation195_spill] sm:$0xff] }
 0x60c   : > { %v3734_v44 = vpop.permute.xlu1 %3733  ;;  %v4034_v56 = vsel %vm1496_vm9, %v3980_v60, %v3738_v0  ;;  %v4178_v46 = vsel %vm3272_vm4, %v4130_v42, %v14604_v33  ;;  %v4303_v8 = vshrl.u32 %v4220_v54, 16  ;;  %v3906_v2 = vsel %vm3085_vm2, %v14607_v7, %v14606_v58 }
 0x60d   : > { %v3812_v55 = vpop.permute.xlu0 %3811  ;;  %v4087_v30 = vsel %vm3207_vm6, %v4034_v56, %v3780_v25  ;;  %v4292_v17 = vsel %vm917_vm5, %v4288_v38, %v4291_v62  ;;  %v4226_v13 = vsel %vm1562_vm11, %v4178_v46, %v14605_v18  ;;  %v4333_v42 = vshrl.u32 %v4229_v14, 16  ;;  %v14611_v38 = vld [vmem:[#allocation202_spill] sm:$0xff] }
 0x60e   : > { %3889 = vrot.lane.b32.xlu1 %v14551_v15, %s6804_s20  ;;  %v4309_v15 = vshll.u32 %v4222_v48, 16  ;;  %v4135_v24 = vsel %vm1529_vm10, %v4087_v30, %v3812_v55  ;;  %v4337_v48 = vrot.slane %v4335_v3, 1  ;;  %v14608_v55 = vld [vmem:[#allocation328_spill] sm:$0xff]  ;;  %v4308_v49 = vor.u32 %v4307_v34, %v4303_v8  ;;  %v14612_v8 = vld [vmem:[#allocation274_spill] sm:$0xff] }
 0x60f   : > { %v3942_v5 = vsel %vm340_vm8, %v3906_v2, %v14608_v55  ;;  %v4325_v45 = vshll.u32 %v4226_v13, 16  ;;  %v14614_v2 = vld [vmem:[#allocation37_spill] sm:$0xff]  ;;  %v14615_v55 = vld [vmem:[#allocation286_spill] sm:$0xff] }
 0x610   : > { %v3778_v35 = vpop.permute.xlu1 %3777  ;;  %v4311_v41 = vrot.slane %v4309_v15, 1  ;;  %v3978_v47 = vsel %vm3146_vm3, %v3942_v5, %v14609_v27  ;;  %v4338_v15 = vor.u32 %v4337_v48, %v4333_v42  ;;  %v14617_v27 = vld [vmem:[#allocation327_spill] sm:$0xff] }
 0x611   : > { %v3844_v43 = vpop.permute.xlu0 %3843  ;;  %v4030_v62 = vsel %vm1496_vm9, %v3978_v47, %v3734_v44  ;;  %v4327_v46 = vrot.slane %v4325_v45, 1  ;;  %v14618_v47 = vld [vmem:[#allocation239_spill] sm:$0xff]  ;;  %v14619_v45 = vld [vmem:[#allocation80_spill] sm:$0xff] }
 0x612   : > { %4415 = vrot.lane.b32.xlu1 %v4272_v10, %s6794_s30  ;;  %v4183_v0 = vsel %vm3272_vm4, %v4135_v24, %v3844_v43  ;;  %v4312_v60 = vsel %vm917_vm5, %v4308_v49, %v4311_v41  ;;  %v4084_v43 = vsel %vm3207_vm6, %v4030_v62, %v3778_v35  ;;  %v14610_v10 = vld [vmem:[#allocation280_spill] sm:$0xff]  ;;  %v14616_v49 = vld [vmem:[#allocation18_spill] sm:$0xff] }
 0x614   : > { %v3810_v52 = vpop.permute.xlu1 %3809 }
 0x615   : > { %v3876_v26 = vpop.permute.xlu0 %3875  ;;  %v4132_v14 = vsel %vm1529_vm10, %v4084_v43, %v3810_v52 }
 0x616   : > { %v4231_v25 = vsel %vm1562_vm11, %v4183_v0, %v3876_v26  ;;  %4419 = vrot.lane.b32.xlu1 %v4292_v17, %s6794_s30  ;;  %v4323_v17 = vshrl.u32 %v4226_v13, 16  ;;  %v14613_v26 = vld [vmem:[#allocation295_spill] sm:$0xff] }
 0x617   : > { %v4339_v54 = vshll.u32 %v4231_v25, 16 }
 0x618   : > { %v3842_v6 = vpop.permute.xlu1 %3841  ;;  %v4328_v0 = vor.u32 %v4327_v46, %v4323_v17 }
 0x619   : > { %v4341_v29 = vrot.slane %v4339_v54, 1  ;;  %v3744_v22 = vpop.permute.xlu0 %3743  ;;  %v4180_v33 = vsel %vm3272_vm4, %v4132_v14, %v3842_v6  ;;  %v3912_v6 = vsel %vm3085_vm2, %v14618_v47, %v14617_v27 }
 0x61a   : > { %v4040_v3 = vsel %vm1496_vm9, %v14610_v10, %v3744_v22  ;;  %4423 = vrot.lane.b32.xlu1 %v4312_v60, %s6794_s30 }
 0x61b   : > { %v4342_v56 = vsel %vm917_vm5, %v4338_v15, %v4341_v29  ;;  %v4091_v30 = vsel %vm3207_vm6, %v4040_v3, %v14611_v38  ;;  %v14620_v29 = vld [vmem:[#allocation205_spill] sm:$0xff]  ;;  %v14621_v15 = vld [vmem:[#allocation190_spill] sm:$0xff] }
 0x61c   : > { %4429 = vrot.lane.b32.xlu0 %v4342_v56, %s6794_s30  ;;  %v3874_v44 = vpop.permute.xlu1 %3873  ;;  %v4139_v41 = vsel %vm1529_vm10, %v4091_v30, %v14612_v8  ;;  %v3948_v22 = vsel %vm340_vm8, %v3912_v6, %v14620_v29  ;;  %v14622_v56 = vld [vmem:[#allocation17_spill] sm:$0xff]  ;;  %v14623_v30 = vld [vmem:[#allocation16_spill] sm:$0xff] }
 0x61d   : > { %v4228_v35 = vsel %vm1562_vm11, %v4180_v33, %v3874_v44  ;;  %v3746_v34 = vpop.permute.xlu0 %3745  ;;  %v4187_v25 = vsel %vm3272_vm4, %v4139_v41, %v14614_v2  ;;  %v3984_v43 = vsel %vm3146_vm3, %v3948_v22, %v14621_v15  ;;  %v14624_v41 = vld [vmem:[#allocation130_spill] sm:$0xff] }
 0x61e   : > { %v4329_v24 = vshll.u32 %v4228_v35, 16  ;;  %v4235_v42 = vsel %vm1562_vm11, %v4187_v25, %v14616_v49  ;;  %v4042_v14 = vsel %vm1496_vm9, %v3984_v43, %v3746_v34 }
 0x61f   : > { %v4355_v3 = vshll.u32 %v4235_v42, 16 }
 0x620   : > { %v4331_v52 = vrot.slane %v4329_v24, 1  ;;  %v3740_v18 = vpop.permute.xlu1 %3739 }
 0x621   : > { %v4036_v48 = vsel %vm1496_vm9, %v14613_v26, %v3740_v18  ;;  %v3784_v58 = vpop.permute.xlu0 %3783  ;;  %v4357_v8 = vrot.slane %v4355_v3, 1 }
 0x622   : > { %v4332_v7 = vsel %vm917_vm5, %v4328_v0, %v4331_v52  ;;  %v4088_v13 = vsel %vm3207_vm6, %v4036_v48, %v14615_v55  ;;  %v4093_v44 = vsel %vm3207_vm6, %v4042_v14, %v3784_v58  ;;  %v14625_v52 = vld [vmem:[#allocation245_spill] sm:$0xff]  ;;  %v14626_v0 = vld [vmem:[#allocation178_spill] sm:$0xff]  ;;  %v4353_v58 = vshrl.u32 %v4235_v42, 16 }
 0x623   : > { %4427 = vrot.lane.b32.xlu1 %v4332_v7, %s6794_s30  ;;  %v4136_v62 = vsel %vm1529_vm10, %v4088_v13, %v14619_v45  ;;  %v3910_v18 = vsel %vm3085_vm2, %v14625_v52, %v14624_v41  ;;  %v14627_v7 = vld [vmem:[#allocation208_spill] sm:$0xff] }
 0x624   : > { %v3742_v5 = vpop.permute.xlu1 %3741  ;;  %v4184_v33 = vsel %vm3272_vm4, %v4136_v62, %v14622_v56  ;;  %v3946_v26 = vsel %vm340_vm8, %v3910_v18, %v14626_v0  ;;  %v4358_v27 = vor.u32 %v4357_v8, %v4353_v58  ;;  %v14631_v52 = vld [vmem:[#allocation20_spill] sm:$0xff]  ;;  %v14633_v58 = vld [vmem:[#allocation325_spill] sm:$0xff] }
 0x625   : > { %v3816_v54 = vpop.permute.xlu0 %3815  ;;  %v4232_v35 = vsel %vm1562_vm11, %v4184_v33, %v14623_v30  ;;  %v3982_v2 = vsel %vm3146_vm3, %v3946_v26, %v14627_v7  ;;  %v14632_v0 = vld [vmem:[#allocation136_spill] sm:$0xff]  ;;  %v14634_v7 = vld [vmem:[#allocation123_spill] sm:$0xff] }
 0x626   : > { %v4141_v46 = vsel %vm1529_vm10, %v4093_v44, %v3816_v54  ;;  %v4345_v55 = vshll.u32 %v4232_v35, 16  ;;  %v4038_v13 = vsel %vm1496_vm9, %v3982_v2, %v3742_v5  ;;  %v4343_v43 = vshrl.u32 %v4232_v35, 16 }
 0x627   : > { %v3914_v2 = vsel %vm3085_vm2, %v14634_v7, %v14633_v58  ;;  %v14641_v58 = vld [vmem:[#allocation15_spill] sm:$0xff] }
 0x628   : > { %v3782_v60 = vpop.permute.xlu1 %3781  ;;  %v4347_v29 = vrot.slane %v4345_v55, 1  ;;  %v6676_v7 = vunpack.i.h.bf16 %v14641_v58 }
 0x629   : > { %v3848_v10 = vpop.permute.xlu0 %3847  ;;  %v4090_v47 = vsel %vm3207_vm6, %v4038_v13, %v3782_v60  ;;  %v14628_v60 = vld [vmem:[#allocation99_spill] sm:$0xff]  ;;  %v14636_v13 = vld [vmem:[#allocation193_spill] sm:$0xff] }
 0x62a   : > { %v4189_v24 = vsel %vm3272_vm4, %v4141_v46, %v3848_v10  ;;  %v4348_v14 = vor.u32 %v4347_v29, %v4343_v43  ;;  %v14629_v46 = vld [vmem:[#allocation289_spill] sm:$0xff]  ;;  %v14637_v29 = vld [vmem:[#allocation84_spill] sm:$0xff] }
 0x62c   : > { %v3814_v38 = vpop.permute.xlu1 %3813 }
 0x62d   : > { %v3880_v17 = vpop.permute.xlu0 %3879  ;;  %v4138_v6 = vsel %vm1529_vm10, %v4090_v47, %v3814_v38 }
 0x62e   : > { %v4237_v34 = vsel %vm1562_vm11, %v4189_v24, %v3880_v17  ;;  %v14630_v17 = vld [vmem:[#allocation38_spill] sm:$0xff] }
 0x62f   : > { %v4359_v48 = vshll.u32 %v4237_v34, 16 }
 0x630   : > { %v3846_v25 = vpop.permute.xlu1 %3845 }
 0x631   : > { %v4361_v54 = vrot.slane %v4359_v48, 1  ;;  %v11827_v49 = vpop.permute.xlu0 %3663  ;;  %v4186_v62 = vsel %vm3272_vm4, %v4138_v6, %v3846_v25  ;;  %v14635_v25 = vld [vmem:[#allocation172_spill] sm:$0xff] }
 0x632   : > { %v3950_v55 = vsel %vm340_vm8, %v3914_v2, %v14635_v25  ;;  %v14642_v25 = vld [vmem:[#allocation86_spill] sm:$0xff] }
 0x633   : > { %v4362_v45 = vsel %vm917_vm5, %v4358_v27, %v4361_v54  ;;  %v3986_v54 = vsel %vm3146_vm3, %v3950_v55, %v14636_v13 }
 0x634   : > { %4433 = vrot.lane.b32.xlu0 %v4362_v45, %s6794_s30  ;;  %v3878_v42 = vpop.permute.xlu1 %3877 }
 0x635   : > { %v4234_v22 = vsel %vm1562_vm11, %v4186_v62, %v3878_v42  ;;  %v11835_v15 = vpop.permute.xlu0 %3661 }
 0x636   : > { %v4349_v5 = vshll.u32 %v4234_v22, 16  ;;  %v6762_v22 = vunpack.i.l.bf16 %v14637_v29 }
 0x638   : > { %v4351_v10 = vrot.slane %v4349_v5, 1  ;;  %v3748_v3 = vpop.permute.xlu1 %3747 }
 0x639   : > { %v4044_v56 = vsel %vm1496_vm9, %v14628_v60, %v3748_v3  ;;  %v11839_v33 = vpop.permute.xlu0 %3665  ;;  %v14638_v3 = vld [vmem:[#allocation87_spill] sm:$0xff] }
 0x63a   : > { %v4352_v44 = vsel %vm917_vm5, %v4348_v14, %v4351_v10  ;;  %v4094_v38 = vsel %vm3207_vm6, %v4044_v56, %v14629_v46  ;;  %v14639_v14 = vld [vmem:[#allocation4_spill] sm:$0xff] }
 0x63b   : > { %4431 = vrot.lane.b32.xlu1 %v4352_v44, %s6794_s30  ;;  %v4142_v35 = vsel %vm1529_vm10, %v4094_v38, %v14630_v17  ;;  %v3087_v60 = vsel %vm3085_vm2, %v14639_v14, %v14638_v3 }
 0x63c   : > { %v3750_v30 = vpop.permute.xlu1 %3749  ;;  %v4190_v18 = vsel %vm3272_vm4, %v4142_v35, %v14631_v52 }
 0x63d   : > { %v11845_v24 = vpop.permute.xlu0 %3789  ;;  %v4238_v26 = vsel %vm1562_vm11, %v4190_v18, %v14632_v0  ;;  %v4046_v6 = vsel %vm1496_vm9, %v3986_v54, %v3750_v30  ;;  %v3117_v30 = vsel %vm340_vm8, %v3087_v60, %v6762_v22  ;;  %v14646_v60 = vld [vmem:[#allocation21_spill] sm:$0xff] }
 0x63e   : > { %v4365_v47 = vshll.u32 %v4238_v26, 16  ;;  %v4363_v38 = vshrl.u32 %v4238_v26, 16  ;;  %v11888_v26 = vunpack.i.l.bf16 %v14642_v25 }
 0x640   : > { %v3786_v8 = vpop.permute.xlu1 %3785  ;;  %v4367_v10 = vrot.slane %v4365_v47, 1  ;;  %v14643_v47 = vld [vmem:[#allocation39_spill] sm:$0xff] }
 0x641   : > { %v11849_v41 = vpop.permute.xlu0 %3787  ;;  %v4096_v62 = vsel %vm3207_vm6, %v4046_v6, %v3786_v8  ;;  %v11898_v6 = vunpack.i.l.bf16 %v14643_v47 }
 0x642   : > { %v4368_v8 = vor.u32 %v4367_v10, %v4363_v38 }
 0x644   : > { %v3818_v34 = vpop.permute.xlu1 %3817 }
 0x645   : > { %v11855_v48 = vpop.permute.xlu0 %3791  ;;  %v4144_v42 = vsel %vm1529_vm10, %v4096_v62, %v3818_v34  ;;  %v14640_v34 = vld [vmem:[#allocation89_spill] sm:$0xff] }
 0x646   : > { %v11883_v0 = vsel %vm3146_vm3, %v3117_v30, %v14640_v34  ;;  %v14648_v30 = vld [vmem:[#allocation131_spill] sm:$0xff] }
 0x647   : > { %v11892_v13 = vsel %vm1496_vm9, %v11883_v0, %v6676_v7 }
 0x648   : > { %v3850_v27 = vpop.permute.xlu1 %3849 }
 0x649   : > { %v11865_v45 = vpop.permute.xlu0 %3853  ;;  %v4192_v5 = vsel %vm3272_vm4, %v4144_v42, %v3850_v27  ;;  %v3209_v27 = vsel %vm3207_vm6, %v11892_v13, %v11888_v26  ;;  %v14644_v42 = vld [vmem:[#allocation88_spill] sm:$0xff] }
 0x64a   : > { %v3241_v22 = vsel %vm1529_vm10, %v3209_v27, %v14644_v42  ;;  %v14651_v27 = vld [vmem:[#allocation278_spill] sm:$0xff] }
 0x64b   : > { %v3274_v3 = vsel %vm3272_vm4, %v3241_v22, %v11898_v6 }
 0x64c   : > { %v3882_v43 = vpop.permute.xlu1 %3881 }
 0x64d   : > { %v4240_v56 = vsel %vm1562_vm11, %v4192_v5, %v3882_v43  ;;  %v11875_v44 = vpop.permute.xlu0 %3851  ;;  %v14645_v5 = vld [vmem:[#allocation3_spill] sm:$0xff] }
 0x64e   : > { %v4369_v46 = vshll.u32 %v4240_v56, 16  ;;  %v3306_v56 = vsel %vm1562_vm11, %v3274_v3, %v14646_v60  ;;  %v14653_v3 = vld [vmem:[#allocation183_spill] sm:$0xff] }
 0x650   : > { %v4371_v17 = vrot.slane %v4369_v46, 1  ;;  %v3752_v35 = vpop.permute.xlu1 %3751  ;;  %v14647_v46 = vld [vmem:[#allocation228_spill] sm:$0xff] }
 0x651   : > { %v11878_v52 = vpop.permute.xlu0 %3855  ;;  %v4048_v43 = vsel %vm1496_vm9, %v14645_v5, %v3752_v35  ;;  %v3339_v38 = vsel %vm3337_vm7, %v3306_v56, %v14647_v46  ;;  %v14650_v35 = vld [vmem:[#allocation108_spill] sm:$0xff]  ;;  %v14652_v5 = vld [vmem:[#allocation326_spill] sm:$0xff]  ;;  %v14654_v56 = vld [vmem:[#allocation107_spill] sm:$0xff] }
 0x652   : > { %v4372_v18 = vsel %vm917_vm5, %v4368_v8, %v4371_v17  ;;  %v4097_v17 = vsel %vm3207_vm6, %v4048_v43, %v14648_v30  ;;  %v14649_v8 = vld [vmem:[#allocation121_spill] sm:$0xff]  ;;  %v3918_v21 = vsel %vm3085_vm2, %v14653_v3, %v14652_v5  ;;  %v14655_v43 = vld [vmem:[#allocation159_spill] sm:$0xff]  ;;  %v14656_v30 = vld [vmem:[#allocation92_spill] sm:$0xff] }
 0x653   : > { %4435 = vrot.lane.b32.xlu1 %v4372_v18, %s6794_s30  ;;  %v3371_v18 = vsel %vm1595_vm12, %v3339_v38, %v14649_v8  ;;  %v4145_v46 = vsel %vm1529_vm10, %v4097_v17, %v14654_v56  ;;  %v3089_v38 = vsel %vm3085_vm2, %v14656_v30, %v14655_v43  ;;  %v14657_v8 = vld [vmem:[#allocation150_spill] sm:$0xff]  ;;  %v14661_v3 = vld [vmem:[#allocation323_spill] sm:$0xff]  ;;  %v14662_v56 = vld [vmem:[#allocation40_spill] sm:$0xff] }
 0x654   : > { %v3756_v2 = vpop.permute.xlu1 %3755  ;;  %v3404_v58 = vsel %vm3402_vm1, %v3371_v18, %v14650_v35  ;;  %v14659_v18 = vld [vmem:[#allocation330_spill] sm:$0xff]  ;;  %v4193_v43 = vsel %vm3272_vm4, %v4145_v46, %v14662_v56  ;;  %v14669_v46 = vld [vmem:[#allocation19_spill] sm:$0xff] }
 0x655   : > { %v3668_v55 = vpop.permute.xlu0 %3667  ;;  %v3436_v22 = vsel %vm13579_vm13, %v3404_v58, %v14651_v27  ;;  %v3954_v35 = vsel %vm340_vm8, %v3918_v21, %v14659_v18  ;;  %vm4498_vm13 = vcmask 408576   ;;  %v14664_v18 = vld [vmem:[#allocation203_spill] sm:$0xff] }
 0x656   : > { %v3469_v53 = vsel %vm14658_vm0, %v3436_v22, %v14657_v8  ;;  %v3990_v27 = vsel %vm3146_vm3, %v3954_v35, %v11827_v49  ;;  %v14663_v8 = vld [vmem:[#allocation155_spill] sm:$0xff]  ;;  %vm14666_vm0 = vcmask 261120   ;;  %v14667_v49 = vld [vmem:[#allocation161_spill] sm:$0xff] }
 0x657   : > { %v3501_v58 = vsel %vm1661_vm14, %v3469_v53, %v14660_v9  ;;  %v4052_v30 = vsel %vm1496_vm9, %v3990_v27, %v3756_v2  ;;  %v3119_v21 = vsel %vm340_vm8, %v3089_v38, %v14663_v8  ;;  %v3916_v9 = vsel %vm3085_vm2, %v14665_v11, %v14664_v18  ;;  %v14671_v56 = vld [vmem:[#allocation187_spill] sm:$0xff] }
 0x658   : > { %v3754_v54 = vpop.permute.xlu1 %3753  ;;  %v3534_v17 = vsel %vm3532_vm15, %v3501_v58, %v14661_v3  ;;  %v3150_v35 = vsel %vm3146_vm3, %v3119_v21, %v14667_v49  ;;  %v3952_v58 = vsel %vm340_vm8, %v3916_v9, %v14668_v23  ;;  %v4241_v38 = vsel %vm1562_vm11, %v4193_v43, %v14669_v46  ;;  %v14673_v43 = vld [vmem:[#allocation186_spill] sm:$0xff]  ;;  %v14674_v9 = vld [vmem:[#allocation157_spill] sm:$0xff]  ;;  %v14676_v49 = vld [vmem:[#allocation147_spill] sm:$0xff] }
 0x659   : > { %v3760_v62 = vpop.permute.xlu0 %3759  ;;  %v3988_v2 = vsel %vm3146_vm3, %v3952_v58, %v11835_v15  ;;  %v4101_v27 = vsel %vm3207_vm6, %v4052_v30, %v11845_v24  ;;  %v6763_v3 = vunpack.i.h.bf16 %v14637_v29  ;;  %v6768_v21 = vunpack.i.h.bf16 %v14642_v25  ;;  %v14672_v15 = vld [vmem:[#allocation153_spill] sm:$0xff]  ;;  %v14675_v30 = vld [vmem:[#allocation331_spill] sm:$0xff]  ;;  %v14677_v58 = vld [vmem:[#allocation296_spill] sm:$0xff] }
 0x65a   : > { %v4050_v23 = vsel %vm1496_vm9, %v3988_v2, %v3754_v54  ;;  %v3180_v18 = vsel %vm1496_vm9, %v3150_v35, %v14672_v15  ;;  %v3920_v24 = vsel %vm3085_vm2, %v14674_v9, %v14673_v43  ;;  %v3182_v46 = vsel %vm1496_vm9, %v14677_v58, %v14676_v49  ;;  %v14685_v49 = vld [vmem:[#allocation238_spill] sm:$0xff] }
 0x65b   : > { %v4375_v2 = vshll.u32 %v4241_v38, 16  ;;  %v4059_v43 = vsel %vm1496_vm9, %v11883_v0, %v3760_v62  ;;  %v3188_v58 = vsel %vm1496_vm9, %v11606_v20, %v14685_v49 }
 0x65c   : > { %v3758_v10 = vpop.permute.xlu1 %3757 }
 0x65d   : > { %v11906_v14 = vpop.permute.xlu0 %3671 }
 0x660   : > { %v3822_v34 = vpop.permute.xlu1 %3821 }
 0x661   : > { %v11918_v7 = vpop.permute.xlu0 %3825  ;;  %v4149_v8 = vsel %vm1529_vm10, %v4101_v27, %v3822_v34 }
 0x664   : > { %v3820_v5 = vpop.permute.xlu1 %3819 }
 0x665   : > { %v4414_v22 = vpop.permute.xlu0 %4413 }
 0x666   : > { %v4446_v53 = vsel %vm14666_vm0, %v3534_v17, %v4414_v22  ;;  %v14670_v17 = vld [vmem:[#allocation213_spill] sm:$0xff] }
 0x667   : > { %6569 = vmatprep.mubr.msk.bf16.mxu0 %vm4498_vm13, %v4446_v53  ;;  %v3922_v22 = vsel %vm3085_vm2, %v14671_v56, %v14670_v17  ;;  %v14678_v17 = vld [vmem:[#allocation332_spill] sm:$0xff]  ;;  %v4099_v56 = vsel %vm3207_vm6, %v4050_v23, %v11849_v41  ;;  %v14681_v23 = vld [vmem:[#allocation201_spill] sm:$0xff] }
 0x668   : > { %v3824_v11 = vpop.permute.xlu1 %3823  ;;  %v3958_v53 = vsel %vm340_vm8, %v3922_v22, %v14675_v30  ;;  %v3956_v54 = vsel %vm340_vm8, %v3920_v24, %v14678_v17  ;;  %v4197_v22 = vsel %vm3272_vm4, %v4149_v8, %v11865_v45  ;;  %v14679_v30 = vld [vmem:[#allocation143_spill] sm:$0xff]  ;;  %v3184_v45 = vsel %vm1496_vm9, %v11586_v1, %v14681_v23  ;;  %v14682_v8 = vld [vmem:[#allocation142_spill] sm:$0xff] }
 0x669   : > { %v3994_v34 = vsel %vm3146_vm3, %v3958_v53, %v3668_v55  ;;  %v3992_v35 = vsel %vm3146_vm3, %v3956_v54, %v11839_v33  ;;  %v4147_v55 = vsel %vm1529_vm10, %v4099_v56, %v3820_v5  ;;  %v3211_v33 = vsel %vm3207_vm6, %v11892_v13, %v14679_v30  ;;  %v14680_v53 = vld [vmem:[#allocation184_spill] sm:$0xff] }
 0x66a   : > { %v4056_v27 = vsel %vm1496_vm9, %v3994_v34, %v3760_v62  ;;  %v4054_v9 = vsel %vm1496_vm9, %v3992_v35, %v3758_v10  ;;  %v3215_v41 = vsel %vm3207_vm6, %v3182_v46, %v14680_v53  ;;  %v3213_v0 = vsel %vm3207_vm6, %v3180_v18, %v14682_v8  ;;  %v14683_v62 = vld [vmem:[#allocation192_spill] sm:$0xff]  ;;  %v14684_v10 = vld [vmem:[#allocation194_spill] sm:$0xff] }
 0x66b   : > { %v3186_v5 = vsel %vm1496_vm9, %v14684_v10, %v14683_v62  ;;  %v4104_v13 = vsel %vm3207_vm6, %v4056_v27, %v11888_v26  ;;  %v4377_v17 = vrot.slane %v4375_v2, 1  ;;  %v4107_v46 = vsel %vm3207_vm6, %v4059_v43, %v11888_v26  ;;  %v14686_v27 = vld [vmem:[#allocation232_spill] sm:$0xff]  ;;  %v14689_v43 = vld [vmem:[#allocation290_spill] sm:$0xff] }
 0x66c   : > { %v3886_v15 = vpop.permute.xlu1 %3885  ;;  %v4103_v1 = vsel %vm3207_vm6, %v4054_v9, %v11855_v48  ;;  %v4195_v18 = vsel %vm3272_vm4, %v4147_v55, %v11875_v44  ;;  %v12018_v35 = vsel %vm3207_vm6, %v3186_v5, %v14536_v28  ;;  %v12022_v20 = vsel %vm3207_vm6, %v3184_v45, %v14571_v19  ;;  %v14687_v28 = vld [vmem:[#allocation262_spill] sm:$0xff]  ;;  %v14688_v19 = vld [vmem:[#allocation85_spill] sm:$0xff]  ;;  %v14691_v8 = vld [vmem:[#allocation292_spill] sm:$0xff] }
 0x66d   : > { %v4245_v24 = vsel %vm1562_vm11, %v4197_v22, %v3886_v15  ;;  %v4151_v2 = vsel %vm1529_vm10, %v4103_v1, %v3824_v11  ;;  %v12029_v48 = vsel %vm1496_vm9, %v11455_v12, %v14686_v27  ;;  %v4152_v44 = vsel %vm1529_vm10, %v4104_v13, %v14644_v42  ;;  %v14694_v1 = vld [vmem:[#allocation236_spill] sm:$0xff] }
 0x66e   : > { %v4385_v54 = vshll.u32 %v4245_v24, 16  ;;  %v4373_v22 = vshrl.u32 %v4241_v38, 16  ;;  %v12036_v15 = vsel %vm1496_vm9, %v11648_v57, %v14687_v28  ;;  %v12040_v11 = vmul.f32 %v14689_v43, %v14688_v19  ;;  %v14690_v57 = vld [vmem:[#allocation291_spill] sm:$0xff]  ;;  %v14699_v28 = vld [vmem:[#allocation45_spill] sm:$0xff] }
 0x66f   : > { %v12044_v9 = vsel %vm3207_vm6, %v3188_v58, %v14574_v36  ;;  %v4155_v12 = vsel %vm1529_vm10, %v4107_v46, %v14644_v42  ;;  %v4199_v38 = vsel %vm3272_vm4, %v4151_v2, %v11878_v52  ;;  %v12052_v45 = vmul.f32 %v14688_v19, %v14690_v57  ;;  %v14692_v58 = vld [vmem:[#allocation293_spill] sm:$0xff] }
 0x670   : > { %v3884_v34 = vpop.permute.xlu1 %3883  ;;  %v4387_v55 = vrot.slane %v4385_v54, 1  ;;  %v4378_v23 = vor.u32 %v4377_v17, %v4373_v22  ;;  %v12056_v62 = vmul.f32 %v14691_v8, %v14688_v19  ;;  %v4200_v36 = vsel %vm3272_vm4, %v4152_v44, %v11898_v6  ;;  %v14693_v17 = vld [vmem:[#allocation237_spill] sm:$0xff]  ;;  %v14704_v8 = vld [vmem:[#allocation22_spill] sm:$0xff] }
 0x671   : > { %v4243_v26 = vsel %vm1562_vm11, %v4195_v18, %v3884_v34  ;;  %v4203_v10 = vsel %vm3272_vm4, %v4155_v12, %v11898_v6  ;;  %v4383_v5 = vshrl.u32 %v4245_v24, 16  ;;  %v12066_v13 = vmul.f32 %v14688_v19, %v14692_v58  ;;  %v14695_v18 = vld [vmem:[#allocation129_spill] sm:$0xff]  ;;  %v14696_v6 = vld [vmem:[#allocation166_spill] sm:$0xff]  ;;  %v14700_v12 = vld [vmem:[#allocation43_spill] sm:$0xff] }
 0x672   : > { %v4379_v56 = vshll.u32 %v4243_v26, 16  ;;  %v3243_v46 = vsel %vm1529_vm10, %v3211_v33, %v14693_v17  ;;  %v3247_v54 = vsel %vm1529_vm10, %v3215_v41, %v14694_v1  ;;  %v3245_v34 = vsel %vm1529_vm10, %v3213_v0, %v14695_v18  ;;  %v14697_v2 = vld [vmem:[#allocation145_spill] sm:$0xff]  ;;  %v14707_v18 = vld [vmem:[#allocation250_spill] sm:$0xff] }
 0x673   : > { %v3276_v24 = vsel %vm3272_vm4, %v3243_v46, %v14696_v6  ;;  %v14698_v26 = vld [vmem:[#allocation5_spill] sm:$0xff]  ;;  %v4388_v44 = vor.u32 %v4387_v55, %v4383_v5  ;;  %v6773_v33 = vunpack.i.h.bf16 %v14643_v47  ;;  %v4251_v0 = vsel %vm1562_vm11, %v4203_v10, %v14646_v60  ;;  %v14705_v5 = vld [vmem:[#allocation300_spill] sm:$0xff] }
 0x674   : > { %v4381_v30 = vrot.slane %v4379_v56, 1  ;;  %v3888_v53 = vpop.permute.xlu1 %3887  ;;  %v3926_v27 = vsel %vm3085_vm2, %v14698_v26, %v14697_v2  ;;  %v3308_v41 = vsel %vm1562_vm11, %v3276_v24, %v14699_v28  ;;  %v4248_v43 = vsel %vm1562_vm11, %v4200_v36, %v14646_v60  ;;  %v14702_v55 = vld [vmem:[#allocation329_spill] sm:$0xff]  ;;  %v14709_v2 = vld [vmem:[#allocation158_spill] sm:$0xff] }
 0x675   : > { %v4247_v42 = vsel %vm1562_vm11, %v4199_v38, %v3888_v53  ;;  %v14701_v38 = vld [vmem:[#allocation23_spill] sm:$0xff]  ;;  %v3962_v36 = vsel %vm340_vm8, %v3926_v27, %v6763_v3  ;;  %v4405_v46 = vshll.u32 %v4251_v0, 16  ;;  %v4395_v1 = vshll.u32 %v4248_v43, 16  ;;  %v14708_v6 = vld [vmem:[#allocation221_spill] sm:$0xff]  ;;  %v14710_v27 = vld [vmem:[#allocation96_spill] sm:$0xff] }
 0x676   : > { %v4389_v52 = vshll.u32 %v4247_v42, 16  ;;  %v4382_v49 = vsel %vm917_vm5, %v4378_v23, %v4381_v30  ;;  %v3278_v30 = vsel %vm3272_vm4, %v3245_v34, %v14700_v12  ;;  %v3341_v53 = vsel %vm3337_vm7, %v3308_v41, %v14701_v38  ;;  %v14703_v23 = vld [vmem:[#allocation46_spill] sm:$0xff]  ;;  %v14713_v41 = vld [vmem:[#allocation120_spill] sm:$0xff] }
 0x677   : > { %4437 = vrot.lane.b32.xlu0 %v4382_v49, %s6794_s30  ;;  %v3924_v57 = vsel %vm3085_vm2, %v14703_v23, %v14702_v55  ;;  %v3310_v42 = vsel %vm1562_vm11, %v3278_v30, %v14704_v8  ;;  %v3373_v10 = vsel %vm1595_vm12, %v3341_v53, %v14705_v5  ;;  %v3998_v49 = vsel %vm3146_vm3, %v3962_v36, %v11906_v14  ;;  %v14717_v8 = vld [vmem:[#allocation265_spill] sm:$0xff] }
 0x678   : > { %v4391_v56 = vrot.slane %v4389_v52, 1  ;;  %v3670_v22 = vpop.permute.xlu1 %3669  ;;  %v14706_v52 = vld [vmem:[#allocation333_spill] sm:$0xff]  ;;  %v3343_v34 = vsel %vm3337_vm7, %v3310_v42, %v14707_v18  ;;  %v3406_v24 = vsel %vm3402_vm1, %v3373_v10, %v14708_v6  ;;  %vm14711_vm2 = vcmask 195584   ;;  %v4418_v18 = vpop.permute.xlu0 %4417 }
 0x679   : > { %v3960_v60 = vsel %vm340_vm8, %v3924_v57, %v14706_v52  ;;  %v3375_v26 = vsel %vm1595_vm12, %v3343_v34, %v14709_v2  ;;  %v3438_v14 = vsel %vm14711_vm2, %v3406_v24, %v14710_v27  ;;  %v4407_v25 = vrot.slane %v4405_v46, 1  ;;  %v14720_v46 = vld [vmem:[#allocation179_spill] sm:$0xff] }
 0x67a   : > { %v4392_v47 = vsel %vm917_vm5, %v4388_v44, %v4391_v56  ;;  %v3996_v58 = vsel %vm3146_vm3, %v3960_v60, %v3670_v22  ;;  %v14712_v22 = vld [vmem:[#allocation273_spill] sm:$0xff]  ;;  %vm14714_vm3 = vcmask 211968   ;;  %v4397_v57 = vrot.slane %v4395_v1, 1 }
 0x67b   : > { %4439 = vrot.lane.b32.xlu1 %v4392_v47, %s6794_s30  ;;  %v3408_v28 = vsel %vm3402_vm1, %v3375_v26, %v14712_v22  ;;  %v3471_v12 = vsel %vm14714_vm3, %v3438_v14, %v14713_v41  ;;  %v4393_v36 = vshrl.u32 %v4248_v43, 16  ;;  %vm14719_vm0 = vmmov %vm14714_vm3  ;;  %v14724_v26 = vld [vmem:[#allocation242_spill] sm:$0xff] }
 0x67c   : > { %v3762_v17 = vpop.permute.xlu1 %3761  ;;  %v3503_v42 = vsel %vm1661_vm14, %v3471_v12, %v14717_v8  ;;  %v12176_v12 = vsel %vm3207_vm6, %v12036_v15, %v14580_v63  ;;  %v14732_v63 = vld [vmem:[#allocation139_spill] sm:$0xff] }
 0x67d   : > { %v4058_v29 = vsel %vm1496_vm9, %v3996_v58, %v3762_v17  ;;  %v4060_v3 = vsel %vm1496_vm9, %v3998_v49, %v3762_v17  ;;  %vm14716_vm9 = vmmov %vm14711_vm2  ;;  %v3280_v49 = vsel %vm3272_vm4, %v3247_v54, %v14537_v40  ;;  %v14718_v58 = vld [vmem:[#allocation240_spill] sm:$0xff]  ;;  %v3536_v1 = vsel %vm3532_vm15, %v3503_v42, %v14720_v46  ;;  %v14734_v8 = vld [vmem:[#allocation119_spill] sm:$0xff] }
 0x67e   : > { %v4106_v44 = vsel %vm3207_vm6, %v4058_v29, %v6768_v21  ;;  %v4108_v56 = vsel %vm3207_vm6, %v4060_v3, %v6768_v21  ;;  %v14715_v21 = vld [vmem:[#allocation285_spill] sm:$0xff]  ;;  %vm14722_vm2 = vcmask 261120   ;;  %v14723_v3 = vld [vmem:[#allocation24_spill] sm:$0xff]  ;;  %v14735_v42 = vld [vmem:[#allocation127_spill] sm:$0xff] }
 0x67f   : > { %v4154_v30 = vsel %vm1529_vm10, %v4106_v44, %v11918_v7  ;;  %v4156_v38 = vsel %vm1529_vm10, %v4108_v56, %v11918_v7  ;;  %v3440_v47 = vsel %vm14716_vm9, %v3408_v28, %v14715_v21  ;;  %v4403_v7 = vshrl.u32 %v4251_v0, 16  ;;  %v14725_v44 = vld [vmem:[#allocation303_spill] sm:$0xff]  ;;  %vm14726_vm3 = vmmov %vm14722_vm2  ;;  %v14727_v28 = vld [vmem:[#allocation253_spill] sm:$0xff] }
 0x680   : > { %v3890_v53 = vpop.permute.xlu1 %3889  ;;  %v4202_v55 = vsel %vm3272_vm4, %v4154_v30, %v6773_v33  ;;  %v4204_v23 = vsel %vm3272_vm4, %v4156_v38, %v6773_v33  ;;  %v3249_v33 = vsel %vm1529_vm10, %v12022_v20, %v14573_v59  ;;  %v3473_v17 = vsel %vm14719_vm0, %v3440_v47, %v14718_v58  ;;  %v14721_v20 = vld [vmem:[#allocation227_spill] sm:$0xff]  ;;  %v14728_v30 = vld [vmem:[#allocation302_spill] sm:$0xff]  ;;  %v14744_v46 = vld [vmem:[#allocation144_spill] sm:$0xff] }
 0x681   : > { %v4250_v5 = vsel %vm1562_vm11, %v4202_v55, %v3890_v53  ;;  %v4252_v10 = vsel %vm1562_vm11, %v4204_v23, %v3890_v53  ;;  %v4408_v29 = vor.u32 %v4407_v25, %v4403_v7  ;;  %v4398_v0 = vor.u32 %v4397_v57, %v4393_v36  ;;  %v14729_v38 = vld [vmem:[#allocation271_spill] sm:$0xff]  ;;  %v14730_v55 = vld [vmem:[#allocation82_spill] sm:$0xff]  ;;  %v14740_v36 = vld [vmem:[#allocation109_spill] sm:$0xff] }
 0x682   : > { %v4399_v52 = vshll.u32 %v4250_v5, 16  ;;  %v4409_v60 = vshll.u32 %v4252_v10, 16  ;;  %v3282_v43 = vsel %vm3272_vm4, %v3249_v33, %v14576_v39  ;;  %v3312_v59 = vsel %vm1562_vm11, %v3280_v49, %v14543_v37  ;;  %v14731_v25 = vld [vmem:[#allocation247_spill] sm:$0xff]  ;;  %v14741_v33 = vld [vmem:[#allocation9_spill] sm:$0xff]  ;;  %v14743_v49 = vld [vmem:[#allocation122_spill] sm:$0xff] }
 0x683   : > { %v3505_v40 = vsel %vm1661_vm14, %v3473_v17, %v14721_v20  ;;  %v3345_v2 = vsel %vm3337_vm7, %v3312_v59, %v14723_v3  ;;  %v3314_v37 = vsel %vm1562_vm11, %v3282_v43, %v14581_v32  ;;  %v3223_v41 = vsel %vm3207_vm6, %v12029_v48, %v14727_v28  ;;  %vm14736_vm6 = vmmov %vm14719_vm0  ;;  %v14737_v10 = vld [vmem:[#allocation259_spill] sm:$0xff]  ;;  %v14749_v3 = vld [vmem:[#allocation148_spill] sm:$0xff] }
 0x684   : > { %v4401_v34 = vrot.slane %v4399_v52, 1  ;;  %v4411_v6 = vrot.slane %v4409_v60, 1  ;;  %v4416_v24 = vpop.permute.xlu1 %4415  ;;  %v3538_v27 = vsel %vm3532_vm15, %v3505_v40, %v14724_v26  ;;  %v3377_v56 = vsel %vm1595_vm12, %v3345_v2, %v14725_v44  ;;  %v14738_v60 = vld [vmem:[#allocation6_spill] sm:$0xff]  ;;  %v14748_v40 = vld [vmem:[#allocation25_spill] sm:$0xff] }
 0x685   : > { %v4448_v54 = vsel %vm14722_vm2, %v3536_v1, %v4416_v24  ;;  %v4450_v22 = vsel %vm14726_vm3, %v3538_v27, %v4418_v18  ;;  %v3347_v32 = vsel %vm3337_vm7, %v3314_v37, %v14728_v30  ;;  %v3410_v53 = vsel %vm3402_vm1, %v3377_v56, %v14729_v38  ;;  %v14745_v1 = vld [vmem:[#allocation312_spill] sm:$0xff]  ;;  %v14750_v2 = vld [vmem:[#allocation305_spill] sm:$0xff]  ;;  %vm14751_vm3 = vmmov %vm14722_vm2 }
 0x686   : > { %6570 = vmatmul.mubr.msk.bf16.vlgmr.msra.gmra.mrb[32].mxu0 %vm4498_vm13, %v4448_v54  ;;  %v4412_v14 = vsel %vm917_vm5, %v4408_v29, %v4411_v6  ;;  %v4402_v39 = vsel %vm917_vm5, %v4398_v0, %v4401_v34  ;;  %v12185_v23 = vadd.f32 %v14730_v55, %v12040_v11  ;;  %v1979_v48 = vadd.f32 %v14730_v55, %v12052_v45  ;;  %vm14733_vm5 = vmmov %vm14716_vm9  ;;  %v4422_v34 = vpop.permute.xlu0 %4421  ;;  %v14746_v29 = vld [vmem:[#allocation311_spill] sm:$0xff]  ;;  %v14753_v37 = vld [vmem:[#allocation304_spill] sm:$0xff] }
 0x687   : > { %4443 = vrot.lane.b32.xlu1 %v4412_v14, %s6794_s30  ;;  %4441 = vrot.lane.b32.xlu0 %v4402_v39, %s6794_s30  ;;  %v3379_v57 = vsel %vm1595_vm12, %v3347_v32, %v14731_v25  ;;  %v3442_v15 = vsel %vm14733_vm5, %v3410_v53, %v14732_v63  ;;  %v12195_v21 = vadd.f32 %v14730_v55, %v12056_v62  ;;  %vm14739_vm9 = vmmov %vm14733_vm5  ;;  %s6811_s30 = smov 106   ;;  %v14752_v14 = vld [vmem:[#allocation214_spill] sm:$0xff]  ;;  %v14754_v56 = vld [vmem:[#allocation264_spill] sm:$0xff] }
 0x688   : > { %6573 = vmatprep.mubr.msk.bf16.mxu0 %vm4498_vm13, %v4450_v22  ;;  %v1980_v47 = vadd.f32 %v14730_v55, %v12066_v13  ;;  %v3412_v11 = vsel %vm3402_vm1, %v3379_v57, %v14734_v8  ;;  %v3475_v5 = vsel %vm14736_vm6, %v3442_v15, %v14735_v42  ;;  %v4420_v45 = vpop.permute.xlu1 %4419  ;;  %v3251_v52 = vsel %vm1529_vm10, %v12018_v35, %v14737_v10  ;;  %v14742_v13 = vld [vmem:[#allocation7_spill] sm:$0xff]  ;;  %v14756_v38 = vld [vmem:[#allocation93_spill] sm:$0xff]  ;;  %v14758_v57 = vld [vmem:[#allocation282_spill] sm:$0xff] }
 0x689   : > { %v3444_v7 = vsel %vm14739_vm9, %v3412_v11, %v14738_v60  ;;  %v3507_v62 = vsel %vm1661_vm14, %v3475_v5, %v14740_v36  ;;  %v1949_v58 = vmul.f32 %v14743_v49, %v14688_v19  ;;  %v3284_v17 = vsel %vm3272_vm4, %v3251_v52, %v14544_v16  ;;  %v14747_v16 = vld [vmem:[#allocation251_spill] sm:$0xff]  ;;  %v14759_v15 = vld [vmem:[#allocation152_spill] sm:$0xff]  ;;  %vm14760_vm6 = vmmov %vm14719_vm0 }
 0x68a   : > { %v3477_v35 = vsel %vm14719_vm0, %v3444_v7, %v14744_v46  ;;  %v3540_v18 = vsel %vm3532_vm15, %v3507_v62, %v14745_v1  ;;  %v3253_v6 = vsel %vm1529_vm10, %v12044_v9, %v14577_v50  ;;  %v3316_v24 = vsel %vm1562_vm11, %v3284_v17, %v10267_v31  ;;  %v14755_v30 = vld [vmem:[#allocation283_spill] sm:$0xff]  ;;  %vm14762_vm9 = vmmov %vm14733_vm5  ;;  %v14763_v10 = vld [vmem:[#allocation229_spill] sm:$0xff] }
 0x68b   : > { %4730 = vrot.lane.b32.xlu1 %v14741_v33, %s6810_s26  ;;  %4695 = vrot.lane.b32.xlu0 %v14742_v13, %s6810_s26  ;;  %v3509_v0 = vsel %vm1661_vm14, %v3477_v35, %v14746_v29  ;;  %v4452_v43 = vsel %vm14722_vm2, %v3540_v18, %v4420_v45  ;;  %v1947_v59 = vmul.f32 %v14688_v19, %v14747_v16  ;;  %v2013_v31 = vmax.f32 %v12185_v23, 0.0  ;;  %v14761_v5 = vld [vmem:[#allocation287_spill] sm:$0xff]  ;;  %v14764_v7 = vld [vmem:[#allocation182_spill] sm:$0xff] }
 0x68c   : > { %v3286_v20 = vsel %vm3272_vm4, %v3253_v6, %v14582_v4  ;;  %v3349_v54 = vsel %vm3337_vm7, %v3316_v24, %v14748_v40  ;;  %v3542_v50 = vsel %vm3532_vm15, %v3509_v0, %v14749_v3  ;;  %v2011_v4 = vmax.f32 %v1979_v48, 0.0  ;;  %v14757_v48 = vld [vmem:[#allocation156_spill] sm:$0xff]  ;;  %v4424_v8 = vpop.permute.xlu1 %4423  ;;  %v14765_v62 = vld [vmem:[#allocation134_spill] sm:$0xff]  ;;  %v14769_v46 = vld [vmem:[#allocation115_spill] sm:$0xff] }
 0x68d   : > { %v3318_v9 = vsel %vm1562_vm11, %v3286_v20, %v14589_v61  ;;  %v3381_v26 = vsel %vm1595_vm12, %v3349_v54, %v14750_v2  ;;  %v4454_v27 = vsel %vm14751_vm3, %v3542_v50, %v4422_v34  ;;  %v1948_v39 = vmul.f32 %v14688_v19, %v14752_v14  ;;  %v14770_v34 = vld [vmem:[#allocation133_spill] sm:$0xff]  ;;  %v14771_v24 = vld [vmem:[#allocation27_spill] sm:$0xff]  ;;  %vm14775_vm3 = vmmov %vm14722_vm2 }
 0x68e   : > { %6574 = vmatmul.mubr.msk.bf16.gmra.mrb[36].mxu0 %vm4498_vm13, %v4452_v43  ;;  %v3351_v44 = vsel %vm3337_vm7, %v3318_v9, %v14753_v37  ;;  %v3414_v61 = vsel %vm3402_vm1, %v3381_v26, %v14754_v56  ;;  %v2012_v22 = vmax.f32 %v1980_v47, 0.0  ;;  %v12253_v28 = vadd.f32 %v14730_v55, %v1949_v58  ;;  %v14768_v58 = vld [vmem:[#allocation204_spill] sm:$0xff]  ;;  %v14772_v0 = vld [vmem:[#allocation267_spill] sm:$0xff]  ;;  %v14776_v50 = vld [vmem:[#allocation98_spill] sm:$0xff] }
 0x68f   : > { %5662 = vrot.lane.b32.xlu1 %v14741_v33, %s6811_s30  ;;  %5627 = vrot.lane.b32.xlu0 %v14742_v13, %s6811_s30  ;;  %v3383_v32 = vsel %vm1595_vm12, %v3351_v44, %v14755_v30  ;;  %v3446_v53 = vsel %vm14733_vm5, %v3414_v61, %v14756_v38  ;;  %v1983_v23 = vadd.f32 %v14730_v55, %v1947_v59  ;;  %v2014_v11 = vmax.f32 %v12195_v21, 0.0  ;;  %v14766_v33 = vld [vmem:[#allocation276_spill] sm:$0xff]  ;;  %v14767_v13 = vld [vmem:[#allocation243_spill] sm:$0xff]  ;;  %v14774_v59 = vld [vmem:[#allocation306_spill] sm:$0xff] }
 0x690   : > { %6577 = vmatprep.mubr.msk.bf16.mxu0 %vm4498_vm13, %v4454_v27  ;;  %v1950_v25 = vmul.f32 %v14757_v48, %v14688_v19  ;;  %v3416_v63 = vsel %vm3402_vm1, %v3383_v32, %v14758_v57  ;;  %v3479_v47 = vsel %vm14760_vm6, %v3446_v53, %v14759_v15  ;;  %v3255_v42 = vsel %vm1529_vm10, %v3223_v41, %v14547_v51  ;;  %v4426_v41 = vpop.permute.xlu0 %4425  ;;  %v14777_v2 = vld [vmem:[#allocation255_spill] sm:$0xff]  ;;  %v14778_v27 = vld [vmem:[#allocation41_spill] sm:$0xff]  ;;  %v14779_v14 = vld [vmem:[#allocation170_spill] sm:$0xff] }
 0x691   : > { %v3448_v45 = vsel %vm14762_vm9, %v3416_v63, %v14761_v5  ;;  %v3511_v52 = vsel %vm1661_vm14, %v3479_v47, %v14763_v10  ;;  %v1984_v60 = vadd.f32 %v14730_v55, %v1948_v39  ;;  %v3288_v36 = vsel %vm3272_vm4, %v3255_v42, %v14764_v7  ;;  %v14780_v37 = vld [vmem:[#allocation2_spill] sm:$0xff]  ;;  %v14783_v61 = vld [vmem:[#allocation188_spill] sm:$0xff]  ;;  %v14786_v48 = vld [vmem:[#allocation297_spill] sm:$0xff] }
 0x692   : > { %v3481_v21 = vsel %vm14719_vm0, %v3448_v45, %v14765_v62  ;;  %v3544_v51 = vsel %vm3532_vm15, %v3511_v52, %v14766_v33  ;;  %v3257_v49 = vsel %vm1529_vm10, %v12176_v12, %v14767_v13  ;;  %v3320_v17 = vsel %vm1562_vm11, %v3288_v36, %v14768_v58  ;;  %v14773_v12 = vld [vmem:[#allocation31_spill] sm:$0xff]  ;;  %v14784_v30 = vld [vmem:[#allocation90_spill] sm:$0xff]  ;;  %v14788_v57 = vld [vmem:[#allocation248_spill] sm:$0xff] }
 0x693   : > { %5763 = vrot.lane.b32.xlu1 %v2012_v22, %s6792_s27  ;;  %5761 = vrot.lane.b32.xlu0 %v2011_v4, %s6792_s27  ;;  %v3513_v35 = vsel %vm1661_vm14, %v3481_v21, %v14769_v46  ;;  %v4456_v1 = vsel %vm14722_vm2, %v3544_v51, %v4424_v8  ;;  %v1986_v18 = vadd.f32 %v14730_v55, %v1950_v25  ;;  %v2015_v54 = vmax.f32 %v1983_v23, 0.0  ;;  %v14789_v15 = vld [vmem:[#allocation42_spill] sm:$0xff]  ;;  %v14790_v8 = vld [vmem:[#allocation44_spill] sm:$0xff]  ;;  %v14791_v42 = vld [vmem:[#allocation277_spill] sm:$0xff] }
 0x694   : > { %v3290_v6 = vsel %vm3272_vm4, %v3257_v49, %v14770_v34  ;;  %v3353_v29 = vsel %vm3337_vm7, %v3320_v17, %v14771_v24  ;;  %v3546_v43 = vsel %vm3532_vm15, %v3513_v35, %v14772_v0  ;;  %v2016_v3 = vmax.f32 %v1984_v60, 0.0  ;;  %vm14782_vm4 = vmmov %vm14733_vm5  ;;  %v14793_v5 = vld [vmem:[#allocation315_spill] sm:$0xff]  ;;  %v4430_v10 = vpop.permute.xlu0 %4429  ;;  %v14794_v7 = vld [vmem:[#allocation314_spill] sm:$0xff] }
 0x695   : > { %v3322_v16 = vsel %vm1562_vm11, %v3290_v6, %v14773_v12  ;;  %v3385_v20 = vsel %vm1595_vm12, %v3353_v29, %v14774_v59  ;;  %v4458_v40 = vsel %vm14775_vm3, %v3546_v43, %v4426_v41  ;;  %v1951_v4 = vmul.f32 %v14688_v19, %v14778_v27  ;;  %v4428_v38 = vpop.permute.xlu1 %4427  ;;  %vm14787_vm5 = vmmov %vm14782_vm4  ;;  %v14796_v21 = vld [vmem:[#allocation116_spill] sm:$0xff]  ;;  %v14798_v17 = vld [vmem:[#allocation95_spill] sm:$0xff] }
 0x696   : > { %6578 = vmatmul.mubr.msk.bf16.gmra.mrb[40].mxu0 %vm4498_vm13, %v4456_v1  ;;  %v3355_v9 = vsel %vm3337_vm7, %v3322_v16, %v14776_v50  ;;  %v3418_v26 = vsel %vm3402_vm1, %v3385_v20, %v14777_v2  ;;  %v1952_v39 = vmul.f32 %v14688_v19, %v14779_v14  ;;  %vm14785_vm7 = vmmov %vm14719_vm0  ;;  %v2017_v53 = vmax.f32 %v12253_v28, 0.0  ;;  %v14799_v35 = vld [vmem:[#allocation175_spill] sm:$0xff]  ;;  %v14801_v6 = vld [vmem:[#allocation110_spill] sm:$0xff] }
 0x697   : > { %5767 = vrot.lane.b32.xlu1 %v2014_v11, %s6792_s27  ;;  %5765 = vrot.lane.b32.xlu0 %v2013_v31, %s6792_s27  ;;  %v3387_v44 = vsel %vm1595_vm12, %v3355_v9, %v14780_v37  ;;  %v14781_v31 = vld [vmem:[#allocation261_spill] sm:$0xff]  ;;  %v2018_v23 = vmax.f32 %v1986_v18, 0.0  ;;  %v1953_v47 = vmul.f32 %v14789_v15, %v14688_v19  ;;  %v1954_v11 = vmul.f32 %v14790_v8, %v14688_v19  ;;  %vm14792_vm12 = vmmov %vm14719_vm0  ;;  %v14800_v18 = vld [vmem:[#allocation35_spill] sm:$0xff] }
 0x698   : > { %6581 = vmatprep.mubr.msk.bf16.mxu0 %vm4498_vm13, %v4458_v40  ;;  %v3450_v56 = vsel %vm14782_vm4, %v3418_v26, %v14781_v31  ;;  %v3420_v22 = vsel %vm3402_vm1, %v3387_v44, %v14783_v61  ;;  %v1987_v52 = vadd.f32 %v14730_v55, %v1951_v4  ;;  %v1988_v60 = vadd.f32 %v14730_v55, %v1952_v39  ;;  %vm14795_vm1 = vmmov %vm14722_vm2  ;;  %v14803_v50 = vld [vmem:[#allocation132_spill] sm:$0xff]  ;;  %v14804_v2 = vld [vmem:[#allocation14_spill] sm:$0xff] }
 0x699   : > { %v3483_v32 = vsel %vm14785_vm7, %v3450_v56, %v14784_v30  ;;  %v3452_v25 = vsel %vm14787_vm5, %v3420_v22, %v14786_v48  ;;  %vm14797_vm6 = vmmov %vm14795_vm1  ;;  %v1989_v41 = vadd.f32 %v14730_v55, %v1953_v47  ;;  %v1990_v13 = vadd.f32 %v14730_v55, %v1954_v11  ;;  %v14805_v27 = vld [vmem:[#allocation279_spill] sm:$0xff]  ;;  %v14806_v61 = vld [vmem:[#allocation317_spill] sm:$0xff] }
 0x69a   : > { %v3515_v63 = vsel %vm1661_vm14, %v3483_v32, %v14788_v57  ;;  %v3485_v28 = vsel %vm14792_vm12, %v3452_v25, %v14791_v42  ;;  %v2019_v49 = vmax.f32 %v1987_v52, 0.0  ;;  %v2020_v58 = vmax.f32 %v1988_v60, 0.0  ;;  %v14810_v25 = vld [vmem:[#allocation284_spill] sm:$0xff]  ;;  %v14812_v47 = vld [vmem:[#allocation174_spill] sm:$0xff]  ;;  %v14813_v11 = vld [vmem:[#allocation141_spill] sm:$0xff] }
 0x69b   : > { %5771 = vrot.lane.b32.xlu1 %v2016_v3, %s6792_s27  ;;  %5769 = vrot.lane.b32.xlu0 %v2015_v54, %s6792_s27  ;;  %v3548_v45 = vsel %vm3532_vm15, %v3515_v63, %v14793_v5  ;;  %v3517_v36 = vsel %vm1661_vm14, %v3485_v28, %v14794_v7  ;;  %v1955_v46 = vmul.f32 %v14688_v19, %v14798_v17  ;;  %v2021_v29 = vmax.f32 %v1989_v41, 0.0  ;;  %v14802_v54 = vld [vmem:[#allocation260_spill] sm:$0xff]  ;;  %vm14807_vm14 = vmmov %vm14795_vm1  ;;  %v14811_v63 = vld [vmem:[#allocation181_spill] sm:$0xff] }
 0x69c   : > { %v4460_v62 = vsel %vm14795_vm1, %v3548_v45, %v4428_v38  ;;  %v3550_v33 = vsel %vm3532_vm15, %v3517_v36, %v14796_v21  ;;  %v1956_v1 = vmul.f32 %v14688_v19, %v14799_v35  ;;  %v1957_v34 = vmul.f32 %v14800_v18, %v14688_v19  ;;  %v14808_v38 = vld [vmem:[#allocation112_spill] sm:$0xff]  ;;  %vm14809_vm15 = vmmov %vm14795_vm1  ;;  %v14816_v41 = vld [vmem:[#allocation138_spill] sm:$0xff] }
 0x69d   : > { %v4462_v51 = vsel %vm14797_vm6, %v3550_v33, %v4430_v10  ;;  %v1958_v24 = vmul.f32 %v14801_v6, %v14688_v19  ;;  %v2022_v0 = vmax.f32 %v1990_v13, 0.0  ;;  %v1991_v43 = vadd.f32 %v14730_v55, %v1955_v46  ;;  %v14815_v33 = vld [vmem:[#allocation102_spill] sm:$0xff]  ;;  %vm14823_vm9 = vmmov %vm14795_vm1 }
 0x69e   : > { %6582 = vmatmul.mubr.msk.bf16.gmra.mrb[44].mxu0 %vm4498_vm13, %v4460_v62  ;;  %v1992_v12 = vadd.f32 %v14730_v55, %v1956_v1  ;;  %v1993_v16 = vadd.f32 %v14730_v55, %v1957_v34  ;;  %v1959_v3 = vmul.f32 %v14688_v19, %v14802_v54  ;;  %v1960_v9 = vmul.f32 %v14688_v19, %v14803_v50  ;;  %v14814_v62 = vld [vmem:[#allocation189_spill] sm:$0xff]  ;;  %vm14825_vm0 = vmmov %vm14795_vm1 }
 0x69f   : > { %5775 = vrot.lane.b32.xlu1 %v2018_v23, %s6792_s27  ;;  %5773 = vrot.lane.b32.xlu0 %v2017_v53, %s6792_s27  ;;  %v1994_v59 = vadd.f32 %v14730_v55, %v1958_v24  ;;  %v2023_v20 = vmax.f32 %v1991_v43, 0.0  ;;  %v1961_v26 = vmul.f32 %v14804_v2, %v14688_v19  ;;  %v1962_v4 = vmul.f32 %v14805_v27, %v14688_v19  ;;  %v14819_v43 = vld [vmem:[#allocation215_spill] sm:$0xff]  ;;  %vm14827_vm2 = vmmov %vm14825_vm0 }
 0x6a0   : > { %6585 = vmatprep.mubr.msk.bf16.mxu0 %vm4498_vm13, %v4462_v51  ;;  %v2024_v40 = vmax.f32 %v1992_v12, 0.0  ;;  %v2025_v14 = vmax.f32 %v1993_v16, 0.0  ;;  %v1995_v37 = vadd.f32 %v14730_v55, %v1959_v3  ;;  %v1996_v44 = vadd.f32 %v14730_v55, %v1960_v9  ;;  %v14821_v3 = vld [vmem:[#allocation125_spill] sm:$0xff]  ;;  %vm14829_vm3 = vmmov %vm14825_vm0 }
 0x6a1   : > { %v2026_v39 = vmax.f32 %v1994_v59, 0.0  ;;  %v1997_v30 = vadd.f32 %v14730_v55, %v1961_v26  ;;  %v1998_v32 = vadd.f32 %v14730_v55, %v1962_v4  ;;  %v1963_v57 = vmul.f32 %v14688_v19, %v14810_v25  ;;  %v14822_v26 = vld [vmem:[#allocation320_spill] sm:$0xff]  ;;  %vm14831_vm4 = vmmov %vm14825_vm0 }
 0x6a2   : > { %v2027_v23 = vmax.f32 %v1995_v37, 0.0  ;;  %v2028_v48 = vmax.f32 %v1996_v44, 0.0  ;;  %v1964_v15 = vmul.f32 %v14688_v19, %v14811_v63  ;;  %v1965_v8 = vmul.f32 %v14812_v47, %v14688_v19  ;;  %v14832_v47 = vld [vmem:[#allocation324_spill] sm:$0xff] }
 0x6a3   : > { %5779 = vrot.lane.b32.xlu1 %v2020_v58, %s6792_s27  ;;  %5777 = vrot.lane.b32.xlu0 %v2019_v49, %s6792_s27  ;;  %v1966_v42 = vmul.f32 %v14813_v11, %v14688_v19  ;;  %v2029_v28 = vmax.f32 %v1997_v30, 0.0  ;;  %v2030_v5 = vmax.f32 %v1998_v32, 0.0  ;;  %v1999_v45 = vadd.f32 %v14730_v55, %v1963_v57  ;;  %v14817_v49 = vld [vmem:[#allocation100_spill] sm:$0xff]  ;;  %v14826_v30 = vld [vmem:[#allocation154_spill] sm:$0xff] }
 0x6a4   : > { %v2000_v10 = vadd.f32 %v14730_v55, %v1964_v15  ;;  %v2001_v52 = vadd.f32 %v14730_v55, %v1965_v8  ;;  %v1967_v21 = vmul.f32 %v14688_v19, %v14814_v62  ;;  %v1968_v51 = vmul.f32 %v14688_v19, %v14815_v33 }
 0x6a5   : > { %v2002_v60 = vadd.f32 %v14730_v55, %v1966_v42  ;;  %v2031_v7 = vmax.f32 %v1999_v45, 0.0  ;;  %v1969_v13 = vmul.f32 %v14816_v41, %v14688_v19  ;;  %v1970_v58 = vmul.f32 %v14817_v49, %v14688_v19  ;;  %v14834_v45 = vld [vmem:[#allocation321_spill] sm:$0xff] }
 0x6a6   : > { %v4434_v31 = vpop.permute.xlu0 %4433  ;;  %v2032_v36 = vmax.f32 %v2000_v10, 0.0  ;;  %v2033_v17 = vmax.f32 %v2001_v52, 0.0  ;;  %v2003_v35 = vadd.f32 %v14730_v55, %v1967_v21  ;;  %v2004_v1 = vadd.f32 %v14730_v55, %v1968_v51  ;;  %v14835_v52 = vld [vmem:[#allocation171_spill] sm:$0xff] }
 0x6a7   : > { %5783 = vrot.lane.b32.xlu1 %v2022_v0, %s6792_s27  ;;  %5781 = vrot.lane.b32.xlu0 %v2021_v29, %s6792_s27  ;;  %v4466_v53 = vsel %vm14809_vm15, %v14808_v38, %v4434_v31  ;;  %v2034_v46 = vmax.f32 %v2002_v60, 0.0  ;;  %v2005_v18 = vadd.f32 %v14730_v55, %v1969_v13  ;;  %v2006_v34 = vadd.f32 %v14730_v55, %v1970_v58  ;;  %v14818_v29 = vld [vmem:[#allocation104_spill] sm:$0xff] }
 0x6a8   : > { %v2035_v6 = vmax.f32 %v2003_v35, 0.0  ;;  %v2036_v24 = vmax.f32 %v2004_v1, 0.0  ;;  %v1971_v0 = vmul.f32 %v14688_v19, %v14818_v29  ;;  %v1972_v12 = vmul.f32 %v14688_v19, %v14819_v43 }
 0x6a9   : > { %v2037_v16 = vmax.f32 %v2005_v18, 0.0  ;;  %v2038_v59 = vmax.f32 %v2006_v34, 0.0  ;;  %v1974_v50 = vmul.f32 %v14821_v3, %v14688_v19 }
 0x6aa   : > { %v2007_v54 = vadd.f32 %v14730_v55, %v1971_v0  ;;  %v2008_v9 = vadd.f32 %v14730_v55, %v1972_v12 }
 0x6ab   : > { %5787 = vrot.lane.b32.xlu1 %v2024_v40, %s6792_s27  ;;  %5785 = vrot.lane.b32.xlu0 %v2023_v20, %s6792_s27  ;;  %v14820_v20 = vld [vmem:[#allocation113_spill] sm:$0xff] }
 0x6ac   : > { %v1973_v40 = vmul.f32 %v14820_v20, %v14688_v19  ;;  %v2040_v37 = vmax.f32 %v2008_v9, 0.0 }
 0x6ad   : > { %v4432_v56 = vpop.permute.xlu1 %4431 }
 0x6ae   : > { %v4464_v22 = vsel %vm14807_vm14, %v14806_v61, %v4432_v56  ;;  %v2009_v4 = vadd.f32 %v14730_v55, %v1973_v40  ;;  %v14824_v56 = vld [vmem:[#allocation101_spill] sm:$0xff] }
 0x6af   : > { %5791 = vrot.lane.b32.xlu1 %v2026_v39, %s6792_s27  ;;  %5789 = vrot.lane.b32.xlu0 %v2025_v14, %s6792_s27  ;;  %v2039_v14 = vmax.f32 %v2007_v54, 0.0  ;;  %v2010_v39 = vadd.f32 %v14730_v55, %v1974_v50 }
 0x6b0   : > { %6586 = vmatmul.mubr.msk.bf16.gmra.mrb[48].mxu0 %vm4498_vm13, %v4464_v22  ;;  %v2041_v19 = vmax.f32 %v2009_v4, 0.0 }
 0x6b1   : > { %6589 = vmatprep.mubr.msk.bf16.mxu0 %vm4498_vm13, %v4466_v53  ;;  %v2042_v44 = vmax.f32 %v2010_v39, 0.0  ;;  %v14828_v53 = vld [vmem:[#allocation151_spill] sm:$0xff] }
 0x6b3   : > { %5795 = vrot.lane.b32.xlu1 %v2028_v48, %s6792_s27  ;;  %5793 = vrot.lane.b32.xlu0 %v2027_v23, %s6792_s27  ;;  %v14830_v48 = vld [vmem:[#allocation216_spill] sm:$0xff] }
 0x6b7   : > { %5799 = vrot.lane.b32.xlu1 %v2030_v5, %s6792_s27  ;;  %5797 = vrot.lane.b32.xlu0 %v2029_v28, %s6792_s27  ;;  %v14833_v28 = vld [vmem:[#allocation128_spill] sm:$0xff] }
 0x6bb   : > { %5803 = vrot.lane.b32.xlu1 %v2032_v36, %s6792_s27  ;;  %5801 = vrot.lane.b32.xlu0 %v2031_v7, %s6792_s27  ;;  %v14836_v7 = vld [vmem:[#allocation322_spill] sm:$0xff] }
 0x6bf   : > { %5807 = vrot.lane.b32.xlu1 %v2034_v46, %s6792_s27  ;;  %5805 = vrot.lane.b32.xlu0 %v2033_v17, %s6792_s27 }
 0x6c3   : > { %5811 = vrot.lane.b32.xlu1 %v2036_v24, %s6792_s27  ;;  %5809 = vrot.lane.b32.xlu0 %v2035_v6, %s6792_s27 }
 0x6c5   : > { %v4436_v2 = vpop.permute.xlu1 %4435 }
 0x6c6   : > { %v4468_v27 = vsel %vm14823_vm9, %v14822_v26, %v4436_v2 }
 0x6c7   : > { %5815 = vrot.lane.b32.xlu1 %v2038_v59, %s6792_s27  ;;  %5813 = vrot.lane.b32.xlu0 %v2037_v16, %s6792_s27 }
 0x6c8   : > { %6590 = vmatmul.mubr.msk.bf16.gmra.mrb[52].mxu0 %vm4498_vm13, %v4468_v27 }
 0x6cb   : > { %5819 = vrot.lane.b32.xlu1 %v2040_v37, %s6792_s27  ;;  %5817 = vrot.lane.b32.xlu0 %v2039_v14, %s6792_s27 }
 0x6cf   : > { %5823 = vrot.lane.b32.xlu1 %v2042_v44, %s6792_s27  ;;  %5821 = vrot.lane.b32.xlu0 %v2041_v19, %s6792_s27  ;;  %s6639_s27 = smul.u32 48, %s14929_s22 }
 0x6e9   : > { %v4438_v31 = vpop.permute.xlu0 %4437 }
 0x6ea   : > { %v4470_v61 = vsel %vm14825_vm0, %v14824_v56, %v4438_v31 }
 0x6eb   : > { %6593 = vmatprep.mubr.msk.bf16.mxu0 %vm4498_vm13, %v4470_v61 }
 0x6ed   : > { %v4440_v22 = vpop.permute.xlu1 %4439 }
 0x6ee   : > { %v4472_v55 = vsel %vm14827_vm2, %v14826_v30, %v4440_v22 }
 0x6ef   : > { %6594 = vmatmul.mubr.msk.bf16.gmra.mrb[56].mxu0 %vm4498_vm13, %v4472_v55 }
 0x6f9   : > { %v4444_v32 = vpop.permute.xlu1 %4443  ;;  %v4442_v38 = vpop.permute.xlu0 %4441 }
 0x6fa   : > { %v4476_v23 = vsel %vm14829_vm3, %v14828_v53, %v4444_v32  ;;  %v4474_v25 = vsel %vm14831_vm4, %v14830_v48, %v4442_v38 }
 0x6fb   : > { %6597 = vmatprep.mubr.msk.bf16.mxu0 %vm4498_vm13, %v4474_v25 }
 0x6fc   : > { %6598 = vmatmul.mubr.msk.bf16.gmra.mrb[60].mxu0 %vm4498_vm13, %v4476_v23 }
 0x6fd   : > { %v12456_v57 = vpop.permute.xlu0 %4695  ;;  %v12458_v63 = vpop.permute.xlu1 %4730 }
 0x701   : > { %v12460_v15 = vpop.permute.xlu0 %5627  ;;  %v12464_v11 = vpop.permute.xlu1 %5662 }
 0x702   : > { %v5659_v8 = vmul.f32 %v12460_v15, %v14832_v47  ;;  %v5644_v5 = vmul.f32 %v14833_v28, %v12460_v15  ;;  %v5660_v10 = vmul.f32 %v14834_v45, %v12460_v15  ;;  %v5645_v60 = vmul.f32 %v14835_v52, %v12460_v15 }
 0x703   : > { %v5661_v36 = vmul.f32 %v14836_v7, %v12460_v15 }
 0x704   : > { %v12467_v42 = vadd.f32 %v12464_v11, %v5659_v8  ;;  %v12478_v62 = vadd.f32 %v12464_v11, %v5644_v5  ;;  %v12481_v21 = vadd.f32 %v12464_v11, %v5660_v10  ;;  %v12484_v33 = vadd.f32 %v12464_v11, %v5645_v60 }
 0x705   : > { %v12487_v51 = vadd.f32 %v12464_v11, %v5661_v36  ;;  %v12525_v7 = vpop.permute.xlu0 %5761 }
 0x759   : > { %v6571_v41 = vpop.f32.mrb[32].mxu0 }
 0x75a   : > { %v4568_v13 = vpop.f32.mrb[33].mxu0  ;;  %v4700_v49 = vmul.f32 %v6571_v41, %v12456_v57 }
 0x75b   : > { %v4698_v58 = vmul.f32 %v12456_v57, %v4568_v13  ;;  %v6572_v17 = vpop.f32.mrb[34].mxu0 }
 0x75c   : > { %v4571_v46 = vpop.f32.mrb[35].mxu0  ;;  %v4701_v1 = vmul.f32 %v6572_v17, %v12456_v57  ;;  %v4735_v34 = vadd.f32 %v12458_v63, %v4700_v49 }
 0x75d   : > { %v4733_v35 = vadd.f32 %v12458_v63, %v4698_v58  ;;  %v4699_v18 = vmul.f32 %v12456_v57, %v4571_v46  ;;  %v12531_v58 = vpop.permute.xlu1 %5763 }
 0x75e   : > { %v4736_v29 = vadd.f32 %v12458_v63, %v4701_v1  ;;  %v4767_v16 = vmax.f32 %v4735_v34, 0.0  ;;  %v12538_v34 = vpop.permute.xlu0 %5765 }
 0x75f   : > { %v4765_v6 = vmax.f32 %v4733_v35, 0.0  ;;  %v4734_v24 = vadd.f32 %v12458_v63, %v4699_v18 }
 0x760   : > { %v4768_v3 = vmax.f32 %v4736_v29, 0.0 }
 0x761   : > { %v4766_v0 = vmax.f32 %v4734_v24, 0.0  ;;  %5889 = vrot.lane.b32.xlu0 %v4765_v6, %s6797_s12  ;;  %v6575_v43 = vpop.f32.mrb[36].mxu0  ;;  %v12541_v24 = vpop.permute.xlu1 %5767 }
 0x762   : > { %v4584_v12 = vpop.f32.mrb[37].mxu0  ;;  %v4704_v59 = vmul.f32 %v6575_v43, %v12456_v57 }
 0x763   : > { %v4702_v20 = vmul.f32 %v12456_v57, %v4584_v12  ;;  %5891 = vrot.lane.b32.xlu1 %v4766_v0, %s6797_s12  ;;  %v6576_v40 = vpop.f32.mrb[38].mxu0  ;;  %v12545_v0 = vpop.permute.xlu0 %5769 }
 0x764   : > { %v4587_v54 = vpop.f32.mrb[39].mxu0  ;;  %v4705_v9 = vmul.f32 %v6576_v40, %v12456_v57  ;;  %v4739_v26 = vadd.f32 %v12458_v63, %v4704_v59 }
 0x765   : > { %v4737_v50 = vadd.f32 %v12458_v63, %v4702_v20  ;;  %v4703_v2 = vmul.f32 %v12456_v57, %v4587_v54  ;;  %5893 = vrot.lane.b32.xlu0 %v4767_v16, %s6797_s12  ;;  %v12547_v43 = vpop.permute.xlu1 %5771 }
 0x766   : > { %v4740_v14 = vadd.f32 %v12458_v63, %v4705_v9  ;;  %v4771_v44 = vmax.f32 %v4739_v26, 0.0 }
 0x767   : > { %v4769_v27 = vmax.f32 %v4737_v50, 0.0  ;;  %v4738_v4 = vadd.f32 %v12458_v63, %v4703_v2  ;;  %5895 = vrot.lane.b32.xlu1 %v4768_v3, %s6797_s12  ;;  %v12551_v3 = vpop.permute.xlu0 %5773 }
 0x768   : > { %v4772_v30 = vmax.f32 %v4740_v14, 0.0 }
 0x769   : > { %v4770_v39 = vmax.f32 %v4738_v4, 0.0  ;;  %5897 = vrot.lane.b32.xlu0 %v4769_v27, %s6797_s12  ;;  %v6579_v37 = vpop.f32.mrb[40].mxu0  ;;  %v12556_v26 = vpop.permute.xlu1 %5775 }
 0x76a   : > { %v4600_v19 = vpop.f32.mrb[41].mxu0  ;;  %v4708_v31 = vmul.f32 %v6579_v37, %v12456_v57 }
 0x76b   : > { %v4706_v56 = vmul.f32 %v12456_v57, %v4600_v19  ;;  %5899 = vrot.lane.b32.xlu1 %v4770_v39, %s6797_s12  ;;  %v6580_v61 = vpop.f32.mrb[42].mxu0  ;;  %v12562_v19 = vpop.permute.xlu0 %5777 }
 0x76c   : > { %v4603_v22 = vpop.f32.mrb[43].mxu0  ;;  %v4709_v32 = vmul.f32 %v6580_v61, %v12456_v57  ;;  %v4743_v53 = vadd.f32 %v12458_v63, %v4708_v31 }
 0x76d   : > { %v4741_v55 = vadd.f32 %v12458_v63, %v4706_v56  ;;  %v4707_v38 = vmul.f32 %v12456_v57, %v4603_v22  ;;  %5901 = vrot.lane.b32.xlu0 %v4771_v44, %s6797_s12  ;;  %v12565_v31 = vpop.permute.xlu1 %5779 }
 0x76e   : > { %v4744_v25 = vadd.f32 %v12458_v63, %v4709_v32  ;;  %v4775_v5 = vmax.f32 %v4743_v53, 0.0 }
 0x76f   : > { %v4773_v23 = vmax.f32 %v4741_v55, 0.0  ;;  %v4742_v48 = vadd.f32 %v12458_v63, %v4707_v38  ;;  %5903 = vrot.lane.b32.xlu1 %v4772_v30, %s6797_s12  ;;  %v12569_v61 = vpop.permute.xlu0 %5781 }
 0x770   : > { %v4776_v36 = vmax.f32 %v4744_v25, 0.0 }
 0x771   : > { %v4774_v47 = vmax.f32 %v4742_v48, 0.0  ;;  %5905 = vrot.lane.b32.xlu0 %v4773_v23, %s6797_s12  ;;  %v6583_v8 = vpop.f32.mrb[44].mxu0  ;;  %v12571_v22 = vpop.permute.xlu1 %5783 }
 0x772   : > { %v4616_v28 = vpop.f32.mrb[45].mxu0  ;;  %v4712_v45 = vmul.f32 %v6583_v8, %v12456_v57 }
 0x773   : > { %v4710_v10 = vmul.f32 %v12456_v57, %v4616_v28  ;;  %5907 = vrot.lane.b32.xlu1 %v4774_v47, %s6797_s12  ;;  %v6584_v52 = vpop.f32.mrb[46].mxu0  ;;  %v12573_v30 = vpop.permute.xlu0 %5785 }
 0x774   : > { %v4619_v60 = vpop.f32.mrb[47].mxu0  ;;  %v4713_v13 = vmul.f32 %v6584_v52, %v12456_v57  ;;  %v4747_v17 = vadd.f32 %v12458_v63, %v4712_v45 }
 0x775   : > { %v4745_v41 = vadd.f32 %v12458_v63, %v4710_v10  ;;  %v4711_v49 = vmul.f32 %v12456_v57, %v4619_v60  ;;  %5909 = vrot.lane.b32.xlu0 %v4775_v5, %s6797_s12  ;;  %v12575_v55 = vpop.permute.xlu1 %5787 }
 0x776   : > { %v4748_v1 = vadd.f32 %v12458_v63, %v4713_v13  ;;  %v4779_v6 = vmax.f32 %v4747_v17, 0.0 }
 0x777   : > { %v4777_v46 = vmax.f32 %v4745_v41, 0.0  ;;  %v4746_v35 = vadd.f32 %v12458_v63, %v4711_v49  ;;  %5911 = vrot.lane.b32.xlu1 %v4776_v36, %s6797_s12  ;;  %v12579_v47 = vpop.permute.xlu0 %5789 }
 0x778   : > { %v4780_v29 = vmax.f32 %v4748_v1, 0.0 }
 0x779   : > { %v4778_v18 = vmax.f32 %v4746_v35, 0.0  ;;  %5913 = vrot.lane.b32.xlu0 %v4777_v46, %s6797_s12  ;;  %v12584_v45 = vpop.permute.xlu1 %5791 }
 0x77b   : > { %5915 = vrot.lane.b32.xlu1 %v4778_v18, %s6797_s12  ;;  %v12590_v13 = vpop.permute.xlu0 %5793 }
 0x77d   : > { %5917 = vrot.lane.b32.xlu0 %v4779_v6, %s6797_s12  ;;  %v12593_v17 = vpop.permute.xlu1 %5795 }
 0x77f   : > { %5919 = vrot.lane.b32.xlu1 %v4780_v29, %s6797_s12  ;;  %v12597_v35 = vpop.permute.xlu0 %5797 }
 0x781   : > { %v12599_v1 = vpop.permute.xlu1 %5799 }
 0x783   : > { %v6587_v12 = vpop.f32.mrb[48].mxu0  ;;  %v12601_v18 = vpop.permute.xlu0 %5801 }
 0x784   : > { %v4632_v16 = vpop.f32.mrb[49].mxu0  ;;  %v4716_v59 = vmul.f32 %v6587_v12, %v12456_v57 }
 0x785   : > { %v4714_v20 = vmul.f32 %v12456_v57, %v4632_v16  ;;  %v6588_v40 = vpop.f32.mrb[50].mxu0  ;;  %v12603_v6 = vpop.permute.xlu1 %5803 }
 0x786   : > { %v4635_v54 = vpop.f32.mrb[51].mxu0  ;;  %v4717_v9 = vmul.f32 %v6588_v40, %v12456_v57  ;;  %v4751_v27 = vadd.f32 %v12458_v63, %v4716_v59 }
 0x787   : > { %v4749_v50 = vadd.f32 %v12458_v63, %v4714_v20  ;;  %v4715_v2 = vmul.f32 %v12456_v57, %v4635_v54  ;;  %v12605_v29 = vpop.permute.xlu0 %5805 }
 0x788   : > { %v4752_v39 = vadd.f32 %v12458_v63, %v4717_v9  ;;  %v4783_v44 = vmax.f32 %v4751_v27, 0.0 }
 0x789   : > { %v4781_v4 = vmax.f32 %v4749_v50, 0.0  ;;  %v4750_v14 = vadd.f32 %v12458_v63, %v4715_v2  ;;  %v12607_v12 = vpop.permute.xlu1 %5807 }
 0x78a   : > { %v4784_v56 = vmax.f32 %v4752_v39, 0.0 }
 0x78b   : > { %v4782_v37 = vmax.f32 %v4750_v14, 0.0  ;;  %5921 = vrot.lane.b32.xlu0 %v4781_v4, %s6797_s12  ;;  %v12609_v16 = vpop.permute.xlu0 %5809 }
 0x78d   : > { %5923 = vrot.lane.b32.xlu1 %v4782_v37, %s6797_s12  ;;  %v12611_v59 = vpop.permute.xlu1 %5811 }
 0x78f   : > { %5925 = vrot.lane.b32.xlu0 %v4783_v44, %s6797_s12  ;;  %v12613_v40 = vpop.permute.xlu0 %5813 }
 0x791   : > { %5927 = vrot.lane.b32.xlu1 %v4784_v56, %s6797_s12  ;;  %v12617_v27 = vpop.permute.xlu1 %5815 }
 0x79b   : > { %v6591_v32 = vpop.f32.mrb[52].mxu0 }
 0x79c   : > { %v4648_v38 = vpop.f32.mrb[53].mxu0  ;;  %v4720_v53 = vmul.f32 %v6591_v32, %v12456_v57 }
 0x79d   : > { %v4718_v23 = vmul.f32 %v12456_v57, %v4648_v38  ;;  %v6592_v48 = vpop.f32.mrb[54].mxu0  ;;  %v12624_v38 = vpop.permute.xlu0 %5817 }
 0x79e   : > { %v4651_v25 = vpop.f32.mrb[55].mxu0  ;;  %v4721_v28 = vmul.f32 %v6592_v48, %v12456_v57  ;;  %v4755_v10 = vadd.f32 %v12458_v63, %v4720_v53  ;;  %v12628_v48 = vpop.permute.xlu1 %5819 }
 0x79f   : > { %v4753_v8 = vadd.f32 %v12458_v63, %v4718_v23  ;;  %v4719_v5 = vmul.f32 %v12456_v57, %v4651_v25 }
 0x7a0   : > { %v4756_v36 = vadd.f32 %v12458_v63, %v4721_v28  ;;  %v4787_v49 = vmax.f32 %v4755_v10, 0.0 }
 0x7a1   : > { %v4785_v52 = vmax.f32 %v4753_v8, 0.0  ;;  %v4754_v60 = vadd.f32 %v12458_v63, %v4719_v5  ;;  %v12632_v28 = vpop.permute.xlu0 %5821 }
 0x7a2   : > { %v4788_v46 = vmax.f32 %v4756_v36, 0.0 }
 0x7a3   : > { %v4786_v41 = vmax.f32 %v4754_v60, 0.0  ;;  %5929 = vrot.lane.b32.xlu0 %v4785_v52, %s6797_s12  ;;  %v12635_v52 = vpop.permute.xlu1 %5823 }
 0x7a5   : > { %5931 = vrot.lane.b32.xlu1 %v4786_v41, %s6797_s12 }
 0x7a7   : > { %5933 = vrot.lane.b32.xlu0 %v4787_v49, %s6797_s12 }
 0x7a9   : > { %5935 = vrot.lane.b32.xlu1 %v4788_v46, %s6797_s12 }
 0x7c2   : > { %v6595_v20 = vpop.f32.mrb[56].mxu0 }
 0x7c3   : > { %v4664_v54 = vpop.f32.mrb[57].mxu0  ;;  %v4724_v50 = vmul.f32 %v6595_v20, %v12456_v57 }
 0x7c4   : > { %v4722_v9 = vmul.f32 %v12456_v57, %v4664_v54  ;;  %v6596_v2 = vpop.f32.mrb[58].mxu0 }
 0x7c5   : > { %v4667_v4 = vpop.f32.mrb[59].mxu0  ;;  %v4725_v39 = vmul.f32 %v6596_v2, %v12456_v57  ;;  %v4759_v44 = vadd.f32 %v12458_v63, %v4724_v50 }
 0x7c6   : > { %v4757_v14 = vadd.f32 %v12458_v63, %v4722_v9  ;;  %v4723_v37 = vmul.f32 %v12456_v57, %v4667_v4  ;;  %v14837_v9 = vld [vmem:[#allocation51_spill] sm:$0xff] }
 0x7c7   : > { %v4760_v53 = vadd.f32 %v12458_v63, %v4725_v39  ;;  %v4791_v25 = vmax.f32 %v4759_v44, 0.0  ;;  %v14838_v2 = vmax.f32 %v14837_v9, 0.0 }
 0x7c8   : > { %v4789_v56 = vmax.f32 %v4757_v14, 0.0  ;;  %v4758_v32 = vadd.f32 %v12458_v63, %v4723_v37 }
 0x7c9   : > { %v4792_v8 = vmax.f32 %v4760_v53, 0.0  ;;  %v6114_v4 = vsel %vm340_vm8, %v14838_v2, %v12531_v58  ;;  %v14840_v58 = vld [vmem:[#allocation169_spill] sm:$0xff]  ;;  %v14844_v2 = vld [vmem:[#allocation114_spill] sm:$0xff] }
 0x7ca   : > { %v4790_v23 = vmax.f32 %v4758_v32, 0.0  ;;  %5937 = vrot.lane.b32.xlu0 %v4789_v56, %s6797_s12  ;;  %v14839_v56 = vld [vmem:[#allocation91_spill] sm:$0xff] }
 0x7cb   : > { %v5630_v32 = vmul.f32 %v12460_v15, %v14839_v56 }
 0x7cc   : > { %5939 = vrot.lane.b32.xlu1 %v4790_v23, %s6797_s12 }
 0x7ce   : > { %5941 = vrot.lane.b32.xlu0 %v4791_v25, %s6797_s12 }
 0x7cf   : > { %v6599_v5 = vpop.f32.mrb[60].mxu0 }
 0x7d0   : > { %5943 = vrot.lane.b32.xlu1 %v4792_v8, %s6797_s12  ;;  %v4680_v10 = vpop.f32.mrb[61].mxu0  ;;  %v4728_v60 = vmul.f32 %v6599_v5, %v12456_v57  ;;  %v5631_v8 = vmul.f32 %v12460_v15, %v14840_v58 }
 0x7d1   : > { %v4726_v36 = vmul.f32 %v12456_v57, %v4680_v10  ;;  %v6600_v41 = vpop.f32.mrb[62].mxu0 }
 0x7d2   : > { %v4683_v49 = vpop.f32.mrb[63].mxu0  ;;  %v4729_v20 = vmul.f32 %v6600_v41, %v12456_v57  ;;  %v4763_v14 = vadd.f32 %v12458_v63, %v4728_v60  ;;  %v5665_v60 = vadd.f32 %v12464_v11, %v5630_v32  ;;  %v5666_v9 = vadd.f32 %v12464_v11, %v5631_v8  ;;  %v14848_v8 = vld [vmem:[#allocation52_spill] sm:$0xff] }
 0x7d3   : > { %v4761_v46 = vadd.f32 %v12458_v63, %v4726_v36  ;;  %v4727_v54 = vmul.f32 %v12456_v57, %v4683_v49  ;;  %v12642_v50 = vpop.permute.xlu0 %5889  ;;  %v14841_v36 = vld [vmem:[#allocation137_spill] sm:$0xff] }
 0x7d4   : > { %v4764_v57 = vadd.f32 %v12458_v63, %v4729_v20  ;;  %v4795_v5 = vmax.f32 %v4763_v14, 0.0  ;;  %v5632_v41 = vmul.f32 %v14841_v36, %v12460_v15 }
 0x7d5   : > { %v4793_v39 = vmax.f32 %v4761_v46, 0.0  ;;  %v4762_v37 = vadd.f32 %v12458_v63, %v4727_v54  ;;  %v5892_v44 = vpop.permute.xlu1 %5891  ;;  %v14842_v63 = vld [vmem:[#allocation53_spill] sm:$0xff] }
 0x7d6   : > { %v12653_v53 = vsel %vm1529_vm10, %v6114_v4, %v5892_v44  ;;  %v14843_v49 = vmax.f32 %v14842_v63, 0.0  ;;  %v4796_v20 = vmax.f32 %v4764_v57, 0.0  ;;  %v5633_v4 = vmul.f32 %v14844_v2, %v12460_v15  ;;  %v14847_v57 = vld [vmem:[#allocation252_spill] sm:$0xff] }
 0x7d7   : > { %v4794_v23 = vmax.f32 %v4762_v37, 0.0  ;;  %v12656_v25 = vpop.permute.xlu0 %5893  ;;  %5945 = vrot.lane.b32.xlu0 %v4793_v39, %s6797_s12  ;;  %v14845_v39 = vld [vmem:[#allocation55_spill] sm:$0xff]  ;;  %v5667_v32 = vadd.f32 %v12464_v11, %v5632_v41 }
 0x7d8   : > { %v6117_v46 = vsel %vm340_vm8, %v14843_v49, %v12545_v0  ;;  %v14846_v37 = vmax.f32 %v14845_v39, 0.0  ;;  %v5697_v0 = vmax.f32 %v5665_v60, 0.0  ;;  %v5668_v49 = vadd.f32 %v12464_v11, %v5633_v4  ;;  %v14850_v60 = vld [vmem:[#allocation269_spill] sm:$0xff] }
 0x7d9   : > { %v12661_v10 = vpop.permute.xlu1 %5895  ;;  %5947 = vrot.lane.b32.xlu1 %v4794_v23, %s6797_s12  ;;  %v5634_v23 = vmul.f32 %v12460_v15, %v14847_v57  ;;  %v5635_v41 = vmul.f32 %v12460_v15, %v14850_v60 }
 0x7da   : > { %v6118_v44 = vsel %vm340_vm8, %v14846_v37, %v12547_v43  ;;  %v5698_v43 = vmax.f32 %v5666_v9, 0.0  ;;  %v14853_v9 = vld [vmem:[#allocation168_spill] sm:$0xff] }
 0x7db   : > { %v5898_v54 = vpop.permute.xlu0 %5897  ;;  %5949 = vrot.lane.b32.xlu0 %v4795_v5, %s6797_s12  ;;  %v14849_v5 = vmax.f32 %v14848_v8, 0.0  ;;  %v5669_v37 = vadd.f32 %v12464_v11, %v5634_v23  ;;  %v5636_v4 = vmul.f32 %v14853_v9, %v12460_v15 }
 0x7dc   : > { %v12676_v14 = vsel %vm1529_vm10, %v6117_v46, %v5898_v54 }
 0x7dd   : > { %v5900_v56 = vpop.permute.xlu1 %5899  ;;  %5951 = vrot.lane.b32.xlu1 %v4796_v20, %s6797_s12  ;;  %v6119_v36 = vsel %vm340_vm8, %v14849_v5, %v12551_v3  ;;  %v14851_v20 = vld [vmem:[#allocation54_spill] sm:$0xff]  ;;  %v5699_v3 = vmax.f32 %v5667_v32, 0.0  ;;  %v5670_v5 = vadd.f32 %v12464_v11, %v5635_v41 }
 0x7de   : > { %v12687_v58 = vsel %vm1529_vm10, %v6118_v44, %v5900_v56  ;;  %v14852_v54 = vmax.f32 %v14851_v20, 0.0  ;;  %v14854_v56 = vld [vmem:[#allocation57_spill] sm:$0xff]  ;;  %v14856_v32 = vld [vmem:[#allocation254_spill] sm:$0xff] }
 0x7df   : > { %v5902_v63 = vpop.permute.xlu0 %5901  ;;  %6017 = vrot.lane.b32.xlu0 %v5697_v0, %s6804_s20  ;;  %v14855_v0 = vmax.f32 %v14854_v56, 0.0  ;;  %v5646_v23 = vmul.f32 %v12460_v15, %v14856_v32 }
 0x7e0   : > { %v12698_v46 = vsel %vm1529_vm10, %v6119_v36, %v5902_v63  ;;  %v6120_v2 = vsel %vm340_vm8, %v14852_v54, %v12556_v26  ;;  %v5700_v26 = vmax.f32 %v5668_v49, 0.0  ;;  %v14857_v63 = vld [vmem:[#allocation59_spill] sm:$0xff]  ;;  %v5671_v54 = vadd.f32 %v12464_v11, %v5636_v4  ;;  %v14859_v49 = vld [vmem:[#allocation313_spill] sm:$0xff] }
 0x7e1   : > { %v5904_v39 = vpop.permute.xlu1 %5903  ;;  %6019 = vrot.lane.b32.xlu1 %v5698_v43, %s6804_s20  ;;  %v6121_v57 = vsel %vm340_vm8, %v14855_v0, %v12562_v19  ;;  %v14858_v43 = vmax.f32 %v14857_v63, 0.0  ;;  %v5701_v19 = vmax.f32 %v5669_v37, 0.0  ;;  %v5647_v41 = vmul.f32 %v12460_v15, %v14859_v49  ;;  %v14862_v37 = vld [vmem:[#allocation310_spill] sm:$0xff] }
 0x7e2   : > { %v12709_v44 = vsel %vm1529_vm10, %v6120_v2, %v5904_v39  ;;  %v14860_v39 = vld [vmem:[#allocation56_spill] sm:$0xff]  ;;  %v5681_v0 = vadd.f32 %v12464_v11, %v5646_v23  ;;  %v5648_v4 = vmul.f32 %v14862_v37, %v12460_v15 }
 0x7e3   : > { %v5906_v8 = vpop.permute.xlu0 %5905  ;;  %6021 = vrot.lane.b32.xlu0 %v5699_v3, %s6804_s20  ;;  %v6122_v60 = vsel %vm340_vm8, %v14858_v43, %v12565_v31  ;;  %v14861_v3 = vmax.f32 %v14860_v39, 0.0  ;;  %v5702_v31 = vmax.f32 %v5670_v5, 0.0  ;;  %v5682_v43 = vadd.f32 %v12464_v11, %v5647_v41  ;;  %v14865_v5 = vld [vmem:[#allocation233_spill] sm:$0xff] }
 0x7e4   : > { %v12720_v36 = vsel %vm1529_vm10, %v6121_v57, %v5906_v8  ;;  %v14863_v8 = vld [vmem:[#allocation58_spill] sm:$0xff]  ;;  %v5649_v23 = vmul.f32 %v14865_v5, %v12460_v15 }
 0x7e5   : > { %v5908_v20 = vpop.permute.xlu1 %5907  ;;  %6023 = vrot.lane.b32.xlu1 %v5700_v26, %s6804_s20  ;;  %v6123_v9 = vsel %vm340_vm8, %v14861_v3, %v12569_v61  ;;  %v14864_v26 = vmax.f32 %v14863_v8, 0.0  ;;  %v5703_v61 = vmax.f32 %v5671_v54, 0.0  ;;  %v5683_v3 = vadd.f32 %v12464_v11, %v5648_v4  ;;  %v14868_v54 = vld [vmem:[#allocation111_spill] sm:$0xff] }
 0x7e6   : > { %v12731_v2 = vsel %vm1529_vm10, %v6122_v60, %v5908_v20  ;;  %v14866_v20 = vld [vmem:[#allocation61_spill] sm:$0xff]  ;;  %v5650_v41 = vmul.f32 %v12460_v15, %v14868_v54 }
 0x7e7   : > { %v5910_v56 = vpop.permute.xlu0 %5909  ;;  %6025 = vrot.lane.b32.xlu0 %v5701_v19, %s6804_s20  ;;  %v6124_v32 = vsel %vm340_vm8, %v14864_v26, %v12571_v22  ;;  %v14867_v19 = vmax.f32 %v14866_v20, 0.0  ;;  %v5713_v22 = vmax.f32 %v5681_v0, 0.0  ;;  %v5684_v26 = vadd.f32 %v12464_v11, %v5649_v23  ;;  %v14871_v0 = vld [vmem:[#allocation316_spill] sm:$0xff] }
 0x7e8   : > { %v12742_v57 = vsel %vm1529_vm10, %v6123_v9, %v5910_v56  ;;  %v14869_v56 = vld [vmem:[#allocation63_spill] sm:$0xff]  ;;  %v5651_v4 = vmul.f32 %v12460_v15, %v14871_v0  ;;  %v14878_v0 = vld [vmem:[#allocation294_spill] sm:$0xff] }
 0x7e9   : > { %v5912_v63 = vpop.permute.xlu1 %5911  ;;  %6027 = vrot.lane.b32.xlu1 %v5702_v31, %s6804_s20  ;;  %v6125_v49 = vsel %vm340_vm8, %v14867_v19, %v12573_v30  ;;  %v14870_v31 = vmax.f32 %v14869_v56, 0.0  ;;  %v5714_v30 = vmax.f32 %v5682_v43, 0.0  ;;  %v5685_v19 = vadd.f32 %v12464_v11, %v5650_v41  ;;  %v14874_v43 = vld [vmem:[#allocation256_spill] sm:$0xff] }
 0x7ea   : > { %v12753_v60 = vsel %vm1529_vm10, %v6124_v32, %v5912_v63  ;;  %v14872_v63 = vld [vmem:[#allocation60_spill] sm:$0xff]  ;;  %v5652_v23 = vmul.f32 %v14874_v43, %v12460_v15 }
 0x7eb   : > { %v5914_v39 = vpop.permute.xlu0 %5913  ;;  %6029 = vrot.lane.b32.xlu0 %v5703_v61, %s6804_s20  ;;  %v6126_v37 = vsel %vm340_vm8, %v14870_v31, %v12575_v55  ;;  %v14873_v61 = vmax.f32 %v14872_v63, 0.0  ;;  %v5715_v55 = vmax.f32 %v5683_v3, 0.0  ;;  %v5686_v31 = vadd.f32 %v12464_v11, %v5651_v4  ;;  %v14877_v3 = vld [vmem:[#allocation226_spill] sm:$0xff]  ;;  %v14879_v4 = vld [vmem:[#allocation103_spill] sm:$0xff] }
 0x7ec   : > { %v12764_v9 = vsel %vm1529_vm10, %v6125_v49, %v5914_v39  ;;  %v14875_v39 = vld [vmem:[#allocation62_spill] sm:$0xff]  ;;  %v5637_v41 = vmul.f32 %v14877_v3, %v12460_v15 }
 0x7ed   : > { %v5916_v8 = vpop.permute.xlu1 %5915  ;;  %6049 = vrot.lane.b32.xlu1 %v5713_v22, %s6804_s20  ;;  %v6127_v5 = vsel %vm340_vm8, %v14873_v61, %v12579_v47  ;;  %v14876_v22 = vmax.f32 %v14875_v39, 0.0  ;;  %v5716_v47 = vmax.f32 %v5684_v26, 0.0  ;;  %v5718_v63 = vmax.f32 %v5686_v31, 0.0  ;;  %v14881_v39 = vld [vmem:[#allocation308_spill] sm:$0xff] }
 0x7ee   : > { %v12775_v32 = vsel %vm1529_vm10, %v6126_v37, %v5916_v8  ;;  %v5717_v8 = vmax.f32 %v5685_v19, 0.0  ;;  %v5672_v26 = vadd.f32 %v12464_v11, %v5637_v41  ;;  %v5638_v61 = vmul.f32 %v12460_v15, %v14879_v4 }
 0x7ef   : > { %v5918_v20 = vpop.permute.xlu0 %5917  ;;  %6051 = vrot.lane.b32.xlu0 %v5714_v30, %s6804_s20  ;;  %v6128_v54 = vsel %vm340_vm8, %v14876_v22, %v12584_v45  ;;  %v5687_v30 = vadd.f32 %v12464_v11, %v5652_v23  ;;  %v5653_v45 = vmul.f32 %v14878_v0, %v12460_v15  ;;  %v5639_v22 = vmul.f32 %v12460_v15, %v14881_v39 }
 0x7f0   : > { %v12786_v49 = vsel %vm1529_vm10, %v6127_v5, %v5918_v20  ;;  %v5704_v43 = vmax.f32 %v5672_v26, 0.0  ;;  %v5673_v23 = vadd.f32 %v12464_v11, %v5638_v61 }
 0x7f1   : > { %v5920_v56 = vpop.permute.xlu1 %5919  ;;  %6053 = vrot.lane.b32.xlu1 %v5715_v55, %s6804_s20  ;;  %v5719_v5 = vmax.f32 %v5687_v30, 0.0  ;;  %v5688_v20 = vadd.f32 %v12464_v11, %v5653_v45  ;;  %v14880_v55 = vld [vmem:[#allocation117_spill] sm:$0xff]  ;;  %v5674_v41 = vadd.f32 %v12464_v11, %v5639_v22 }
 0x7f2   : > { %v12797_v37 = vsel %vm1529_vm10, %v6128_v54, %v5920_v56  ;;  %v5654_v19 = vmul.f32 %v12460_v15, %v14880_v55  ;;  %v5705_v3 = vmax.f32 %v5673_v23, 0.0 }
 0x7f3   : > { %6055 = vrot.lane.b32.xlu0 %v5716_v47, %s6804_s20  ;;  %v5720_v54 = vmax.f32 %v5688_v20, 0.0  ;;  %v14882_v47 = vld [vmem:[#allocation319_spill] sm:$0xff]  ;;  %v5706_v4 = vmax.f32 %v5674_v41, 0.0 }
 0x7f4   : > { %v5689_v56 = vadd.f32 %v12464_v11, %v5654_v19  ;;  %v5655_v31 = vmul.f32 %v12460_v15, %v14882_v47 }
 0x7f5   : > { %6057 = vrot.lane.b32.xlu1 %v5717_v8, %s6804_s20  ;;  %v14883_v8 = vld [vmem:[#allocation307_spill] sm:$0xff] }
 0x7f6   : > { %v5640_v30 = vmul.f32 %v14883_v8, %v12460_v15  ;;  %v5721_v0 = vmax.f32 %v5689_v56, 0.0  ;;  %v5690_v45 = vadd.f32 %v12464_v11, %v5655_v31 }
 0x7f7   : > { %6059 = vrot.lane.b32.xlu0 %v5718_v63, %s6804_s20  ;;  %v14884_v63 = vld [vmem:[#allocation318_spill] sm:$0xff] }
 0x7f8   : > { %v5656_v26 = vmul.f32 %v14884_v63, %v12460_v15  ;;  %v5675_v61 = vadd.f32 %v12464_v11, %v5640_v30  ;;  %v5722_v55 = vmax.f32 %v5690_v45, 0.0 }
 0x7f9   : > { %6061 = vrot.lane.b32.xlu1 %v5719_v5, %s6804_s20  ;;  %v14885_v5 = vld [vmem:[#allocation97_spill] sm:$0xff] }
 0x7fa   : > { %v5641_v20 = vmul.f32 %v14885_v5, %v12460_v15  ;;  %v5691_v19 = vadd.f32 %v12464_v11, %v5656_v26  ;;  %v5707_v39 = vmax.f32 %v5675_v61, 0.0 }
 0x7fb   : > { %6031 = vrot.lane.b32.xlu0 %v5704_v43, %s6804_s20  ;;  %v14886_v43 = vld [vmem:[#allocation106_spill] sm:$0xff] }
 0x7fc   : > { %v5657_v23 = vmul.f32 %v14886_v43, %v12460_v15  ;;  %v5676_v22 = vadd.f32 %v12464_v11, %v5641_v20  ;;  %v5723_v47 = vmax.f32 %v5691_v19, 0.0  ;;  %v5727_v19 = vmax.f32 %v12481_v21, 0.0 }
 0x7fd   : > { %6063 = vrot.lane.b32.xlu1 %v5720_v54, %s6804_s20  ;;  %v14887_v54 = vld [vmem:[#allocation118_spill] sm:$0xff]  ;;  %v5728_v43 = vmax.f32 %v12487_v51, 0.0  ;;  %v14890_v51 = vld [vmem:[#allocation79_spill] sm:$0xff] }
 0x7fe   : > { %v5642_v56 = vmul.f32 %v12460_v15, %v14887_v54  ;;  %v5692_v31 = vadd.f32 %v12464_v11, %v5657_v23  ;;  %v5708_v8 = vmax.f32 %v5676_v22, 0.0  ;;  %v5922_v23 = vpop.permute.xlu0 %5921 }
 0x7ff   : > { %6033 = vrot.lane.b32.xlu0 %v5705_v3, %s6804_s20  ;;  %v14888_v3 = vld [vmem:[#allocation217_spill] sm:$0xff] }
 0x800   : > { %v5658_v41 = vmul.f32 %v12460_v15, %v14888_v3  ;;  %v5677_v30 = vadd.f32 %v12464_v11, %v5642_v56  ;;  %v5724_v63 = vmax.f32 %v5692_v31, 0.0  ;;  %v14891_v31 = vmax.f32 %v14890_v51, 0.0 }
 0x801   : > { %6065 = vrot.lane.b32.xlu1 %v5721_v0, %s6804_s20  ;;  %v14889_v0 = vld [vmem:[#allocation309_spill] sm:$0xff] }
 0x802   : > { %v5643_v45 = vmul.f32 %v12460_v15, %v14889_v0  ;;  %v5693_v26 = vadd.f32 %v12464_v11, %v5658_v41  ;;  %v5726_v15 = vmax.f32 %v12467_v42, 0.0  ;;  %v5924_v42 = vpop.permute.xlu1 %5923  ;;  %v6139_v3 = vsel %vm340_vm8, %v14891_v31, %v12613_v40  ;;  %v14898_v31 = vld [vmem:[#allocation49_spill] sm:$0xff] }
 0x803   : > { %6035 = vrot.lane.b32.xlu0 %v5706_v4, %s6804_s20  ;;  %v5709_v4 = vmax.f32 %v5677_v30, 0.0  ;;  %v14892_v30 = vld [vmem:[#allocation76_spill] sm:$0xff] }
 0x804   : > { %v5678_v61 = vadd.f32 %v12464_v11, %v5643_v45  ;;  %v5725_v5 = vmax.f32 %v5693_v26, 0.0  ;;  %v5712_v11 = vmax.f32 %v12484_v33, 0.0  ;;  %v14893_v0 = vmax.f32 %v14892_v30, 0.0 }
 0x805   : > { %6067 = vrot.lane.b32.xlu1 %v5722_v55, %s6804_s20  ;;  %v5711_v55 = vmax.f32 %v12478_v62, 0.0 }
 0x806   : > { %v5710_v20 = vmax.f32 %v5678_v61, 0.0  ;;  %v12864_v22 = vpop.permute.xlu1 %5927  ;;  %v6140_v45 = vsel %vm340_vm8, %v14893_v0, %v12617_v27 }
 0x807   : > { %6037 = vrot.lane.b32.xlu0 %v5707_v39, %s6804_s20  ;;  %v5926_v39 = vpop.permute.xlu0 %5925 }
 0x809   : > { %6069 = vrot.lane.b32.xlu1 %v5723_v47, %s6804_s20 }
 0x80b   : > { %6039 = vrot.lane.b32.xlu0 %v5708_v8, %s6804_s20 }
 0x80d   : > { %6071 = vrot.lane.b32.xlu1 %v5724_v63, %s6804_s20 }
 0x80f   : > { %6041 = vrot.lane.b32.xlu0 %v5709_v4, %s6804_s20  ;;  %v14894_v4 = vld [vmem:[#allocation75_spill] sm:$0xff] }
 0x810   : > { %v14895_v61 = vmax.f32 %v14894_v4, 0.0 }
 0x811   : > { %6073 = vrot.lane.b32.xlu1 %v5725_v5, %s6804_s20 }
 0x812   : > { %v6141_v5 = vsel %vm340_vm8, %v14895_v61, %v12624_v38  ;;  %v14899_v38 = vmax.f32 %v14898_v31, 0.0  ;;  %v14900_v61 = vld [vmem:[#allocation36_spill] sm:$0xff] }
 0x813   : > { %6043 = vrot.lane.b32.xlu0 %v5710_v20, %s6804_s20 }
 0x815   : > { %6075 = vrot.lane.b32.xlu1 %v5726_v15, %s6804_s20  ;;  %v12866_v62 = vpop.permute.xlu0 %5929  ;;  %v14896_v15 = vld [vmem:[#allocation77_spill] sm:$0xff] }
 0x817   : > { %6045 = vrot.lane.b32.xlu0 %v5711_v55, %s6804_s20  ;;  %v12868_v54 = vpop.permute.xlu1 %5931  ;;  %v14897_v55 = vmax.f32 %v14896_v15, 0.0 }
 0x819   : > { %6077 = vrot.lane.b32.xlu1 %v5727_v19, %s6804_s20  ;;  %v12870_v21 = vpop.permute.xlu0 %5933  ;;  %v6142_v19 = vsel %vm340_vm8, %v14897_v55, %v12628_v48 }
 0x81b   : > { %6047 = vrot.lane.b32.xlu0 %v5712_v11, %s6804_s20  ;;  %v12872_v56 = vpop.permute.xlu1 %5935 }
 0x81d   : > { %6079 = vrot.lane.b32.xlu1 %v5728_v43, %s6804_s20  ;;  %s251_s20 = scalar_lea.vmem %s13059_s6, %s6639_s27 }
 0x83c   : > { %v12874_v33 = vpop.permute.xlu0 %5937 }
 0x83e   : > { %v12876_v47 = vpop.permute.xlu1 %5939 }
 0x840   : > { %v5942_v41 = vpop.permute.xlu0 %5941 }
 0x841   : > { %v12883_v8 = vsel %vm1529_vm10, %v6139_v3, %v5942_v41  ;;  %v6113_v3 = vsel %vm340_vm8, %v14899_v38, %v12525_v7 }
 0x842   : > { %v5944_v63 = vpop.permute.xlu1 %5943  ;;  %v6145_v41 = vsel %vm1529_vm10, %v6113_v3, %v12642_v50  ;;  %v14904_v3 = vld [vmem:[#allocation64_spill] sm:$0xff] }
 0x843   : > { %v12890_v26 = vsel %vm1529_vm10, %v6140_v45, %v5944_v63 }
 0x849   : > { %v5946_v20 = vpop.permute.xlu0 %5945 }
 0x84a   : > { %v12897_v40 = vsel %vm1529_vm10, %v6141_v5, %v5946_v20  ;;  %v14901_v5 = vmax.f32 %v14900_v61, 0.0 }
 0x84b   : > { %v5948_v11 = vpop.permute.xlu1 %5947 }
 0x84c   : > { %v12904_v27 = vsel %vm1529_vm10, %v6142_v19, %v5948_v11  ;;  %v6115_v20 = vsel %vm340_vm8, %v14901_v5, %v12538_v34  ;;  %v14902_v19 = vld [vmem:[#allocation50_spill] sm:$0xff]  ;;  %v14905_v34 = vmax.f32 %v14904_v3, 0.0 }
 0x84d   : > { %v12906_v43 = vpop.permute.xlu0 %5949  ;;  %v6147_v7 = vsel %vm1529_vm10, %v6115_v20, %v12656_v25  ;;  %v14903_v11 = vmax.f32 %v14902_v19, 0.0  ;;  %v14908_v20 = vld [vmem:[#allocation67_spill] sm:$0xff] }
 0x84f   : > { %v12908_v51 = vpop.permute.xlu1 %5951 }
 0x851   : > { %v6018_v30 = vpop.permute.xlu0 %6017 }
 0x852   : > { %v6177_v0 = vsel %vm1562_vm11, %v6145_v41, %v6018_v30  ;;  %v6129_v41 = vsel %vm340_vm8, %v14905_v34, %v12590_v13  ;;  %v14912_v34 = vld [vmem:[#allocation68_spill] sm:$0xff] }
 0x853   : > { %6209 = vxpose.xlu0.b32.start [1/16] (narrow) %v6177_v0, 24  ;;  %v6020_v48 = vpop.permute.xlu1 %6019  ;;  %v6161_v30 = vsel %vm1529_vm10, %v6129_v41, %v5922_v23  ;;  %v14913_v41 = vmax.f32 %v14912_v34, 0.0 }
 0x854   : > { %v6178_v63 = vsel %vm1562_vm11, %v12653_v53, %v6020_v48  ;;  %v6116_v53 = vsel %vm340_vm8, %v14903_v11, %v12541_v24  ;;  %v14906_v24 = vld [vmem:[#allocation66_spill] sm:$0xff]  ;;  %v14910_v11 = vld [vmem:[#allocation65_spill] sm:$0xff] }
 0x855   : > { %v6022_v45 = vpop.permute.xlu0 %6021  ;;  %v6148_v31 = vsel %vm1529_vm10, %v6116_v53, %v12661_v10  ;;  %v14911_v53 = vmax.f32 %v14910_v11, 0.0 }
 0x856   : > { %v6179_v15 = vsel %vm1562_vm11, %v6147_v7, %v6022_v45  ;;  %v14909_v7 = vmax.f32 %v14908_v20, 0.0 }
 0x857   : > { %6210 = vxpose.xlu0.b32.cont [2/16] (narrow) %v6178_v63, 24  ;;  %v6024_v4 = vpop.permute.xlu1 %6023  ;;  %v14907_v63 = vmax.f32 %v14906_v24, 0.0 }
 0x858   : > { %v6180_v25 = vsel %vm1562_vm11, %v6148_v31, %v6024_v4  ;;  %v6132_v31 = vsel %vm340_vm8, %v14911_v53, %v12599_v1  ;;  %v14922_v53 = vld [vmem:[#allocation74_spill] sm:$0xff] }
 0x859   : > { %v6026_v50 = vpop.permute.xlu0 %6025  ;;  %v6130_v10 = vsel %vm340_vm8, %v14907_v63, %v12593_v17 }
 0x85a   : > { %v6181_v61 = vsel %vm1562_vm11, %v12676_v14, %v6026_v50  ;;  %v6162_v13 = vsel %vm1529_vm10, %v6130_v10, %v5924_v42  ;;  %v14916_v10 = vld [vmem:[#allocation71_spill] sm:$0xff] }
 0x85b   : > { %6211 = vxpose.xlu0.b32.cont [3/16] (narrow) %v6179_v15, 24  ;;  %v6028_v55 = vpop.permute.xlu1 %6027  ;;  %v6131_v15 = vsel %vm340_vm8, %v14909_v7, %v12597_v35  ;;  %v6164_v35 = vsel %vm1529_vm10, %v6132_v31, %v12864_v22  ;;  %v14923_v31 = vmax.f32 %v14922_v53, 0.0 }
 0x85c   : > { %v6182_v19 = vsel %vm1562_vm11, %v12687_v58, %v6028_v55  ;;  %v6163_v17 = vsel %vm1529_vm10, %v6131_v15, %v5926_v39 }
 0x85d   : > { %v6030_v38 = vpop.permute.xlu0 %6029 }
 0x85e   : > { %v6183_v3 = vsel %vm1562_vm11, %v12698_v46, %v6030_v38 }
 0x85f   : > { %6212 = vxpose.xlu0.b32.cont [4/16] (narrow) %v6180_v25, 24  ;;  %v6050_v0 = vpop.permute.xlu1 %6049  ;;  %v6133_v25 = vsel %vm340_vm8, %v14913_v41, %v12601_v18 }
 0x860   : > { %v6193_v48 = vsel %vm1562_vm11, %v6161_v30, %v6050_v0  ;;  %v6165_v46 = vsel %vm1529_vm10, %v6133_v25, %v12866_v62  ;;  %v14914_v0 = vld [vmem:[#allocation69_spill] sm:$0xff] }
 0x861   : > { %v6052_v45 = vpop.permute.xlu0 %6051  ;;  %6241 = vxpose.xlu1.b32.start [1/16] (narrow) %v6193_v48, 24  ;;  %v14915_v48 = vmax.f32 %v14914_v0, 0.0 }
 0x862   : > { %v6194_v23 = vsel %vm1562_vm11, %v6162_v13, %v6052_v45 }
 0x863   : > { %6213 = vxpose.xlu0.b32.cont [5/16] (narrow) %v6181_v61, 24  ;;  %v6054_v4 = vpop.permute.xlu1 %6053  ;;  %v6134_v45 = vsel %vm340_vm8, %v14915_v48, %v12603_v6  ;;  %v14917_v61 = vmax.f32 %v14916_v10, 0.0 }
 0x864   : > { %v6195_v42 = vsel %vm1562_vm11, %v6163_v17, %v6054_v4  ;;  %v14920_v17 = vld [vmem:[#allocation72_spill] sm:$0xff] }
 0x865   : > { %v6056_v5 = vpop.permute.xlu0 %6055  ;;  %6242 = vxpose.xlu1.b32.cont [2/16] (narrow) %v6194_v23, 24  ;;  %v6135_v13 = vsel %vm340_vm8, %v14917_v61, %v12605_v29 }
 0x866   : > { %v6196_v39 = vsel %vm1562_vm11, %v6164_v35, %v6056_v5  ;;  %v14918_v5 = vld [vmem:[#allocation70_spill] sm:$0xff] }
 0x867   : > { %6214 = vxpose.xlu0.b32.cont [6/16] (narrow) %v6182_v19, 24  ;;  %v6058_v14 = vpop.permute.xlu1 %6057  ;;  %v14919_v20 = vmax.f32 %v14918_v5, 0.0 }
 0x868   : > { %v6197_v22 = vsel %vm1562_vm11, %v6165_v46, %v6058_v14  ;;  %v14921_v14 = vmax.f32 %v14920_v17, 0.0 }
 0x869   : > { %v6060_v50 = vpop.permute.xlu0 %6059  ;;  %6243 = vxpose.xlu1.b32.cont [3/16] (narrow) %v6195_v42, 24  ;;  %v6136_v7 = vsel %vm340_vm8, %v14919_v20, %v12607_v12 }
 0x86a   : > { %v6137_v42 = vsel %vm340_vm8, %v14921_v14, %v12609_v16 }
 0x86b   : > { %6215 = vxpose.xlu0.b32.cont [7/16] (narrow) %v6183_v3, 24  ;;  %v6062_v58 = vpop.permute.xlu1 %6061  ;;  %v6138_v3 = vsel %vm340_vm8, %v14923_v31, %v12611_v59 }
 0x86d   : > { %v6032_v55 = vpop.permute.xlu0 %6031  ;;  %6244 = vxpose.xlu1.b32.cont [4/16] (narrow) %v6196_v39, 24 }
 0x86e   : > { %v6184_v1 = vsel %vm1562_vm11, %v12709_v44, %v6032_v55  ;;  %v6166_v44 = vsel %vm1529_vm10, %v6134_v45, %v12868_v54 }
 0x86f   : > { %6216 = vxpose.xlu0.b32.cont [8/16] (narrow) %v6184_v1, 24  ;;  %v6064_v38 = vpop.permute.xlu1 %6063  ;;  %v6198_v62 = vsel %vm1562_vm11, %v6166_v44, %v6060_v50  ;;  %v14924_v1 = vld [vmem:[#allocation83_spill] sm:$0xff] }
 0x871   : > { %v6034_v30 = vpop.permute.xlu0 %6033  ;;  %6245 = vxpose.xlu1.b32.cont [5/16] (narrow) %v6197_v22, 24 }
 0x872   : > { %v6185_v18 = vsel %vm1562_vm11, %v12720_v36, %v6034_v30  ;;  %v6167_v36 = vsel %vm1529_vm10, %v6135_v13, %v12870_v21 }
 0x873   : > { %6217 = vxpose.xlu0.b32.cont [9/16] (narrow) %v6185_v18, 24  ;;  %v6066_v24 = vpop.permute.xlu1 %6065  ;;  %v6199_v54 = vsel %vm1562_vm11, %v6167_v36, %v6062_v58 }
 0x875   : > { %v6036_v63 = vpop.permute.xlu0 %6035  ;;  %6246 = vxpose.xlu1.b32.cont [6/16] (narrow) %v6198_v62, 24 }
 0x876   : > { %v6186_v6 = vsel %vm1562_vm11, %v12731_v2, %v6036_v63  ;;  %v6168_v2 = vsel %vm1529_vm10, %v6136_v7, %v12872_v56 }
 0x877   : > { %6218 = vxpose.xlu0.b32.cont [10/16] (narrow) %v6186_v6, 24  ;;  %v6068_v4 = vpop.permute.xlu1 %6067  ;;  %v6200_v21 = vsel %vm1562_vm11, %v6168_v2, %v6064_v38 }
 0x879   : > { %v6038_v23 = vpop.permute.xlu0 %6037  ;;  %6247 = vxpose.xlu1.b32.cont [7/16] (narrow) %v6199_v54, 24 }
 0x87a   : > { %v6187_v29 = vsel %vm1562_vm11, %v12742_v57, %v6038_v23  ;;  %v6169_v57 = vsel %vm1529_vm10, %v6137_v42, %v12874_v33 }
 0x87b   : > { %6219 = vxpose.xlu0.b32.cont [11/16] (narrow) %v6187_v29, 24  ;;  %v6070_v15 = vpop.permute.xlu1 %6069  ;;  %v6201_v56 = vsel %vm1562_vm11, %v6169_v57, %v6066_v24 }
 0x87c   : > { %v6203_v55 = vsel %vm1562_vm11, %v12883_v8, %v6070_v15 }
 0x87d   : > { %v6040_v19 = vpop.permute.xlu0 %6039  ;;  %6248 = vxpose.xlu1.b32.cont [8/16] (narrow) %v6200_v21, 24 }
 0x87e   : > { %v6188_v12 = vsel %vm1562_vm11, %v12753_v60, %v6040_v19  ;;  %v6170_v60 = vsel %vm1529_vm10, %v6138_v3, %v12876_v47 }
 0x87f   : > { %6220 = vxpose.xlu0.b32.cont [12/16] (narrow) %v6188_v12, 24  ;;  %v6072_v50 = vpop.permute.xlu1 %6071  ;;  %v6202_v33 = vsel %vm1562_vm11, %v6170_v60, %v6068_v4 }
 0x880   : > { %v6204_v47 = vsel %vm1562_vm11, %v12890_v26, %v6072_v50  ;;  %v14925_v26 = vmax.f32 %v14924_v1, 0.0 }
 0x881   : > { %v6042_v11 = vpop.permute.xlu0 %6041  ;;  %6249 = vxpose.xlu1.b32.cont [9/16] (narrow) %v6201_v56, 24 }
 0x882   : > { %v6189_v16 = vsel %vm1562_vm11, %v12764_v9, %v6042_v11  ;;  %v6143_v46 = vsel %vm340_vm8, %v14925_v26, %v12632_v28 }
 0x883   : > { %6221 = vxpose.xlu0.b32.cont [13/16] (narrow) %v6189_v16, 24  ;;  %v6074_v39 = vpop.permute.xlu1 %6073  ;;  %v6175_v38 = vsel %vm1529_vm10, %v6143_v46, %v12906_v43 }
 0x884   : > { %v6205_v8 = vsel %vm1562_vm11, %v12897_v40, %v6074_v39  ;;  %v14926_v40 = vld [vmem:[#allocation81_spill] sm:$0xff] }
 0x885   : > { %v6044_v35 = vpop.permute.xlu0 %6043  ;;  %6250 = vxpose.xlu1.b32.cont [10/16] (narrow) %v6202_v33, 24  ;;  %v14927_v30 = vmax.f32 %v14926_v40, 0.0 }
 0x886   : > { %v6190_v58 = vsel %vm1562_vm11, %v12775_v32, %v6044_v35 }
 0x887   : > { %6222 = vxpose.xlu0.b32.cont [14/16] (narrow) %v6190_v58, 24  ;;  %v6076_v34 = vpop.permute.xlu1 %6075  ;;  %v6144_v0 = vsel %vm340_vm8, %v14927_v30, %v12635_v52 }
 0x889   : > { %v6046_v59 = vpop.permute.xlu0 %6045  ;;  %6251 = vxpose.xlu1.b32.cont [11/16] (narrow) %v6203_v55, 24 }
 0x88a   : > { %v6191_v9 = vsel %vm1562_vm11, %v12786_v49, %v6046_v59  ;;  %v6206_v49 = vsel %vm1562_vm11, %v12904_v27, %v6076_v34  ;;  %v6176_v27 = vsel %vm1529_vm10, %v6144_v0, %v12908_v51 }
 0x88b   : > { %6223 = vxpose.xlu0.b32.cont [15/16] (narrow) %v6191_v9, 24  ;;  %v6078_v25 = vpop.permute.xlu1 %6077 }
 0x88d   : > { %v6048_v41 = vpop.permute.xlu0 %6047  ;;  %6252 = vxpose.xlu1.b32.cont [12/16] (narrow) %v6204_v47, 24 }
 0x88e   : > { %v6192_v32 = vsel %vm1562_vm11, %v12797_v37, %v6048_v41  ;;  %v6207_v37 = vsel %vm1562_vm11, %v6175_v38, %v6078_v25 }
 0x88f   : > { %6224 = vxpose.xlu0.b32.end [16/16] (narrow) %v6192_v32, 24  ;;  %v6080_v22 = vpop.permute.xlu1 %6079 }
 0x890   : > { %v6208_v48 = vsel %vm1562_vm11, %v6176_v27, %v6080_v22 }
 0x891   : > { %6253 = vxpose.xlu1.b32.cont [13/16] (narrow) %v6205_v8, 24 }
 0x895   : > { %6254 = vxpose.xlu1.b32.cont [14/16] (narrow) %v6206_v49, 24 }
 0x899   : > { %6255 = vxpose.xlu1.b32.cont [15/16] (narrow) %v6207_v37, 24 }
 0x89d   : > { %6256 = vxpose.xlu1.b32.end [16/16] (narrow) %v6208_v48, 24 }
 0x8d3   : > { %v6225_v28 = vpop.trf.xlu0 }
 0x8d4   : > { %6273 = vst [vmem:[%s251_s20] sm:$0xff] %v6225_v28 }
 0x8d7   : > { %v6226_v43 = vpop.trf.xlu0 }
 0x8d8   : > { %6275 = vst [vmem:[%s251_s20 + $0x10] sm:$0xff] %v6226_v43 }
 0x8db   : > { %v6227_v45 = vpop.trf.xlu0 }
 0x8dc   : > { %6277 = vst [vmem:[%s251_s20 + $0x20] sm:$0xf] %v6227_v45 }
 0x8e1   : > { %v6257_v18 = vpop.trf.xlu1 }
 0x8e2   : > { %6274 = vst [vmem:[%s251_s20 + $0x8] sm:$0xff] %v6257_v18 }
 0x8e5   : > { %v6258_v52 = vpop.trf.xlu1 }
 0x8e6   : > { %6276 = vst [vmem:[%s251_s20 + $0x18] sm:$0xff] %v6258_v52 }
 0x8e9   : > { %v6259_v44 = vpop.trf.xlu1 }
 0x8ea   : > { %6278 = vst [vmem:[%s251_s20 + $0x28] sm:$0xf] %v6259_v44 }
 0x8eb PF: > { %s16_s21 = sadd.s32 1, %s6787_s21  }
 0x8ec   : > { %p13_p4 = scmp.ge.s32.totalorder %s16_s21, 4  }
 0x8ee   :  { %15 = sbr.rel (!%p13_p4) target bundleno = 1 (0x1), region = 74 }

</bundles_post_ra>
